<compile_context>
chip_gen: v5e
topology: v5e:2x2
jax: 0.10.0
libtpu: 0.0.40
codegen_flags: <defaults>
</compile_context>

<pallas_src>
import functools

import numpy as np
import jax
import jax.numpy as jnp
from jax.experimental import pallas as pl
from jax.experimental.pallas import tpu as pltpu


# Re-derive per generation / tile config (v5e scoped default 16 MiB, v6e/v7x 32 MiB; v7x physical 64 MiB).
_VMEM_LIMIT_BYTES = 64 * 1024 * 1024


def _cp(dimension_semantics):
    return pltpu.CompilerParams(dimension_semantics=dimension_semantics,
                                vmem_limit_bytes=_VMEM_LIMIT_BYTES)


def _pick_tile(n, preferred=(512, 256, 128)):
    """Largest 128-multiple tile that divides n (else the full extent)."""
    for t in preferred:
        if t <= n and n % t == 0:
            return t
    return n


# --------------------------------------------------------------------------------------
# Kernels
# --------------------------------------------------------------------------------------

def _qkv_proj_kernel(x_ref, norm_ref, w_ref, out_ref, *, eps):
    """attention_norm(x) fused with one N-tile of the fused [wq|wk|wv] projection."""
    x = x_ref[...]                                                  # (M, dim) f32, resident
    var = jnp.mean(x * x, axis=-1, keepdims=True)
    hn = (x * jax.lax.rsqrt(var + eps) * norm_ref[...]).astype(jnp.bfloat16)
    out_ref[...] = jnp.dot(hn, w_ref[...], preferred_element_type=jnp.float32)


def _attn_kernel(q_ref, kn_ref, vn_ref, cosf_ref, sinf_ref, maskc_ref, maskn_ref,
                 kc_ref, vc_ref, ctx_ref, ko_ref, vo_ref, m_scr, l_scr, acc_scr,
                 *, n_heads, n_kv_heads, head_dim, scale, use_roll):
    """Grouped-query flash-decode attention for one KV head over one cache chunk."""
    groups = n_heads // n_kv_heads
    half = head_dim // 2
    c = pl.program_id(1)
    last = pl.num_programs(1) - 1
    rows = q_ref.shape[0]                                           # = bsz (seq_len == 1)

    def rope(t):
        # rotate-half RoPE; cos/sin tables already carry the [-sin | sin] sign pattern.
        bshape = (1,) * (t.ndim - 1) + (head_dim,)
        cf = cosf_ref[...].reshape(bshape)
        sf = sinf_ref[...].reshape(bshape)
        if use_roll:
            rotated = pltpu.roll(t, shift=half, axis=t.ndim - 1)    # XLU slot, no lane concat
        else:
            rotated = jnp.concatenate([t[..., half:], t[..., :half]], axis=-1)
        return t * cf + rotated * sf

    @pl.when(c == 0)
    def _():
        m_scr[...] = jnp.full(m_scr.shape, -jnp.inf, jnp.float32)
        l_scr[...] = jnp.zeros(l_scr.shape, jnp.float32)
        acc_scr[...] = jnp.zeros(acc_scr.shape, jnp.float32)

    # This KV head's group of query heads; fold 1/scale into q once.
    q = q_ref[...].reshape(rows, groups, head_dim)
    q = rope(q) * (1.0 / scale)                                     # f32
    qb = q.astype(jnp.bfloat16)

    kc = kc_ref[0]                                                  # (bsz, hd, chunk)  bf16
    vc = vc_ref[0]                                                  # (bsz, chunk, hd)  bf16
    s = jnp.einsum('bgd,bdt->bgt', qb, kc,
                   preferred_element_type=jnp.float32) + maskc_ref[...]

    # online softmax update over this cache chunk
    m_prev = m_scr[...]
    m_new = jnp.maximum(m_prev, jnp.max(s, axis=-1, keepdims=True))
    alpha = jnp.exp(m_prev - m_new)
    p = jnp.exp(s - m_new)
    l_scr[...] = alpha * l_scr[...] + jnp.sum(p, axis=-1, keepdims=True)
    acc_scr[...] = alpha * acc_scr[...] + jnp.einsum(
        'bgt,bth->bgh', p.astype(jnp.bfloat16), vc, preferred_element_type=jnp.float32)
    m_scr[...] = m_new

    @pl.when(c == last)
    def _():
        # fold in the current token's K/V, finalize, and emit the new cache entries.
        kn = rope(kn_ref[...])                                      # (bsz, hd) f32, RoPE'd
        vn = vn_ref[...]                                            # (bsz, hd) f32
        ko_ref[...] = kn[None, :, None, :]                          # (1, bsz, 1, hd)
        vo_ref[...] = vn[None, :, None, :]

        s_n = jnp.sum(q * kn[:, None, :], axis=-1, keepdims=True) + maskn_ref[...]
        m_fin = jnp.maximum(m_scr[...], s_n)
        a_fin = jnp.exp(m_scr[...] - m_fin)
        p_n = jnp.exp(s_n - m_fin)
        l_fin = a_fin * l_scr[...] + p_n
        acc = a_fin * acc_scr[...] + p_n * vn[:, None, :]
        ctx_ref[...] = (acc * pl.reciprocal(l_fin, approx=True)
                        ).reshape(rows, groups * head_dim)


def _wo_residual_kernel(ctx_ref, x_ref, wo_ref, h_ref):
    """One N-tile of the wo projection plus the first residual add."""
    y = jnp.dot(ctx_ref[...].astype(jnp.bfloat16), wo_ref[...],
                preferred_element_type=jnp.float32)
    h_ref[...] = x_ref[...] + y


def _ffn_kernel(h_ref, norm_ref, w1_ref, w3_ref, w2_ref, out_ref, *, eps):
    """ffn_norm + SwiGLU FFN accumulated over hidden-dim tiles, with the second residual."""
    t = pl.program_id(0)
    h = h_ref[...]                                                  # (M, dim) f32, resident

    @pl.when(t == 0)
    def _():
        out_ref[...] = h                                            # residual base

    var = jnp.mean(h * h, axis=-1, keepdims=True)
    hn = (h * jax.lax.rsqrt(var + eps) * norm_ref[...]).astype(jnp.bfloat16)
    g = jnp.dot(hn, w1_ref[...], preferred_element_type=jnp.float32)
    u = jnp.dot(hn, w3_ref[...], preferred_element_type=jnp.float32)
    act = (g * pl.reciprocal(1.0 + jnp.exp(-g), approx=True) * u).astype(jnp.bfloat16)
    out_ref[...] += jnp.dot(act, w2_ref[...], preferred_element_type=jnp.float32)


# --------------------------------------------------------------------------------------
# One-time (model-load) host-side preparation — NOT per decode step.
# --------------------------------------------------------------------------------------

def prepare_decoder_params(params):
    wdt = jnp.bfloat16
    return dict(
        wqkv=jnp.concatenate([params["wq"].T, params["wk"].T, params["wv"].T],
                             axis=1).astype(wdt),                   # (dim, q_out + 2*kv_out)
        wo=params["wo"].T.astype(wdt),                              # (q_out, dim)
        w1t=params["w1"].T.astype(wdt),                             # (dim, hidden)
        w3t=params["w3"].T.astype(wdt),                             # (dim, hidden)
        w2t=params["w2"].T.astype(wdt),                             # (hidden, dim)
        attention_norm=params["attention_norm"].reshape(1, -1).astype(jnp.float32),
        ffn_norm=params["ffn_norm"].reshape(1, -1).astype(jnp.float32),
    )


def prepare_kv_caches(k_caches, v_caches):
    """Stack per-head caches once and keep them persistently in bf16."""
    return (jnp.stack(k_caches).astype(jnp.bfloat16),               # (n_kv, bsz, hd, cache_len)
            jnp.stack(v_caches).astype(jnp.bfloat16))               # (n_kv, bsz, cache_len, hd)


# --------------------------------------------------------------------------------------
# Decode-step wrapper
# --------------------------------------------------------------------------------------

def llama_decoder_layer(x, freqs_cos, freqs_sin, atten_mask, k_cache_all, v_cache_all,
                        prep, *, n_heads, n_kv_heads, head_dim, eps, cache_chunk=512):
    bsz, seq, dim = x.shape
    # static_llama decode step: the torch 4-D RoPE broadcast is only defined for seq_len == 1.
    assert seq == 1, "this kernel implements the decode step (seq_len == 1)"
    assert n_heads % n_kv_heads == 0
    n_kv = n_kv_heads
    groups = n_heads // n_kv
    q_out = n_heads * head_dim
    kv_out = n_kv * head_dim
    n_proj = q_out + 2 * kv_out
    hidden = prep["w1t"].shape[1]
    cache_len = k_cache_all.shape[-1]
    scale = float(head_dim) ** 0.5
    M = bsz * seq

    xf = x.reshape(M, dim)
    # rotate-half RoPE tables with the sign baked in (tiny per-step prep).
    cosf = jnp.concatenate([freqs_cos, freqs_cos], axis=-1)          # (1, head_dim)
    sinf = jnp.concatenate([-freqs_sin, freqs_sin], axis=-1)
    mask_c = atten_mask[:, :, :cache_len]                            # (bsz, 1, cache_len)
    mask_n = atten_mask[:, :, cache_len:]                            # (bsz, 1, 1)

    # ---- 1) attention_norm + fused QKV projection, N-tiled & pipelined -------------------
    tn = _pick_tile(n_proj)
    qkv = pl.pallas_call(
        functools.partial(_qkv_proj_kernel, eps=eps),
        grid=(n_proj // tn,),
        in_specs=[
            pl.BlockSpec((M, dim), lambda i: (0, 0)),
            pl.BlockSpec((1, dim), lambda i: (0, 0)),
            pl.BlockSpec((dim, tn), lambda i: (0, i)),
        ],
        out_specs=pl.BlockSpec((M, tn), lambda i: (0, i)),
        out_shape=jax.ShapeDtypeStruct((M, n_proj), jnp.float32),
        compiler_params=_cp(("parallel",)),
    )(xf, prep["attention_norm"], prep["wqkv"])

    # ---- 2) grouped-query flash-decode attention over KV-cache chunks --------------------
    if cache_len >= cache_chunk and cache_len % cache_chunk == 0 and cache_chunk % 128 == 0:
        chunk = cache_chunk
    else:
        chunk = cache_len
    n_chunks = cache_len // chunk
    use_roll = (head_dim % 128 == 0)

    attn_kernel = functools.partial(
        _attn_kernel, n_heads=n_heads, n_kv_heads=n_kv, head_dim=head_dim,
        scale=scale, use_roll=use_roll)

    ctx, k_new_all, v_new_all = pl.pallas_call(
        attn_kernel,
        grid=(n_kv, n_chunks),
        in_specs=[
            pl.BlockSpec((M, groups * head_dim), lambda j, c: (0, j)),
            pl.BlockSpec((M, head_dim), lambda j, c: (0, q_out // head_dim + j)),
            pl.BlockSpec((M, head_dim), lambda j, c: (0, (q_out + kv_out) // head_dim + j)),
            pl.BlockSpec((seq, head_dim), lambda j, c: (0, 0)),
            pl.BlockSpec((seq, head_dim), lambda j, c: (0, 0)),
            pl.BlockSpec((bsz, seq, chunk), lambda j, c: (0, 0, c)),
            pl.BlockSpec((bsz, seq, seq), lambda j, c: (0, 0, 0)),
            pl.BlockSpec((1, bsz, head_dim, chunk), lambda j, c: (j, 0, 0, c)),
            pl.BlockSpec((1, bsz, chunk, head_dim), lambda j, c: (j, 0, c, 0)),
        ],
        out_specs=[
            pl.BlockSpec((M, groups * head_dim), lambda j, c: (0, j)),
            pl.BlockSpec((1, bsz, seq, head_dim), lambda j, c: (j, 0, 0, 0)),
            pl.BlockSpec((1, bsz, seq, head_dim), lambda j, c: (j, 0, 0, 0)),
        ],
        out_shape=[
            jax.ShapeDtypeStruct((M, q_out), jnp.float32),
            jax.ShapeDtypeStruct((n_kv, bsz, seq, head_dim), jnp.float32),
            jax.ShapeDtypeStruct((n_kv, bsz, seq, head_dim), jnp.float32),
        ],
        scratch_shapes=[
            pltpu.VMEM((bsz, groups, 1), jnp.float32),
            pltpu.VMEM((bsz, groups, 1), jnp.float32),
            pltpu.VMEM((bsz, groups, head_dim), jnp.float32),
        ],
        compiler_params=_cp(("parallel", "arbitrary")),
    )(qkv, qkv, qkv, cosf, sinf, mask_c, mask_n, k_cache_all, v_cache_all)

    # ---- 3) wo projection + residual, N-tiled ---------------------------------------------
    td = _pick_tile(dim)
    h = pl.pallas_call(
        _wo_residual_kernel,
        grid=(dim // td,),
        in_specs=[
            pl.BlockSpec((M, q_out), lambda i: (0, 0)),
            pl.BlockSpec((M, td), lambda i: (0, i)),
            pl.BlockSpec((q_out, td), lambda i: (0, i)),
        ],
        out_specs=pl.BlockSpec((M, td), lambda i: (0, i)),
        out_shape=jax.ShapeDtypeStruct((M, dim), jnp.float32),
        compiler_params=_cp(("parallel",)),
    )(ctx, xf, prep["wo"])

    # ---- 4) ffn_norm + SwiGLU FFN accumulated over hidden tiles + residual ----------------
    th = _pick_tile(hidden)
    out = pl.pallas_call(
        functools.partial(_ffn_kernel, eps=eps),
        grid=(hidden // th,),
        in_specs=[
            pl.BlockSpec((M, dim), lambda t: (0, 0)),
            pl.BlockSpec((1, dim), lambda t: (0, 0)),
            pl.BlockSpec((dim, th), lambda t: (0, t)),
            pl.BlockSpec((dim, th), lambda t: (0, t)),
            pl.BlockSpec((th, dim), lambda t: (t, 0)),
        ],
        out_specs=pl.BlockSpec((M, dim), lambda t: (0, 0)),
        out_shape=jax.ShapeDtypeStruct((M, dim), jnp.float32),
        compiler_params=_cp(("arbitrary",)),
    )(h, prep["ffn_norm"], prep["w1t"], prep["w3t"], prep["w2t"])

    out = out.reshape(bsz, seq, dim)
    # Module semantics (output_new_cache_only=False): new RoPE'd K as (bsz, hd, seq), raw V as
    # (bsz, seq, hd). These are tiny per-step tensors; caller appends them to its caches
    # (round to bf16 when appending to the bf16 caches to avoid drift vs the kernel inputs).
    k_list = [jnp.swapaxes(k_new_all[j], 1, 2) for j in range(n_kv)]
    v_list = [v_new_all[j] for j in range(n_kv)]
    return out, k_list, v_list


# --------------------------------------------------------------------------------------
# Pure-JAX reference (mirror of the PyTorch LlamaDecoderLayer.forward, default MHA path)
# --------------------------------------------------------------------------------------

def reference_layer(x, cos, sin, mask, k_caches, v_caches, params,
                    *, n_heads, n_kv_heads, head_dim, eps):
    bsz, seq, dim = x.shape
    groups = n_heads // n_kv_heads
    scale = float(head_dim) ** 0.5

    def rms(v, w):
        return v * jax.lax.rsqrt(jnp.mean(v * v, axis=-1, keepdims=True) + eps) * w

    def rope4(t):  # t: (bsz, seq, nh, hd); torch broadcast freqs[None, None, :, :]
        half = head_dim // 2
        tr, ti = t[..., :half], t[..., half:]
        c = cos[None, None, :, :]
        s = sin[None, None, :, :]
        return jnp.concatenate([tr * c - ti * s, tr * s + ti * c], axis=-1)

    hn = rms(x, params["attention_norm"])
    q = (hn @ params["wq"].T).reshape(bsz, seq, n_heads, head_dim)
    k = (hn @ params["wk"].T).reshape(bsz, seq, n_kv_heads, head_dim)
    v = (hn @ params["wv"].T).reshape(bsz, seq, n_kv_heads, head_dim)
    q = rope4(q)
    k = jnp.transpose(rope4(k), (0, 2, 3, 1))   # (bsz, n_kv, hd, seq)

    kh = [jnp.concatenate([k_caches[i], k[:, i]], axis=-1) for i in range(n_kv_heads)]
    vh = [jnp.concatenate([v_caches[i], v[:, :, i]], axis=1) for i in range(n_kv_heads)]

    ys = []
    for i in range(n_heads):
        ci = i // groups
        attn = jnp.einsum("bsh,bht->bst", q[:, :, i, :], kh[ci]) / scale + mask
        attn = jax.nn.softmax(attn, axis=-1)
        ys.append(jnp.einsum("bst,bth->bsh", attn, vh[ci]))
    y = jnp.concatenate(ys, axis=-1) @ params["wo"].T
    h = x + y

    hn2 = rms(h, params["ffn_norm"])
    g = hn2 @ params["w1"].T
    u = hn2 @ params["w3"].T
    out = h + (g * jax.nn.sigmoid(g) * u) @ params["w2"].T

    k_new = [k[:, i] for i in range(n_kv_heads)]
    v_new = [v[:, :, i] for i in range(n_kv_heads)]
    return out, k_new, v_new


if __name__ == "__main__":
    # Small-but-representative config (head_dim = 128 so the lane-aligned / pltpu.roll paths run).
    dim = 512
    n_heads = 4
    n_kv_heads = 2
    head_dim = dim // n_heads          # 128
    hidden_dim = 1024
    eps = 1e-5
    bsz = 2
    seq_len = 1                        # static-llama decode step
    cache_len = 256                    # 2 cache chunks of 128 -> exercises the online softmax
    total = cache_len + seq_len

    key = jax.random.PRNGKey(0)
    ks = jax.random.split(key, 16)

    def init_w(k, out_f, in_f):
        return (jax.random.normal(k, (out_f, in_f), jnp.float32) / np.sqrt(in_f)).astype(jnp.float32)

    params = {
        "wq": init_w(ks[0], n_heads * head_dim, dim),
        "wk": init_w(ks[1], n_kv_heads * head_dim, dim),
        "wv": init_w(ks[2], n_kv_heads * head_dim, dim),
        "wo": init_w(ks[3], dim, n_heads * head_dim),
        "w1": init_w(ks[4], hidden_dim, dim),
        "w2": init_w(ks[5], dim, hidden_dim),
        "w3": init_w(ks[6], hidden_dim, dim),
        "attention_norm": (1.0 + 0.1 * jax.random.normal(ks[7], (dim,), jnp.float32)),
        "ffn_norm": (1.0 + 0.1 * jax.random.normal(ks[8], (dim,), jnp.float32)),
    }

    x = jax.random.normal(ks[9], (bsz, seq_len, dim), jnp.float32)

    # RoPE frequencies for the current position (position index = cache_len)
    pos = float(cache_len)
    inv_freq = 1.0 / (10000.0 ** (np.arange(0, head_dim // 2, dtype=np.float32) * 2.0 / head_dim))
    freqs_cos = jnp.asarray(np.cos(pos * inv_freq))[None, :]   # (seq_len, head_dim//2)
    freqs_sin = jnp.asarray(np.sin(pos * inv_freq))[None, :]

    # attention mask over (cache ++ new) positions; mask out the oldest cache slots
    atten_mask = jnp.zeros((bsz, seq_len, total), jnp.float32).at[..., :3].set(-1e4)

    k_caches = [jax.random.normal(ks[10 + i], (bsz, head_dim, cache_len), jnp.float32)
                for i in range(n_kv_heads)]
    v_caches = [jax.random.normal(ks[12 + i], (bsz, cache_len, head_dim), jnp.float32)
                for i in range(n_kv_heads)]

    # The kernel streams weights / KV caches in bf16; round once so both the kernel path and the
    # f32 reference consume identical parameter values.
    def bf16_round(t):
        return t.astype(jnp.bfloat16).astype(jnp.float32)

    for name in ("wq", "wk", "wv", "wo", "w1", "w2", "w3"):
        params[name] = bf16_round(params[name])
    k_caches = [bf16_round(c) for c in k_caches]
    v_caches = [bf16_round(c) for c in v_caches]

    # One-time model-load prep (NOT part of the per-token decode step).
    prep = prepare_decoder_params(params)
    k_cache_all, v_cache_all = prepare_kv_caches(k_caches, v_caches)

    decode_step = jax.jit(functools.partial(
        llama_decoder_layer, n_heads=n_heads, n_kv_heads=n_kv_heads,
        head_dim=head_dim, eps=eps, cache_chunk=128))

    out, k_new, v_new = decode_step(x, freqs_cos, freqs_sin, atten_mask,
                                    k_cache_all, v_cache_all, prep)
    jax.block_until_ready((out, k_new, v_new))

    ref_out, ref_k, ref_v = reference_layer(
        x, freqs_cos, freqs_sin, atten_mask, k_caches, v_caches, params,
        n_heads=n_heads, n_kv_heads=n_kv_heads, head_dim=head_dim, eps=eps)

    assert np.allclose(np.asarray(out), np.asarray(ref_out), rtol=5e-2, atol=5e-2), "output mismatch"
    for a, b in zip(k_new, ref_k):
        assert np.allclose(np.asarray(a), np.asarray(b), rtol=5e-2, atol=5e-2), "k cache mismatch"
    for a, b in zip(v_new, ref_v):
        assert np.allclose(np.asarray(a), np.asarray(b), rtol=5e-2, atol=5e-2), "v cache mismatch"

    print("KERNEL_OK")
</pallas_src>

<mosaic_0001>
module attributes {stable_mosaic.version = 11 : i64} {
  func.func @_ffn_kernel(%arg0: i32, %arg1: memref<2x512xf32, #tpu.memory_space<vmem>>, %arg2: memref<1x512xf32, #tpu.memory_space<vmem>>, %arg3: memref<512x512xbf16, #tpu.memory_space<vmem>>, %arg4: memref<512x512xbf16, #tpu.memory_space<vmem>>, %arg5: memref<512x512xbf16, #tpu.memory_space<vmem>>, %arg6: memref<2x512xf32, #tpu.memory_space<vmem>>) attributes {dimension_semantics = [#tpu.dimension_semantics<arbitrary>], iteration_bounds = array<i64: 2>, scalar_prefetch = 0 : i64, scratch_operands = 0 : i64, tpu.core_type = #tpu.core_type<tc>, window_params = [{pipeline_mode = #tpu.pipeline_mode<synchronous>, transform_indices = @transform_0, window_bounds = array<i64: 2, 512>}, {pipeline_mode = #tpu.pipeline_mode<synchronous>, transform_indices = @transform_1, window_bounds = array<i64: 1, 512>}, {transform_indices = @transform_2, window_bounds = array<i64: 512, 512>}, {transform_indices = @transform_3, window_bounds = array<i64: 512, 512>}, {transform_indices = @transform_4, window_bounds = array<i64: 512, 512>}, {pipeline_mode = #tpu.pipeline_mode<synchronous>, transform_indices = @transform_5, window_bounds = array<i64: 2, 512>}]} {
    %c0 = arith.constant 0 : index
    %c0_0 = arith.constant 0 : index
    %0 = vector.load %arg1[%c0, %c0_0] : memref<2x512xf32, #tpu.memory_space<vmem>>, vector<2x512xf32>
    %c0_i32 = arith.constant 0 : i32
    %1 = arith.cmpi eq, %arg0, %c0_i32 : i32
    %2 = arith.extui %1 : i1 to i32
    %c0_i32_1 = arith.constant 0 : i32
    %3 = arith.cmpi ne, %2, %c0_i32_1 : i32
    scf.if %3 {
      %c0_21 = arith.constant 0 : index
      %c0_22 = arith.constant 0 : index
      %36 = vector.load %arg6[%c0_21, %c0_22] : memref<2x512xf32, #tpu.memory_space<vmem>>, vector<2x512xf32>
      tpu.vector_store %arg6[%c0_21, %c0_22], %0 {strides = array<i32>} : memref<2x512xf32, #tpu.memory_space<vmem>>, vector<2x512xf32>,
    } else {
    }
    %4 = arith.mulf %0, %0 : vector<2x512xf32>
    %cst = arith.constant dense<0.000000e+00> : vector<2xf32>
    %5 = vector.multi_reduction <add>, %4, %cst [1] : vector<2x512xf32> to vector<2xf32>
    %6 = vector.shape_cast %5 : vector<2xf32> to vector<2x1xf32>
    %cst_2 = arith.constant 5.120000e+02 : f32
    %7 = vector.broadcast %cst_2 : f32 to vector<2x1xf32>
    %8 = arith.divf %6, %7 : vector<2x1xf32>
    %cst_3 = arith.constant 9.99999974E-6 : f32
    %9 = vector.broadcast %cst_3 : f32 to vector<2x1xf32>
    %10 = arith.addf %8, %9 : vector<2x1xf32>
    %11 = math.rsqrt %10 : vector<2x1xf32>
    %12 = vector.broadcast %11 : vector<2x1xf32> to vector<2x512xf32>
    %13 = arith.mulf %0, %12 : vector<2x512xf32>
    %c0_4 = arith.constant 0 : index
    %c0_5 = arith.constant 0 : index
    %14 = vector.load %arg2[%c0_4, %c0_5] : memref<1x512xf32, #tpu.memory_space<vmem>>, vector<1x512xf32>
    %15 = vector.broadcast %14 : vector<1x512xf32> to vector<2x512xf32>
    %16 = arith.mulf %13, %15 : vector<2x512xf32>
    %17 = arith.truncf %16 : vector<2x512xf32> to vector<2x512xbf16>
    %c0_6 = arith.constant 0 : index
    %c0_7 = arith.constant 0 : index
    %18 = vector.load %arg3[%c0_6, %c0_7] : memref<512x512xbf16, #tpu.memory_space<vmem>>, vector<512x512xbf16>
    %cst_8 = arith.constant dense<0.000000e+00> : vector<2x512xf32>
    %19 = tpu.matmul %17, %18, %cst_8 {dimension_numbers = #tpu.dot_dimension_numbers<[1], [0], [0], [1], [0, 0, 1, 1], [], []>} : vector<2x512xbf16>, vector<512x512xbf16>, vector<2x512xf32> -> vector<2x512xf32>
    %c0_9 = arith.constant 0 : index
    %c0_10 = arith.constant 0 : index
    %20 = vector.load %arg4[%c0_9, %c0_10] : memref<512x512xbf16, #tpu.memory_space<vmem>>, vector<512x512xbf16>
    %cst_11 = arith.constant dense<0.000000e+00> : vector<2x512xf32>
    %21 = tpu.matmul %17, %20, %cst_11 {dimension_numbers = #tpu.dot_dimension_numbers<[1], [0], [0], [1], [0, 0, 1, 1], [], []>} : vector<2x512xbf16>, vector<512x512xbf16>, vector<2x512xf32> -> vector<2x512xf32>
    %cst_12 = arith.constant 0.000000e+00 : f32
    %22 = vector.broadcast %cst_12 : f32 to vector<2x512xf32>
    %23 = arith.subf %22, %19 : vector<2x512xf32>
    %24 = math.exp %23 : vector<2x512xf32>
    %cst_13 = arith.constant 1.000000e+00 : f32
    %25 = vector.broadcast %cst_13 : f32 to vector<2x512xf32>
    %26 = arith.addf %25, %24 : vector<2x512xf32>
    %27 = tpu.reciprocal %26 {approx = true} : vector<2x512xf32> -> vector<2x512xf32>
    %28 = arith.mulf %19, %27 : vector<2x512xf32>
    %29 = arith.mulf %28, %21 : vector<2x512xf32>
    %30 = arith.truncf %29 : vector<2x512xf32> to vector<2x512xbf16>
    %c0_14 = arith.constant 0 : index
    %c0_15 = arith.constant 0 : index
    %31 = vector.load %arg6[%c0_14, %c0_15] : memref<2x512xf32, #tpu.memory_space<vmem>>, vector<2x512xf32>
    %c0_16 = arith.constant 0 : index
    %c0_17 = arith.constant 0 : index
    %32 = vector.load %arg5[%c0_16, %c0_17] : memref<512x512xbf16, #tpu.memory_space<vmem>>, vector<512x512xbf16>
    %cst_18 = arith.constant dense<0.000000e+00> : vector<2x512xf32>
    %33 = tpu.matmul %30, %32, %cst_18 {dimension_numbers = #tpu.dot_dimension_numbers<[1], [0], [0], [1], [0, 0, 1, 1], [], []>} : vector<2x512xbf16>, vector<512x512xbf16>, vector<2x512xf32> -> vector<2x512xf32>
    %34 = arith.addf %31, %33 : vector<2x512xf32>
    %c0_19 = arith.constant 0 : index
    %c0_20 = arith.constant 0 : index
    %35 = vector.load %arg6[%c0_19, %c0_20] : memref<2x512xf32, #tpu.memory_space<vmem>>, vector<2x512xf32>
    tpu.vector_store %arg6[%c0_19, %c0_20], %34 {strides = array<i32>} : memref<2x512xf32, #tpu.memory_space<vmem>>, vector<2x512xf32>,
    return
  }
  func.func @transform_0(%arg0: i32) -> (i32, i32) {
    %c0_i32 = arith.constant 0 : i32
    %c0_i32_0 = arith.constant 0 : i32
    %c0_i32_1 = arith.constant 0 : i32
    return %c0_i32, %c0_i32_0 : i32, i32
  }
  func.func @transform_1(%arg0: i32) -> (i32, i32) {
    %c0_i32 = arith.constant 0 : i32
    %c0_i32_0 = arith.constant 0 : i32
    %c0_i32_1 = arith.constant 0 : i32
    return %c0_i32, %c0_i32_0 : i32, i32
  }
  func.func @transform_2(%arg0: i32) -> (i32, i32) {
    %c0_i32 = arith.constant 0 : i32
    %c0_i32_0 = arith.constant 0 : i32
    return %c0_i32, %arg0 : i32, i32
  }
  func.func @transform_3(%arg0: i32) -> (i32, i32) {
    %c0_i32 = arith.constant 0 : i32
    %c0_i32_0 = arith.constant 0 : i32
    return %c0_i32, %arg0 : i32, i32
  }
  func.func @transform_4(%arg0: i32) -> (i32, i32) {
    %c0_i32 = arith.constant 0 : i32
    %c0_i32_0 = arith.constant 0 : i32
    return %arg0, %c0_i32 : i32, i32
  }
  func.func @transform_5(%arg0: i32) -> (i32, i32) {
    %c0_i32 = arith.constant 0 : i32
    %c0_i32_0 = arith.constant 0 : i32
    %c0_i32_1 = arith.constant 0 : i32
    return %c0_i32, %c0_i32_0 : i32, i32
  }
}

module attributes {stable_mosaic.version = 11 : i64} {
  func.func @_qkv_proj_kernel(%arg0: i32, %arg1: memref<2x512xf32, #tpu.memory_space<vmem>>, %arg2: memref<1x512xf32, #tpu.memory_space<vmem>>, %arg3: memref<512x512xbf16, #tpu.memory_space<vmem>>, %arg4: memref<2x512xf32, #tpu.memory_space<vmem>>) attributes {dimension_semantics = [#tpu.dimension_semantics<parallel>], iteration_bounds = array<i64: 2>, scalar_prefetch = 0 : i64, scratch_operands = 0 : i64, tpu.core_type = #tpu.core_type<tc>, window_params = [{pipeline_mode = #tpu.pipeline_mode<synchronous>, transform_indices = @transform_0, window_bounds = array<i64: 2, 512>}, {pipeline_mode = #tpu.pipeline_mode<synchronous>, transform_indices = @transform_1, window_bounds = array<i64: 1, 512>}, {transform_indices = @transform_2, window_bounds = array<i64: 512, 512>}, {transform_indices = @transform_3, window_bounds = array<i64: 2, 512>}]} {
    %c0 = arith.constant 0 : index
    %c0_0 = arith.constant 0 : index
    %0 = vector.load %arg1[%c0, %c0_0] : memref<2x512xf32, #tpu.memory_space<vmem>>, vector<2x512xf32>
    %1 = arith.mulf %0, %0 : vector<2x512xf32>
    %cst = arith.constant dense<0.000000e+00> : vector<2xf32>
    %2 = vector.multi_reduction <add>, %1, %cst [1] : vector<2x512xf32> to vector<2xf32>
    %3 = vector.shape_cast %2 : vector<2xf32> to vector<2x1xf32>
    %cst_1 = arith.constant 5.120000e+02 : f32
    %4 = vector.broadcast %cst_1 : f32 to vector<2x1xf32>
    %5 = arith.divf %3, %4 : vector<2x1xf32>
    %cst_2 = arith.constant 9.99999974E-6 : f32
    %6 = vector.broadcast %cst_2 : f32 to vector<2x1xf32>
    %7 = arith.addf %5, %6 : vector<2x1xf32>
    %8 = math.rsqrt %7 : vector<2x1xf32>
    %9 = vector.broadcast %8 : vector<2x1xf32> to vector<2x512xf32>
    %10 = arith.mulf %0, %9 : vector<2x512xf32>
    %c0_3 = arith.constant 0 : index
    %c0_4 = arith.constant 0 : index
    %11 = vector.load %arg2[%c0_3, %c0_4] : memref<1x512xf32, #tpu.memory_space<vmem>>, vector<1x512xf32>
    %12 = vector.broadcast %11 : vector<1x512xf32> to vector<2x512xf32>
    %13 = arith.mulf %10, %12 : vector<2x512xf32>
    %14 = arith.truncf %13 : vector<2x512xf32> to vector<2x512xbf16>
    %c0_5 = arith.constant 0 : index
    %c0_6 = arith.constant 0 : index
    %15 = vector.load %arg3[%c0_5, %c0_6] : memref<512x512xbf16, #tpu.memory_space<vmem>>, vector<512x512xbf16>
    %cst_7 = arith.constant dense<0.000000e+00> : vector<2x512xf32>
    %16 = tpu.matmul %14, %15, %cst_7 {dimension_numbers = #tpu.dot_dimension_numbers<[1], [0], [0], [1], [0, 0, 1, 1], [], []>} : vector<2x512xbf16>, vector<512x512xbf16>, vector<2x512xf32> -> vector<2x512xf32>
    %c0_8 = arith.constant 0 : index
    %c0_9 = arith.constant 0 : index
    %17 = vector.load %arg4[%c0_8, %c0_9] : memref<2x512xf32, #tpu.memory_space<vmem>>, vector<2x512xf32>
    tpu.vector_store %arg4[%c0_8, %c0_9], %16 {strides = array<i32>} : memref<2x512xf32, #tpu.memory_space<vmem>>, vector<2x512xf32>,
    return
  }
  func.func @transform_0(%arg0: i32) -> (i32, i32) {
    %c0_i32 = arith.constant 0 : i32
    %c0_i32_0 = arith.constant 0 : i32
    %c0_i32_1 = arith.constant 0 : i32
    return %c0_i32, %c0_i32_0 : i32, i32
  }
  func.func @transform_1(%arg0: i32) -> (i32, i32) {
    %c0_i32 = arith.constant 0 : i32
    %c0_i32_0 = arith.constant 0 : i32
    %c0_i32_1 = arith.constant 0 : i32
    return %c0_i32, %c0_i32_0 : i32, i32
  }
  func.func @transform_2(%arg0: i32) -> (i32, i32) {
    %c0_i32 = arith.constant 0 : i32
    %c0_i32_0 = arith.constant 0 : i32
    return %c0_i32, %arg0 : i32, i32
  }
  func.func @transform_3(%arg0: i32) -> (i32, i32) {
    %c0_i32 = arith.constant 0 : i32
    %c0_i32_0 = arith.constant 0 : i32
    return %c0_i32, %arg0 : i32, i32
  }
}

module attributes {stable_mosaic.version = 11 : i64} {
  func.func @_wo_residual_kernel(%arg0: i32, %arg1: memref<2x512xf32, #tpu.memory_space<vmem>>, %arg2: memref<2x512xf32, #tpu.memory_space<vmem>>, %arg3: memref<512x512xbf16, #tpu.memory_space<vmem>>, %arg4: memref<2x512xf32, #tpu.memory_space<vmem>>) attributes {dimension_semantics = [#tpu.dimension_semantics<parallel>], iteration_bounds = array<i64: 1>, scalar_prefetch = 0 : i64, scratch_operands = 0 : i64, tpu.core_type = #tpu.core_type<tc>, window_params = [{pipeline_mode = #tpu.pipeline_mode<synchronous>, transform_indices = @transform_0, window_bounds = array<i64: 2, 512>}, {transform_indices = @transform_1, window_bounds = array<i64: 2, 512>}, {transform_indices = @transform_2, window_bounds = array<i64: 512, 512>}, {transform_indices = @transform_3, window_bounds = array<i64: 2, 512>}]} {
    %c0 = arith.constant 0 : index
    %c0_0 = arith.constant 0 : index
    %0 = vector.load %arg1[%c0, %c0_0] : memref<2x512xf32, #tpu.memory_space<vmem>>, vector<2x512xf32>
    %1 = arith.truncf %0 : vector<2x512xf32> to vector<2x512xbf16>
    %c0_1 = arith.constant 0 : index
    %c0_2 = arith.constant 0 : index
    %2 = vector.load %arg3[%c0_1, %c0_2] : memref<512x512xbf16, #tpu.memory_space<vmem>>, vector<512x512xbf16>
    %cst = arith.constant dense<0.000000e+00> : vector<2x512xf32>
    %3 = tpu.matmul %1, %2, %cst {dimension_numbers = #tpu.dot_dimension_numbers<[1], [0], [0], [1], [0, 0, 1, 1], [], []>} : vector<2x512xbf16>, vector<512x512xbf16>, vector<2x512xf32> -> vector<2x512xf32>
    %c0_3 = arith.constant 0 : index
    %c0_4 = arith.constant 0 : index
    %4 = vector.load %arg2[%c0_3, %c0_4] : memref<2x512xf32, #tpu.memory_space<vmem>>, vector<2x512xf32>
    %5 = arith.addf %4, %3 : vector<2x512xf32>
    %c0_5 = arith.constant 0 : index
    %c0_6 = arith.constant 0 : index
    %6 = vector.load %arg4[%c0_5, %c0_6] : memref<2x512xf32, #tpu.memory_space<vmem>>, vector<2x512xf32>
    tpu.vector_store %arg4[%c0_5, %c0_6], %5 {strides = array<i32>} : memref<2x512xf32, #tpu.memory_space<vmem>>, vector<2x512xf32>,
    return
  }
  func.func @transform_0(%arg0: i32) -> (i32, i32) {
    %c0_i32 = arith.constant 0 : i32
    %c0_i32_0 = arith.constant 0 : i32
    %c0_i32_1 = arith.constant 0 : i32
    return %c0_i32, %c0_i32_0 : i32, i32
  }
  func.func @transform_1(%arg0: i32) -> (i32, i32) {
    %c0_i32 = arith.constant 0 : i32
    %c0_i32_0 = arith.constant 0 : i32
    return %c0_i32, %arg0 : i32, i32
  }
  func.func @transform_2(%arg0: i32) -> (i32, i32) {
    %c0_i32 = arith.constant 0 : i32
    %c0_i32_0 = arith.constant 0 : i32
    return %c0_i32, %arg0 : i32, i32
  }
  func.func @transform_3(%arg0: i32) -> (i32, i32) {
    %c0_i32 = arith.constant 0 : i32
    %c0_i32_0 = arith.constant 0 : i32
    return %c0_i32, %arg0 : i32, i32
  }
}

module attributes {stable_mosaic.version = 11 : i64} {
  func.func @_attn_kernel(%arg0: i32, %arg1: i32, %arg2: memref<2x256xf32, #tpu.memory_space<vmem>>, %arg3: memref<2x128xf32, #tpu.memory_space<vmem>>, %arg4: memref<2x128xf32, #tpu.memory_space<vmem>>, %arg5: memref<1x128xf32, #tpu.memory_space<vmem>>, %arg6: memref<1x128xf32, #tpu.memory_space<vmem>>, %arg7: memref<2x1x128xf32, #tpu.memory_space<vmem>>, %arg8: memref<2x1x1xf32, #tpu.memory_space<vmem>>, %arg9: memref<1x2x128x128xbf16, #tpu.memory_space<vmem>>, %arg10: memref<1x2x128x128xbf16, #tpu.memory_space<vmem>>, %arg11: memref<2x256xf32, #tpu.memory_space<vmem>>, %arg12: memref<1x2x1x128xf32, #tpu.memory_space<vmem>>, %arg13: memref<1x2x1x128xf32, #tpu.memory_space<vmem>>, %arg14: memref<2x2x1xf32, #tpu.memory_space<vmem>>, %arg15: memref<2x2x1xf32, #tpu.memory_space<vmem>>, %arg16: memref<2x2x128xf32, #tpu.memory_space<vmem>>) attributes {dimension_semantics = [#tpu.dimension_semantics<parallel>, #tpu.dimension_semantics<arbitrary>], iteration_bounds = array<i64: 2, 2>, scalar_prefetch = 0 : i64, scratch_operands = 3 : i64, tpu.core_type = #tpu.core_type<tc>, window_params = [{transform_indices = @transform_0, window_bounds = array<i64: 2, 256>}, {transform_indices = @transform_1, window_bounds = array<i64: 2, 128>}, {transform_indices = @transform_2, window_bounds = array<i64: 2, 128>}, {pipeline_mode = #tpu.pipeline_mode<synchronous>, transform_indices = @transform_3, window_bounds = array<i64: 1, 128>}, {pipeline_mode = #tpu.pipeline_mode<synchronous>, transform_indices = @transform_4, window_bounds = array<i64: 1, 128>}, {transform_indices = @transform_5, window_bounds = array<i64: 2, 1, 128>}, {pipeline_mode = #tpu.pipeline_mode<synchronous>, transform_indices = @transform_6, window_bounds = array<i64: 2, 1, 1>}, {transform_indices = @transform_7, window_bounds = array<i64: 1, 2, 128, 128>}, {transform_indices = @transform_8, window_bounds = array<i64: 1, 2, 128, 128>}, {transform_indices = @transform_9, window_bounds = array<i64: 2, 256>}, {transform_indices = @transform_10, window_bounds = array<i64: 1, 2, 1, 128>}, {transform_indices = @transform_11, window_bounds = array<i64: 1, 2, 1, 128>}]} {
    %c0_i32 = arith.constant 0 : i32
    %0 = arith.cmpi eq, %arg1, %c0_i32 : i32
    %1 = arith.extui %0 : i1 to i32
    %c0_i32_0 = arith.constant 0 : i32
    %2 = arith.cmpi ne, %1, %c0_i32_0 : i32
    scf.if %2 {
      %cst_40 = arith.constant 0xFF800000 : f32
      %52 = vector.broadcast %cst_40 : f32 to vector<2x2x1xf32>
      %c0_41 = arith.constant 0 : index
      %c0_42 = arith.constant 0 : index
      %c0_43 = arith.constant 0 : index
      %53 = vector.load %arg14[%c0_41, %c0_42, %c0_43] : memref<2x2x1xf32, #tpu.memory_space<vmem>>, vector<2x2x1xf32>
      tpu.vector_store %arg14[%c0_41, %c0_42, %c0_43], %52 {strides = array<i32>} : memref<2x2x1xf32, #tpu.memory_space<vmem>>, vector<2x2x1xf32>,
      %cst_44 = arith.constant 0.000000e+00 : f32
      %54 = vector.broadcast %cst_44 : f32 to vector<2x2x1xf32>
      %c0_45 = arith.constant 0 : index
      %c0_46 = arith.constant 0 : index
      %c0_47 = arith.constant 0 : index
      %55 = vector.load %arg15[%c0_45, %c0_46, %c0_47] : memref<2x2x1xf32, #tpu.memory_space<vmem>>, vector<2x2x1xf32>
      tpu.vector_store %arg15[%c0_45, %c0_46, %c0_47], %54 {strides = array<i32>} : memref<2x2x1xf32, #tpu.memory_space<vmem>>, vector<2x2x1xf32>,
      %cst_48 = arith.constant 0.000000e+00 : f32
      %56 = vector.broadcast %cst_48 : f32 to vector<2x2x128xf32>
      %c0_49 = arith.constant 0 : index
      %c0_50 = arith.constant 0 : index
      %c0_51 = arith.constant 0 : index
      %57 = vector.load %arg16[%c0_49, %c0_50, %c0_51] : memref<2x2x128xf32, #tpu.memory_space<vmem>>, vector<2x2x128xf32>
      tpu.vector_store %arg16[%c0_49, %c0_50, %c0_51], %56 {strides = array<i32>} : memref<2x2x128xf32, #tpu.memory_space<vmem>>, vector<2x2x128xf32>,
    } else {
    }
    %c0 = arith.constant 0 : index
    %c0_1 = arith.constant 0 : index
    %3 = vector.load %arg2[%c0, %c0_1] : memref<2x256xf32, #tpu.memory_space<vmem>>, vector<2x256xf32>
    %4 = vector.shape_cast %3 : vector<2x256xf32> to vector<2x2x128xf32>
    %c0_2 = arith.constant 0 : index
    %c0_3 = arith.constant 0 : index
    %5 = vector.load %arg5[%c0_2, %c0_3] : memref<1x128xf32, #tpu.memory_space<vmem>>, vector<1x128xf32>
    %6 = vector.shape_cast %5 : vector<1x128xf32> to vector<1x1x128xf32>
    %c0_4 = arith.constant 0 : index
    %c0_5 = arith.constant 0 : index
    %7 = vector.load %arg6[%c0_4, %c0_5] : memref<1x128xf32, #tpu.memory_space<vmem>>, vector<1x128xf32>
    %8 = vector.shape_cast %7 : vector<1x128xf32> to vector<1x1x128xf32>
    %c64_i32 = arith.constant 64 : i32
    %9 = tpu.dynamic_rotate %4 by %c64_i32 dim 2 : vector<2x2x128xf32>, i32 -> vector<2x2x128xf32>
    %10 = vector.broadcast %6 : vector<1x1x128xf32> to vector<2x2x128xf32>
    %11 = arith.mulf %4, %10 : vector<2x2x128xf32>
    %12 = vector.broadcast %8 : vector<1x1x128xf32> to vector<2x2x128xf32>
    %13 = arith.mulf %9, %12 : vector<2x2x128xf32>
    %14 = arith.addf %11, %13 : vector<2x2x128xf32>
    %cst = arith.constant 0.0883883461 : f32
    %15 = vector.broadcast %cst : f32 to vector<2x2x128xf32>
    %16 = arith.mulf %14, %15 : vector<2x2x128xf32>
    %17 = arith.truncf %16 : vector<2x2x128xf32> to vector<2x2x128xbf16>
    %c0_6 = arith.constant 0 : index
    %c0_7 = arith.constant 0 : index
    %c0_8 = arith.constant 0 : index
    %c0_9 = arith.constant 0 : index
    %18 = vector.load %arg9[%c0_6, %c0_7, %c0_8, %c0_9] : memref<1x2x128x128xbf16, #tpu.memory_space<vmem>>, vector<1x2x128x128xbf16>
    %19 = vector.shape_cast %18 : vector<1x2x128x128xbf16> to vector<2x128x128xbf16>
    %c0_10 = arith.constant 0 : index
    %c0_11 = arith.constant 0 : index
    %c0_12 = arith.constant 0 : index
    %c0_13 = arith.constant 0 : index
    %20 = vector.load %arg10[%c0_10, %c0_11, %c0_12, %c0_13] : memref<1x2x128x128xbf16, #tpu.memory_space<vmem>>, vector<1x2x128x128xbf16>
    %21 = vector.shape_cast %20 : vector<1x2x128x128xbf16> to vector<2x128x128xbf16>
    "tpu.trace_start"() <{level = 10 : i32, message = "bgd,bdt->bgt"}> : () -> ()
    %cst_14 = arith.constant dense<0.000000e+00> : vector<2x2x128xf32>
    %22 = tpu.matmul %17, %19, %cst_14 {dimension_numbers = #tpu.dot_dimension_numbers<[2], [1], [1], [2], [0, 0, 0, 1, 1, 2], [0], [0]>} : vector<2x2x128xbf16>, vector<2x128x128xbf16>, vector<2x2x128xf32> -> vector<2x2x128xf32>
    "tpu.trace_stop"() : () -> ()
    %c0_15 = arith.constant 0 : index
    %c0_16 = arith.constant 0 : index
    %c0_17 = arith.constant 0 : index
    %23 = vector.load %arg7[%c0_15, %c0_16, %c0_17] : memref<2x1x128xf32, #tpu.memory_space<vmem>>, vector<2x1x128xf32>
    %24 = vector.broadcast %23 : vector<2x1x128xf32> to vector<2x2x128xf32>
    %25 = arith.addf %22, %24 : vector<2x2x128xf32>
    %c0_18 = arith.constant 0 : index
    %c0_19 = arith.constant 0 : index
    %c0_20 = arith.constant 0 : index
    %26 = vector.load %arg14[%c0_18, %c0_19, %c0_20] : memref<2x2x1xf32, #tpu.memory_space<vmem>>, vector<2x2x1xf32>
    %cst_21 = arith.constant dense<0xFF800000> : vector<2x2xf32>
    %27 = vector.multi_reduction <maximumf>, %25, %cst_21 [2] : vector<2x2x128xf32> to vector<2x2xf32>
    %28 = vector.shape_cast %27 : vector<2x2xf32> to vector<2x2x1xf32>
    %29 = arith.maximumf %26, %28 : vector<2x2x1xf32>
    %30 = arith.subf %26, %29 : vector<2x2x1xf32>
    %31 = math.exp %30 : vector<2x2x1xf32>
    %32 = vector.broadcast %29 : vector<2x2x1xf32> to vector<2x2x128xf32>
    %33 = arith.subf %25, %32 : vector<2x2x128xf32>
    %34 = math.exp %33 : vector<2x2x128xf32>
    %c0_22 = arith.constant 0 : index
    %c0_23 = arith.constant 0 : index
    %c0_24 = arith.constant 0 : index
    %35 = vector.load %arg15[%c0_22, %c0_23, %c0_24] : memref<2x2x1xf32, #tpu.memory_space<vmem>>, vector<2x2x1xf32>
    %36 = arith.mulf %31, %35 : vector<2x2x1xf32>
    %cst_25 = arith.constant dense<0.000000e+00> : vector<2x2xf32>
    %37 = vector.multi_reduction <add>, %34, %cst_25 [2] : vector<2x2x128xf32> to vector<2x2xf32>
    %38 = vector.shape_cast %37 : vector<2x2xf32> to vector<2x2x1xf32>
    %39 = arith.addf %36, %38 : vector<2x2x1xf32>
    %c0_26 = arith.constant 0 : index
    %c0_27 = arith.constant 0 : index
    %c0_28 = arith.constant 0 : index
    %40 = vector.load %arg15[%c0_26, %c0_27, %c0_28] : memref<2x2x1xf32, #tpu.memory_space<vmem>>, vector<2x2x1xf32>
    tpu.vector_store %arg15[%c0_26, %c0_27, %c0_28], %39 {strides = array<i32>} : memref<2x2x1xf32, #tpu.memory_space<vmem>>, vector<2x2x1xf32>,
    %c0_29 = arith.constant 0 : index
    %c0_30 = arith.constant 0 : index
    %c0_31 = arith.constant 0 : index
    %41 = vector.load %arg16[%c0_29, %c0_30, %c0_31] : memref<2x2x128xf32, #tpu.memory_space<vmem>>, vector<2x2x128xf32>
    %42 = vector.broadcast %31 : vector<2x2x1xf32> to vector<2x2x128xf32>
    %43 = arith.mulf %42, %41 : vector<2x2x128xf32>
    %44 = arith.truncf %34 : vector<2x2x128xf32> to vector<2x2x128xbf16>
    "tpu.trace_start"() <{level = 10 : i32, message = "bgt,bth->bgh"}> : () -> ()
    %cst_32 = arith.constant dense<0.000000e+00> : vector<2x2x128xf32>
    %45 = tpu.matmul %44, %21, %cst_32 {dimension_numbers = #tpu.dot_dimension_numbers<[2], [1], [1], [2], [0, 0, 0, 1, 1, 2], [0], [0]>} : vector<2x2x128xbf16>, vector<2x128x128xbf16>, vector<2x2x128xf32> -> vector<2x2x128xf32>
    "tpu.trace_stop"() : () -> ()
    %46 = arith.addf %43, %45 : vector<2x2x128xf32>
    %c0_33 = arith.constant 0 : index
    %c0_34 = arith.constant 0 : index
    %c0_35 = arith.constant 0 : index
    %47 = vector.load %arg16[%c0_33, %c0_34, %c0_35] : memref<2x2x128xf32, #tpu.memory_space<vmem>>, vector<2x2x128xf32>
    tpu.vector_store %arg16[%c0_33, %c0_34, %c0_35], %46 {strides = array<i32>} : memref<2x2x128xf32, #tpu.memory_space<vmem>>, vector<2x2x128xf32>,
    %c0_36 = arith.constant 0 : index
    %c0_37 = arith.constant 0 : index
    %c0_38 = arith.constant 0 : index
    %48 = vector.load %arg14[%c0_36, %c0_37, %c0_38] : memref<2x2x1xf32, #tpu.memory_space<vmem>>, vector<2x2x1xf32>
    tpu.vector_store %arg14[%c0_36, %c0_37, %c0_38], %29 {strides = array<i32>} : memref<2x2x1xf32, #tpu.memory_space<vmem>>, vector<2x2x1xf32>,
    %c1_i32 = arith.constant 1 : i32
    %49 = arith.cmpi eq, %arg1, %c1_i32 : i32
    %50 = arith.extui %49 : i1 to i32
    %c0_i32_39 = arith.constant 0 : i32
    %51 = arith.cmpi ne, %50, %c0_i32_39 : i32
    scf.if %51 {
      %c0_40 = arith.constant 0 : index
      %c0_41 = arith.constant 0 : index
      %52 = vector.load %arg3[%c0_40, %c0_41] : memref<2x128xf32, #tpu.memory_space<vmem>>, vector<2x128xf32>
      %c0_42 = arith.constant 0 : index
      %c0_43 = arith.constant 0 : index
      %53 = vector.load %arg5[%c0_42, %c0_43] : memref<1x128xf32, #tpu.memory_space<vmem>>, vector<1x128xf32>
      %c0_44 = arith.constant 0 : index
      %c0_45 = arith.constant 0 : index
      %54 = vector.load %arg6[%c0_44, %c0_45] : memref<1x128xf32, #tpu.memory_space<vmem>>, vector<1x128xf32>
      %c64_i32_46 = arith.constant 64 : i32
      %55 = tpu.dynamic_rotate %52 by %c64_i32_46 dim 1 : vector<2x128xf32>, i32 -> vector<2x128xf32>
      %56 = vector.broadcast %53 : vector<1x128xf32> to vector<2x128xf32>
      %57 = arith.mulf %52, %56 : vector<2x128xf32>
      %58 = vector.broadcast %54 : vector<1x128xf32> to vector<2x128xf32>
      %59 = arith.mulf %55, %58 : vector<2x128xf32>
      %60 = arith.addf %57, %59 : vector<2x128xf32>
      %c0_47 = arith.constant 0 : index
      %c0_48 = arith.constant 0 : index
      %61 = vector.load %arg4[%c0_47, %c0_48] : memref<2x128xf32, #tpu.memory_space<vmem>>, vector<2x128xf32>
      %62 = vector.shape_cast %60 : vector<2x128xf32> to vector<1x2x1x128xf32>
      %c0_49 = arith.constant 0 : index
      %c0_50 = arith.constant 0 : index
      %c0_51 = arith.constant 0 : index
      %c0_52 = arith.constant 0 : index
      %63 = vector.load %arg12[%c0_49, %c0_50, %c0_51, %c0_52] : memref<1x2x1x128xf32, #tpu.memory_space<vmem>>, vector<1x2x1x128xf32>
      tpu.vector_store %arg12[%c0_49, %c0_50, %c0_51, %c0_52], %62 {strides = array<i32>} : memref<1x2x1x128xf32, #tpu.memory_space<vmem>>, vector<1x2x1x128xf32>,
      %64 = vector.shape_cast %61 : vector<2x128xf32> to vector<1x2x1x128xf32>
      %c0_53 = arith.constant 0 : index
      %c0_54 = arith.constant 0 : index
      %c0_55 = arith.constant 0 : index
      %c0_56 = arith.constant 0 : index
      %65 = vector.load %arg13[%c0_53, %c0_54, %c0_55, %c0_56] : memref<1x2x1x128xf32, #tpu.memory_space<vmem>>, vector<1x2x1x128xf32>
      tpu.vector_store %arg13[%c0_53, %c0_54, %c0_55, %c0_56], %64 {strides = array<i32>} : memref<1x2x1x128xf32, #tpu.memory_space<vmem>>, vector<1x2x1x128xf32>,
      %66 = vector.shape_cast %60 : vector<2x128xf32> to vector<2x1x128xf32>
      %67 = vector.broadcast %66 : vector<2x1x128xf32> to vector<2x2x128xf32>
      %68 = arith.mulf %16, %67 : vector<2x2x128xf32>
      %cst_57 = arith.constant dense<0.000000e+00> : vector<2x2xf32>
      %69 = vector.multi_reduction <add>, %68, %cst_57 [2] : vector<2x2x128xf32> to vector<2x2xf32>
      %70 = vector.shape_cast %69 : vector<2x2xf32> to vector<2x2x1xf32>
      %c0_58 = arith.constant 0 : index
      %c0_59 = arith.constant 0 : index
      %c0_60 = arith.constant 0 : index
      %71 = vector.load %arg8[%c0_58, %c0_59, %c0_60] : memref<2x1x1xf32, #tpu.memory_space<vmem>>, vector<2x1x1xf32>
      %72 = vector.broadcast %71 : vector<2x1x1xf32> to vector<2x2x1xf32>
      %73 = arith.addf %70, %72 : vector<2x2x1xf32>
      %c0_61 = arith.constant 0 : index
      %c0_62 = arith.constant 0 : index
      %c0_63 = arith.constant 0 : index
      %74 = vector.load %arg14[%c0_61, %c0_62, %c0_63] : memref<2x2x1xf32, #tpu.memory_space<vmem>>, vector<2x2x1xf32>
      %75 = arith.maximumf %74, %73 : vector<2x2x1xf32>
      %c0_64 = arith.constant 0 : index
      %c0_65 = arith.constant 0 : index
      %c0_66 = arith.constant 0 : index
      %76 = vector.load %arg14[%c0_64, %c0_65, %c0_66] : memref<2x2x1xf32, #tpu.memory_space<vmem>>, vector<2x2x1xf32>
      %77 = arith.subf %76, %75 : vector<2x2x1xf32>
      %78 = math.exp %77 : vector<2x2x1xf32>
      %79 = arith.subf %73, %75 : vector<2x2x1xf32>
      %80 = math.exp %79 : vector<2x2x1xf32>
      %c0_67 = arith.constant 0 : index
      %c0_68 = arith.constant 0 : index
      %c0_69 = arith.constant 0 : index
      %81 = vector.load %arg15[%c0_67, %c0_68, %c0_69] : memref<2x2x1xf32, #tpu.memory_space<vmem>>, vector<2x2x1xf32>
      %82 = arith.mulf %78, %81 : vector<2x2x1xf32>
      %83 = arith.addf %82, %80 : vector<2x2x1xf32>
      %c0_70 = arith.constant 0 : index
      %c0_71 = arith.constant 0 : index
      %c0_72 = arith.constant 0 : index
      %84 = vector.load %arg16[%c0_70, %c0_71, %c0_72] : memref<2x2x128xf32, #tpu.memory_space<vmem>>, vector<2x2x128xf32>
      %85 = vector.broadcast %78 : vector<2x2x1xf32> to vector<2x2x128xf32>
      %86 = arith.mulf %85, %84 : vector<2x2x128xf32>
      %87 = vector.shape_cast %61 : vector<2x128xf32> to vector<2x1x128xf32>
      %88 = vector.broadcast %80 : vector<2x2x1xf32> to vector<2x2x128xf32>
      %89 = vector.broadcast %87 : vector<2x1x128xf32> to vector<2x2x128xf32>
      %90 = arith.mulf %88, %89 : vector<2x2x128xf32>
      %91 = arith.addf %86, %90 : vector<2x2x128xf32>
      %92 = tpu.reciprocal %83 {approx = true} : vector<2x2x1xf32> -> vector<2x2x1xf32>
      %93 = vector.broadcast %92 : vector<2x2x1xf32> to vector<2x2x128xf32>
      %94 = arith.mulf %91, %93 : vector<2x2x128xf32>
      %95 = vector.shape_cast %94 : vector<2x2x128xf32> to vector<2x256xf32>
      %c0_73 = arith.constant 0 : index
      %c0_74 = arith.constant 0 : index
      %96 = vector.load %arg11[%c0_73, %c0_74] : memref<2x256xf32, #tpu.memory_space<vmem>>, vector<2x256xf32>
      tpu.vector_store %arg11[%c0_73, %c0_74], %95 {strides = array<i32>} : memref<2x256xf32, #tpu.memory_space<vmem>>, vector<2x256xf32>,
    } else {
    }
    return
  }
  func.func @transform_0(%arg0: i32, %arg1: i32) -> (i32, i32) {
    %c0_i32 = arith.constant 0 : i32
    %c0_i32_0 = arith.constant 0 : i32
    return %c0_i32, %arg0 : i32, i32
  }
  func.func @transform_1(%arg0: i32, %arg1: i32) -> (i32, i32) {
    %c4_i32 = arith.constant 4 : i32
    %0 = arith.addi %c4_i32, %arg0 : i32
    %c0_i32 = arith.constant 0 : i32
    %c0_i32_0 = arith.constant 0 : i32
    return %c0_i32, %0 : i32, i32
  }
  func.func @transform_2(%arg0: i32, %arg1: i32) -> (i32, i32) {
    %c6_i32 = arith.constant 6 : i32
    %0 = arith.addi %c6_i32, %arg0 : i32
    %c0_i32 = arith.constant 0 : i32
    %c0_i32_0 = arith.constant 0 : i32
    return %c0_i32, %0 : i32, i32
  }
  func.func @transform_3(%arg0: i32, %arg1: i32) -> (i32, i32) {
    %c0_i32 = arith.constant 0 : i32
    %c0_i32_0 = arith.constant 0 : i32
    %c0_i32_1 = arith.constant 0 : i32
    return %c0_i32, %c0_i32_0 : i32, i32
  }
  func.func @transform_4(%arg0: i32, %arg1: i32) -> (i32, i32) {
    %c0_i32 = arith.constant 0 : i32
    %c0_i32_0 = arith.constant 0 : i32
    %c0_i32_1 = arith.constant 0 : i32
    return %c0_i32, %c0_i32_0 : i32, i32
  }
  func.func @transform_5(%arg0: i32, %arg1: i32) -> (i32, i32, i32) {
    %c0_i32 = arith.constant 0 : i32
    %c0_i32_0 = arith.constant 0 : i32
    %c0_i32_1 = arith.constant 0 : i32
    return %c0_i32, %c0_i32_0, %arg1 : i32, i32, i32
  }
  func.func @transform_6(%arg0: i32, %arg1: i32) -> (i32, i32, i32) {
    %c0_i32 = arith.constant 0 : i32
    %c0_i32_0 = arith.constant 0 : i32
    %c0_i32_1 = arith.constant 0 : i32
    %c0_i32_2 = arith.constant 0 : i32
    return %c0_i32, %c0_i32_0, %c0_i32_1 : i32, i32, i32
  }
  func.func @transform_7(%arg0: i32, %arg1: i32) -> (i32, i32, i32, i32) {
    %c0_i32 = arith.constant 0 : i32
    %c0_i32_0 = arith.constant 0 : i32
    %c0_i32_1 = arith.constant 0 : i32
    return %arg0, %c0_i32, %c0_i32_0, %arg1 : i32, i32, i32, i32
  }
  func.func @transform_8(%arg0: i32, %arg1: i32) -> (i32, i32, i32, i32) {
    %c0_i32 = arith.constant 0 : i32
    %c0_i32_0 = arith.constant 0 : i32
    %c0_i32_1 = arith.constant 0 : i32
    return %arg0, %c0_i32, %arg1, %c0_i32_0 : i32, i32, i32, i32
  }
  func.func @transform_9(%arg0: i32, %arg1: i32) -> (i32, i32) {
    %c0_i32 = arith.constant 0 : i32
    %c0_i32_0 = arith.constant 0 : i32
    return %c0_i32, %arg0 : i32, i32
  }
  func.func @transform_10(%arg0: i32, %arg1: i32) -> (i32, i32, i32, i32) {
    %c0_i32 = arith.constant 0 : i32
    %c0_i32_0 = arith.constant 0 : i32
    %c0_i32_1 = arith.constant 0 : i32
    %c0_i32_2 = arith.constant 0 : i32
    return %arg0, %c0_i32, %c0_i32_0, %c0_i32_1 : i32, i32, i32, i32
  }
  func.func @transform_11(%arg0: i32, %arg1: i32) -> (i32, i32, i32, i32) {
    %c0_i32 = arith.constant 0 : i32
    %c0_i32_0 = arith.constant 0 : i32
    %c0_i32_1 = arith.constant 0 : i32
    %c0_i32_2 = arith.constant 0 : i32
    return %arg0, %c0_i32, %c0_i32_0, %c0_i32_1 : i32, i32, i32, i32
  }
}

</mosaic_0001>

<bundles_post_ra>
// kernel: neg.1
= control target key start
LH: loop header
LB: loop body
LE: loop exit
PB: predicated region body
PF: predicated region fallthrough
CT: control target
= control target key end

     0   :  { %s24_s0 = inlined_call_operand.vmem [shape: f32[1,64], index: 0, kind: input, shape index: {}]   ;;  %s25_s1 = inlined_call_operand.vmem [shape: f32[1,64], index: 1, kind: output, shape index: {}]  }
   0x1   :  { %v2_v0 = vld [vmem:[%s24_s0] sm:$0x1] }
   0x2   :  { %v5_v1 = vxor.u32 2147483648, %v2_v0 }
   0x4   :  { %7 = vst [vmem:[%s25_s1] sm:$0x1] %v5_v1 }

// kernel: llama_decoder_layer.5
= control target key start
LH: loop header
LB: loop body
LE: loop exit
PB: predicated region body
PF: predicated region fallthrough
CT: control target
= control target key end

     0   :  { %s2272_s0 = inlined_call_operand.vmem [shape: f32[2,1024], index: 0, kind: input, shape index: {}, may-alias: {0,1,2}]   ;;  %s2273_s1 = inlined_call_operand.vmem [shape: f32[2,1024], index: 1, kind: input, shape index: {}, may-alias: {0,1,2}]   ;;  %s2274_s2 = inlined_call_operand.vmem [shape: f32[2,1024], index: 2, kind: input, shape index: {}, may-alias: {0,1,2}]   ;;  %s2275_s3 = inlined_call_operand.vmem [shape: f32[1,128], index: 3, kind: input, shape index: {}]   ;;  %s2276_s4 = inlined_call_operand.vmem [shape: f32[1,128], index: 4, kind: input, shape index: {}]   ;;  %s2277_s5 = inlined_call_operand.vmem [shape: f32[2,1,256], index: 5, kind: input, shape index: {}]   ;;  %s2278_s6 = inlined_call_operand.vmem [shape: f32[2,1,1], index: 6, kind: input, shape index: {}]   ;;  %s2279_s7 = inlined_call_operand.hbm [shape: bf16[2,2,128,256], index: 7, kind: input, shape index: {}]   ;;  %s2280_s8 = inlined_call_operand.hbm [shape: bf16[2,2,256,128], index: 8, kind: input, shape index: {}]   ;;  %s2281_s9 = inlined_call_operand.vmem [shape: f32[2,512], index: 9, kind: output, shape index: {0}]   ;;  %s2282_s10 = inlined_call_operand.vmem [shape: f32[2,2,1,128], index: 10, kind: output, shape index: {1}]   ;;  %s2283_s11 = inlined_call_operand.vmem [shape: f32[2,2,1,128], index: 11, kind: output, shape index: {2}]  }
   0x1   :  { %2290 = sst [smem:[#allocation23_spill]] %s2272_s0 }
   0x2   :  { %2291 = sst [smem:[#allocation24_spill]] %s2275_s3 }
   0x3   :  { %2292 = sst [smem:[#allocation25_spill]] %s2276_s4 }
   0x4   :  { %2293 = sst [smem:[#allocation26_spill]] %s2277_s5 }
   0x5   :  { %2294 = sst [smem:[#allocation27_spill]] %s2278_s6 }
   0x6   :  { %2295 = sst [smem:[#allocation28_spill]] %s2279_s7 }
   0x7   :  { %2296 = sst [smem:[#allocation29_spill]] %s2283_s11 }
   0x8   :  { %17 = vsyncpa [#allocation7], 0 }
   0x9   :  { %19 = vsyncpa [#allocation7 + $0x1], 0 }
   0xa   :  { %20 = vsyncpa [#allocation9], 0 }
   0xb   :  { %22 = vsyncpa [#allocation9 + $0x1], 0  ;;  %s1957_s17 = smov 0   ;;  %s1959_s18 = smov 0  }
   0xc   :  { %s1961_s19 = smov 0   ;;  %s1963_s20 = smov 0  }
   0xd   :  { %s1965_s21 = smov 0   ;;  %s1967_s22 = smov 0  }
   0xe   :  { %s1969_s23 = smov 0   ;;  %s1971_s24 = smov 0  }
   0xf   :  { %s1973_s25 = smov 0   ;;  %s1975_s26 = smov 0  }
  0x10 LB: > { %2297 = sst [smem:[#allocation15_spill]] %s1851_s19  ;;  %s1433_s27 = sadd.s32 4294967295, %s1879_s26   ;;  %s1879_s26 = sphi %s1975_s26, %s28_s26   ;;  %s1875_s25 = sphi %s1973_s25, %s2328_s25   ;;  %s1871_s24 = sphi %s1971_s24, %s2332_s24   ;;  %s1867_s23 = sphi %s1969_s23, %s2326_s23   ;;  %s1863_s22 = sphi %s1967_s22, %s2331_s22   ;;  %s1859_s21 = sphi %s1965_s21, %s2325_s21   ;;  %s1855_s20 = sphi %s1963_s20, %s2324_s20   ;;  %s1851_s19 = sphi %s1961_s19, %s2323_s19   ;;  %s1847_s18 = sphi %s1959_s18, %s2330_s18   ;;  %s1843_s17 = sphi %s1957_s17, %s2329_s17  }
  0x11   : > { %2298 = sst [smem:[#allocation16_spill]] %s1859_s21  ;;  %s37_s28 = sadd.s32 1, %s1871_s24 }
  0x12   : > { %2299 = sst [smem:[#allocation17_spill]] %s1863_s22  ;;  %p38_p0 = scmp.ge.s32.totalorder %s37_s28, 2 }
  0x13   : > { %2300 = sst [smem:[#allocation18_spill]] %s1875_s25  ;;  %s40_s29 = sadd.s32 1, %s1875_s25 }
  0x14   : > { %s171_s30 = sadd.s32 1, %s1859_s21  ;;  %p178_p1 = scmp.ne.s32.totalorder %s1859_s21, %s1855_s20 }
  0x15   : > { %s2334_s28 = smov (%p38_p0, %s37_s28), 0  ;;  %s2336_s29 = smov (!%p38_p0, %s40_s29), %s1875_s25 }
  0x16   : > { %2301 = sst [smem:[#allocation19_spill]] %s2334_s28  ;;  %s168_s12 = ssub.s32 %s1871_s24, %s2334_s28 }
  0x17   : > { %p179_p2 = scmp.eq.s32.totalorder %s1879_s26, 0  ;;  %p42_p3 = scmp.ge.s32.totalorder %s2336_s29, 2 }
  0x18   : > { %p169_p4 = scmp.eq.s32.totalorder %s168_s12, 0  ;;  %s220_s14 = sadd.s32 1, %s1851_s19 }
  0x19   : > { %p2019_p5 = por %p179_p2, %p178_p1  ;;  %s2338_s29 = smov (%p42_p3, %s2336_s29), 0 }
  0x1a   : > { %2303 = sst [smem:[#allocation20_spill]] %s2338_s29  ;;  %s215_s16 = ssub.s32 %s1875_s25, %s2338_s29 }
  0x1b   : > { %s2027_s15 = scalar_select %p169_p4, %s1859_s21, %s171_s30  }
  0x1c   : > { %p227_p6 = scmp.ne.s32.totalorder %s1851_s19, %s1847_s18  ;;  %s217_s6 = sor.u32 %s215_s16, %s168_s12 }
  0x1d   : > { %2304 = sst [smem:[#allocation21_spill]] %s2027_s15  ;;  %p233_p7 = scmp.ne.s32.totalorder %s1847_s18, %s1843_s17 }
  0x1e   : > { %p218_p8 = scmp.eq.s32.totalorder %s217_s6, 0  ;;  %p2035_p9 = por %p227_p6, %p179_p2 }
  0x1f   : > { %p234_p10 = scmp.eq.s32.totalorder %s1433_s27, 0  ;;  %p1436_p12 = scmp.ge.s32.totalorder %s1879_s26, 4 }
  0x20   : > { %s2040_s4 = scalar_select %p218_p8, %s1851_s19, %s220_s14  }
  0x21   : > { %p2042_p11 = por %p234_p10, %p233_p7  ;;  %368 = sbr.rel (%p1436_p12) target bundleno = 76 (0x4c), region = 28 }
  0x22   : > { %2306 = sst [smem:[#allocation22_spill]] %s2040_s4 }
  0x26   : > { %398 = sbr.rel (!%p2019_p5) target bundleno = 49 (0x31), region = 44  ;;  %s400_s6 = sand.u32 (%p2019_p5), 1, %s1859_s21  }
  0x27   : > { %s2308_s5 = sld [smem:[#allocation26_spill]] (%p2019_p5)  ;;  %s1437_s27 = sshll.u32 (%p2019_p5), %s400_s6, 1 }
  0x28   : > { %s402_s14 = scalar_lea.vmem (%p2019_p5), [#allocation5], %s1437_s27 }
  0x2d   : > { %s403_s12 = scalar_lea.vmem %s2308_s5, %s1871_s24 }
  0x2e   : > { %v420_v0 = vld [vmem:[%s403_s12] sm:$0x1]  ;;  %v422_v1 = vld [vmem:[%s403_s12 + $0x2] sm:$0x1] }
  0x2f   : > { %421 = vst [vmem:[%s402_s14] sm:$0x1] %v420_v0 }
  0x30   : > { %423 = vst [vmem:[%s402_s14 + $0x1] sm:$0x1] %v422_v1 }
  0x31 PF: > { %s2055_s13 = sand.u32 1, %s1851_s19   ;;  %s1439_s16 = sshll.u32 %s1875_s25, 6 }
  0x32   : > { %s1438_s29 = sshll.u32 %s2055_s13, 7  ;;  %s452_s15 = sadd.s32 %s1871_s24, %s1439_s16 }
  0x33   : > { %s1440_s17 = sshll.u32 %s452_s15, 2  ;;  %s448_s30 = scalar_lea.vmem [#allocation6], %s1438_s29 }
  0x34   : > { %s457_s6 = sshll.u32 %s448_s30, 4  ;;  %s2309_s7 = sld [smem:[#allocation28_spill]]  ;;  %s458_s6 = int_to_ptr.vmem [resolvable:$true] %s457_s6 }
  0x35   : > { %s445_s21 = scalar_lea.sflag [#allocation7], %s2055_s13  ;;  %s1881_s4 = smov 128  }
  0x36   : > { %s1882_s22 = smov 64   ;;  %s1883_s19 = smov 4  }
  0x3a   : > { %s454_s27 = scalar_lea.hbm %s2309_s7, %s1440_s17 }
  0x3b   : > { %s455_s14 = sshll.u32 %s454_s27, 4  ;;  %s456_s14 = int_to_ptr.hbm [resolvable:$true] %s455_s14 }
  0x3c   : > { %1624 = dma.hbm_to_vmem [thread:$0]  (%p2035_p9), %s456_s14, 2048, %s458_s6, %s445_s21, %s1881_s4, %s1882_s22, %s1883_s19  }
  0x3d   : > { %s1442_s15 = sshll.u32 %s1871_s24, 4  ;;  %s471_s25 = scalar_lea.vmem [#allocation8], %s1438_s29 }
  0x3e   : > { %s476_s30 = sadd.s32 %s1442_s15, %s1439_s16  ;;  %s493_s5 = sshll.u32 %s471_s25, 4  ;;  %s494_s5 = int_to_ptr.vmem [resolvable:$true] %s493_s5 }
  0x3f   : > { %s1444_s17 = sshll.u32 %s476_s30, 2  ;;  %s1884_s11 = smov 2048  }
  0x40   : > { %s478_s7 = scalar_lea.hbm %s2280_s8, %s1444_s17  ;;  %1626 = sst [smem:[#allocation11]] (%p2035_p9), %s1884_s11 }
  0x41   : > { %s1625_s4 = scalar_select %p2035_p9, [#allocation0], [#allocation12] }
  0x42   : > { %s491_s21 = sshll.u32 %s478_s7, 4  ;;  %s1885_s22 = smov 1024   ;;  %s492_s21 = int_to_ptr.hbm [resolvable:$true] %s491_s21 }
  0x43   : > { %s483_s19 = sld [smem:[%s1625_s4]]   ;;  %s1886_s25 = smov 16  }
  0x44   : > { %1627 = sst [smem:[#allocation11 + $0x1]] (%p2035_p9), %s1885_s22  ;;  %s1887_s29 = smov 64  }
  0x45   : > { %1628 = sst [smem:[#allocation11 + $0x2]] (%p2035_p9), %s1886_s25  ;;  %s1888_s11 = smov 4  }
  0x46   : > { %1629 = sst [smem:[#allocation11 + $0x3]] (%p2035_p9), %s1887_s29  ;;  %s468_s14 = scalar_lea.sflag [#allocation9], %s2055_s13 }
  0x47   : > { %1630 = sst [smem:[#allocation11 + $0x4]] (%p2035_p9), %s1887_s29  ;;  %s1889_s15 = smov [#allocation10]  }
  0x48   : > { %1631 = sst [smem:[#allocation11 + $0x5]] (%p2035_p9), %s1888_s11 }
  0x49   : > { %s1445_s16 = sshll.u32 %s483_s19, 26 }
  0x4a   : > { %s1446_s6 = sadd.s32 134217728, %s1445_s16 }
  0x4b   : > { %1632 = dma.general (%p2035_p9), %s492_s21, 2048, %s494_s5, %s468_s14, %s1889_s15, [#allocation11], %s1446_s6, 0  }
  0x4c PF: > { %p1447_p13 = scmp.ge.s32.totalorder %s1879_s26, 1  ;;  %p514_p0 = scmp.lt.s32.totalorder %s1879_s26, 5 }
  0x4e   : > { %p515_p1 = pnand %p1447_p13, %p514_p0 }
  0x4f   : > { %s521_s7 = sand.u32 (!%p515_p1), 1, %s1855_s20   ;;  %s527_s30 = sand.u32 (!%p515_p1), 1, %s1847_s18  }
  0x50   : > { %518 = sbr.rel (%p515_p1) target bundleno = 1140 (0x474), region = 86  ;;  %s2091_s17 = sshll.u32 (!%p515_p1), %s521_s7, 1 }
  0x51   : > { %s1449_s12 = sshll.u32 (!%p515_p1), %s527_s30, 7  ;;  %s528_s27 = scalar_lea.sflag (!%p515_p1), [#allocation7], %s527_s30 }
  0x52   : > { %s2094_s28 = scalar_lea.vmem (!%p515_p1), [#allocation6], %s1449_s12 }
  0x55   : > { %1834 = dma.done.wait (%p2042_p11), %s528_s27, 2048  }
  0x56   : > { %1836 = vsyncadd (%p2042_p11), %s528_s27, 4294965248  ;;  %s538_s5 = scalar_lea.sflag [#allocation9], %s527_s30  ;;  %s2100_s4 = scalar_lea.vmem [#allocation8], %s1449_s12 }
  0x57   : > { %1838 = dma.done.wait (%p2042_p11), %s538_s5, 2048  }
  0x58   : > { %1840 = vsyncadd (%p2042_p11), %s538_s5, 4294965248  ;;  %s1451_s20 = sshll.u32 %s1867_s23, 1  ;;  %s619_s19 = sadd.s32 4, %s1867_s23 }
  0x59   : > { %p614_p2 = scmp.lt.s32.totalorder %s1451_s20, 7  ;;  %p620_p3 = scmp.lt.s32.totalorder %s619_s19, 7 }
  0x5a   : > { %s625_s21 = sadd.s32 6, %s1867_s23  ;;  %p633_p4 = scmp.lt.s32.totalorder %s1451_s20, 3 }
  0x5b   : > { %s615_s22 = scalar_select %p614_p2, %s1451_s20, 7 }
  0x5c   : > { %s2340_s19 = smov (!%p620_p3, %s619_s19), 7  ;;  %p626_p5 = scmp.lt.s32.totalorder %s625_s21, 7 }
  0x5d   : > { %s1452_s25 = sshll.u32 %s615_s22, 1  ;;  %s2310_s0 = sld [smem:[#allocation23_spill]] }
  0x5e   : > { %s1453_s16 = sshll.u32 %s2340_s19, 1  ;;  %p638_p6 = scmp.lt.s32.totalorder %s1867_s23, 1 }
  0x5f   : > { %s2115_s15 = scalar_lea.vmem %s2273_s1, %s1453_s16  ;;  %s2342_s21 = smov (!%p626_p5, %s625_s21), 7 }
  0x60   : > { %s2344_s20 = smov (!%p633_p4, %s1451_s20), 3  ;;  %s1454_s7 = sshll.u32 %s2342_s21, 1 }
  0x61   : > { %s2121_s27 = scalar_lea.vmem %s2274_s2, %s1454_s7  ;;  %s1456_s5 = sshll.u32 %s2344_s20, 1 }
  0x62   : > { %s2346_s23 = smov (!%p638_p6, %s1867_s23), 1  ;;  %s2311_s14 = sld [smem:[#allocation29_spill]] }
  0x63   : > { %s617_s3 = scalar_lea.vmem %s2310_s0, %s1452_s25  ;;  %s2126_s25 = scalar_lea.vmem %s2281_s9, %s1456_s5 }
  0x64   : > { %s1457_s19 = sshll.u32 %s2346_s23, 1  ;;  %s2312_s7 = sld [smem:[#allocation17_spill]] }
  0x65   : > { %s2132_s16 = scalar_lea.vmem %s2282_s10, %s1457_s19 }
  0x68   : > { %s2137_s0 = scalar_lea.vmem %s2311_s14, %s1457_s19 }
  0x6a   : > { %p1459_p7 = scmp.ne.s32.totalorder %s2312_s7, 0 }
  0x6c   : > { %649 = sbr.rel (%p1459_p7) target bundleno = 120 (0x78), region = 102 }
  0x71   : > { %vm650_vm0 = vcmask 1024   ;;  %v1890_v2 = vmov -inf   ;;  %v1891_v3 = vmov 0.0  }
  0x72   : > { %651 = vst.msk [vmem:[#allocation2] sm:$0x3] %vm650_vm0, %v1890_v2 }
  0x73   : > { %652 = vst.msk [vmem:[#allocation2 + $0x2] sm:$0x3] %vm650_vm0, %v1890_v2 }
  0x74   : > { %653 = vst.msk [vmem:[#allocation3] sm:$0x3] %vm650_vm0, %v1891_v3 }
  0x75   : > { %654 = vst.msk [vmem:[#allocation3 + $0x2] sm:$0x3] %vm650_vm0, %v1891_v3 }
  0x76   : > { %655 = vst [vmem:[#allocation4] sm:$0x3] %v1891_v3 }
  0x77   : > { %656 = vst [vmem:[#allocation4 + $0x2] sm:$0x3] %v1891_v3 }
  0x78 PF: > { %v657_v4 = vld [vmem:[%s617_s3] sm:$0xf]  ;;  %vm662_vm1 = vcmask 1047556   ;;  %v1892_v6 = vmov 1934713408   ;;  %v1599_v8 = vld [vmem:[%s2094_s28 + $0x38] sm:$0xff] }
  0x79   : > { %v1460_v5 = vrot.slane %v657_v4, 6  ;;  %v2140_v7 = vunpack.c.l.s4 %v1892_v6  ;;  %v1607_v9 = vld [vmem:[%s2094_s28 + $0x78] sm:$0xff]  ;;  %812 = vmatpush.bf16.msra.mxu0 %v1599_v8  ;;  %v1598_v12 = vld [vmem:[%s2094_s28 + $0x30] sm:$0xff]  ;;  %s1893_s23 = smov 64   ;;  %v1597_v15 = vld [vmem:[%s2094_s28 + $0x28] sm:$0xff]  ;;  %s2313_s3 = sld [smem:[#allocation24_spill]] }
  0x7a   : > { %873 = vmatpush.bf16.msra.mxu1 %v1607_v9  ;;  %v1606_v13 = vld [vmem:[%s2094_s28 + $0x70] sm:$0xff]  ;;  %v1605_v17 = vld [vmem:[%s2094_s28 + $0x68] sm:$0xff]  ;;  %v1596_v18 = vld [vmem:[%s2094_s28 + $0x20] sm:$0xff]  ;;  %s2314_s5 = sld [smem:[#allocation25_spill]]  ;;  %vm888_vm2 = vcmask 1041408   ;;  %v1894_v53 = vmov 0  }
  0x7b   : > { %v663_v10 = vsel %vm662_vm1, %v1460_v5, %v657_v4  ;;  %v666_v11 = vunpack.c.0.s8 %v2140_v7  ;;  %v1604_v20 = vld [vmem:[%s2094_s28 + $0x60] sm:$0xff]  ;;  %v1595_v21 = vld [vmem:[%s2094_s28 + $0x18] sm:$0xff]  ;;  %v1594_v22 = vld [vmem:[%s2094_s28 + $0x10] sm:$0xff]  ;;  %1731 = vset.pattern.permute.xlu2 %v1894_v53  ;;  %1732 = vset.pattern.permute.xlu0 %v1894_v53  ;;  %vm931_vm3 = vcmask 1024  }
  0x7c   : > { %v1593_v23 = vld [vmem:[%s2094_s28 + $0x8] sm:$0xff]  ;;  %v1603_v24 = vld [vmem:[%s2094_s28 + $0x58] sm:$0xff]  ;;  %v1592_v25 = vld [vmem:[%s2094_s28] sm:$0xff]  ;;  %1733 = vset.pattern.permute.xlu1 %v1894_v53 }
  0x7d   : > { %v667_v14 = vperm.slane %v663_v10, %v666_v11  ;;  %813 = vmatpush.bf16.msra.mxu0 %v1598_v12  ;;  %v1602_v26 = vld [vmem:[%s2094_s28 + $0x50] sm:$0xff]  ;;  %v1601_v27 = vld [vmem:[%s2094_s28 + $0x48] sm:$0xff]  ;;  %v1600_v28 = vld [vmem:[%s2094_s28 + $0x40] sm:$0xff]  ;;  %s2315_s28 = scalar_lea.vmem [#allocation5], %s2091_s17  ;;  %s2317_s17 = sld [smem:[#allocation17_spill]] }
  0x7e   : > { %874 = vmatpush.bf16.msra.mxu1 %v1606_v13  ;;  %v1736_v43 = vld [vmem:[%s2315_s28] ss:$0 sm:$0xff]  ;;  %s2316_s22 = smov %s2315_s28  ;;  %v1614_v56 = vld [vmem:[%s2100_s4 + $0x30] sm:$0xff]  ;;  %v1613_v58 = vld [vmem:[%s2100_s4 + $0x28] sm:$0xff] }
  0x7f   : > { %672 = vrot.lane.b32.xlu0 %v667_v14, %s1893_s23  ;;  %v668_v16 = vrot.slane %v667_v14, 4  ;;  %v1734_v29 = vld [vmem:[%s2313_s3] ss:$0 sm:$0xff]  ;;  %v1737_v47 = vld [vmem:[%s2316_s22 + $0x1] ss:$0 sm:$0xff]  ;;  %v1615_v54 = vld [vmem:[%s2100_s4 + $0x38] sm:$0xff] }
  0x80   : > { %v1735_v30 = vld [vmem:[%s2314_s5] ss:$0 sm:$0xff]  ;;  %v679_v31 = vmul.f32 %v1734_v29, %v667_v14  ;;  %v1623_v55 = vld [vmem:[%s2100_s4 + $0x78] sm:$0xff]  ;;  %998 = vmatpush.bf16.msra.mxu2 %v1615_v54  ;;  %v1621_v59 = vld [vmem:[%s2100_s4 + $0x68] sm:$0xff] }
  0x81   : > { %814 = vmatpush.bf16.msra.mxu0 %v1597_v15  ;;  %v669_v19 = vsel %vm662_vm1, 0.0, %v668_v16  ;;  %1059 = vmatpush.bf16.msra.mxu3 %v1623_v55  ;;  %v1622_v57 = vld [vmem:[%s2100_s4 + $0x70] sm:$0xff]  ;;  %v1612_v62 = vld [vmem:[%s2100_s4 + $0x20] sm:$0xff]  ;;  %v1611_v1 = vld [vmem:[%s2100_s4 + $0x18] sm:$0xff] }
  0x82   : > { %875 = vmatpush.bf16.msra.mxu1 %v1605_v17  ;;  %v680_v36 = vmul.f32 %v1734_v29, %v669_v19  ;;  %v886_v60 = vld [vmem:[#allocation2] sm:$0x3]  ;;  %v887_v3 = vld [vmem:[#allocation2 + $0x2] sm:$0x3]  ;;  %v1620_v13 = vld [vmem:[%s2100_s4 + $0x60] sm:$0xff] }
  0x83   : > { %v1610_v12 = vld [vmem:[%s2100_s4 + $0x10] sm:$0xff]  ;;  %v1609_v14 = vld [vmem:[%s2100_s4 + $0x8] sm:$0xff]  ;;  %v1619_v15 = vld [vmem:[%s2100_s4 + $0x58] sm:$0xff]  ;;  %p1589_p8 = scmp.ne.s32.totalorder %s2317_s17, 1 }
  0x84   : > { %999 = vmatpush.bf16.msra.mxu2 %v1614_v56  ;;  %v1608_v16 = vld [vmem:[%s2100_s4] sm:$0xff]  ;;  %v1618_v17 = vld [vmem:[%s2100_s4 + $0x50] sm:$0xff]  ;;  %s2318_s11 = sld [smem:[#allocation24_spill]] (!%p1589_p8) }
  0x85   : > { %815 = vmatpush.bf16.msra.mxu0 %v1596_v18  ;;  %1060 = vmatpush.bf16.msra.mxu3 %v1622_v57  ;;  %v1617_v18 = vld [vmem:[%s2100_s4 + $0x48] sm:$0xff]  ;;  %s2319_s14 = sld [smem:[#allocation25_spill]] (!%p1589_p8) }
  0x86   : > { %876 = vmatpush.bf16.msra.mxu1 %v1604_v20 }
  0x87   : > { %674 = vrot.lane.b32.xlu0 %v669_v19, %s1893_s23  ;;  %v1616_v19 = vld [vmem:[%s2100_s4 + $0x40] sm:$0xff]  ;;  %s1895_s4 = smov (!%p1589_p8), 64   ;;  %s2320_s23 = sld [smem:[#allocation27_spill]] (!%p1589_p8) }
  0x88   : > { %1000 = vmatpush.bf16.msra.mxu2 %v1613_v58 }
  0x89   : > { %816 = vmatpush.bf16.msra.mxu0 %v1595_v21  ;;  %1061 = vmatpush.bf16.msra.mxu3 %v1621_v59 }
  0x8a   : > { %877 = vmatpush.bf16.msra.mxu1 %v1603_v24 }
  0x8c   : > { %1001 = vmatpush.bf16.msra.mxu2 %v1612_v62 }
  0x8d   : > { %817 = vmatpush.bf16.msra.mxu0 %v1594_v22  ;;  %1062 = vmatpush.bf16.msra.mxu3 %v1620_v13  ;;  %s2321_s13 = smov (!%p1589_p8), %s2320_s23 }
  0x8e   : > { %878 = vmatpush.bf16.msra.mxu1 %v1602_v26 }
  0x90   : > { %1002 = vmatpush.bf16.msra.mxu2 %v1611_v1 }
  0x91   : > { %818 = vmatpush.bf16.msra.mxu0 %v1593_v23  ;;  %1063 = vmatpush.bf16.msra.mxu3 %v1619_v15 }
  0x92   : > { %879 = vmatpush.bf16.msra.mxu1 %v1601_v27 }
  0x94   : > { %1003 = vmatpush.bf16.msra.mxu2 %v1610_v12 }
  0x95   : > { %819 = vmatpush.bf16.msra.mxu0 %v1592_v25  ;;  %1064 = vmatpush.bf16.msra.mxu3 %v1618_v17 }
  0x96   : > { %880 = vmatpush.bf16.msra.mxu1 %v1600_v28 }
  0x98   : > { %1004 = vmatpush.bf16.msra.mxu2 %v1609_v14 }
  0x99   : > { %1065 = vmatpush.bf16.msra.mxu3 %v1617_v18 }
  0x9c   : > { %1005 = vmatpush.bf16.msra.mxu2 %v1608_v16 }
  0x9d   : > { %1066 = vmatpush.bf16.msra.mxu3 %v1616_v19 }
  0xf1   : > { %v673_v32 = vpop.permute.xlu0 %672 }
  0xf2   : > { %v684_v33 = vmul.f32 %v1735_v30, %v673_v32  ;;  %v919_v32 = vld [vmem:[#allocation3] sm:$0x3] }
  0xf4   : > { %v686_v34 = vadd.f32 %v684_v33, %v679_v31 }
  0xf6   : > { %v2169_v35 = vmul.f32 0.088388346, %v686_v34 }
  0xf8   : > { %v690_v37 = vpack.c.bf16 %v2169_v35, %v2169_v35 }
  0xf9   : > { %v675_v38 = vpop.permute.xlu0 %674 }
  0xfa   : > { %v685_v39 = vmul.f32 %v1735_v30, %v675_v38  ;;  %820 = vmatmul.bf16.vlgmr.msra.gmra.mxu0 %v690_v37  ;;  %v920_v38 = vld [vmem:[#allocation3 + $0x2] sm:$0x3] }
  0xfc   : > { %v687_v40 = vadd.f32 %v685_v39, %v680_v36 }
  0xfe   : > { %v2173_v41 = vmul.f32 0.088388346, %v687_v40 }
 0x100   : > { %v691_v42 = vpack.c.bf16 %v2173_v41, %v2173_v41 }
 0x102   : > { %881 = vmatmul.bf16.vlgmr.msra.gmra.mxu1 %v691_v42 }
 0x177   : > { %v821_v44 = vpop.f32.mrf.mxu0 }
 0x178   : > { %v2179_v45 = vadd.f32 %v1736_v43, %v821_v44  ;;  %v934_v43 = vld [vmem:[#allocation4] sm:$0x3] }
 0x17a   : > { %v889_v46 = vsel %vm888_vm2, %v2179_v45, -inf }
 0x17b   : > { %890 = vmax.xlane.f32.xlu1 %v889_v46 }
 0x17f   : > { %v823_v48 = vpop.f32.mrf.mxu0  ;;  %v882_v49 = vpop.f32.mrf.mxu1 }
 0x180   : > { %v2185_v50 = vadd.f32 %v1737_v47, %v882_v49  ;;  %v935_v47 = vld [vmem:[#allocation4 + $0x2] sm:$0x3] }
 0x182   : > { %v892_v51 = vsel %vm888_vm2, %v2185_v50, -inf }
 0x183   : > { %893 = vmax.xlane.f32.xlu1 %v892_v51 }
 0x187   : > { %v884_v52 = vpop.f32.mrf.mxu1 }
 0x1ee   : > { %v891_v61 = vpop.xlane.xlu1 %890 }
 0x1ef   : > { %v895_v63 = vmax.f32 %v886_v60, %v891_v61 }
 0x1f1   : > { %v897_v0 = vsub.f32 %v886_v60, %v895_v63  ;;  %1076 = vst.msk [vmem:[#allocation2] sm:$0x3] %vm931_vm3, %v895_v63  ;;  %905 = vperm.xlu2 %1731, %v895_v63  }
 0x1f3   : > { %v899_v2 = vmul.f32 1.442695, %v897_v0 }
 0x1f5   : > { %1738 = vpow2.f32 %v899_v2 }
 0x1f6   : > { %v894_v4 = vpop.xlane.xlu1 %893 }
 0x1f7   : > { %v896_v5 = vmax.f32 %v887_v3, %v894_v4 }
 0x1f9   : > { %v898_v6 = vsub.f32 %v887_v3, %v896_v5  ;;  %1077 = vst.msk [vmem:[#allocation2 + $0x2] sm:$0x3] %vm931_vm3, %v896_v5  ;;  %910 = vperm.xlu2 %1731, %v896_v5  }
 0x1fb   : > { %v1739_v8 = vpop.eup %1738  ;;  %v901_v9 = vmul.f32 1.442695, %v898_v6 }
 0x1fc   : > { %938 = vperm.xlu0 %1732, %v1739_v8   ;;  %v921_v33 = vmul.f32 %v1739_v8, %v919_v32 }
 0x1fd   : > { %1740 = vpow2.f32 %v901_v9 }
 0x203   : > { %v1741_v10 = vpop.eup %1740 }
 0x204   : > { %943 = vperm.xlu1 %1733, %v1741_v10   ;;  %v922_v39 = vmul.f32 %v1741_v10, %v920_v38 }
 0x24b   : > { %v906_v20 = vpop.permute.xlu2 %905 }
 0x24c   : > { %v913_v21 = vsub.f32 %v2179_v45, %v906_v20 }
 0x24e   : > { %v915_v22 = vmul.f32 1.442695, %v913_v21 }
 0x250   : > { %1742 = vpow2.f32 %v915_v22 }
 0x253   : > { %v911_v23 = vpop.permute.xlu2 %910 }
 0x254   : > { %v914_v24 = vsub.f32 %v2185_v50, %v911_v23 }
 0x256   : > { %v1743_v25 = vpop.eup %1742  ;;  %v917_v26 = vmul.f32 1.442695, %v914_v24 }
 0x257   : > { %v923_v27 = vsel %vm888_vm2, %v1743_v25, 0.0  ;;  %v948_v28 = vpack.c.bf16 %v1743_v25, %v1743_v25 }
 0x258   : > { %1744 = vpow2.f32 %v917_v26  ;;  %924 = vadd.xlane.f32.xlu2 %v923_v27 }
 0x259   : > { %1006 = vmatmul.bf16.vlgmr.msra.gmra.mxu2 %v948_v28 }
 0x25e   : > { %v1745_v29 = vpop.eup %1744 }
 0x25f   : > { %v926_v30 = vsel %vm888_vm2, %v1745_v29, 0.0  ;;  %v949_v31 = vpack.c.bf16 %v1745_v29, %v1745_v29 }
 0x260   : > { %927 = vadd.xlane.f32.xlu0 %v926_v30 }
 0x261   : > { %1067 = vmatmul.bf16.vlgmr.msra.gmra.mxu3 %v949_v31 }
 0x26e   : > { %v939_v34 = vpop.permute.xlu0 %938 }
 0x26f   : > { %v946_v44 = vmul.f32 %v939_v34, %v934_v43 }
 0x276   : > { %v944_v48 = vpop.permute.xlu1 %943 }
 0x277   : > { %v947_v49 = vmul.f32 %v944_v48, %v935_v47 }
 0x2cb   : > { %v925_v36 = vpop.xlane.xlu2 %924 }
 0x2cc   : > { %v929_v37 = vadd.f32 %v925_v36, %v921_v33 }
 0x2ce   : > { %932 = vst.msk [vmem:[#allocation3] sm:$0x3] %vm931_vm3, %v929_v37 }
 0x2d3   : > { %v928_v40 = vpop.xlane.xlu0 %927 }
 0x2d4   : > { %v930_v42 = vadd.f32 %v928_v40, %v922_v39 }
 0x2d6   : > { %933 = vst.msk [vmem:[#allocation3 + $0x2] sm:$0x3] %vm931_vm3, %v930_v42 }
 0x2dc   : > { %v1007_v45 = vpop.f32.mrf.mxu2 }
 0x2dd   : > { %v1072_v46 = vadd.f32 %v1007_v45, %v946_v44 }
 0x2df   : > { %1074 = vst [vmem:[#allocation4] sm:$0x3] %v1072_v46 }
 0x2e4   : > { %v1009_v50 = vpop.f32.mrf.mxu2  ;;  %v1068_v51 = vpop.f32.mrf.mxu3 }
 0x2e5   : > { %v1073_v52 = vadd.f32 %v1068_v51, %v947_v49 }
 0x2e7   : > { %1075 = vst [vmem:[#allocation4 + $0x2] sm:$0x3] %v1073_v52 }
 0x2e8   : > { %1081 = sbr.rel (%p1589_p8) target bundleno = 1140 (0x474), region = 106 }
 0x2ec   : > { %v1070_v53 = vpop.f32.mrf.mxu3 }
 0x2ed   : > { %v1082_v54 = vld [vmem:[%s2115_s15] sm:$0x3]  ;;  %v1896_v4 = vmov 0   ;;  %v1146_v25 = vld [vmem:[#allocation3 + $0x2] sm:$0x3] }
 0x2ee   : > { %1085 = vrot.lane.b32.xlu0 %v1082_v54, %s1895_s4  ;;  %v1749_v55 = vld [vmem:[%s2318_s11] ss:$0 sm:$0xff]  ;;  %1747 = vset.pattern.permute.xlu2 %v1896_v4  ;;  %v1145_v30 = vld [vmem:[#allocation3] sm:$0x3]  ;;  %v1152_v45 = vld [vmem:[#allocation4 + $0x2] sm:$0x3] }
 0x2ef   : > { %v1750_v56 = vld [vmem:[%s2319_s14] ss:$0 sm:$0xff]  ;;  %v1090_v57 = vmul.f32 %v1749_v55, %v1082_v54  ;;  %1746 = vset.pattern.permute.xlu1 %v1896_v4  ;;  %1748 = vset.pattern.permute.xlu0 %v1896_v4  ;;  %v1151_v46 = vld [vmem:[#allocation4] sm:$0x3] }
 0x2f0   : > { %v1751_v5 = vld [vmem:[%s2320_s23] ss:$0 sm:$0xff] }
 0x2f1   : > { %v1129_v6 = vld [vmem:[#allocation2] sm:$0x3] }
 0x2f2   : > { %v1096_v36 = vld [vmem:[%s2121_s27] sm:$0x3] }
 0x2f3   : > { %1105 = vst [vmem:[%s2137_s0] sm:$0x1] %v1096_v36  ;;  %v1103_v37 = vrot.slane %v1096_v36, 1  ;;  %v1175_v42 = vperm.slane %v1096_v36, 0 }
 0x2f5   : > { %1106 = vst [vmem:[%s2137_s0 + $0x1] sm:$0x1] %v1103_v37  ;;  %v1176_v43 = vperm.slane %v1103_v37, 0 }
 0x360   : > { %v1086_v58 = vpop.permute.xlu0 %1085 }
 0x361   : > { %v1094_v59 = vmul.f32 %v1750_v56, %v1086_v58 }
 0x363   : > { %v1095_v60 = vadd.f32 %v1094_v59, %v1090_v57 }
 0x365   : > { %1100 = vst [vmem:[%s2132_s16] sm:$0x1] %v1095_v60  ;;  %v1107_v61 = vperm.slane %v1095_v60, 0  ;;  %v1098_v62 = vrot.slane %v1095_v60, 1 }
 0x367   : > { %v1111_v63 = vmul.f32 %v1107_v61, %v2169_v35  ;;  %v1108_v0 = vperm.slane %v1098_v62, 0  ;;  %1101 = vst [vmem:[%s2132_s16 + $0x1] sm:$0x1] %v1098_v62  ;;  %v1752_v35 = vld [vmem:[%s2321_s13 + $0x1] ss:$0 sm:$0xff] }
 0x369   : > { %v1113_v1 = vsel %vm888_vm2, %v1111_v63, 0.0  ;;  %v1112_v2 = vmul.f32 %v1108_v0, %v2173_v41  ;;  %v1130_v41 = vld [vmem:[#allocation2 + $0x2] sm:$0x3] }
 0x36a   : > { %1114 = vadd.xlane.f32.xlu1 %v1113_v1 }
 0x36b   : > { %v1116_v3 = vsel %vm888_vm2, %v1112_v2, 0.0 }
 0x36c   : > { %1117 = vadd.xlane.f32.xlu0 %v1116_v3 }
 0x3dd   : > { %v1115_v8 = vpop.xlane.xlu1 %1114 }
 0x3de   : > { %v1127_v9 = vadd.f32 %v1751_v5, %v1115_v8 }
 0x3df   : > { %v1118_v10 = vpop.xlane.xlu0 %1117 }
 0x3e0   : > { %v1131_v12 = vmax.f32 %v1129_v6, %v1127_v9  ;;  %v1128_v13 = vadd.f32 %v1752_v35, %v1118_v10 }
 0x3e2   : > { %v1133_v14 = vsub.f32 %v1129_v6, %v1131_v12  ;;  %v1132_v15 = vmax.f32 %v1130_v41, %v1128_v13  ;;  %v1139_v18 = vsub.f32 %v1127_v9, %v1131_v12 }
 0x3e4   : > { %v1135_v16 = vmul.f32 1.442695, %v1133_v14  ;;  %v1134_v17 = vsub.f32 %v1130_v41, %v1132_v15  ;;  %v1141_v20 = vmul.f32 1.442695, %v1139_v18  ;;  %v1140_v21 = vsub.f32 %v1128_v13, %v1132_v15 }
 0x3e6   : > { %1753 = vpow2.f32 %v1135_v16  ;;  %v1137_v19 = vmul.f32 1.442695, %v1134_v17  ;;  %v1143_v24 = vmul.f32 1.442695, %v1140_v21 }
 0x3e8   : > { %1755 = vpow2.f32 %v1137_v19 }
 0x3e9   : > { %1757 = vpow2.f32 %v1141_v20 }
 0x3ea   : > { %1759 = vpow2.f32 %v1143_v24 }
 0x3ec   : > { %v1754_v22 = vpop.eup %1753 }
 0x3ed   : > { %1155 = vperm.xlu2 %1747, %v1754_v22   ;;  %v1147_v31 = vmul.f32 %v1754_v22, %v1145_v30 }
 0x3ee   : > { %v1756_v23 = vpop.eup %1755 }
 0x3ef   : > { %1160 = vperm.xlu1 %1746, %v1756_v23   ;;  %v1758_v26 = vpop.eup %1757  ;;  %v1148_v27 = vmul.f32 %v1756_v23, %v1146_v25 }
 0x3f0   : > { %v1760_v28 = vpop.eup %1759  ;;  %v1149_v32 = vadd.f32 %v1758_v26, %v1147_v31 }
 0x3f1   : > { %v1150_v29 = vadd.f32 %v1760_v28, %v1148_v27 }
 0x3f3   : > { %1761 = vrcp.f32 %v1150_v29 }
 0x3f4   : > { %1763 = vrcp.f32 %v1149_v32 }
 0x3f5   : > { %1167 = vperm.xlu2 %1747, %v1758_v26  }
 0x3f9   : > { %v1762_v33 = vpop.eup %1761 }
 0x3fa   : > { %v1764_v34 = vpop.eup %1763 }
 0x3fd   : > { %1172 = vperm.xlu2 %1747, %v1760_v28  }
 0x405   : > { %1192 = vperm.xlu2 %1747, %v1762_v33  }
 0x40d   : > { %1187 = vperm.xlu2 %1747, %v1764_v34  }
 0x447   : > { %v1156_v38 = vpop.permute.xlu2 %1155 }
 0x448   : > { %v1163_v51 = vmul.f32 %v1156_v38, %v1151_v46 }
 0x44f   : > { %v1168_v39 = vpop.permute.xlu2 %1167 }
 0x450   : > { %v1179_v48 = vmul.f32 %v1175_v42, %v1168_v39 }
 0x452   : > { %v1181_v54 = vadd.f32 %v1179_v48, %v1163_v51 }
 0x457   : > { %v1173_v40 = vpop.permute.xlu2 %1172 }
 0x458   : > { %v1180_v49 = vmul.f32 %v1176_v43, %v1173_v40 }
 0x45f   : > { %v1193_v44 = vpop.permute.xlu2 %1192 }
 0x461   : > { %v1161_v47 = vpop.permute.xlu1 %1160 }
 0x462   : > { %v1164_v50 = vmul.f32 %v1161_v47, %v1152_v45 }
 0x464   : > { %v1182_v52 = vadd.f32 %v1180_v49, %v1164_v50 }
 0x466   : > { %v1196_v53 = vmul.f32 %v1193_v44, %v1182_v52 }
 0x467   : > { %v1188_v55 = vpop.permute.xlu2 %1187 }
 0x468   : > { %v1197_v56 = vrot.slane %v1196_v53, 4  ;;  %v1195_v57 = vmul.f32 %v1188_v55, %v1181_v54 }
 0x46a   : > { %v1198_v58 = vsel %vm662_vm1, %v1197_v56, %v1195_v57 }
 0x46b   : > { %v1202_v59 = vperm.slane %v1198_v58, %v666_v11 }
 0x46d   : > { %v1203_v60 = vrot.slane %v1202_v59, 4 }
 0x46f   : > { %v1204_v61 = vsel %vm662_vm1, 0.0, %v1203_v60 }
 0x470   : > { %v1207_v62 = vrot.slane %v1204_v61, 6 }
 0x472   : > { %v1208_v63 = vsel %vm888_vm2, %v1202_v59, %v1207_v62 }
 0x473   : > { %1210 = vst [vmem:[%s2126_s25] sm:$0xf] %v1208_v63 }
 0x474 PF: > { %s28_s26 = sadd.s32 1, %s1879_s26   ;;  %s2322_s0 = sld [smem:[#allocation15_spill]] }
 0x475   : > { %p25_p9 = scmp.ge.s32.totalorder %s28_s26, 6   ;;  %s2323_s19 = sld [smem:[#allocation22_spill]] }
 0x476   : > { %s2324_s20 = sld [smem:[#allocation16_spill]]  ;;  %s2329_s17 = smov %s1847_s18 }
 0x477   : > { %s2325_s21 = sld [smem:[#allocation21_spill]]  ;;  %s2331_s22 = smov %s1871_s24 }
 0x478   : > { %s2326_s23 = sld [smem:[#allocation18_spill]] }
 0x479   : > { %s2327_s27 = sld [smem:[#allocation19_spill]] }
 0x47a   : > { %s2328_s25 = sld [smem:[#allocation20_spill]]  ;;  %s2330_s18 = smov %s2322_s0 }
 0x47b   :  { %27 = sbr.rel (!%p25_p9) target bundleno = 16 (0x10), region = 197 }
 0x47f   : > { %s2332_s24 = smov %s2327_s27 }
 0x480   :  { %1261 = vsyncpa [#allocation7], 1 }
 0x481   :  { %1263 = vsyncpa [#allocation7 + $0x1], 1 }
 0x482   :  { %1264 = vsyncpa [#allocation9], 1 }
 0x483   :  { %1266 = vsyncpa [#allocation9 + $0x1], 1 }

// kernel: llama_decoder_layer.4
= control target key start
LH: loop header
LB: loop body
LE: loop exit
PB: predicated region body
PF: predicated region fallthrough
CT: control target
= control target key end

     0   :  { %8 = vsyncpa [#allocation3], 0  ;;  %s2522_s0 = inlined_call_operand.vmem [shape: f32[2,512], index: 0, kind: input, shape index: {}]   ;;  %s2523_s1 = inlined_call_operand.vmem [shape: f32[1,512], index: 1, kind: input, shape index: {}]   ;;  %s2524_s2 = inlined_call_operand.hbm [shape: bf16[512,1024], index: 2, kind: input, shape index: {}]   ;;  %s2525_s3 = inlined_call_operand.vmem [shape: f32[2,1024], index: 3, kind: output, shape index: {}]  }
   0x1   :  { %10 = vsyncpa [#allocation3 + $0x1], 0  ;;  %s2121_s12 = smov 0   ;;  %s2123_s13 = smov 0  }
   0x2   :  { %s2125_s14 = smov 0   ;;  %s2127_s15 = smov 0  }
   0x3 LB: > { %s1328_s16 = sadd.s32 4294967295, %s2094_s15   ;;  %s2141_s17 = sadd.s32 1, %s2094_s15   ;;  %s2094_s15 = sphi %s2127_s15, %s2532_s15   ;;  %s2090_s14 = sphi %s2125_s14, %s2531_s14   ;;  %s2086_s13 = sphi %s2123_s13, %s2530_s13   ;;  %s2082_s12 = sphi %s2121_s12, %s2529_s12  }
   0x4   : > { %s62_s18 = ssub.s32 %s2094_s15, %s2141_s17  ;;  %s65_s19 = sadd.s32 1, %s2090_s14 }
   0x5   : > { %p63_p0 = scmp.eq.s32.totalorder %s62_s18, 0  ;;  %p72_p1 = scmp.ne.s32.totalorder %s2090_s14, %s2086_s13 }
   0x6   : > { %p73_p2 = scmp.eq.s32.totalorder %s2094_s15, 0  ;;  %p78_p3 = scmp.ne.s32.totalorder %s2086_s13, %s2082_s12 }
   0x7   : > { %s2151_s20 = scalar_select %p63_p0, %s2090_s14, %s65_s19  }
   0x8   : > { %p2153_p4 = por %p73_p2, %p72_p1  ;;  %p79_p5 = scmp.eq.s32.totalorder %s1328_s16, 0 }
   0x9   : > { %p1988_p6 = scmp.lt.s32.totalorder %s2094_s15, 2  ;;  %s134_s23 = sand.u32 1, %s2090_s14  }
   0xa   : > { %p2160_p7 = por %p79_p5, %p78_p3  ;;  %s1332_s24 = sshll.u32 %s134_s23, 10 }
   0xb   : > { %s1853_s25 = sshll.u32 %s2094_s15, 4  ;;  %s138_s29 = scalar_lea.vmem [#allocation2], %s1332_s24 }
   0xc   : > { %s143_s28 = scalar_lea.hbm %s2524_s2, %s1853_s25  ;;  %s146_s30 = sshll.u32 %s138_s29, 4  ;;  %s147_s30 = int_to_ptr.vmem [resolvable:$true] %s146_s30 }
   0xd   : > { %s144_s4 = sshll.u32 %s143_s28, 4  ;;  %p2171_p8 = pnand %p1988_p6, %p2153_p4  ;;  %s145_s4 = int_to_ptr.hbm [resolvable:$true] %s144_s4 }
   0xe   : > { %s135_s6 = scalar_lea.sflag [#allocation3], %s134_s23  ;;  %s2030_s7 = sshra.s32 %s145_s4, 4  ;;  %s2031_s7 = int_to_ptr.hbm [resolvable:$true] %s2030_s7 }
   0xf   : > { %s2032_s8 = scalar_lea.hbm %s2031_s7, 1024  ;;  %p2034_p10 = pneg %p2171_p8 }
  0x10   : > { %p2033_p9 = scmp.ne.s32.totalorder %s2031_s7, %s2032_s8  ;;  %s2037_s11 = scalar_lea.hbm %s2524_s2, 2048 }
  0x11   : > { %p2038_p13 = scmp.lt.s32.totalorder %s2031_s7, %s2524_s2  ;;  %p2039_p0 = scmp.lt.s32.totalorder %s2037_s11, %s2032_s8 }
  0x12   : > { %p2035_p11 = pnand %p2034_p10, %p2033_p9 }
  0x13   : > { %p2040_p1 = por %p2039_p0, %p2038_p13 }
  0x14   : > { %p2036_p12 = pneg %p2035_p11 }
  0x16   : > { %p2041_p2 = pnand %p2040_p1, %p2036_p12 }
  0x18   : > { %2044 = shalt.err (!%p2041_p2)
}
  0x19   : > { %s2096_s19 = smov 512   ;;  %s2097_s21 = smov 256  }
  0x1a   : > { %s2098_s23 = smov 16   ;;  %p1335_p3 = scmp.ge.s32.totalorder %s2094_s15, 1 }
  0x1b   : > { %1987 = dma.hbm_to_vmem [thread:$0]  (!%p2171_p8), %s145_s4, 16384, %s147_s30, %s135_s6, %s2096_s19, %s2097_s21, %s2098_s23  }
  0x1c   : > { %p154_p4 = scmp.lt.s32.totalorder %s2094_s15, 3 }
  0x1e   : > { %p155_p5 = pnand %p1335_p3, %p154_p4 }
  0x1f   : > { %s160_s24 = sand.u32 (!%p155_p5), 1, %s2086_s13  }
  0x20   : > { %158 = sbr.rel (%p155_p5) target bundleno = 422 (0x1a6), region = 32  ;;  %s1336_s25 = sshll.u32 (!%p155_p5), %s160_s24, 10 }
  0x21   : > { %s161_s26 = scalar_lea.sflag (!%p155_p5), [#allocation3], %s160_s24  ;;  %s2188_s27 = scalar_lea.vmem (!%p155_p5), [#allocation2], %s1336_s25 }
  0x25   : > { %2077 = dma.done.wait (%p2160_p7), %s161_s26, 16384  }
  0x26   : > { %2079 = vsyncadd (%p2160_p7), %s161_s26, 4294950912  ;;  %v2197_v0 = vld [vmem:[%s2522_s0] sm:$0xff]  ;;  %v1453_v1 = vld [vmem:[%s2188_s27 + $0xe0] sm:$0xf]  ;;  %vm207_vm0 = vcmask 1041408   ;;  %vm253_vm3 = vcmask 1045508  }
  0x27   : > { %v1884_v2 = vld [vmem:[%s2188_s27 + $0xec] sm:$0xf0]  ;;  %v196_v3 = vmul.f32 %v2197_v0, %v2197_v0  ;;  %v1581_v5 = vld [vmem:[%s2188_s27 + $0x1e0] sm:$0xf]  ;;  %vm255_vm6 = vcmask 1043456   ;;  %s1337_s4 = sshll.u32 %s1328_s16, 2 }
  0x28   : > { %v1454_v4 = vor.u32 %v1884_v2, %v1453_v1  ;;  %v1916_v6 = vld [vmem:[%s2188_s27 + $0x1ec] sm:$0xf0]  ;;  %v1709_v7 = vld [vmem:[%s2188_s27 + $0x2e0] sm:$0xf]  ;;  %p190_p6 = scmp.lt.s32.totalorder %s1337_s4, 7 }
  0x29   : > { %v1582_v8 = vor.u32 %v1916_v6, %v1581_v5  ;;  %v1948_v9 = vld [vmem:[%s2188_s27 + $0x2ec] sm:$0xf0]  ;;  %v1837_v10 = vld [vmem:[%s2188_s27 + $0x3e0] sm:$0xf]  ;;  %198 = vst [vmem:[#allocation1] ss:$4 sm:$0xff] %v196_v3 }
  0x2a   : > { %v1980_v11 = vld [vmem:[%s2188_s27 + $0x3ec] sm:$0xf0]  ;;  %1041 = vmatpush.bf16.msra.mxu0 %v1454_v4  ;;  %v1710_v12 = vor.u32 %v1948_v9, %v1709_v7  ;;  %v1437_v14 = vld [vmem:[%s2188_s27 + $0xc0] sm:$0xf]  ;;  %s2534_s4 = smov (!%p190_p6, %s1337_s4), 7 }
  0x2b   : > { %v1838_v13 = vor.u32 %v1980_v11, %v1837_v10  ;;  %v1880_v15 = vld [vmem:[%s2188_s27 + $0xcc] sm:$0xf0]  ;;  %1054 = vmatpush.bf16.msra.mxu1 %v1582_v8  ;;  %v1565_v17 = vld [vmem:[%s2188_s27 + $0x1c0] sm:$0xf]  ;;  %s1338_s5 = sshll.u32 %s2534_s4, 1 }
  0x2c   : > { %v1438_v16 = vor.u32 %v1880_v15, %v1437_v14  ;;  %v1912_v18 = vld [vmem:[%s2188_s27 + $0x1cc] sm:$0xf0]  ;;  %v1693_v19 = vld [vmem:[%s2188_s27 + $0x2c0] sm:$0xf]  ;;  %1067 = vmatpush.bf16.msra.mxu2 %v1710_v12  ;;  %s193_s6 = scalar_lea.vmem %s2525_s3, %s1338_s5 }
  0x2d   : > { %1080 = vmatpush.bf16.msra.mxu3 %v1838_v13  ;;  %v1566_v20 = vor.u32 %v1912_v18, %v1565_v17  ;;  %v1944_v21 = vld [vmem:[%s2188_s27 + $0x2cc] sm:$0xf0]  ;;  %v1821_v22 = vld [vmem:[%s2188_s27 + $0x3c0] sm:$0xf] }
  0x2e   : > { %v1976_v23 = vld [vmem:[%s2188_s27 + $0x3cc] sm:$0xf0]  ;;  %v1694_v24 = vor.u32 %v1944_v21, %v1693_v19  ;;  %v1421_v26 = vld [vmem:[%s2188_s27 + $0xa0] sm:$0xf]  ;;  %1042 = vmatpush.bf16.msra.mxu0 %v1438_v16 }
  0x2f   : > { %v1822_v25 = vor.u32 %v1976_v23, %v1821_v22  ;;  %v1876_v27 = vld [vmem:[%s2188_s27 + $0xac] sm:$0xf0]  ;;  %v1549_v28 = vld [vmem:[%s2188_s27 + $0x1a0] sm:$0xf]  ;;  %1055 = vmatpush.bf16.msra.mxu1 %v1566_v20 }
  0x30   : > { %v1422_v29 = vor.u32 %v1876_v27, %v1421_v26  ;;  %v1908_v30 = vld [vmem:[%s2188_s27 + $0x1ac] sm:$0xf0]  ;;  %v1677_v31 = vld [vmem:[%s2188_s27 + $0x2a0] sm:$0xf]  ;;  %1068 = vmatpush.bf16.msra.mxu2 %v1694_v24 }
  0x31   : > { %v1940_v32 = vld [vmem:[%s2188_s27 + $0x2ac] sm:$0xf0]  ;;  %v1550_v33 = vor.u32 %v1908_v30, %v1549_v28  ;;  %v1805_v34 = vld [vmem:[%s2188_s27 + $0x3a0] sm:$0xf]  ;;  %1081 = vmatpush.bf16.msra.mxu3 %v1822_v25 }
  0x32   : > { %v1972_v35 = vld [vmem:[%s2188_s27 + $0x3ac] sm:$0xf0]  ;;  %v1405_v36 = vld [vmem:[%s2188_s27 + $0x80] sm:$0xf]  ;;  %v1678_v37 = vor.u32 %v1940_v32, %v1677_v31  ;;  %1043 = vmatpush.bf16.msra.mxu0 %v1422_v29 }
  0x33   : > { %v1806_v38 = vor.u32 %v1972_v35, %v1805_v34  ;;  %v1872_v39 = vld [vmem:[%s2188_s27 + $0x8c] sm:$0xf0]  ;;  %v1533_v40 = vld [vmem:[%s2188_s27 + $0x180] sm:$0xf]  ;;  %1056 = vmatpush.bf16.msra.mxu1 %v1550_v33  ;;  %v2099_v33 = vmov 512.0  }
  0x34   : > { %v1904_v41 = vld [vmem:[%s2188_s27 + $0x18c] sm:$0xf0]  ;;  %v199_v42 = vld.sshfl [vmem:[#allocation1] sm:$0xff pattern:$0x73625140]  ;;  %v1406_v46 = vor.u32 %v1872_v39, %v1405_v36  ;;  %1069 = vmatpush.bf16.msra.mxu2 %v1678_v37  ;;  %2026 = vrcp.f32 %v2099_v33 }
  0x35   : > { %v200_v43 = vld.sshfl [vmem:[#allocation1 + $0x8] sm:$0xff pattern:$0x73625140]  ;;  %v201_v44 = vld.sshfl [vmem:[#allocation1 + $0x10] sm:$0xff pattern:$0x73625140]  ;;  %v1534_v47 = vor.u32 %v1904_v41, %v1533_v40  ;;  %1082 = vmatpush.bf16.msra.mxu3 %v1806_v38 }
  0x36   : > { %v202_v45 = vld.sshfl [vmem:[#allocation1 + $0x18] sm:$0xff pattern:$0x73625140]  ;;  %v208_v48 = vsel %vm207_vm0, %v199_v42, 0.0  ;;  %v209_v49 = vsel %vm207_vm0, %v200_v43, 0.0  ;;  %v211_v50 = vsel %vm207_vm0, %v201_v44, 0.0  ;;  %1044 = vmatpush.bf16.msra.mxu0 %v1406_v46 }
  0x37   : > { %v213_v51 = vsel %vm207_vm0, %v202_v45, 0.0  ;;  %v1661_v52 = vld [vmem:[%s2188_s27 + $0x280] sm:$0xf]  ;;  %v210_v53 = vadd.f32 %v209_v49, %v208_v48  ;;  %v1936_v54 = vld [vmem:[%s2188_s27 + $0x28c] sm:$0xf0]  ;;  %1057 = vmatpush.bf16.msra.mxu1 %v1534_v47 }
  0x38   : > { %v1789_v55 = vld [vmem:[%s2188_s27 + $0x380] sm:$0xf]  ;;  %v1968_v56 = vld [vmem:[%s2188_s27 + $0x38c] sm:$0xf0]  ;;  %v1662_v57 = vor.u32 %v1936_v54, %v1661_v52  ;;  %v1882_v46 = vld [vmem:[%s2188_s27 + $0xe4] sm:$0xf] }
  0x39   : > { %v1790_v58 = vor.u32 %v1968_v56, %v1789_v55  ;;  %v1389_v59 = vld [vmem:[%s2188_s27 + $0x60] sm:$0xf]  ;;  %v1868_v60 = vld [vmem:[%s2188_s27 + $0x6c] sm:$0xf0]  ;;  %v212_v62 = vadd.f32 %v211_v50, %v210_v53  ;;  %v1455_v48 = vld [vmem:[%s2188_s27 + $0xf0] sm:$0xf0] }
  0x3a   : > { %v1517_v61 = vld [vmem:[%s2188_s27 + $0x160] sm:$0xf]  ;;  %v1390_v63 = vor.u32 %v1868_v60, %v1389_v59  ;;  %v1900_v1 = vld [vmem:[%s2188_s27 + $0x16c] sm:$0xf0]  ;;  %1070 = vmatpush.bf16.msra.mxu2 %v1662_v57  ;;  %v1914_v49 = vld [vmem:[%s2188_s27 + $0x1e4] sm:$0xf]  ;;  %v2276_v56 = vpop.eup %2026 }
  0x3b   : > { %v1645_v2 = vld [vmem:[%s2188_s27 + $0x260] sm:$0xf]  ;;  %v1932_v3 = vld [vmem:[%s2188_s27 + $0x26c] sm:$0xf0]  ;;  %v1518_v4 = vor.u32 %v1900_v1, %v1517_v61  ;;  %v214_v7 = vadd.f32 %v213_v51, %v212_v62  ;;  %1083 = vmatpush.bf16.msra.mxu3 %v1790_v58  ;;  %v1583_v50 = vld [vmem:[%s2188_s27 + $0x1f0] sm:$0xf0]  ;;  %v1458_v51 = vor.u32 %v1882_v46, %v1455_v48  ;;  %vm222_vm1 = vweird.f32 %v2276_v56 }
  0x3c   : > { %v1773_v5 = vld [vmem:[%s2188_s27 + $0x360] sm:$0xf]  ;;  %v1964_v6 = vld [vmem:[%s2188_s27 + $0x36c] sm:$0xf0]  ;;  %v1646_v8 = vor.u32 %v1932_v3, %v1645_v2  ;;  %1045 = vmatpush.bf16.msra.mxu0 %v1390_v63  ;;  %v1586_v52 = vor.u32 %v1914_v49, %v1583_v50  ;;  %v1946_v53 = vld [vmem:[%s2188_s27 + $0x2e4] sm:$0xf] }
  0x3d   : > { %v1774_v9 = vor.u32 %v1964_v6, %v1773_v5  ;;  %215 = vadd.xlane.f32.xlu0 %v214_v7  ;;  %1058 = vmatpush.bf16.msra.mxu1 %v1518_v4  ;;  %v1373_v10 = vld [vmem:[%s2188_s27 + $0x40] sm:$0xf]  ;;  %v1864_v11 = vld [vmem:[%s2188_s27 + $0x4c] sm:$0xf0]  ;;  %v1711_v54 = vld [vmem:[%s2188_s27 + $0x2f0] sm:$0xf0] }
  0x3e   : > { %1071 = vmatpush.bf16.msra.mxu2 %v1646_v8  ;;  %v1501_v12 = vld [vmem:[%s2188_s27 + $0x140] sm:$0xf]  ;;  %v1374_v13 = vor.u32 %v1864_v11, %v1373_v10  ;;  %v1896_v14 = vld [vmem:[%s2188_s27 + $0x14c] sm:$0xf0]  ;;  %v1978_v55 = vld [vmem:[%s2188_s27 + $0x3e4] sm:$0xf]  ;;  %v1714_v57 = vor.u32 %v1946_v53, %v1711_v54 }
  0x3f   : > { %1084 = vmatpush.bf16.msra.mxu3 %v1774_v9  ;;  %v1629_v15 = vld [vmem:[%s2188_s27 + $0x240] sm:$0xf]  ;;  %v1928_v16 = vld [vmem:[%s2188_s27 + $0x24c] sm:$0xf0]  ;;  %v1502_v17 = vor.u32 %v1896_v14, %v1501_v12  ;;  %v1839_v58 = vld [vmem:[%s2188_s27 + $0x3f0] sm:$0xf0] }
  0x40   : > { %v1630_v18 = vor.u32 %v1928_v16, %v1629_v15  ;;  %v1757_v19 = vld [vmem:[%s2188_s27 + $0x340] sm:$0xf]  ;;  %v1960_v20 = vld [vmem:[%s2188_s27 + $0x34c] sm:$0xf0]  ;;  %1046 = vmatpush.bf16.msra.mxu0 %v1374_v13  ;;  %v1878_v59 = vld [vmem:[%s2188_s27 + $0xc4] sm:$0xf]  ;;  %v1842_v61 = vor.u32 %v1978_v55, %v1839_v58 }
  0x41   : > { %v1758_v21 = vor.u32 %v1960_v20, %v1757_v19  ;;  %1059 = vmatpush.bf16.msra.mxu1 %v1502_v17  ;;  %v1357_v22 = vld [vmem:[%s2188_s27 + $0x20] sm:$0xf]  ;;  %v1860_v23 = vld [vmem:[%s2188_s27 + $0x2c] sm:$0xf0]  ;;  %v1439_v60 = vld [vmem:[%s2188_s27 + $0xd0] sm:$0xf0] }
  0x42   : > { %1072 = vmatpush.bf16.msra.mxu2 %v1630_v18  ;;  %v1485_v24 = vld [vmem:[%s2188_s27 + $0x120] sm:$0xf]  ;;  %v1358_v25 = vor.u32 %v1860_v23, %v1357_v22  ;;  %v1892_v26 = vld [vmem:[%s2188_s27 + $0x12c] sm:$0xf0]  ;;  %v1442_v62 = vor.u32 %v1878_v59, %v1439_v60  ;;  %v1910_v63 = vld [vmem:[%s2188_s27 + $0x1c4] sm:$0xf] }
  0x43   : > { %1085 = vmatpush.bf16.msra.mxu3 %v1758_v21  ;;  %v1613_v27 = vld [vmem:[%s2188_s27 + $0x220] sm:$0xf]  ;;  %v1924_v28 = vld [vmem:[%s2188_s27 + $0x22c] sm:$0xf0]  ;;  %v1486_v29 = vor.u32 %v1892_v26, %v1485_v24  ;;  %v1567_v1 = vld [vmem:[%s2188_s27 + $0x1d0] sm:$0xf0] }
  0x44   : > { %v1614_v30 = vor.u32 %v1924_v28, %v1613_v27  ;;  %v1741_v31 = vld [vmem:[%s2188_s27 + $0x320] sm:$0xf]  ;;  %v1956_v32 = vld [vmem:[%s2188_s27 + $0x32c] sm:$0xf0]  ;;  %1047 = vmatpush.bf16.msra.mxu0 %v1358_v25  ;;  %v1942_v2 = vld [vmem:[%s2188_s27 + $0x2c4] sm:$0xf]  ;;  %v1570_v3 = vor.u32 %v1910_v63, %v1567_v1 }
  0x45   : > { %v1742_v34 = vor.u32 %v1956_v32, %v1741_v31  ;;  %1060 = vmatpush.bf16.msra.mxu1 %v1486_v29  ;;  %v1341_v35 = vld [vmem:[%s2188_s27] sm:$0xf]  ;;  %v1856_v36 = vld [vmem:[%s2188_s27 + $0xc] sm:$0xf0]  ;;  %v1695_v4 = vld [vmem:[%s2188_s27 + $0x2d0] sm:$0xf0] }
  0x46   : > { %1073 = vmatpush.bf16.msra.mxu2 %v1614_v30  ;;  %v1469_v37 = vld [vmem:[%s2188_s27 + $0x100] sm:$0xf]  ;;  %v1342_v38 = vor.u32 %v1856_v36, %v1341_v35  ;;  %v1888_v39 = vld [vmem:[%s2188_s27 + $0x10c] sm:$0xf0]  ;;  %v1974_v5 = vld [vmem:[%s2188_s27 + $0x3c4] sm:$0xf]  ;;  %v1698_v8 = vor.u32 %v1942_v2, %v1695_v4 }
  0x47   : > { %1086 = vmatpush.bf16.msra.mxu3 %v1742_v34  ;;  %v1597_v40 = vld [vmem:[%s2188_s27 + $0x200] sm:$0xf]  ;;  %v1920_v41 = vld [vmem:[%s2188_s27 + $0x20c] sm:$0xf0]  ;;  %v1470_v42 = vor.u32 %v1888_v39, %v1469_v37  ;;  %v1823_v6 = vld [vmem:[%s2188_s27 + $0x3d0] sm:$0xf0] }
  0x48   : > { %v1598_v43 = vor.u32 %v1920_v41, %v1597_v40  ;;  %v1725_v44 = vld [vmem:[%s2188_s27 + $0x300] sm:$0xf]  ;;  %v1952_v45 = vld [vmem:[%s2188_s27 + $0x30c] sm:$0xf0]  ;;  %1048 = vmatpush.bf16.msra.mxu0 %v1342_v38  ;;  %v218_v7 = vmul.f32 512.0, %v2276_v56  ;;  %v1826_v9 = vor.u32 %v1974_v5, %v1823_v6 }
  0x49   : > { %v1726_v47 = vor.u32 %v1952_v45, %v1725_v44  ;;  %1061 = vmatpush.bf16.msra.mxu1 %v1470_v42  ;;  %v1874_v10 = vld [vmem:[%s2188_s27 + $0xa4] sm:$0xf]  ;;  %v1423_v11 = vld [vmem:[%s2188_s27 + $0xb0] sm:$0xf0] }
  0x4a   : > { %1074 = vmatpush.bf16.msra.mxu2 %v1598_v43  ;;  %v1906_v12 = vld [vmem:[%s2188_s27 + $0x1a4] sm:$0xf]  ;;  %v1426_v13 = vor.u32 %v1874_v10, %v1423_v11  ;;  %v1551_v14 = vld [vmem:[%s2188_s27 + $0x1b0] sm:$0xf0]  ;;  %v219_v21 = vsub.f32 1.0, %v218_v7 }
  0x4b   : > { %1087 = vmatpush.bf16.msra.mxu3 %v1726_v47  ;;  %v1938_v15 = vld [vmem:[%s2188_s27 + $0x2a4] sm:$0xf]  ;;  %v1679_v16 = vld [vmem:[%s2188_s27 + $0x2b0] sm:$0xf0]  ;;  %v1554_v17 = vor.u32 %v1906_v12, %v1551_v14 }
  0x4c   : > { %1093 = vmatpush.bf16.msrb.mxu0 %v1458_v51  ;;  %v1682_v18 = vor.u32 %v1938_v15, %v1679_v16  ;;  %v1970_v19 = vld [vmem:[%s2188_s27 + $0x3a4] sm:$0xf]  ;;  %v1807_v20 = vld [vmem:[%s2188_s27 + $0x3b0] sm:$0xf0]  ;;  %v220_v30 = vmul.f32 %v2276_v56, %v219_v21 }
  0x4d   : > { %1106 = vmatpush.bf16.msrb.mxu1 %v1586_v52  ;;  %v1810_v22 = vor.u32 %v1970_v19, %v1807_v20  ;;  %v1870_v23 = vld [vmem:[%s2188_s27 + $0x84] sm:$0xf]  ;;  %v1407_v24 = vld [vmem:[%s2188_s27 + $0x90] sm:$0xf0] }
  0x4e   : > { %1119 = vmatpush.bf16.msrb.mxu2 %v1714_v57  ;;  %v1902_v25 = vld [vmem:[%s2188_s27 + $0x184] sm:$0xf]  ;;  %v1410_v26 = vor.u32 %v1870_v23, %v1407_v24  ;;  %v1535_v27 = vld [vmem:[%s2188_s27 + $0x190] sm:$0xf0]  ;;  %v221_v42 = vadd.f32 %v2276_v56, %v220_v30 }
  0x4f   : > { %1132 = vmatpush.bf16.msrb.mxu3 %v1842_v61  ;;  %v1934_v28 = vld [vmem:[%s2188_s27 + $0x284] sm:$0xf]  ;;  %v1663_v29 = vld [vmem:[%s2188_s27 + $0x290] sm:$0xf0]  ;;  %v1538_v31 = vor.u32 %v1902_v25, %v1535_v27 }
  0x50   : > { %1094 = vmatpush.bf16.msrb.mxu0 %v1442_v62  ;;  %v1666_v32 = vor.u32 %v1934_v28, %v1663_v29  ;;  %v1966_v33 = vld [vmem:[%s2188_s27 + $0x384] sm:$0xf]  ;;  %v1791_v34 = vld [vmem:[%s2188_s27 + $0x390] sm:$0xf0]  ;;  %v223_v62 = vsel %vm222_vm1, %v2276_v56, %v221_v42 }
  0x51   : > { %1107 = vmatpush.bf16.msrb.mxu1 %v1570_v3  ;;  %v1866_v35 = vld [vmem:[%s2188_s27 + $0x64] sm:$0xf]  ;;  %v1794_v36 = vor.u32 %v1966_v33, %v1791_v34  ;;  %v1391_v37 = vld [vmem:[%s2188_s27 + $0x70] sm:$0xf0]  ;;  %v2100_v33 = vmov 269488144  }
  0x52   : > { %1120 = vmatpush.bf16.msrb.mxu2 %v1698_v8  ;;  %v1898_v38 = vld [vmem:[%s2188_s27 + $0x164] sm:$0xf]  ;;  %v1394_v39 = vor.u32 %v1866_v35, %v1391_v37  ;;  %v1519_v40 = vld [vmem:[%s2188_s27 + $0x170] sm:$0xf0]  ;;  %v238_v34 = vunpack.c.l.s4 %v2100_v33  ;;  %v1905_v33 = vld [vmem:[%s2188_s27 + $0x194] sm:$0xf0] }
  0x53   : > { %1133 = vmatpush.bf16.msrb.mxu3 %v1826_v9  ;;  %v1930_v41 = vld [vmem:[%s2188_s27 + $0x264] sm:$0xf]  ;;  %v1522_v43 = vor.u32 %v1898_v38, %v1519_v40  ;;  %v1647_v44 = vld [vmem:[%s2188_s27 + $0x270] sm:$0xf0] }
  0x54   : > { %1095 = vmatpush.bf16.msrb.mxu0 %v1426_v13  ;;  %v1962_v45 = vld [vmem:[%s2188_s27 + $0x364] sm:$0xf]  ;;  %v1775_v46 = vld [vmem:[%s2188_s27 + $0x370] sm:$0xf0]  ;;  %v1650_v47 = vor.u32 %v1930_v41, %v1647_v44  ;;  %v239_v41 = vunpack.c.0.s8 %v238_v34  ;;  %v1669_v34 = vld [vmem:[%s2188_s27 + $0x288] sm:$0xf] }
  0x55   : > { %1108 = vmatpush.bf16.msrb.mxu1 %v1554_v17  ;;  %v1778_v48 = vor.u32 %v1962_v45, %v1775_v46  ;;  %v1862_v49 = vld [vmem:[%s2188_s27 + $0x44] sm:$0xf]  ;;  %v1375_v50 = vld [vmem:[%s2188_s27 + $0x50] sm:$0xf0] }
  0x56   : > { %1121 = vmatpush.bf16.msrb.mxu2 %v1682_v18  ;;  %v1894_v51 = vld [vmem:[%s2188_s27 + $0x144] sm:$0xf]  ;;  %v1378_v52 = vor.u32 %v1862_v49, %v1375_v50  ;;  %v1503_v53 = vld [vmem:[%s2188_s27 + $0x150] sm:$0xf0]  ;;  %v1461_v50 = vld [vmem:[%s2188_s27 + $0xe8] sm:$0xf] }
  0x57   : > { %1134 = vmatpush.bf16.msrb.mxu3 %v1810_v22  ;;  %v1926_v54 = vld [vmem:[%s2188_s27 + $0x244] sm:$0xf]  ;;  %v1631_v55 = vld [vmem:[%s2188_s27 + $0x250] sm:$0xf0]  ;;  %v1506_v57 = vor.u32 %v1894_v51, %v1503_v53  ;;  %v1885_v51 = vld [vmem:[%s2188_s27 + $0xf4] sm:$0xf0] }
  0x58   : > { %1096 = vmatpush.bf16.msrb.mxu0 %v1410_v26  ;;  %v1634_v58 = vor.u32 %v1926_v54, %v1631_v55  ;;  %v1958_v59 = vld [vmem:[%s2188_s27 + $0x344] sm:$0xf]  ;;  %v1759_v60 = vld [vmem:[%s2188_s27 + $0x350] sm:$0xf0]  ;;  %v243_v26 = vld [vmem:[%s2523_s1] sm:$0xf] }
  0x59   : > { %1109 = vmatpush.bf16.msrb.mxu1 %v1538_v31  ;;  %v1858_v61 = vld [vmem:[%s2188_s27 + $0x24] sm:$0xf]  ;;  %v1762_v63 = vor.u32 %v1958_v59, %v1759_v60  ;;  %v1359_v1 = vld [vmem:[%s2188_s27 + $0x30] sm:$0xf0]  ;;  %v246_v29 = vperm.slane %v243_v26, 1  ;;  %v247_v30 = vperm.slane %v243_v26, 2 }
  0x5a   : > { %1122 = vmatpush.bf16.msrb.mxu2 %v1666_v32  ;;  %v1890_v2 = vld [vmem:[%s2188_s27 + $0x124] sm:$0xf]  ;;  %v1487_v3 = vld [vmem:[%s2188_s27 + $0x130] sm:$0xf0]  ;;  %v1362_v8 = vor.u32 %v1858_v61, %v1359_v1  ;;  %v248_v31 = vperm.slane %v243_v26, 3 }
  0x5b   : > { %1135 = vmatpush.bf16.msrb.mxu3 %v1794_v36  ;;  %v1922_v4 = vld [vmem:[%s2188_s27 + $0x224] sm:$0xf]  ;;  %v1615_v5 = vld [vmem:[%s2188_s27 + $0x230] sm:$0xf0]  ;;  %v1490_v56 = vor.u32 %v1890_v2, %v1487_v3  ;;  %v245_v36 = vperm.slane %v243_v26, 0  ;;  %v249_v37 = vrot.slane %v246_v29, 6  ;;  %v1462_v3 = vor.u32 %v1885_v51, %v1461_v50 }
  0x5c   : > { %1097 = vmatpush.bf16.msrb.mxu0 %v1394_v39  ;;  %v1954_v6 = vld [vmem:[%s2188_s27 + $0x324] sm:$0xf]  ;;  %v1743_v9 = vld [vmem:[%s2188_s27 + $0x330] sm:$0xf0]  ;;  %v1618_v12 = vor.u32 %v1922_v4, %v1615_v5  ;;  %v250_v38 = vrot.slane %v247_v30, 4  ;;  %v251_v39 = vrot.slane %v248_v31, 2 }
  0x5d   : > { %1110 = vmatpush.bf16.msrb.mxu1 %v1522_v43  ;;  %v1854_v10 = vld [vmem:[%s2188_s27 + $0x4] sm:$0xf]  ;;  %v1343_v13 = vld [vmem:[%s2188_s27 + $0x10] sm:$0xf0]  ;;  %v1746_v16 = vor.u32 %v1954_v6, %v1743_v9  ;;  %v252_v43 = vsel %vm207_vm0, %v245_v36, %v249_v37  ;;  %v1917_v53 = vld [vmem:[%s2188_s27 + $0x1f4] sm:$0xf0] }
  0x5e   : > { %1123 = vmatpush.bf16.msrb.mxu2 %v1650_v47  ;;  %v1886_v14 = vld [vmem:[%s2188_s27 + $0x104] sm:$0xf]  ;;  %v1471_v15 = vld [vmem:[%s2188_s27 + $0x110] sm:$0xf0]  ;;  %v1346_v22 = vor.u32 %v1854_v10, %v1343_v13  ;;  %v254_v44 = vsel %vm253_vm3, %v250_v38, %v251_v39  ;;  %v1717_v54 = vld [vmem:[%s2188_s27 + $0x2e8] sm:$0xf] }
  0x5f   : > { %1136 = vmatpush.bf16.msrb.mxu3 %v1778_v48  ;;  %v1918_v17 = vld [vmem:[%s2188_s27 + $0x204] sm:$0xf]  ;;  %v1599_v18 = vld [vmem:[%s2188_s27 + $0x210] sm:$0xf0]  ;;  %v1474_v23 = vor.u32 %v1886_v14, %v1471_v15  ;;  %v256_v47 = vsel %vm255_vm6, %v252_v43, %v254_v44  ;;  %v1949_v55 = vld [vmem:[%s2188_s27 + $0x2f4] sm:$0xf0] }
  0x60   : > { %1098 = vmatpush.bf16.msrb.mxu0 %v1378_v52  ;;  %v1950_v20 = vld [vmem:[%s2188_s27 + $0x304] sm:$0xf]  ;;  %v1727_v21 = vld [vmem:[%s2188_s27 + $0x310] sm:$0xf0]  ;;  %v1602_v24 = vor.u32 %v1918_v17, %v1599_v18  ;;  %v1589_v52 = vld [vmem:[%s2188_s27 + $0x1e8] sm:$0xf] }
  0x61   : > { %1111 = vmatpush.bf16.msrb.mxu1 %v1506_v57  ;;  %v1730_v25 = vor.u32 %v1950_v20, %v1727_v21  ;;  %v1845_v57 = vld [vmem:[%s2188_s27 + $0x3e8] sm:$0xf]  ;;  %v1590_v4 = vor.u32 %v1917_v53, %v1589_v52  ;;  %v1913_v9 = vld [vmem:[%s2188_s27 + $0x1d4] sm:$0xf0] }
  0x62   : > { %1124 = vmatpush.bf16.msrb.mxu2 %v1634_v58  ;;  %v1981_v58 = vld [vmem:[%s2188_s27 + $0x3f4] sm:$0xf0]  ;;  %v1445_v61 = vld [vmem:[%s2188_s27 + $0xc8] sm:$0xf] }
  0x63   : > { %1137 = vmatpush.bf16.msrb.mxu3 %v1762_v63  ;;  %v1701_v10 = vld [vmem:[%s2188_s27 + $0x2c8] sm:$0xf]  ;;  %v1977_v13 = vld [vmem:[%s2188_s27 + $0x3d4] sm:$0xf0] }
  0x64   : > { %1099 = vmatpush.bf16.msrb.mxu0 %v1362_v8  ;;  %v1846_v8 = vor.u32 %v1981_v58, %v1845_v57  ;;  %v1877_v17 = vld [vmem:[%s2188_s27 + $0xb4] sm:$0xf0]  ;;  %v1557_v20 = vld [vmem:[%s2188_s27 + $0x1a8] sm:$0xf] }
  0x65   : > { %1112 = vmatpush.bf16.msrb.mxu1 %v1490_v56  ;;  %v1573_v56 = vld [vmem:[%s2188_s27 + $0x1c8] sm:$0xf]  ;;  %v1909_v21 = vld [vmem:[%s2188_s27 + $0x1b4] sm:$0xf0] }
  0x66   : > { %1125 = vmatpush.bf16.msrb.mxu2 %v1618_v12  ;;  %v1829_v12 = vld [vmem:[%s2188_s27 + $0x3c8] sm:$0xf]  ;;  %v1574_v15 = vor.u32 %v1913_v9, %v1573_v56  ;;  %v1873_v29 = vld [vmem:[%s2188_s27 + $0x94] sm:$0xf0] }
  0x67   : > { %1138 = vmatpush.bf16.msrb.mxu3 %v1746_v16  ;;  %v1429_v16 = vld [vmem:[%s2188_s27 + $0xa8] sm:$0xf]  ;;  %v1969_v37 = vld [vmem:[%s2188_s27 + $0x394] sm:$0xf0] }
  0x68   : > { %1100 = vmatpush.bf16.msrb.mxu0 %v1346_v22  ;;  %v1685_v22 = vld [vmem:[%s2188_s27 + $0x2a8] sm:$0xf]  ;;  %v1430_v26 = vor.u32 %v1877_v17, %v1429_v16  ;;  %v1865_v53 = vld [vmem:[%s2188_s27 + $0x54] sm:$0xf0] }
  0x69   : > { %1113 = vmatpush.bf16.msrb.mxu1 %v1474_v23  ;;  %v1941_v23 = vld [vmem:[%s2188_s27 + $0x2b4] sm:$0xf0]  ;;  %v1797_v36 = vld [vmem:[%s2188_s27 + $0x388] sm:$0xf] }
  0x6a   : > { %1126 = vmatpush.bf16.msrb.mxu2 %v1602_v24  ;;  %v1813_v24 = vld [vmem:[%s2188_s27 + $0x3a8] sm:$0xf]  ;;  %v1686_v30 = vor.u32 %v1941_v23, %v1685_v22  ;;  %v1798_v43 = vor.u32 %v1969_v37, %v1797_v36  ;;  %v1897_v58 = vld [vmem:[%s2188_s27 + $0x154] sm:$0xf0] }
  0x6b   : > { %1139 = vmatpush.bf16.msrb.mxu3 %v1730_v25  ;;  %v1973_v25 = vld [vmem:[%s2188_s27 + $0x3b4] sm:$0xf0]  ;;  %v1525_v44 = vld [vmem:[%s2188_s27 + $0x168] sm:$0xf] }
  0x6c   : > { %v1814_v31 = vor.u32 %v1973_v25, %v1813_v24  ;;  %v1381_v52 = vld [vmem:[%s2188_s27 + $0x48] sm:$0xf]  ;;  %v1893_v9 = vld [vmem:[%s2188_s27 + $0x134] sm:$0xf0] }
  0x6d   : > { %v1509_v57 = vld [vmem:[%s2188_s27 + $0x148] sm:$0xf]  ;;  %v1857_v17 = vld [vmem:[%s2188_s27 + $0x14] sm:$0xf0] }
  0x6e   : > { %v1493_v56 = vld [vmem:[%s2188_s27 + $0x128] sm:$0xf]  ;;  %v1921_v23 = vld [vmem:[%s2188_s27 + $0x214] sm:$0xf0] }
  0x6f   : > { %v1494_v16 = vor.u32 %v1893_v9, %v1493_v56  ;;  %v1605_v22 = vld [vmem:[%s2188_s27 + $0x208] sm:$0xf]  ;;  %v1953_v25 = vld [vmem:[%s2188_s27 + $0x314] sm:$0xf0]  ;;  %v1903_v56 = vld [vmem:[%s2188_s27 + $0x18c] sm:$0xf] }
  0x70   : > { %v1733_v24 = vld [vmem:[%s2188_s27 + $0x308] sm:$0xf]  ;;  %v1606_v36 = vor.u32 %v1921_v23, %v1605_v22  ;;  %v1543_v9 = vld [vmem:[%s2188_s27 + $0x198] sm:$0xf0]  ;;  %v1931_v22 = vld [vmem:[%s2188_s27 + $0x26c] sm:$0xf] }
  0x71   : > { %v1734_v37 = vor.u32 %v1953_v25, %v1733_v24  ;;  %v1655_v23 = vld [vmem:[%s2188_s27 + $0x278] sm:$0xf0]  ;;  %v1963_v24 = vld [vmem:[%s2188_s27 + $0x36c] sm:$0xf] }
  0x72   : > { %v1783_v25 = vld [vmem:[%s2188_s27 + $0x378] sm:$0xf0] }
  0xb0   : > { %v216_v7 = vpop.xlane.xlu0 %215 }
  0xb1   : > { %v224_v11 = vmul.f32 %v223_v62, %v216_v7  ;;  %v1881_v62 = vld [vmem:[%s2188_s27 + $0xd4] sm:$0xf0]  ;;  %v1718_v7 = vor.u32 %v1949_v55, %v1717_v54 }
  0xb2   : > { %v1446_v14 = vor.u32 %v1881_v62, %v1445_v61  ;;  %v1765_v61 = vld [vmem:[%s2188_s27 + $0x348] sm:$0xf]  ;;  %v1961_v62 = vld [vmem:[%s2188_s27 + $0x354] sm:$0xf0] }
  0xb3   : > { %v225_v19 = vadd.f32 1e-05, %v224_v11  ;;  %v1945_v11 = vld [vmem:[%s2188_s27 + $0x2d4] sm:$0xf0] }
  0xb4   : > { %v1702_v18 = vor.u32 %v1945_v11, %v1701_v10  ;;  %v1621_v10 = vld [vmem:[%s2188_s27 + $0x228] sm:$0xf]  ;;  %v1925_v11 = vld [vmem:[%s2188_s27 + $0x234] sm:$0xf0] }
  0xb5   : > { %2028 = vrsqrt.f32 %v225_v19  ;;  %vm232_vm4 = vweird.f32 %v225_v19 }
  0xbb   : > { %v2029_v27 = vpop.eup %2028 }
  0xbc   : > { %v227_v28 = vmul.f32 %v2029_v27, %v225_v19  ;;  %vm233_vm2 = vweird.f32 %v2029_v27  ;;  %v1830_v19 = vor.u32 %v1977_v13, %v1829_v12  ;;  %v1749_v12 = vld [vmem:[%s2188_s27 + $0x328] sm:$0xf]  ;;  %v1957_v13 = vld [vmem:[%s2188_s27 + $0x334] sm:$0xf0] }
  0xbd   : > { %vm234_vm5 = vmor %vm232_vm4, %vm233_vm2 }
  0xbe   : > { %v228_v32 = vmul.f32 %v2029_v27, %v227_v28  ;;  %v1413_v28 = vld [vmem:[%s2188_s27 + $0x88] sm:$0xf] }
  0xbf   : > { %v1414_v38 = vor.u32 %v1873_v29, %v1413_v28  ;;  %v1915_v28 = vld [vmem:[%s2188_s27 + $0x1ec] sm:$0xf]  ;;  %v1591_v29 = vld [vmem:[%s2188_s27 + $0x1f8] sm:$0xf0] }
  0xc0   : > { %v229_v35 = vmul.f32 0.5, %v228_v32  ;;  %v1541_v32 = vld [vmem:[%s2188_s27 + $0x188] sm:$0xf] }
  0xc1   : > { %v1542_v39 = vor.u32 %v1905_v33, %v1541_v32  ;;  %v1719_v33 = vld [vmem:[%s2188_s27 + $0x2f8] sm:$0xf0] }
  0xc2   : > { %v230_v40 = vsub.f32 1.5, %v229_v35  ;;  %v1937_v35 = vld [vmem:[%s2188_s27 + $0x294] sm:$0xf0] }
  0xc4   : > { %v231_v42 = vmul.f32 %v2029_v27, %v230_v40  ;;  %v1397_v40 = vld [vmem:[%s2188_s27 + $0x68] sm:$0xf] }
  0xc6   : > { %v235_v45 = vsel %vm234_vm5, %v2029_v27, %v231_v42  ;;  %v1558_v27 = vor.u32 %v1909_v21, %v1557_v20  ;;  %v1670_v42 = vor.u32 %v1937_v35, %v1669_v34  ;;  %v1622_v20 = vor.u32 %v1925_v11, %v1621_v10  ;;  %v1979_v34 = vld [vmem:[%s2188_s27 + $0x3ec] sm:$0xf]  ;;  %v1847_v35 = vld [vmem:[%s2188_s27 + $0x3f8] sm:$0xf0] }
  0xc7   : > { %v240_v46 = vperm.slane %v235_v45, %v239_v41  ;;  %v1869_v41 = vld [vmem:[%s2188_s27 + $0x74] sm:$0xf0]  ;;  %v1750_v21 = vor.u32 %v1957_v13, %v1749_v12  ;;  %v1935_v10 = vld [vmem:[%s2188_s27 + $0x28c] sm:$0xf]  ;;  %v1671_v11 = vld [vmem:[%s2188_s27 + $0x298] sm:$0xf0] }
  0xc8   : > { %v1901_v45 = vld [vmem:[%s2188_s27 + $0x174] sm:$0xf0]  ;;  %v1398_v50 = vor.u32 %v1869_v41, %v1397_v40  ;;  %v1879_v40 = vld [vmem:[%s2188_s27 + $0xcc] sm:$0xf]  ;;  %v1447_v41 = vld [vmem:[%s2188_s27 + $0xd8] sm:$0xf0] }
  0xc9   : > { %v242_v48 = vmul.f32 %v240_v46, %v2197_v0  ;;  %v1653_v46 = vld [vmem:[%s2188_s27 + $0x268] sm:$0xf]  ;;  %v1526_v51 = vor.u32 %v1901_v45, %v1525_v44  ;;  %v1911_v44 = vld [vmem:[%s2188_s27 + $0x1cc] sm:$0xf]  ;;  %v1575_v45 = vld [vmem:[%s2188_s27 + $0x1d8] sm:$0xf0] }
  0xca   : > { %v1967_v12 = vld [vmem:[%s2188_s27 + $0x38c] sm:$0xf]  ;;  %v1799_v13 = vld [vmem:[%s2188_s27 + $0x398] sm:$0xf0] }
  0xcb   : > { %v258_v49 = vmul.f32 %v256_v47, %v242_v48  ;;  %v1933_v47 = vld [vmem:[%s2188_s27 + $0x274] sm:$0xf0]  ;;  %v1781_v48 = vld [vmem:[%s2188_s27 + $0x368] sm:$0xf] }
  0xcc   : > { %v1654_v54 = vor.u32 %v1933_v47, %v1653_v46  ;;  %v1943_v46 = vld [vmem:[%s2188_s27 + $0x2cc] sm:$0xf]  ;;  %v1703_v47 = vld [vmem:[%s2188_s27 + $0x2d8] sm:$0xf0] }
  0xcd   : > { %260 = vst [vmem:[#allocation1] ss:$4 sm:$0xff] %v258_v49  ;;  %v1965_v49 = vld [vmem:[%s2188_s27 + $0x374] sm:$0xf0] }
  0xce   : > { %v1782_v55 = vor.u32 %v1965_v49, %v1781_v48  ;;  %v1975_v48 = vld [vmem:[%s2188_s27 + $0x3cc] sm:$0xf]  ;;  %v1831_v49 = vld [vmem:[%s2188_s27 + $0x3d8] sm:$0xf0] }
  0xd4   : > { %v261_v59 = vld.sshfl [vmem:[#allocation1] sm:$0xff pattern:$0x73625140]  ;;  %v262_v60 = vld.sshfl [vmem:[#allocation1 + $0x8] sm:$0xff pattern:$0x73625140] }
  0xd5   : > { %v2359_v63 = vpack.c.bf16 %v261_v59, %v261_v59  ;;  %v2361_v0 = vpack.c.bf16 %v262_v60, %v262_v60  ;;  %v263_v1 = vld.sshfl [vmem:[#allocation1 + $0x10] sm:$0xff pattern:$0x73625140]  ;;  %v264_v2 = vld.sshfl [vmem:[#allocation1 + $0x18] sm:$0xff pattern:$0x73625140] }
  0xd6   : > { %v2363_v5 = vpack.c.bf16 %v263_v1, %v263_v1  ;;  %v2365_v6 = vpack.c.bf16 %v264_v2, %v264_v2  ;;  %v1637_v59 = vld [vmem:[%s2188_s27 + $0x248] sm:$0xf]  ;;  %v1929_v60 = vld [vmem:[%s2188_s27 + $0x254] sm:$0xf0]  ;;  %v1382_v1 = vor.u32 %v1865_v53, %v1381_v52  ;;  %v1510_v2 = vor.u32 %v1897_v58, %v1509_v57  ;;  %v1875_v52 = vld [vmem:[%s2188_s27 + $0xac] sm:$0xf] }
  0xd7   : > { %1049 = vmatmul.bf16.vlgmr.msra.gmra.mxu0 %v2359_v63  ;;  %1062 = vmatmul.bf16.vlgmr.msra.gmra.mxu1 %v2361_v0  ;;  %v1431_v53 = vld [vmem:[%s2188_s27 + $0xb8] sm:$0xf0]  ;;  %v1907_v57 = vld [vmem:[%s2188_s27 + $0x1ac] sm:$0xf] }
  0xd8   : > { %1075 = vmatmul.bf16.vlgmr.msra.gmra.mxu2 %v2363_v5  ;;  %1088 = vmatmul.bf16.vlgmr.msra.gmra.mxu3 %v2365_v6  ;;  %v1559_v58 = vld [vmem:[%s2188_s27 + $0x1b8] sm:$0xf0] }
  0xd9   : > { %1145 = vmatpush.bf16.msra.mxu0 %v1462_v3  ;;  %1158 = vmatpush.bf16.msra.mxu1 %v1590_v4  ;;  %v1365_v3 = vld [vmem:[%s2188_s27 + $0x28] sm:$0xf]  ;;  %v1861_v4 = vld [vmem:[%s2188_s27 + $0x34] sm:$0xf0] }
  0xda   : > { %1171 = vmatpush.bf16.msra.mxu2 %v1718_v7  ;;  %1184 = vmatpush.bf16.msra.mxu3 %v1846_v8  ;;  %v1638_v7 = vor.u32 %v1929_v60, %v1637_v59  ;;  %v1766_v8 = vor.u32 %v1961_v62, %v1765_v61  ;;  %v1939_v59 = vld [vmem:[%s2188_s27 + $0x2ac] sm:$0xf]  ;;  %v1687_v60 = vld [vmem:[%s2188_s27 + $0x2b8] sm:$0xf0] }
  0xdb   : > { %v1971_v61 = vld [vmem:[%s2188_s27 + $0x3ac] sm:$0xf]  ;;  %v1815_v62 = vld [vmem:[%s2188_s27 + $0x3b8] sm:$0xf0] }
  0xdd   : > { %1146 = vmatpush.bf16.msra.mxu0 %v1446_v14  ;;  %1159 = vmatpush.bf16.msra.mxu1 %v1574_v15  ;;  %v1349_v14 = vld [vmem:[%s2188_s27 + $0x8] sm:$0xf]  ;;  %v1366_v15 = vor.u32 %v1861_v4, %v1365_v3  ;;  %v1871_v3 = vld [vmem:[%s2188_s27 + $0x8c] sm:$0xf]  ;;  %v1415_v4 = vld [vmem:[%s2188_s27 + $0x98] sm:$0xf0] }
  0xde   : > { %1172 = vmatpush.bf16.msra.mxu2 %v1702_v18  ;;  %1185 = vmatpush.bf16.msra.mxu3 %v1830_v19  ;;  %v1477_v18 = vld [vmem:[%s2188_s27 + $0x108] sm:$0xf]  ;;  %v1889_v19 = vld [vmem:[%s2188_s27 + $0x114] sm:$0xf0] }
  0xdf   : > { %v1478_v32 = vor.u32 %v1889_v19, %v1477_v18  ;;  %v1674_v18 = vor.u32 %v1935_v10, %v1671_v11  ;;  %v1802_v19 = vor.u32 %v1967_v12, %v1799_v13 }
  0xe1   : > { %1147 = vmatpush.bf16.msra.mxu0 %v1430_v26  ;;  %1160 = vmatpush.bf16.msra.mxu1 %v1558_v27  ;;  %v1883_v26 = vld [vmem:[%s2188_s27 + $0xec] sm:$0xf]  ;;  %v1463_v27 = vld [vmem:[%s2188_s27 + $0xf8] sm:$0xf0] }
  0xe2   : > { %1173 = vmatpush.bf16.msra.mxu2 %v1686_v30  ;;  %1186 = vmatpush.bf16.msra.mxu3 %v1814_v31  ;;  %v1947_v30 = vld [vmem:[%s2188_s27 + $0x2ec] sm:$0xf]  ;;  %v1350_v31 = vor.u32 %v1857_v17, %v1349_v14  ;;  %v1418_v14 = vor.u32 %v1871_v3, %v1415_v4  ;;  %v1399_v17 = vld [vmem:[%s2188_s27 + $0x78] sm:$0xf0] }
  0xe5   : > { %1148 = vmatpush.bf16.msra.mxu0 %v1414_v38  ;;  %1161 = vmatpush.bf16.msra.mxu1 %v1542_v39  ;;  %v1466_v38 = vor.u32 %v1883_v26, %v1463_v27  ;;  %v1594_v39 = vor.u32 %v1915_v28, %v1591_v29  ;;  %v1863_v28 = vld [vmem:[%s2188_s27 + $0x4c] sm:$0xf]  ;;  %v1383_v29 = vld [vmem:[%s2188_s27 + $0x58] sm:$0xf0] }
  0xe6   : > { %1174 = vmatpush.bf16.msra.mxu2 %v1670_v42  ;;  %1187 = vmatpush.bf16.msra.mxu3 %v1798_v43  ;;  %v1722_v42 = vor.u32 %v1947_v30, %v1719_v33  ;;  %v1850_v43 = vor.u32 %v1979_v34, %v1847_v35  ;;  %v1658_v30 = vor.u32 %v1931_v22, %v1655_v23  ;;  %v1511_v33 = vld [vmem:[%s2188_s27 + $0x158] sm:$0xf0]  ;;  %v1927_v34 = vld [vmem:[%s2188_s27 + $0x24c] sm:$0xf] }
  0xe7   : > { %1101 = vmatmul.bf16.vlgmr.msrb.gmra.mxu0 %v2359_v63  ;;  %1114 = vmatmul.bf16.vlgmr.msrb.gmra.mxu1 %v2361_v0  ;;  %v1639_v35 = vld [vmem:[%s2188_s27 + $0x258] sm:$0xf0] }
  0xe8   : > { %1127 = vmatmul.bf16.vlgmr.msrb.gmra.mxu2 %v2363_v5  ;;  %1140 = vmatmul.bf16.vlgmr.msrb.gmra.mxu3 %v2365_v6 }
  0xe9   : > { %1149 = vmatpush.bf16.msra.mxu0 %v1398_v50  ;;  %1162 = vmatpush.bf16.msra.mxu1 %v1526_v51  ;;  %v1450_v50 = vor.u32 %v1879_v40, %v1447_v41  ;;  %v1578_v51 = vor.u32 %v1911_v44, %v1575_v45  ;;  %v1859_v40 = vld [vmem:[%s2188_s27 + $0x2c] sm:$0xf]  ;;  %v1367_v41 = vld [vmem:[%s2188_s27 + $0x38] sm:$0xf0] }
  0xea   : > { %1175 = vmatpush.bf16.msra.mxu2 %v1654_v54  ;;  %1188 = vmatpush.bf16.msra.mxu3 %v1782_v55  ;;  %v1706_v54 = vor.u32 %v1943_v46, %v1703_v47  ;;  %v1834_v55 = vor.u32 %v1975_v48, %v1831_v49  ;;  %v1891_v44 = vld [vmem:[%s2188_s27 + $0x12c] sm:$0xf]  ;;  %v1495_v45 = vld [vmem:[%s2188_s27 + $0x138] sm:$0xf0] }
  0xeb   : > { %v1923_v46 = vld [vmem:[%s2188_s27 + $0x22c] sm:$0xf]  ;;  %v1623_v47 = vld [vmem:[%s2188_s27 + $0x238] sm:$0xf0] }
  0xec   : > { %v1955_v48 = vld [vmem:[%s2188_s27 + $0x32c] sm:$0xf]  ;;  %v1751_v49 = vld [vmem:[%s2188_s27 + $0x338] sm:$0xf0] }
  0xed   : > { %1150 = vmatpush.bf16.msra.mxu0 %v1382_v1  ;;  %1163 = vmatpush.bf16.msra.mxu1 %v1510_v2  ;;  %v1434_v1 = vor.u32 %v1875_v52, %v1431_v53  ;;  %v1562_v2 = vor.u32 %v1907_v57, %v1559_v58  ;;  %v1855_v52 = vld [vmem:[%s2188_s27 + $0xc] sm:$0xf]  ;;  %v1351_v53 = vld [vmem:[%s2188_s27 + $0x18] sm:$0xf0] }
  0xee   : > { %1176 = vmatpush.bf16.msra.mxu2 %v1638_v7  ;;  %1189 = vmatpush.bf16.msra.mxu3 %v1766_v8  ;;  %v1690_v7 = vor.u32 %v1939_v59, %v1687_v60  ;;  %v1818_v8 = vor.u32 %v1971_v61, %v1815_v62  ;;  %v1887_v57 = vld [vmem:[%s2188_s27 + $0x10c] sm:$0xf]  ;;  %v1479_v58 = vld [vmem:[%s2188_s27 + $0x118] sm:$0xf0] }
  0xef   : > { %v1919_v59 = vld [vmem:[%s2188_s27 + $0x20c] sm:$0xf]  ;;  %v1607_v60 = vld [vmem:[%s2188_s27 + $0x218] sm:$0xf0] }
  0xf0   : > { %v1951_v61 = vld [vmem:[%s2188_s27 + $0x30c] sm:$0xf]  ;;  %v1735_v62 = vld [vmem:[%s2188_s27 + $0x318] sm:$0xf0]  ;;  %v1610_v3 = vor.u32 %v1919_v59, %v1607_v60 }
  0xf1   : > { %1151 = vmatpush.bf16.msra.mxu0 %v1366_v15  ;;  %1164 = vmatpush.bf16.msra.mxu1 %v1494_v16  ;;  %v1546_v15 = vor.u32 %v1903_v56, %v1543_v9  ;;  %v1867_v16 = vld [vmem:[%s2188_s27 + $0x6c] sm:$0xf]  ;;  %v1738_v4 = vor.u32 %v1951_v61, %v1735_v62 }
  0xf2   : > { %1177 = vmatpush.bf16.msra.mxu2 %v1622_v20  ;;  %1190 = vmatpush.bf16.msra.mxu3 %v1750_v21  ;;  %v1899_v20 = vld [vmem:[%s2188_s27 + $0x16c] sm:$0xf]  ;;  %v1527_v21 = vld [vmem:[%s2188_s27 + $0x178] sm:$0xf0]  ;;  %v1402_v26 = vor.u32 %v1867_v16, %v1399_v17 }
  0xf3   : > { %v1530_v27 = vor.u32 %v1899_v20, %v1527_v21 }
  0xf5   : > { %1152 = vmatpush.bf16.msra.mxu0 %v1350_v31  ;;  %1165 = vmatpush.bf16.msra.mxu1 %v1478_v32  ;;  %v1786_v31 = vor.u32 %v1963_v24, %v1783_v25  ;;  %v1895_v32 = vld [vmem:[%s2188_s27 + $0x14c] sm:$0xf] }
  0xf6   : > { %1178 = vmatpush.bf16.msra.mxu2 %v1606_v36  ;;  %1191 = vmatpush.bf16.msra.mxu3 %v1734_v37  ;;  %v1959_v36 = vld [vmem:[%s2188_s27 + $0x34c] sm:$0xf]  ;;  %v1767_v37 = vld [vmem:[%s2188_s27 + $0x358] sm:$0xf0] }
  0xf8   : > { %1153 = vmatmul.bf16.vlgmr.msra.gmra.mxu0 %v2359_v63  ;;  %1166 = vmatmul.bf16.vlgmr.msra.gmra.mxu1 %v2361_v0 }
  0xf9   : > { %1197 = vmatpush.bf16.msrb.mxu0 %v1466_v38  ;;  %1210 = vmatpush.bf16.msrb.mxu1 %v1594_v39  ;;  %v1386_v38 = vor.u32 %v1863_v28, %v1383_v29  ;;  %v1514_v39 = vor.u32 %v1895_v32, %v1511_v33 }
  0xfa   : > { %1223 = vmatpush.bf16.msrb.mxu2 %v1722_v42  ;;  %1236 = vmatpush.bf16.msrb.mxu3 %v1850_v43  ;;  %v1642_v42 = vor.u32 %v1927_v34, %v1639_v35  ;;  %v1770_v43 = vor.u32 %v1959_v36, %v1767_v37 }
  0xfb   : > { %1179 = vmatmul.bf16.vlgmr.msra.gmra.mxu2 %v2363_v5  ;;  %1192 = vmatmul.bf16.vlgmr.msra.gmra.mxu3 %v2365_v6 }
  0xfd   : > { %1198 = vmatpush.bf16.msrb.mxu0 %v1450_v50  ;;  %1211 = vmatpush.bf16.msrb.mxu1 %v1578_v51  ;;  %v1370_v50 = vor.u32 %v1859_v40, %v1367_v41  ;;  %v1498_v51 = vor.u32 %v1891_v44, %v1495_v45 }
  0xfe   : > { %1224 = vmatpush.bf16.msrb.mxu2 %v1706_v54  ;;  %1237 = vmatpush.bf16.msrb.mxu3 %v1834_v55  ;;  %v1626_v54 = vor.u32 %v1923_v46, %v1623_v47  ;;  %v1754_v55 = vor.u32 %v1955_v48, %v1751_v49 }
 0x101   : > { %1199 = vmatpush.bf16.msrb.mxu0 %v1434_v1  ;;  %1212 = vmatpush.bf16.msrb.mxu1 %v1562_v2  ;;  %v1354_v1 = vor.u32 %v1855_v52, %v1351_v53  ;;  %v1482_v2 = vor.u32 %v1887_v57, %v1479_v58 }
 0x102   : > { %1225 = vmatpush.bf16.msrb.mxu2 %v1690_v7  ;;  %1238 = vmatpush.bf16.msrb.mxu3 %v1818_v8 }
 0x105   : > { %1200 = vmatpush.bf16.msrb.mxu0 %v1418_v14  ;;  %1213 = vmatpush.bf16.msrb.mxu1 %v1546_v15 }
 0x106   : > { %1226 = vmatpush.bf16.msrb.mxu2 %v1674_v18  ;;  %1239 = vmatpush.bf16.msrb.mxu3 %v1802_v19 }
 0x109   : > { %1201 = vmatpush.bf16.msrb.mxu0 %v1402_v26  ;;  %1214 = vmatpush.bf16.msrb.mxu1 %v1530_v27 }
 0x10a   : > { %1227 = vmatpush.bf16.msrb.mxu2 %v1658_v30  ;;  %1240 = vmatpush.bf16.msrb.mxu3 %v1786_v31 }
 0x10d   : > { %1202 = vmatpush.bf16.msrb.mxu0 %v1386_v38  ;;  %1215 = vmatpush.bf16.msrb.mxu1 %v1514_v39 }
 0x10e   : > { %1228 = vmatpush.bf16.msrb.mxu2 %v1642_v42  ;;  %1241 = vmatpush.bf16.msrb.mxu3 %v1770_v43 }
 0x111   : > { %1203 = vmatpush.bf16.msrb.mxu0 %v1370_v50  ;;  %1216 = vmatpush.bf16.msrb.mxu1 %v1498_v51 }
 0x112   : > { %1229 = vmatpush.bf16.msrb.mxu2 %v1626_v54  ;;  %1242 = vmatpush.bf16.msrb.mxu3 %v1754_v55 }
 0x115   : > { %1204 = vmatpush.bf16.msrb.mxu0 %v1354_v1  ;;  %1217 = vmatpush.bf16.msrb.mxu1 %v1482_v2 }
 0x116   : > { %1230 = vmatpush.bf16.msrb.mxu2 %v1610_v3  ;;  %1243 = vmatpush.bf16.msrb.mxu3 %v1738_v4 }
 0x118   : > { %1205 = vmatmul.bf16.vlgmr.msrb.gmra.mxu0 %v2359_v63  ;;  %1218 = vmatmul.bf16.vlgmr.msrb.gmra.mxu1 %v2361_v0 }
 0x119   : > { %1231 = vmatmul.bf16.vlgmr.msrb.gmra.mxu2 %v2363_v5  ;;  %1244 = vmatmul.bf16.vlgmr.msrb.gmra.mxu3 %v2365_v6 }
 0x154   : > { %v1050_v7 = vpop.f32.mrf.mxu0  ;;  %v1063_v8 = vpop.f32.mrf.mxu1 }
 0x155   : > { %v1064_v56 = vadd.f32 %v1063_v8, %v1050_v7 }
 0x15b   : > { %v1076_v9 = vpop.f32.mrf.mxu2  ;;  %v1089_v10 = vpop.f32.mrf.mxu3 }
 0x15c   : > { %v1077_v11 = vadd.f32 %v1076_v9, %v1064_v56  ;;  %v1052_v12 = vpop.f32.mrf.mxu0  ;;  %v1065_v13 = vpop.f32.mrf.mxu1 }
 0x15e   : > { %v1090_v14 = vadd.f32 %v1089_v10, %v1077_v11 }
 0x163   : > { %v1078_v15 = vpop.f32.mrf.mxu2  ;;  %v1091_v16 = vpop.f32.mrf.mxu3 }
 0x164   : > { %v1102_v17 = vpop.f32.mrf.mxu0  ;;  %v1115_v63 = vpop.f32.mrf.mxu1 }
 0x165   : > { %v1116_v29 = vadd.f32 %v1115_v63, %v1102_v17 }
 0x16b   : > { %v1128_v18 = vpop.f32.mrf.mxu2  ;;  %v1141_v0 = vpop.f32.mrf.mxu3 }
 0x16c   : > { %v1104_v19 = vpop.f32.mrf.mxu0  ;;  %v1117_v5 = vpop.f32.mrf.mxu1  ;;  %v1129_v32 = vadd.f32 %v1128_v18, %v1116_v29 }
 0x16e   : > { %v1142_v35 = vadd.f32 %v1141_v0, %v1129_v32 }
 0x170   : > { %v1253_v43 = vrot.slane %v1142_v35, 6 }
 0x172   : > { %v1256_v47 = vsel %vm207_vm0, %v1090_v14, %v1253_v43 }
 0x173   : > { %v1130_v20 = vpop.f32.mrf.mxu2  ;;  %v1143_v6 = vpop.f32.mrf.mxu3 }
 0x175   : > { %v1154_v21 = vpop.f32.mrf.mxu0  ;;  %v1167_v22 = vpop.f32.mrf.mxu1 }
 0x176   : > { %v1168_v33 = vadd.f32 %v1167_v22, %v1154_v21 }
 0x17d   : > { %v1156_v25 = vpop.f32.mrf.mxu0  ;;  %v1169_v26 = vpop.f32.mrf.mxu1 }
 0x17e   : > { %v1180_v23 = vpop.f32.mrf.mxu2  ;;  %v1193_v24 = vpop.f32.mrf.mxu3 }
 0x17f   : > { %v1181_v34 = vadd.f32 %v1180_v23, %v1168_v33 }
 0x181   : > { %v1194_v39 = vadd.f32 %v1193_v24, %v1181_v34 }
 0x183   : > { %v1254_v45 = vrot.slane %v1194_v39, 4 }
 0x186   : > { %v1182_v27 = vpop.f32.mrf.mxu2  ;;  %v1195_v28 = vpop.f32.mrf.mxu3 }
 0x195   : > { %v1206_v30 = vpop.f32.mrf.mxu0  ;;  %v1219_v31 = vpop.f32.mrf.mxu1 }
 0x196   : > { %v1220_v36 = vadd.f32 %v1219_v31, %v1206_v30 }
 0x19c   : > { %v1232_v37 = vpop.f32.mrf.mxu2  ;;  %v1245_v38 = vpop.f32.mrf.mxu3 }
 0x19d   : > { %v1233_v40 = vadd.f32 %v1232_v37, %v1220_v36  ;;  %v1208_v41 = vpop.f32.mrf.mxu0  ;;  %v1221_v42 = vpop.f32.mrf.mxu1 }
 0x19f   : > { %v1246_v44 = vadd.f32 %v1245_v38, %v1233_v40 }
 0x1a1   : > { %v1255_v46 = vrot.slane %v1246_v44, 2 }
 0x1a3   : > { %v1257_v48 = vsel %vm253_vm3, %v1254_v45, %v1255_v46 }
 0x1a4   : > { %v1258_v49 = vsel %vm255_vm6, %v1256_v47, %v1257_v48  ;;  %v1234_v50 = vpop.f32.mrf.mxu2  ;;  %v1247_v51 = vpop.f32.mrf.mxu3 }
 0x1a5   : > { %1260 = vst [vmem:[%s193_s6] sm:$0xff] %v1258_v49 }
 0x1a6 PF: > { %p13_p7 = scmp.ge.s32.totalorder %s2141_s17, 4   ;;  %s2529_s12 = smov %s2086_s13 }
 0x1a7   : > { %s2530_s13 = smov %s2090_s14  ;;  %s2531_s14 = smov %s2151_s20 }
 0x1a8   : > { %s2532_s15 = smov %s2141_s17  ;;  %15 = sbr.rel (!%p13_p7) target bundleno = 3 (0x3), region = 72 }
 0x1ad   :  { %1283 = vsyncpa [#allocation3], 1 }
 0x1ae   :  { %1285 = vsyncpa [#allocation3 + $0x1], 1 }

// kernel: llama_decoder_layer.6
= control target key start
LH: loop header
LB: loop body
LE: loop exit
PB: predicated region body
PF: predicated region fallthrough
CT: control target
= control target key end

     0   :  { %8 = vsyncpa [#allocation3], 0  ;;  %s1712_s15 = smov [#allocation2]   ;;  %s1713_s17 = smov 256   ;;  %s1771_s0 = inlined_call_operand.vmem [shape: f32[2,512], index: 0, kind: input, shape index: {}]   ;;  %s1772_s1 = inlined_call_operand.vmem [shape: f32[2,512], index: 1, kind: input, shape index: {}]   ;;  %s1773_s2 = inlined_call_operand.hbm [shape: bf16[512,512], index: 2, kind: input, shape index: {}]   ;;  %s1774_s3 = inlined_call_operand.vmem [shape: f32[2,512], index: 3, kind: output, shape index: {}]  }
   0x1   :  { %s17_s14 = sshll.u32 %s1773_s2, 4  ;;  %s19_s16 = sshll.u32 %s1712_s15, 4  ;;  %s18_s14 = int_to_ptr.hbm [resolvable:$true] %s17_s14  ;;  %s20_s16 = int_to_ptr.vmem [resolvable:$true] %s19_s16 }
   0x2   :  { %s1714_s18 = smov 16  }
   0x3   :  { %25 = dma.hbm_to_vmem [thread:$0]  %s18_s14, 16384, %s20_s16, [#allocation3], %s1713_s17, %s1713_s17, %s1714_s18  }
   0x4   :  { %1710 = dma.done.wait [#allocation3], 16384  }
   0x5   :  { %1711 = vsyncadd [#allocation3], 4294950912  ;;  %v1157_v0 = vld [vmem:[#allocation2 + $0xe0] sm:$0xf]  ;;  %v1585_v1 = vld [vmem:[#allocation2 + $0xec] sm:$0xf0] }
   0x6   :  { %v1285_v2 = vld [vmem:[#allocation2 + $0x1e0] sm:$0xf]  ;;  %v1158_v3 = vor.u32 %v1585_v1, %v1157_v0  ;;  %v1617_v4 = vld [vmem:[#allocation2 + $0x1ec] sm:$0xf0]  ;;  %vm1029_vm0 = vcmask 1041408   ;;  %vm1031_vm1 = vcmask 1045508  }
   0x7   :  { %v1413_v5 = vld [vmem:[#allocation2 + $0x2e0] sm:$0xf]  ;;  %v1649_v6 = vld [vmem:[#allocation2 + $0x2ec] sm:$0xf0]  ;;  %v1286_v7 = vor.u32 %v1617_v4, %v1285_v2  ;;  %vm1033_vm2 = vcmask 1043456  }
   0x8   :  { %v1414_v8 = vor.u32 %v1649_v6, %v1413_v5  ;;  %v1541_v9 = vld [vmem:[#allocation2 + $0x3e0] sm:$0xf]  ;;  %v1681_v10 = vld [vmem:[#allocation2 + $0x3ec] sm:$0xf0]  ;;  %813 = vmatpush.bf16.msra.mxu0 %v1158_v3 }
   0x9   :  { %v1141_v11 = vld [vmem:[#allocation2 + $0xc0] sm:$0xf]  ;;  %v1542_v12 = vor.u32 %v1681_v10, %v1541_v9  ;;  %v1581_v13 = vld [vmem:[#allocation2 + $0xcc] sm:$0xf0]  ;;  %826 = vmatpush.bf16.msra.mxu1 %v1286_v7 }
   0xa   :  { %v1269_v14 = vld [vmem:[#allocation2 + $0x1c0] sm:$0xf]  ;;  %v1613_v15 = vld [vmem:[#allocation2 + $0x1cc] sm:$0xf0]  ;;  %839 = vmatpush.bf16.msra.mxu2 %v1414_v8  ;;  %v1142_v16 = vor.u32 %v1581_v13, %v1141_v11 }
   0xb   :  { %v1270_v17 = vor.u32 %v1613_v15, %v1269_v14  ;;  %v1397_v18 = vld [vmem:[#allocation2 + $0x2c0] sm:$0xf]  ;;  %v1645_v19 = vld [vmem:[#allocation2 + $0x2cc] sm:$0xf0]  ;;  %852 = vmatpush.bf16.msra.mxu3 %v1542_v12 }
   0xc   :  { %v1525_v20 = vld [vmem:[#allocation2 + $0x3c0] sm:$0xf]  ;;  %v1398_v21 = vor.u32 %v1645_v19, %v1397_v18  ;;  %v1677_v22 = vld [vmem:[#allocation2 + $0x3cc] sm:$0xf0]  ;;  %814 = vmatpush.bf16.msra.mxu0 %v1142_v16 }
   0xd   :  { %v1125_v23 = vld [vmem:[#allocation2 + $0xa0] sm:$0xf]  ;;  %v1577_v24 = vld [vmem:[#allocation2 + $0xac] sm:$0xf0]  ;;  %v1526_v25 = vor.u32 %v1677_v22, %v1525_v20  ;;  %827 = vmatpush.bf16.msra.mxu1 %v1270_v17 }
   0xe   :  { %v1253_v26 = vld [vmem:[#allocation2 + $0x1a0] sm:$0xf]  ;;  %v1609_v27 = vld [vmem:[#allocation2 + $0x1ac] sm:$0xf0]  ;;  %v1126_v29 = vor.u32 %v1577_v24, %v1125_v23  ;;  %840 = vmatpush.bf16.msra.mxu2 %v1398_v21 }
   0xf   :  { %v1381_v28 = vld [vmem:[#allocation2 + $0x2a0] sm:$0xf]  ;;  %v1641_v30 = vld [vmem:[#allocation2 + $0x2ac] sm:$0xf0]  ;;  %v1254_v33 = vor.u32 %v1609_v27, %v1253_v26  ;;  %853 = vmatpush.bf16.msra.mxu3 %v1526_v25 }
  0x10   :  { %v1509_v31 = vld [vmem:[#allocation2 + $0x3a0] sm:$0xf]  ;;  %v1673_v32 = vld [vmem:[#allocation2 + $0x3ac] sm:$0xf0]  ;;  %v1382_v34 = vor.u32 %v1641_v30, %v1381_v28  ;;  %815 = vmatpush.bf16.msra.mxu0 %v1126_v29  ;;  %v1583_v28 = vld [vmem:[#allocation2 + $0xe4] sm:$0xf] }
  0x11   :  { %v1109_v35 = vld [vmem:[#allocation2 + $0x80] sm:$0xf]  ;;  %v1573_v36 = vld [vmem:[#allocation2 + $0x8c] sm:$0xf0]  ;;  %v1510_v38 = vor.u32 %v1673_v32, %v1509_v31  ;;  %828 = vmatpush.bf16.msra.mxu1 %v1254_v33  ;;  %v1159_v29 = vld [vmem:[#allocation2 + $0xf0] sm:$0xf0] }
  0x12   :  { %v1237_v37 = vld [vmem:[#allocation2 + $0x180] sm:$0xf]  ;;  %v1605_v39 = vld [vmem:[#allocation2 + $0x18c] sm:$0xf0]  ;;  %v1110_v44 = vor.u32 %v1573_v36, %v1109_v35  ;;  %841 = vmatpush.bf16.msra.mxu2 %v1382_v34  ;;  %v1615_v30 = vld [vmem:[#allocation2 + $0x1e4] sm:$0xf] }
  0x13   :  { %v1365_v40 = vld [vmem:[#allocation2 + $0x280] sm:$0xf]  ;;  %v1637_v41 = vld [vmem:[#allocation2 + $0x28c] sm:$0xf0]  ;;  %v1238_v45 = vor.u32 %v1605_v39, %v1237_v37  ;;  %854 = vmatpush.bf16.msra.mxu3 %v1510_v38  ;;  %v1287_v32 = vld [vmem:[#allocation2 + $0x1f0] sm:$0xf0] }
  0x14   :  { %v1493_v42 = vld [vmem:[#allocation2 + $0x380] sm:$0xf]  ;;  %v1669_v43 = vld [vmem:[#allocation2 + $0x38c] sm:$0xf0]  ;;  %v1366_v46 = vor.u32 %v1637_v41, %v1365_v40  ;;  %816 = vmatpush.bf16.msra.mxu0 %v1110_v44  ;;  %v1647_v33 = vld [vmem:[#allocation2 + $0x2e4] sm:$0xf]  ;;  %v1162_v40 = vor.u32 %v1583_v28, %v1159_v29  ;;  %v1290_v41 = vor.u32 %v1615_v30, %v1287_v32 }
  0x15   :  { %v1093_v47 = vld [vmem:[#allocation2 + $0x60] sm:$0xf]  ;;  %v1569_v48 = vld [vmem:[#allocation2 + $0x6c] sm:$0xf0]  ;;  %v1494_v50 = vor.u32 %v1669_v43, %v1493_v42  ;;  %829 = vmatpush.bf16.msra.mxu1 %v1238_v45  ;;  %v1415_v34 = vld [vmem:[#allocation2 + $0x2f0] sm:$0xf0] }
  0x16   :  { %v1221_v49 = vld [vmem:[#allocation2 + $0x160] sm:$0xf]  ;;  %v1601_v51 = vld [vmem:[#allocation2 + $0x16c] sm:$0xf0]  ;;  %v1094_v56 = vor.u32 %v1569_v48, %v1093_v47  ;;  %842 = vmatpush.bf16.msra.mxu2 %v1366_v46  ;;  %v1679_v37 = vld [vmem:[#allocation2 + $0x3e4] sm:$0xf]  ;;  %v1418_v42 = vor.u32 %v1647_v33, %v1415_v34 }
  0x17   :  { %v1349_v52 = vld [vmem:[#allocation2 + $0x260] sm:$0xf]  ;;  %v1633_v53 = vld [vmem:[#allocation2 + $0x26c] sm:$0xf0]  ;;  %v1222_v57 = vor.u32 %v1601_v51, %v1221_v49  ;;  %855 = vmatpush.bf16.msra.mxu3 %v1494_v50  ;;  %v1543_v38 = vld [vmem:[#allocation2 + $0x3f0] sm:$0xf0] }
  0x18   :  { %v1477_v54 = vld [vmem:[#allocation2 + $0x360] sm:$0xf]  ;;  %v1665_v55 = vld [vmem:[#allocation2 + $0x36c] sm:$0xf0]  ;;  %v1350_v58 = vor.u32 %v1633_v53, %v1349_v52  ;;  %817 = vmatpush.bf16.msra.mxu0 %v1094_v56  ;;  %v1579_v43 = vld [vmem:[#allocation2 + $0xc4] sm:$0xf]  ;;  %v1546_v46 = vor.u32 %v1679_v37, %v1543_v38 }
  0x19   :  { %v1077_v59 = vld [vmem:[#allocation2 + $0x40] sm:$0xf]  ;;  %v1565_v60 = vld [vmem:[#allocation2 + $0x4c] sm:$0xf0]  ;;  %v1478_v62 = vor.u32 %v1665_v55, %v1477_v54  ;;  %830 = vmatpush.bf16.msra.mxu1 %v1222_v57  ;;  %v1143_v44 = vld [vmem:[#allocation2 + $0xd0] sm:$0xf0] }
  0x1a   :  { %v1205_v61 = vld [vmem:[#allocation2 + $0x140] sm:$0xf]  ;;  %v1597_v63 = vld [vmem:[#allocation2 + $0x14c] sm:$0xf0]  ;;  %v1078_v4 = vor.u32 %v1565_v60, %v1077_v59  ;;  %843 = vmatpush.bf16.msra.mxu2 %v1350_v58  ;;  %v1611_v45 = vld [vmem:[#allocation2 + $0x1c4] sm:$0xf]  ;;  %v1146_v53 = vor.u32 %v1579_v43, %v1143_v44 }
  0x1b   :  { %v1333_v0 = vld [vmem:[#allocation2 + $0x240] sm:$0xf]  ;;  %v1629_v1 = vld [vmem:[#allocation2 + $0x24c] sm:$0xf0]  ;;  %v1206_v5 = vor.u32 %v1597_v63, %v1205_v61  ;;  %856 = vmatpush.bf16.msra.mxu3 %v1478_v62  ;;  %v1271_v47 = vld [vmem:[#allocation2 + $0x1d0] sm:$0xf0] }
  0x1c   :  { %v1461_v2 = vld [vmem:[#allocation2 + $0x340] sm:$0xf]  ;;  %v1661_v3 = vld [vmem:[#allocation2 + $0x34c] sm:$0xf0]  ;;  %v1334_v6 = vor.u32 %v1629_v1, %v1333_v0  ;;  %818 = vmatpush.bf16.msra.mxu0 %v1078_v4  ;;  %v1643_v48 = vld [vmem:[#allocation2 + $0x2c4] sm:$0xf]  ;;  %v1274_v54 = vor.u32 %v1611_v45, %v1271_v47 }
  0x1d   :  { %v1061_v7 = vld [vmem:[#allocation2 + $0x20] sm:$0xf]  ;;  %v1561_v8 = vld [vmem:[#allocation2 + $0x2c] sm:$0xf0]  ;;  %v1462_v10 = vor.u32 %v1661_v3, %v1461_v2  ;;  %831 = vmatpush.bf16.msra.mxu1 %v1206_v5  ;;  %v1399_v49 = vld [vmem:[#allocation2 + $0x2d0] sm:$0xf0] }
  0x1e   :  { %v1189_v9 = vld [vmem:[#allocation2 + $0x120] sm:$0xf]  ;;  %v1593_v11 = vld [vmem:[#allocation2 + $0x12c] sm:$0xf0]  ;;  %v1062_v16 = vor.u32 %v1561_v8, %v1061_v7  ;;  %844 = vmatpush.bf16.msra.mxu2 %v1334_v6  ;;  %v1675_v50 = vld [vmem:[#allocation2 + $0x3c4] sm:$0xf]  ;;  %v1402_v55 = vor.u32 %v1643_v48, %v1399_v49 }
  0x1f   :  { %v1317_v12 = vld [vmem:[#allocation2 + $0x220] sm:$0xf]  ;;  %v1625_v13 = vld [vmem:[#allocation2 + $0x22c] sm:$0xf0]  ;;  %v1190_v19 = vor.u32 %v1593_v11, %v1189_v9  ;;  %857 = vmatpush.bf16.msra.mxu3 %v1462_v10  ;;  %v1527_v51 = vld [vmem:[#allocation2 + $0x3d0] sm:$0xf0] }
  0x20   :  { %v1445_v14 = vld [vmem:[#allocation2 + $0x320] sm:$0xf]  ;;  %v1657_v15 = vld [vmem:[#allocation2 + $0x32c] sm:$0xf0]  ;;  %v1318_v20 = vor.u32 %v1625_v13, %v1317_v12  ;;  %819 = vmatpush.bf16.msra.mxu0 %v1062_v16  ;;  %v30_v52 = vld [vmem:[%s1771_s0] sm:$0xff]  ;;  %v1530_v59 = vor.u32 %v1675_v50, %v1527_v51 }
  0x21   :  { %v1045_v17 = vld [vmem:[#allocation2] sm:$0xf]  ;;  %v1557_v18 = vld [vmem:[#allocation2 + $0xc] sm:$0xf0]  ;;  %v1446_v24 = vor.u32 %v1657_v15, %v1445_v14  ;;  %832 = vmatpush.bf16.msra.mxu1 %v1190_v19  ;;  %32 = vst [vmem:[#allocation1] ss:$4 sm:$0xff] %v30_v52 }
  0x22   :  { %v1173_v21 = vld [vmem:[#allocation2 + $0x100] sm:$0xf]  ;;  %v1589_v22 = vld [vmem:[#allocation2 + $0x10c] sm:$0xf0]  ;;  %v1046_v31 = vor.u32 %v1557_v18, %v1045_v17  ;;  %845 = vmatpush.bf16.msra.mxu2 %v1318_v20  ;;  %v1575_v56 = vld [vmem:[#allocation2 + $0xa4] sm:$0xf] }
  0x23   :  { %v1301_v23 = vld [vmem:[#allocation2 + $0x200] sm:$0xf]  ;;  %v1621_v25 = vld [vmem:[#allocation2 + $0x20c] sm:$0xf0]  ;;  %v1174_v35 = vor.u32 %v1589_v22, %v1173_v21  ;;  %858 = vmatpush.bf16.msra.mxu3 %v1446_v24  ;;  %v1127_v57 = vld [vmem:[#allocation2 + $0xb0] sm:$0xf0] }
  0x24   :  { %v1429_v26 = vld [vmem:[#allocation2 + $0x300] sm:$0xf]  ;;  %v1653_v27 = vld [vmem:[#allocation2 + $0x30c] sm:$0xf0]  ;;  %v1302_v36 = vor.u32 %v1621_v25, %v1301_v23  ;;  %820 = vmatpush.bf16.msra.mxu0 %v1046_v31  ;;  %v1607_v58 = vld [vmem:[#allocation2 + $0x1a4] sm:$0xf]  ;;  %v1130_v1 = vor.u32 %v1575_v56, %v1127_v57 }
  0x25   :  { %v1430_v39 = vor.u32 %v1653_v27, %v1429_v26  ;;  %833 = vmatpush.bf16.msra.mxu1 %v1174_v35  ;;  %v1255_v60 = vld [vmem:[#allocation2 + $0x1b0] sm:$0xf0]  ;;  %v1639_v61 = vld [vmem:[#allocation2 + $0x2a4] sm:$0xf] }
  0x26   :  { %846 = vmatpush.bf16.msra.mxu2 %v1302_v36  ;;  %v1383_v62 = vld [vmem:[#allocation2 + $0x2b0] sm:$0xf0]  ;;  %v1671_v63 = vld [vmem:[#allocation2 + $0x3a4] sm:$0xf]  ;;  %v1258_v4 = vor.u32 %v1607_v58, %v1255_v60 }
  0x27   :  { %859 = vmatpush.bf16.msra.mxu3 %v1430_v39  ;;  %v1511_v0 = vld [vmem:[#allocation2 + $0x3b0] sm:$0xf0]  ;;  %v1571_v2 = vld [vmem:[#allocation2 + $0x84] sm:$0xf]  ;;  %v1386_v5 = vor.u32 %v1639_v61, %v1383_v62 }
  0x28   :  { %865 = vmatpush.bf16.msrb.mxu0 %v1162_v40  ;;  %v1111_v3 = vld [vmem:[#allocation2 + $0x90] sm:$0xf0]  ;;  %v1603_v6 = vld [vmem:[#allocation2 + $0x184] sm:$0xf]  ;;  %v1514_v9 = vor.u32 %v1671_v63, %v1511_v0 }
  0x29   :  { %878 = vmatpush.bf16.msrb.mxu1 %v1290_v41  ;;  %v1239_v7 = vld [vmem:[#allocation2 + $0x190] sm:$0xf0]  ;;  %v1635_v8 = vld [vmem:[#allocation2 + $0x284] sm:$0xf]  ;;  %v1114_v15 = vor.u32 %v1571_v2, %v1111_v3 }
  0x2a   :  { %891 = vmatpush.bf16.msrb.mxu2 %v1418_v42  ;;  %v1367_v10 = vld [vmem:[#allocation2 + $0x290] sm:$0xf0]  ;;  %v1667_v11 = vld [vmem:[#allocation2 + $0x384] sm:$0xf]  ;;  %v1242_v16 = vor.u32 %v1603_v6, %v1239_v7  ;;  %v1586_v6 = vld [vmem:[#allocation2 + $0xf4] sm:$0xf0] }
  0x2b   :  { %904 = vmatpush.bf16.msrb.mxu3 %v1546_v46  ;;  %v1495_v12 = vld [vmem:[#allocation2 + $0x390] sm:$0xf0]  ;;  %v35_v13 = vld.sshfl [vmem:[#allocation1 + $0x10] sm:$0xff pattern:$0x73625140]  ;;  %v1370_v21 = vor.u32 %v1635_v8, %v1367_v10 }
  0x2c   :  { %866 = vmatpush.bf16.msrb.mxu0 %v1146_v53  ;;  %v36_v14 = vld.sshfl [vmem:[#allocation1 + $0x18] sm:$0xff pattern:$0x73625140]  ;;  %v1741_v17 = vpack.c.bf16 %v35_v13, %v35_v13  ;;  %v33_v19 = vld.sshfl [vmem:[#allocation1] sm:$0xff pattern:$0x73625140]  ;;  %v1498_v27 = vor.u32 %v1667_v11, %v1495_v12 }
  0x2d   :  { %879 = vmatpush.bf16.msrb.mxu1 %v1274_v54  ;;  %v1743_v18 = vpack.c.bf16 %v36_v14, %v36_v14  ;;  %v34_v20 = vld.sshfl [vmem:[#allocation1 + $0x8] sm:$0xff pattern:$0x73625140]  ;;  %v1095_v23 = vld [vmem:[#allocation2 + $0x70] sm:$0xf0]  ;;  %v1745_v25 = vpack.c.bf16 %v33_v19, %v33_v19 }
  0x2e   :  { %892 = vmatpush.bf16.msrb.mxu2 %v1402_v55  ;;  %v1567_v22 = vld [vmem:[#allocation2 + $0x64] sm:$0xf]  ;;  %v1747_v26 = vpack.c.bf16 %v34_v20, %v34_v20  ;;  %v1223_v28 = vld [vmem:[#allocation2 + $0x170] sm:$0xf0]  ;;  %v1293_v7 = vld [vmem:[#allocation2 + $0x1e8] sm:$0xf] }
  0x2f   :  { %905 = vmatpush.bf16.msrb.mxu3 %v1530_v59  ;;  %v1599_v24 = vld [vmem:[#allocation2 + $0x164] sm:$0xf]  ;;  %847 = vmatmul.bf16.vlgmr.msra.gmra.mxu2 %v1741_v17  ;;  %v1351_v30 = vld [vmem:[#allocation2 + $0x270] sm:$0xf0]  ;;  %v1098_v33 = vor.u32 %v1567_v22, %v1095_v23  ;;  %v1421_v10 = vld [vmem:[#allocation2 + $0x2e8] sm:$0xf] }
  0x30   :  { %867 = vmatpush.bf16.msrb.mxu0 %v1130_v1  ;;  %v1631_v29 = vld [vmem:[#allocation2 + $0x264] sm:$0xf]  ;;  %v1479_v32 = vld [vmem:[#allocation2 + $0x370] sm:$0xf0]  ;;  %860 = vmatmul.bf16.vlgmr.msra.gmra.mxu3 %v1743_v18  ;;  %v1226_v34 = vor.u32 %v1599_v24, %v1223_v28  ;;  %v1650_v11 = vld [vmem:[#allocation2 + $0x2f4] sm:$0xf0] }
  0x31   :  { %880 = vmatpush.bf16.msrb.mxu1 %v1258_v4  ;;  %v1663_v31 = vld [vmem:[#allocation2 + $0x364] sm:$0xf]  ;;  %821 = vmatmul.bf16.vlgmr.msra.gmra.mxu0 %v1745_v25  ;;  %v1354_v35 = vor.u32 %v1631_v29, %v1351_v30  ;;  %v1079_v37 = vld [vmem:[#allocation2 + $0x50] sm:$0xf0]  ;;  %v1549_v14 = vld [vmem:[#allocation2 + $0x3e8] sm:$0xf] }
  0x32   :  { %893 = vmatpush.bf16.msrb.mxu2 %v1386_v5  ;;  %834 = vmatmul.bf16.vlgmr.msra.gmra.mxu1 %v1747_v26  ;;  %v1563_v36 = vld [vmem:[#allocation2 + $0x44] sm:$0xf]  ;;  %v1482_v39 = vor.u32 %v1663_v31, %v1479_v32  ;;  %v1207_v40 = vld [vmem:[#allocation2 + $0x150] sm:$0xf0]  ;;  %v1165_v5 = vld [vmem:[#allocation2 + $0xe8] sm:$0xf] }
  0x33   :  { %906 = vmatpush.bf16.msrb.mxu3 %v1514_v9  ;;  %v1595_v38 = vld [vmem:[#allocation2 + $0x144] sm:$0xf]  ;;  %v1335_v42 = vld [vmem:[#allocation2 + $0x250] sm:$0xf0]  ;;  %v1082_v45 = vor.u32 %v1563_v36, %v1079_v37  ;;  %v1618_v9 = vld [vmem:[#allocation2 + $0x1f4] sm:$0xf0]  ;;  %v1166_v19 = vor.u32 %v1586_v6, %v1165_v5 }
  0x34   :  { %868 = vmatpush.bf16.msrb.mxu0 %v1114_v15  ;;  %v1627_v41 = vld [vmem:[#allocation2 + $0x244] sm:$0xf]  ;;  %v1463_v44 = vld [vmem:[#allocation2 + $0x350] sm:$0xf0]  ;;  %v1210_v46 = vor.u32 %v1595_v38, %v1207_v40  ;;  %v1682_v15 = vld [vmem:[#allocation2 + $0x3f4] sm:$0xf0]  ;;  %v1294_v20 = vor.u32 %v1618_v9, %v1293_v7 }
  0x35   :  { %881 = vmatpush.bf16.msrb.mxu1 %v1242_v16  ;;  %v1659_v43 = vld [vmem:[#allocation2 + $0x344] sm:$0xf]  ;;  %v1338_v47 = vor.u32 %v1627_v41, %v1335_v42  ;;  %v1063_v49 = vld [vmem:[#allocation2 + $0x30] sm:$0xf0]  ;;  %v1149_v22 = vld [vmem:[#allocation2 + $0xc8] sm:$0xf] }
  0x36   :  { %894 = vmatpush.bf16.msrb.mxu2 %v1370_v21  ;;  %v1559_v48 = vld [vmem:[#allocation2 + $0x24] sm:$0xf]  ;;  %v1466_v51 = vor.u32 %v1659_v43, %v1463_v44  ;;  %v1191_v52 = vld [vmem:[#allocation2 + $0x130] sm:$0xf0]  ;;  %v1422_v21 = vor.u32 %v1650_v11, %v1421_v10  ;;  %v1582_v23 = vld [vmem:[#allocation2 + $0xd4] sm:$0xf0] }
  0x37   :  { %907 = vmatpush.bf16.msrb.mxu3 %v1498_v27  ;;  %v1591_v50 = vld [vmem:[#allocation2 + $0x124] sm:$0xf]  ;;  %v1319_v54 = vld [vmem:[#allocation2 + $0x230] sm:$0xf0]  ;;  %v1066_v57 = vor.u32 %v1559_v48, %v1063_v49  ;;  %v1277_v24 = vld [vmem:[#allocation2 + $0x1c8] sm:$0xf]  ;;  %v1550_v27 = vor.u32 %v1682_v15, %v1549_v14 }
  0x38   :  { %869 = vmatpush.bf16.msrb.mxu0 %v1098_v33  ;;  %v1623_v53 = vld [vmem:[#allocation2 + $0x224] sm:$0xf]  ;;  %v1447_v56 = vld [vmem:[#allocation2 + $0x330] sm:$0xf0]  ;;  %v1194_v60 = vor.u32 %v1591_v50, %v1191_v52  ;;  %v1614_v28 = vld [vmem:[#allocation2 + $0x1d4] sm:$0xf0]  ;;  %v1150_v33 = vor.u32 %v1582_v23, %v1149_v22 }
  0x39   :  { %882 = vmatpush.bf16.msrb.mxu1 %v1226_v34  ;;  %v1655_v55 = vld [vmem:[#allocation2 + $0x324] sm:$0xf]  ;;  %v1047_v59 = vld [vmem:[#allocation2 + $0x10] sm:$0xf0]  ;;  %v1322_v61 = vor.u32 %v1623_v53, %v1319_v54  ;;  %v1405_v29 = vld [vmem:[#allocation2 + $0x2c8] sm:$0xf]  ;;  %v1278_v34 = vor.u32 %v1614_v28, %v1277_v24 }
  0x3a   :  { %895 = vmatpush.bf16.msrb.mxu2 %v1354_v35  ;;  %v1555_v58 = vld [vmem:[#allocation2 + $0x4] sm:$0xf]  ;;  %v1175_v63 = vld [vmem:[#allocation2 + $0x110] sm:$0xf0]  ;;  %v1450_v1 = vor.u32 %v1655_v55, %v1447_v56  ;;  %v1646_v30 = vld [vmem:[#allocation2 + $0x2d4] sm:$0xf0] }
  0x3b   :  { %908 = vmatpush.bf16.msrb.mxu3 %v1482_v39  ;;  %v1587_v62 = vld [vmem:[#allocation2 + $0x104] sm:$0xf]  ;;  %v1303_v2 = vld [vmem:[#allocation2 + $0x210] sm:$0xf0]  ;;  %v1050_v8 = vor.u32 %v1555_v58, %v1047_v59  ;;  %v1533_v31 = vld [vmem:[#allocation2 + $0x3c8] sm:$0xf]  ;;  %v1406_v35 = vor.u32 %v1646_v30, %v1405_v29 }
  0x3c   :  { %870 = vmatpush.bf16.msrb.mxu0 %v1082_v45  ;;  %v1619_v0 = vld [vmem:[#allocation2 + $0x204] sm:$0xf]  ;;  %v1431_v4 = vld [vmem:[#allocation2 + $0x310] sm:$0xf0]  ;;  %v1178_v12 = vor.u32 %v1587_v62, %v1175_v63  ;;  %v1678_v32 = vld [vmem:[#allocation2 + $0x3d4] sm:$0xf0] }
  0x3d   :  { %883 = vmatpush.bf16.msrb.mxu1 %v1210_v46  ;;  %v1651_v3 = vld [vmem:[#allocation2 + $0x304] sm:$0xf]  ;;  %v1306_v13 = vor.u32 %v1619_v0, %v1303_v2  ;;  %v1133_v36 = vld [vmem:[#allocation2 + $0xa8] sm:$0xf]  ;;  %v1578_v37 = vld [vmem:[#allocation2 + $0xb4] sm:$0xf0]  ;;  %v1534_v39 = vor.u32 %v1678_v32, %v1533_v31 }
  0x3e   :  { %896 = vmatpush.bf16.msrb.mxu2 %v1338_v47  ;;  %v1434_v16 = vor.u32 %v1651_v3, %v1431_v4  ;;  %v1261_v38 = vld [vmem:[#allocation2 + $0x1a8] sm:$0xf]  ;;  %v1610_v40 = vld [vmem:[#allocation2 + $0x1b4] sm:$0xf0]  ;;  %v1134_v45 = vor.u32 %v1578_v37, %v1133_v36 }
  0x3f   :  { %909 = vmatpush.bf16.msrb.mxu3 %v1466_v51  ;;  %v1389_v41 = vld [vmem:[#allocation2 + $0x2a8] sm:$0xf]  ;;  %v1642_v42 = vld [vmem:[#allocation2 + $0x2b4] sm:$0xf0]  ;;  %v1262_v46 = vor.u32 %v1610_v40, %v1261_v38 }
  0x40   :  { %871 = vmatpush.bf16.msrb.mxu0 %v1066_v57  ;;  %v1517_v43 = vld [vmem:[#allocation2 + $0x3a8] sm:$0xf]  ;;  %v1674_v44 = vld [vmem:[#allocation2 + $0x3b4] sm:$0xf0]  ;;  %v1390_v47 = vor.u32 %v1642_v42, %v1389_v41 }
  0x41   :  { %884 = vmatpush.bf16.msrb.mxu1 %v1194_v60  ;;  %v1117_v48 = vld [vmem:[#allocation2 + $0x88] sm:$0xf]  ;;  %v1574_v49 = vld [vmem:[#allocation2 + $0x94] sm:$0xf0]  ;;  %v1518_v51 = vor.u32 %v1674_v44, %v1517_v43 }
  0x42   :  { %897 = vmatpush.bf16.msrb.mxu2 %v1322_v61  ;;  %v1245_v50 = vld [vmem:[#allocation2 + $0x188] sm:$0xf]  ;;  %v1606_v52 = vld [vmem:[#allocation2 + $0x194] sm:$0xf0]  ;;  %v1118_v57 = vor.u32 %v1574_v49, %v1117_v48  ;;  %v1295_v49 = vld [vmem:[#allocation2 + $0x1f8] sm:$0xf0] }
  0x43   :  { %910 = vmatpush.bf16.msrb.mxu3 %v1450_v1  ;;  %v1373_v53 = vld [vmem:[#allocation2 + $0x288] sm:$0xf]  ;;  %v1638_v54 = vld [vmem:[#allocation2 + $0x294] sm:$0xf0]  ;;  %v1246_v58 = vor.u32 %v1606_v52, %v1245_v50  ;;  %v1648_v50 = vld [vmem:[#allocation2 + $0x2ec] sm:$0xf] }
  0x44   :  { %872 = vmatpush.bf16.msrb.mxu0 %v1050_v8  ;;  %v1501_v55 = vld [vmem:[#allocation2 + $0x388] sm:$0xf]  ;;  %v1670_v56 = vld [vmem:[#allocation2 + $0x394] sm:$0xf0]  ;;  %v1374_v59 = vor.u32 %v1638_v54, %v1373_v53  ;;  %v1680_v54 = vld [vmem:[#allocation2 + $0x3ec] sm:$0xf] }
  0x45   :  { %885 = vmatpush.bf16.msrb.mxu1 %v1178_v12  ;;  %v1101_v60 = vld [vmem:[#allocation2 + $0x68] sm:$0xf]  ;;  %v1570_v61 = vld [vmem:[#allocation2 + $0x74] sm:$0xf0]  ;;  %v1502_v63 = vor.u32 %v1670_v56, %v1501_v55  ;;  %v1551_v55 = vld [vmem:[#allocation2 + $0x3f8] sm:$0xf0] }
  0x46   :  { %898 = vmatpush.bf16.msrb.mxu2 %v1306_v13  ;;  %v1229_v62 = vld [vmem:[#allocation2 + $0x168] sm:$0xf]  ;;  %v1602_v0 = vld [vmem:[#allocation2 + $0x174] sm:$0xf0]  ;;  %v1102_v5 = vor.u32 %v1570_v61, %v1101_v60  ;;  %v1580_v60 = vld [vmem:[#allocation2 + $0xcc] sm:$0xf] }
  0x47   :  { %911 = vmatpush.bf16.msrb.mxu3 %v1434_v16  ;;  %873 = vmatmul.bf16.vlgmr.msrb.gmra.mxu0 %v1745_v25  ;;  %v1357_v1 = vld [vmem:[#allocation2 + $0x268] sm:$0xf]  ;;  %v1634_v2 = vld [vmem:[#allocation2 + $0x274] sm:$0xf0]  ;;  %v1230_v6 = vor.u32 %v1602_v0, %v1229_v62  ;;  %v1151_v61 = vld [vmem:[#allocation2 + $0xd8] sm:$0xf0] }
  0x48   :  { %917 = vmatpush.bf16.msra.mxu0 %v1166_v19  ;;  %886 = vmatmul.bf16.vlgmr.msrb.gmra.mxu1 %v1747_v26  ;;  %v1485_v3 = vld [vmem:[#allocation2 + $0x368] sm:$0xf]  ;;  %v1666_v4 = vld [vmem:[#allocation2 + $0x374] sm:$0xf0]  ;;  %v1358_v7 = vor.u32 %v1634_v2, %v1357_v1  ;;  %v1612_v62 = vld [vmem:[#allocation2 + $0x1cc] sm:$0xf] }
  0x49   :  { %930 = vmatpush.bf16.msra.mxu1 %v1294_v20  ;;  %899 = vmatmul.bf16.vlgmr.msrb.gmra.mxu2 %v1741_v17  ;;  %v1085_v8 = vld [vmem:[#allocation2 + $0x48] sm:$0xf]  ;;  %v1566_v9 = vld [vmem:[#allocation2 + $0x54] sm:$0xf0]  ;;  %v1486_v11 = vor.u32 %v1666_v4, %v1485_v3  ;;  %v1279_v0 = vld [vmem:[#allocation2 + $0x1d8] sm:$0xf0] }
  0x4a   :  { %943 = vmatpush.bf16.msra.mxu2 %v1422_v21  ;;  %912 = vmatmul.bf16.vlgmr.msrb.gmra.mxu3 %v1743_v18  ;;  %v1213_v10 = vld [vmem:[#allocation2 + $0x148] sm:$0xf]  ;;  %v1598_v12 = vld [vmem:[#allocation2 + $0x154] sm:$0xf0]  ;;  %v1086_v19 = vor.u32 %v1566_v9, %v1085_v8  ;;  %v1644_v1 = vld [vmem:[#allocation2 + $0x2cc] sm:$0xf] }
  0x4b   :  { %956 = vmatpush.bf16.msra.mxu3 %v1550_v27  ;;  %v1341_v13 = vld [vmem:[#allocation2 + $0x248] sm:$0xf]  ;;  %v1630_v14 = vld [vmem:[#allocation2 + $0x254] sm:$0xf0]  ;;  %v1214_v20 = vor.u32 %v1598_v12, %v1213_v10  ;;  %v1407_v2 = vld [vmem:[#allocation2 + $0x2d8] sm:$0xf0] }
  0x4c   :  { %918 = vmatpush.bf16.msra.mxu0 %v1150_v33  ;;  %v1469_v15 = vld [vmem:[#allocation2 + $0x348] sm:$0xf]  ;;  %v1662_v16 = vld [vmem:[#allocation2 + $0x354] sm:$0xf0]  ;;  %v1342_v21 = vor.u32 %v1630_v14, %v1341_v13  ;;  %v1676_v3 = vld [vmem:[#allocation2 + $0x3cc] sm:$0xf] }
  0x4d   :  { %931 = vmatpush.bf16.msra.mxu1 %v1278_v34  ;;  %v1069_v22 = vld [vmem:[#allocation2 + $0x28] sm:$0xf]  ;;  %v1562_v23 = vld [vmem:[#allocation2 + $0x34] sm:$0xf0]  ;;  %v1470_v27 = vor.u32 %v1662_v16, %v1469_v15  ;;  %v1535_v4 = vld [vmem:[#allocation2 + $0x3d8] sm:$0xf0] }
  0x4e   :  { %944 = vmatpush.bf16.msra.mxu2 %v1406_v35  ;;  %v1197_v24 = vld [vmem:[#allocation2 + $0x128] sm:$0xf]  ;;  %v1594_v28 = vld [vmem:[#allocation2 + $0x134] sm:$0xf0]  ;;  %v1070_v33 = vor.u32 %v1562_v23, %v1069_v22  ;;  %v1576_v8 = vld [vmem:[#allocation2 + $0xac] sm:$0xf] }
  0x4f   :  { %957 = vmatpush.bf16.msra.mxu3 %v1534_v39  ;;  %v1325_v29 = vld [vmem:[#allocation2 + $0x228] sm:$0xf]  ;;  %v1626_v30 = vld [vmem:[#allocation2 + $0x234] sm:$0xf0]  ;;  %v1198_v36 = vor.u32 %v1594_v28, %v1197_v24  ;;  %v1135_v9 = vld [vmem:[#allocation2 + $0xb8] sm:$0xf0] }
  0x50   :  { %919 = vmatpush.bf16.msra.mxu0 %v1134_v45  ;;  %v1453_v31 = vld [vmem:[#allocation2 + $0x328] sm:$0xf]  ;;  %v1658_v32 = vld [vmem:[#allocation2 + $0x334] sm:$0xf0]  ;;  %v1326_v37 = vor.u32 %v1626_v30, %v1325_v29  ;;  %v1584_v45 = vld [vmem:[#allocation2 + $0xec] sm:$0xf] }
  0x51   :  { %932 = vmatpush.bf16.msra.mxu1 %v1262_v46  ;;  %v1053_v34 = vld [vmem:[#allocation2 + $0x8] sm:$0xf]  ;;  %v1558_v35 = vld [vmem:[#allocation2 + $0x14] sm:$0xf0]  ;;  %v1454_v41 = vor.u32 %v1658_v32, %v1453_v31  ;;  %v1167_v46 = vld [vmem:[#allocation2 + $0xf8] sm:$0xf0] }
  0x52   :  { %945 = vmatpush.bf16.msra.mxu2 %v1390_v47  ;;  %v1181_v38 = vld [vmem:[#allocation2 + $0x108] sm:$0xf]  ;;  %v1590_v39 = vld [vmem:[#allocation2 + $0x114] sm:$0xf0]  ;;  %v1616_v47 = vld [vmem:[#allocation2 + $0x1ec] sm:$0xf]  ;;  %v1054_v48 = vor.u32 %v1558_v35, %v1053_v34 }
  0x53   :  { %958 = vmatpush.bf16.msra.mxu3 %v1518_v51  ;;  %v1309_v40 = vld [vmem:[#allocation2 + $0x208] sm:$0xf]  ;;  %v1622_v42 = vld [vmem:[#allocation2 + $0x214] sm:$0xf0]  ;;  %v1423_v51 = vld [vmem:[#allocation2 + $0x2f8] sm:$0xf0]  ;;  %v1182_v52 = vor.u32 %v1590_v39, %v1181_v38 }
  0x54   :  { %920 = vmatpush.bf16.msra.mxu0 %v1118_v57  ;;  %v1437_v43 = vld [vmem:[#allocation2 + $0x308] sm:$0xf]  ;;  %v1654_v44 = vld [vmem:[#allocation2 + $0x314] sm:$0xf0]  ;;  %v1310_v53 = vor.u32 %v1622_v42, %v1309_v40  ;;  %v1170_v57 = vor.u32 %v1584_v45, %v1167_v46  ;;  %v1608_v10 = vld [vmem:[#allocation2 + $0x1ac] sm:$0xf] }
  0x55   :  { %933 = vmatpush.bf16.msra.mxu1 %v1246_v58  ;;  %v1438_v56 = vor.u32 %v1654_v44, %v1437_v43  ;;  %v1298_v58 = vor.u32 %v1616_v47, %v1295_v49  ;;  %v1263_v12 = vld [vmem:[#allocation2 + $0x1b8] sm:$0xf0]  ;;  %v1640_v13 = vld [vmem:[#allocation2 + $0x2ac] sm:$0xf] }
  0x56   :  { %946 = vmatpush.bf16.msra.mxu2 %v1374_v59  ;;  %v1426_v59 = vor.u32 %v1648_v50, %v1423_v51  ;;  %v1391_v14 = vld [vmem:[#allocation2 + $0x2b8] sm:$0xf0]  ;;  %v1672_v15 = vld [vmem:[#allocation2 + $0x3ac] sm:$0xf] }
  0x57   :  { %959 = vmatpush.bf16.msra.mxu3 %v1502_v63  ;;  %v1554_v63 = vor.u32 %v1680_v54, %v1551_v55  ;;  %v1519_v16 = vld [vmem:[#allocation2 + $0x3b8] sm:$0xf0]  ;;  %v1572_v22 = vld [vmem:[#allocation2 + $0x8c] sm:$0xf] }
  0x58   :  { %921 = vmatpush.bf16.msra.mxu0 %v1102_v5  ;;  %v1154_v5 = vor.u32 %v1580_v60, %v1151_v61  ;;  %v1119_v23 = vld [vmem:[#allocation2 + $0x98] sm:$0xf0]  ;;  %v1604_v24 = vld [vmem:[#allocation2 + $0x18c] sm:$0xf] }
  0x59   :  { %934 = vmatpush.bf16.msra.mxu1 %v1230_v6  ;;  %v1282_v6 = vor.u32 %v1612_v62, %v1279_v0  ;;  %v1247_v28 = vld [vmem:[#allocation2 + $0x198] sm:$0xf0]  ;;  %v1636_v29 = vld [vmem:[#allocation2 + $0x28c] sm:$0xf] }
  0x5a   :  { %947 = vmatpush.bf16.msra.mxu2 %v1358_v7  ;;  %v1410_v7 = vor.u32 %v1644_v1, %v1407_v2  ;;  %v1375_v30 = vld [vmem:[#allocation2 + $0x298] sm:$0xf0]  ;;  %v1668_v31 = vld [vmem:[#allocation2 + $0x38c] sm:$0xf]  ;;  %v1250_v34 = vor.u32 %v1604_v24, %v1247_v28 }
  0x5b   :  { %960 = vmatpush.bf16.msra.mxu3 %v1486_v11  ;;  %v1538_v11 = vor.u32 %v1676_v3, %v1535_v4  ;;  %v1503_v32 = vld [vmem:[#allocation2 + $0x398] sm:$0xf0]  ;;  %v1378_v35 = vor.u32 %v1636_v29, %v1375_v30  ;;  %v1600_v38 = vld [vmem:[#allocation2 + $0x16c] sm:$0xf] }
  0x5c   :  { %922 = vmatpush.bf16.msra.mxu0 %v1086_v19  ;;  %v1138_v19 = vor.u32 %v1576_v8, %v1135_v9  ;;  %v1506_v39 = vor.u32 %v1668_v31, %v1503_v32  ;;  %v1231_v40 = vld [vmem:[#allocation2 + $0x178] sm:$0xf0]  ;;  %v1664_v43 = vld [vmem:[#allocation2 + $0x36c] sm:$0xf] }
  0x5d   :  { %935 = vmatpush.bf16.msra.mxu1 %v1214_v20  ;;  %v1266_v20 = vor.u32 %v1608_v10, %v1263_v12  ;;  %v1359_v42 = vld [vmem:[#allocation2 + $0x278] sm:$0xf0]  ;;  %v1234_v46 = vor.u32 %v1600_v38, %v1231_v40  ;;  %v1596_v50 = vld [vmem:[#allocation2 + $0x14c] sm:$0xf] }
  0x5e   :  { %948 = vmatpush.bf16.msra.mxu2 %v1342_v21  ;;  %v1394_v21 = vor.u32 %v1640_v13, %v1391_v14  ;;  %v1487_v44 = vld [vmem:[#allocation2 + $0x378] sm:$0xf0]  ;;  %v1660_v55 = vld [vmem:[#allocation2 + $0x34c] sm:$0xf] }
  0x5f   :  { %961 = vmatpush.bf16.msra.mxu3 %v1470_v27  ;;  %v1522_v27 = vor.u32 %v1672_v15, %v1519_v16  ;;  %v1087_v49 = vld [vmem:[#allocation2 + $0x58] sm:$0xf0]  ;;  %v1490_v51 = vor.u32 %v1664_v43, %v1487_v44  ;;  %v1560_v60 = vld [vmem:[#allocation2 + $0x2c] sm:$0xf] }
  0x60   :  { %923 = vmatpush.bf16.msra.mxu0 %v1070_v33  ;;  %v1122_v33 = vor.u32 %v1572_v22, %v1119_v23  ;;  %v1343_v54 = vld [vmem:[#allocation2 + $0x258] sm:$0xf0]  ;;  %v1592_v62 = vld [vmem:[#allocation2 + $0x12c] sm:$0xf] }
  0x61   :  { %936 = vmatpush.bf16.msra.mxu1 %v1198_v36  ;;  %v1568_v36 = vld [vmem:[#allocation2 + $0x6c] sm:$0xf]  ;;  %v1071_v61 = vld [vmem:[#allocation2 + $0x38] sm:$0xf0] }
  0x62   :  { %949 = vmatpush.bf16.msra.mxu2 %v1326_v37  ;;  %v1103_v37 = vld [vmem:[#allocation2 + $0x78] sm:$0xf0]  ;;  %v1624_v1 = vld [vmem:[#allocation2 + $0x22c] sm:$0xf] }
  0x63   :  { %962 = vmatpush.bf16.msra.mxu3 %v1454_v41  ;;  %v1632_v41 = vld [vmem:[#allocation2 + $0x26c] sm:$0xf]  ;;  %v1106_v45 = vor.u32 %v1568_v36, %v1103_v37  ;;  %v1199_v0 = vld [vmem:[#allocation2 + $0x138] sm:$0xf0] }
  0x64   :  { %924 = vmatpush.bf16.msra.mxu0 %v1054_v48  ;;  %v1362_v47 = vor.u32 %v1632_v41, %v1359_v42  ;;  %v1564_v48 = vld [vmem:[#allocation2 + $0x4c] sm:$0xf]  ;;  %v1327_v2 = vld [vmem:[#allocation2 + $0x238] sm:$0xf0] }
  0x65   :  { %937 = vmatpush.bf16.msra.mxu1 %v1182_v52  ;;  %v1215_v52 = vld [vmem:[#allocation2 + $0x158] sm:$0xf0]  ;;  %v1656_v3 = vld [vmem:[#allocation2 + $0x32c] sm:$0xf] }
  0x66   :  { %950 = vmatpush.bf16.msra.mxu2 %v1310_v53  ;;  %v1628_v53 = vld [vmem:[#allocation2 + $0x24c] sm:$0xf]  ;;  %v1455_v4 = vld [vmem:[#allocation2 + $0x338] sm:$0xf0] }
  0x67   :  { %963 = vmatpush.bf16.msra.mxu3 %v1438_v56  ;;  %925 = vmatmul.bf16.vlgmr.msra.gmra.mxu0 %v1745_v25  ;;  %v1471_v56 = vld [vmem:[#allocation2 + $0x358] sm:$0xf0]  ;;  %v1556_v8 = vld [vmem:[#allocation2 + $0xc] sm:$0xf] }
  0x68   :  { %969 = vmatpush.bf16.msrb.mxu0 %v1170_v57  ;;  %938 = vmatmul.bf16.vlgmr.msra.gmra.mxu1 %v1747_v26  ;;  %v1090_v57 = vor.u32 %v1564_v48, %v1087_v49  ;;  %v1055_v9 = vld [vmem:[#allocation2 + $0x18] sm:$0xf0]  ;;  %v1588_v10 = vld [vmem:[#allocation2 + $0x10c] sm:$0xf] }
  0x69   :  { %982 = vmatpush.bf16.msrb.mxu1 %v1298_v58  ;;  %951 = vmatmul.bf16.vlgmr.msra.gmra.mxu2 %v1741_v17  ;;  %v1218_v58 = vor.u32 %v1596_v50, %v1215_v52  ;;  %v1183_v12 = vld [vmem:[#allocation2 + $0x118] sm:$0xf0]  ;;  %v1620_v13 = vld [vmem:[#allocation2 + $0x20c] sm:$0xf] }
  0x6a   :  { %995 = vmatpush.bf16.msrb.mxu2 %v1426_v59  ;;  %964 = vmatmul.bf16.vlgmr.msra.gmra.mxu3 %v1743_v18  ;;  %v1346_v59 = vor.u32 %v1628_v53, %v1343_v54  ;;  %v1311_v14 = vld [vmem:[#allocation2 + $0x218] sm:$0xf0]  ;;  %v1652_v15 = vld [vmem:[#allocation2 + $0x30c] sm:$0xf] }
  0x6b   :  { %1008 = vmatpush.bf16.msrb.mxu3 %v1554_v63  ;;  %v1474_v63 = vor.u32 %v1660_v55, %v1471_v56  ;;  %v1439_v16 = vld [vmem:[#allocation2 + $0x318] sm:$0xf0] }
  0x6c   :  { %970 = vmatpush.bf16.msrb.mxu0 %v1154_v5  ;;  %v1074_v5 = vor.u32 %v1560_v60, %v1071_v61  ;;  %v1442_v22 = vor.u32 %v1652_v15, %v1439_v16 }
  0x6d   :  { %983 = vmatpush.bf16.msrb.mxu1 %v1282_v6  ;;  %v1202_v6 = vor.u32 %v1592_v62, %v1199_v0 }
  0x6e   :  { %996 = vmatpush.bf16.msrb.mxu2 %v1410_v7  ;;  %v1330_v7 = vor.u32 %v1624_v1, %v1327_v2  ;;  %v1021_v2 = vld [vmem:[%s1772_s1] sm:$0xff] }
  0x6f   :  { %1009 = vmatpush.bf16.msrb.mxu3 %v1538_v11  ;;  %v1458_v11 = vor.u32 %v1656_v3, %v1455_v4 }
  0x70   :  { %971 = vmatpush.bf16.msrb.mxu0 %v1138_v19  ;;  %v1058_v19 = vor.u32 %v1556_v8, %v1055_v9 }
  0x71   :  { %984 = vmatpush.bf16.msrb.mxu1 %v1266_v20  ;;  %v1186_v20 = vor.u32 %v1588_v10, %v1183_v12 }
  0x72   :  { %997 = vmatpush.bf16.msrb.mxu2 %v1394_v21  ;;  %v1314_v21 = vor.u32 %v1620_v13, %v1311_v14 }
  0x73   :  { %1010 = vmatpush.bf16.msrb.mxu3 %v1522_v27 }
  0x74   :  { %972 = vmatpush.bf16.msrb.mxu0 %v1122_v33 }
  0x75   :  { %985 = vmatpush.bf16.msrb.mxu1 %v1250_v34 }
  0x76   :  { %998 = vmatpush.bf16.msrb.mxu2 %v1378_v35 }
  0x77   :  { %1011 = vmatpush.bf16.msrb.mxu3 %v1506_v39 }
  0x78   :  { %973 = vmatpush.bf16.msrb.mxu0 %v1106_v45 }
  0x79   :  { %986 = vmatpush.bf16.msrb.mxu1 %v1234_v46 }
  0x7a   :  { %999 = vmatpush.bf16.msrb.mxu2 %v1362_v47 }
  0x7b   :  { %1012 = vmatpush.bf16.msrb.mxu3 %v1490_v51 }
  0x7c   :  { %974 = vmatpush.bf16.msrb.mxu0 %v1090_v57 }
  0x7d   :  { %987 = vmatpush.bf16.msrb.mxu1 %v1218_v58 }
  0x7e   :  { %1000 = vmatpush.bf16.msrb.mxu2 %v1346_v59 }
  0x7f   :  { %1013 = vmatpush.bf16.msrb.mxu3 %v1474_v63 }
  0x80   :  { %975 = vmatpush.bf16.msrb.mxu0 %v1074_v5 }
  0x81   :  { %988 = vmatpush.bf16.msrb.mxu1 %v1202_v6 }
  0x82   :  { %1001 = vmatpush.bf16.msrb.mxu2 %v1330_v7 }
  0x83   :  { %1014 = vmatpush.bf16.msrb.mxu3 %v1458_v11 }
  0x84   :  { %976 = vmatpush.bf16.msrb.mxu0 %v1058_v19 }
  0x85   :  { %989 = vmatpush.bf16.msrb.mxu1 %v1186_v20 }
  0x86   :  { %1002 = vmatpush.bf16.msrb.mxu2 %v1314_v21 }
  0x87   :  { %1015 = vmatpush.bf16.msrb.mxu3 %v1442_v22  ;;  %977 = vmatmul.bf16.vlgmr.msrb.gmra.mxu0 %v1745_v25 }
  0x88   :  { %990 = vmatmul.bf16.vlgmr.msrb.gmra.mxu1 %v1747_v26 }
  0x89   :  { %1003 = vmatmul.bf16.vlgmr.msrb.gmra.mxu2 %v1741_v17 }
  0x8a   :  { %1016 = vmatmul.bf16.vlgmr.msrb.gmra.mxu3 %v1743_v18 }
  0xae   :  { %v822_v23 = vpop.f32.mrf.mxu0 }
  0xaf   :  { %v835_v24 = vpop.f32.mrf.mxu1 }
  0xb0   :  { %v836_v27 = vadd.f32 %v835_v24, %v822_v23 }
  0xb2   :  { %v848_v28 = vpop.f32.mrf.mxu2 }
  0xb3   :  { %v849_v29 = vadd.f32 %v848_v28, %v836_v27  ;;  %v861_v30 = vpop.f32.mrf.mxu3 }
  0xb5   :  { %v862_v31 = vadd.f32 %v861_v30, %v849_v29 }
  0xb6   :  { %v824_v32 = vpop.f32.mrf.mxu0 }
  0xb7   :  { %v837_v33 = vpop.f32.mrf.mxu1 }
  0xba   :  { %v850_v34 = vpop.f32.mrf.mxu2 }
  0xbb   :  { %v863_v35 = vpop.f32.mrf.mxu3 }
  0xc4   :  { %v874_v36 = vpop.f32.mrf.mxu0 }
  0xc5   :  { %v887_v37 = vpop.f32.mrf.mxu1 }
  0xc6   :  { %v888_v48 = vadd.f32 %v887_v37, %v874_v36 }
  0xcc   :  { %v900_v25 = vpop.f32.mrf.mxu2  ;;  %v876_v26 = vpop.f32.mrf.mxu0 }
  0xcd   :  { %v913_v38 = vpop.f32.mrf.mxu3  ;;  %v889_v39 = vpop.f32.mrf.mxu1  ;;  %v901_v52 = vadd.f32 %v900_v25, %v888_v48 }
  0xcf   :  { %v914_v55 = vadd.f32 %v913_v38, %v901_v52 }
  0xd1   :  { %v1026_v62 = vrot.slane %v914_v55, 6 }
  0xd3   :  { %v1030_v3 = vsel %vm1029_vm0, %v862_v31, %v1026_v62 }
  0xd4   :  { %v902_v17 = vpop.f32.mrf.mxu2 }
  0xd5   :  { %v915_v40 = vpop.f32.mrf.mxu3 }
  0xe4   :  { %v926_v18 = vpop.f32.mrf.mxu0 }
  0xe5   :  { %v939_v41 = vpop.f32.mrf.mxu1 }
  0xe6   :  { %v940_v49 = vadd.f32 %v939_v41, %v926_v18 }
  0xec   :  { %v952_v42 = vpop.f32.mrf.mxu2  ;;  %v928_v44 = vpop.f32.mrf.mxu0 }
  0xed   :  { %v965_v43 = vpop.f32.mrf.mxu3  ;;  %v941_v45 = vpop.f32.mrf.mxu1  ;;  %v953_v53 = vadd.f32 %v952_v42, %v940_v49 }
  0xef   :  { %v966_v57 = vadd.f32 %v965_v43, %v953_v53 }
  0xf1   :  { %v1027_v0 = vrot.slane %v966_v57, 4 }
  0xf4   :  { %v954_v46 = vpop.f32.mrf.mxu2 }
  0xf5   :  { %v967_v47 = vpop.f32.mrf.mxu3 }
 0x104   :  { %v978_v50 = vpop.f32.mrf.mxu0 }
 0x105   :  { %v991_v51 = vpop.f32.mrf.mxu1 }
 0x106   :  { %v992_v54 = vadd.f32 %v991_v51, %v978_v50 }
 0x10c   :  { %v1004_v56 = vpop.f32.mrf.mxu2  ;;  %v980_v60 = vpop.f32.mrf.mxu0 }
 0x10d   :  { %v1005_v58 = vadd.f32 %v1004_v56, %v992_v54  ;;  %v1017_v59 = vpop.f32.mrf.mxu3  ;;  %v993_v61 = vpop.f32.mrf.mxu1 }
 0x10f   :  { %v1018_v63 = vadd.f32 %v1017_v59, %v1005_v58 }
 0x111   :  { %v1028_v1 = vrot.slane %v1018_v63, 2 }
 0x113   :  { %v1032_v4 = vsel %vm1031_vm1, %v1027_v0, %v1028_v1 }
 0x114   :  { %v1034_v5 = vsel %vm1033_vm2, %v1030_v3, %v1032_v4  ;;  %v1006_v6 = vpop.f32.mrf.mxu2 }
 0x115   :  { %v1036_v7 = vadd.f32 %v1034_v5, %v1021_v2  ;;  %v1019_v8 = vpop.f32.mrf.mxu3 }
 0x117   :  { %1037 = vst [vmem:[%s1774_s3] sm:$0xff] %v1036_v7 }
 0x118   :  { %1042 = vsyncpa [#allocation3], 1 }

// kernel: llama_decoder_layer.7
= control target key start
LH: loop header
LB: loop body
LE: loop exit
PB: predicated region body
PF: predicated region fallthrough
CT: control target
= control target key end

     0   :  { %s6685_s0 = inlined_call_operand.vmem [shape: f32[2,512], index: 0, kind: input, shape index: {}]   ;;  %s6686_s1 = inlined_call_operand.vmem [shape: f32[1,512], index: 1, kind: input, shape index: {}]   ;;  %s6687_s2 = inlined_call_operand.hbm [shape: bf16[512,1024], index: 2, kind: input, shape index: {}]   ;;  %s6688_s3 = inlined_call_operand.hbm [shape: bf16[512,1024], index: 3, kind: input, shape index: {}]   ;;  %s6689_s4 = inlined_call_operand.hbm [shape: bf16[1024,512], index: 4, kind: input, shape index: {}]   ;;  %s6690_s5 = inlined_call_operand.vmem [shape: f32[2,512], index: 5, kind: output, shape index: {}]  }
   0x1   :  { %6691 = sst [smem:[#allocation10_spill]] %s6688_s3 }
   0x2   :  { %10 = vsyncpa [#allocation3], 0 }
   0x3   :  { %12 = vsyncpa [#allocation3 + $0x1], 0 }
   0x4   :  { %13 = vsyncpa [#allocation5], 0 }
   0x5   :  { %15 = vsyncpa [#allocation5 + $0x1], 0  ;;  %s5639_s18 = smov 0   ;;  %s5641_s19 = smov 0  }
   0x6   :  { %s5643_s20 = smov 0   ;;  %s5645_s21 = smov 0  }
   0x7 LB: > { %s5658_s22 = sadd.s32 4294967295, %s5602_s21   ;;  %s5661_s23 = sadd.s32 1, %s5602_s21   ;;  %s5602_s21 = sphi %s5645_s21, %s6701_s21   ;;  %s5598_s20 = sphi %s5643_s20, %s6700_s20   ;;  %s5594_s19 = sphi %s5641_s19, %s6699_s19   ;;  %s5590_s18 = sphi %s5639_s18, %s6698_s18  }
   0x8   : > { %s67_s24 = ssub.s32 %s5602_s21, %s5661_s23  ;;  %s70_s25 = sadd.s32 1, %s5598_s20 }
   0x9   : > { %p68_p0 = scmp.eq.s32.totalorder %s67_s24, 0  ;;  %p77_p1 = scmp.ne.s32.totalorder %s5598_s20, %s5594_s19 }
   0xa   : > { %p78_p2 = scmp.eq.s32.totalorder %s5602_s21, 0  ;;  %p83_p3 = scmp.ne.s32.totalorder %s5594_s19, %s5590_s18 }
   0xb   : > { %s5671_s26 = scalar_select %p68_p0, %s5598_s20, %s70_s25  }
   0xc   : > { %p79_p4 = por %p78_p2, %p77_p1  ;;  %p84_p5 = scmp.eq.s32.totalorder %s5658_s22, 0 }
   0xd   : > { %6692 = sst [smem:[#allocation9_spill]] %s5671_s26  ;;  %p5416_p6 = scmp.lt.s32.totalorder %s5602_s21, 2 }
   0xe   : > { %p5675_p7 = por %p84_p5, %p83_p3  ;;  %s186_s28 = sand.u32 1, %s5598_s20  }
   0xf   : > { %s5682_s29 = sshll.u32 %s186_s28, 10  ;;  %s5012_s30 = sshll.u32 %s5602_s21, 4 }
  0x10   : > { %p5685_p8 = pnand %p5416_p6, %p79_p4  ;;  %s208_s7 = sand.u32 1, %s5602_s21  }
  0x11   : > { %s6695_s3 = sld [smem:[#allocation10_spill]]  ;;  %s212_s11 = scalar_lea.vmem [#allocation4], %s5682_s29 }
  0x12   : > { %s220_s12 = sshll.u32 %s212_s11, 4  ;;  %p3469_p9 = scmp.ge.s32.totalorder %s5602_s21, 1  ;;  %s221_s12 = int_to_ptr.vmem [resolvable:$true] %s220_s12 }
  0x13   : > { %s5697_s14 = scalar_lea.sflag [#allocation5], %s208_s7  ;;  %p5478_p11 = pneg %p5685_p8 }
  0x17   : > { %s217_s10 = scalar_lea.hbm %s6695_s3, %s5012_s30  ;;  %s5481_s24 = scalar_lea.hbm %s6695_s3, 2048 }
  0x18   : > { %s218_s13 = sshll.u32 %s217_s10, 4  ;;  %s219_s13 = int_to_ptr.hbm [resolvable:$true] %s218_s13 }
  0x19   : > { %s5474_s15 = sshra.s32 %s219_s13, 4  ;;  %s5475_s15 = int_to_ptr.hbm [resolvable:$true] %s5474_s15 }
  0x1a   : > { %s5476_s16 = scalar_lea.hbm %s5475_s15, 1024  ;;  %p5482_p0 = scmp.lt.s32.totalorder %s5475_s15, %s6695_s3 }
  0x1b   : > { %p5477_p10 = scmp.ne.s32.totalorder %s5475_s15, %s5476_s16  ;;  %p5483_p1 = scmp.lt.s32.totalorder %s5481_s24, %s5476_s16 }
  0x1d   : > { %p5479_p12 = pnand %p5478_p11, %p5477_p10  ;;  %p5484_p2 = por %p5483_p1, %p5482_p0 }
  0x1f   : > { %p5480_p13 = pneg %p5479_p12 }
  0x21   : > { %p5485_p3 = pnand %p5484_p2, %p5480_p13 }
  0x23   : > { %5488 = shalt.err (!%p5485_p3)
}
  0x24   : > { %s5604_s7 = smov 512   ;;  %s5605_s9 = smov 256  }
  0x25   : > { %s5606_s10 = smov 16   ;;  %p251_p4 = scmp.lt.s32.totalorder %s5602_s21, 3 }
  0x26   : > { %5412 = dma.hbm_to_vmem [thread:$0]  (!%p5685_p8), %s219_s13, 16384, %s221_s12, %s5697_s14, %s5604_s7, %s5605_s9, %s5606_s10  }
  0x27   : > { %s195_s16 = scalar_lea.hbm %s6687_s2, %s5012_s30  ;;  %p5724_p5 = pnand %p3469_p9, %p251_p4 }
  0x28   : > { %s196_s18 = sshll.u32 %s195_s16, 4  ;;  %s190_s24 = scalar_lea.vmem [#allocation2], %s5682_s29  ;;  %s197_s18 = int_to_ptr.hbm [resolvable:$true] %s196_s18 }
  0x29   : > { %s198_s25 = sshll.u32 %s190_s24, 4  ;;  %s187_s8 = scalar_lea.sflag [#allocation3], %s186_s28  ;;  %s199_s25 = int_to_ptr.vmem [resolvable:$true] %s198_s25 }
  0x2a   : > { %s5504_s3 = sshra.s32 %s197_s18, 4  ;;  %s5511_s11 = scalar_lea.hbm %s6687_s2, 2048  ;;  %s5505_s3 = int_to_ptr.hbm [resolvable:$true] %s5504_s3 }
  0x2b   : > { %s5506_s12 = scalar_lea.hbm %s5505_s3, 1024  ;;  %p5512_p9 = scmp.lt.s32.totalorder %s5505_s3, %s6687_s2 }
  0x2c   : > { %p5507_p6 = scmp.ne.s32.totalorder %s5505_s3, %s5506_s12  ;;  %p5513_p13 = scmp.lt.s32.totalorder %s5511_s11, %s5506_s12 }
  0x2e   : > { %p5509_p10 = pnand %p5507_p6, %p5478_p11  ;;  %p5514_p0 = por %p5513_p13, %p5512_p9 }
  0x30   : > { %p5510_p12 = pneg %p5509_p10 }
  0x32   : > { %p5515_p1 = pnand %p5514_p0, %p5510_p12 }
  0x34   : > { %5518 = shalt.err (!%p5515_p1)
}
  0x35   : > { %5409 = dma.hbm_to_vmem [thread:$0]  (!%p5685_p8), %s197_s18, 16384, %s199_s25, %s187_s8, %s5604_s7, %s5605_s9, %s5606_s10  }
  0x36   : > { %s5015_s28 = sshll.u32 %s5602_s21, 10  ;;  %s234_s24 = scalar_lea.vmem [#allocation6], %s5682_s29 }
  0x37   : > { %s243_s30 = sshll.u32 %s234_s24, 4  ;;  %s240_s3 = scalar_lea.hbm %s6689_s4, %s5015_s28  ;;  %s244_s30 = int_to_ptr.vmem [resolvable:$true] %s243_s30 }
  0x38   : > { %s241_s12 = sshll.u32 %s240_s3, 4  ;;  %s5541_s21 = scalar_lea.hbm %s6689_s4, 2048  ;;  %s242_s12 = int_to_ptr.hbm [resolvable:$true] %s241_s12 }
  0x39   : > { %s5534_s11 = sshra.s32 %s242_s12, 4  ;;  %s5535_s11 = int_to_ptr.hbm [resolvable:$true] %s5534_s11 }
  0x3a   : > { %s5536_s15 = scalar_lea.hbm %s5535_s11, 1024  ;;  %p5542_p6 = scmp.lt.s32.totalorder %s5535_s11, %s6689_s4 }
  0x3b   : > { %p5537_p2 = scmp.ne.s32.totalorder %s5535_s11, %s5536_s15  ;;  %p5543_p10 = scmp.lt.s32.totalorder %s5541_s21, %s5536_s15 }
  0x3d   : > { %p5539_p3 = pnand %p5537_p2, %p5478_p11  ;;  %p5544_p12 = por %p5543_p10, %p5542_p6 }
  0x3f   : > { %p5540_p4 = pneg %p5539_p3 }
  0x41   : > { %p5545_p9 = pnand %p5544_p12, %p5540_p4 }
  0x43   : > { %5548 = shalt.err (!%p5545_p9)
}
  0x44   : > { %5415 = dma.hbm_to_vmem [thread:$0]  (!%p5685_p8), %s242_s12, 16384, %s244_s30, %s5697_s14, %s5605_s9, %s5605_s9, %s5606_s10  }
  0x45   : > { %255 = sbr.rel (%p5724_p5) target bundleno = 801 (0x321), region = 40  ;;  %s257_s26 = sand.u32 (!%p5724_p5), 1, %s5594_s19  }
  0x46   : > { %s3470_s25 = sshll.u32 (!%p5724_p5), %s257_s26, 10  ;;  %s258_s8 = scalar_lea.sflag (!%p5724_p5), [#allocation3], %s257_s26 }
  0x47   : > { %s5768_s28 = scalar_lea.vmem (!%p5724_p5), [#allocation2], %s3470_s25 }
  0x4a   : > { %5581 = dma.done.wait (%p5675_p7), %s258_s8, 16384  }
  0x4b   : > { %5583 = vsyncadd (%p5675_p7), %s258_s8, 4294950912  ;;  %s267_s6 = sand.u32 1, %s5658_s22   ;;  %s5775_s14 = scalar_lea.vmem [#allocation4], %s3470_s25 }
  0x4c   : > { %s268_s24 = scalar_lea.sflag [#allocation5], %s267_s6 }
  0x4d   : > { %5585 = dma.done.wait (%p5675_p7), %s268_s24, 32768  }
  0x4e   : > { %5587 = vsyncadd (%p5675_p7), %s268_s24, 4294934528  ;;  %v5784_v0 = vld [vmem:[%s6685_s0] sm:$0xff]  ;;  %s5786_s17 = scalar_lea.vmem [#allocation6], %s3470_s25  ;;  %p3473_p8 = scmp.ne.s32.totalorder %s5658_s22, 0 }
  0x50   : > { %321 = sbr.rel (%p3473_p8) target bundleno = 86 (0x56), region = 56 }
  0x55   : > { %322 = vst [vmem:[%s6690_s5] sm:$0xff] %v5784_v0 }
  0x56 PF: > { %v323_v1 = vmul.f32 %v5784_v0, %v5784_v0  ;;  %vm334_vm0 = vcmask 1041408   ;;  %v3588_v2 = vld [vmem:[%s5768_s28 + $0xe0] sm:$0xf]  ;;  %v5046_v3 = vld [vmem:[%s5768_s28 + $0xec] sm:$0xf0]  ;;  %vm380_vm3 = vcmask 1045508  }
  0x57   : > { %v3589_v4 = vor.u32 %v5046_v3, %v3588_v2  ;;  %v3716_v5 = vld [vmem:[%s5768_s28 + $0x1e0] sm:$0xf]  ;;  %v5078_v6 = vld [vmem:[%s5768_s28 + $0x1ec] sm:$0xf0]  ;;  %vm382_vm6 = vcmask 1043456  }
  0x58   : > { %v3844_v7 = vld [vmem:[%s5768_s28 + $0x2e0] sm:$0xf]  ;;  %325 = vst [vmem:[#allocation1] ss:$4 sm:$0xff] %v323_v1  ;;  %v3717_v8 = vor.u32 %v5078_v6, %v3716_v5  ;;  %v5110_v9 = vld [vmem:[%s5768_s28 + $0x2ec] sm:$0xf0] }
  0x59   : > { %v3972_v10 = vld [vmem:[%s5768_s28 + $0x3e0] sm:$0xf]  ;;  %1168 = vmatpush.bf16.msra.mxu0 %v3589_v4  ;;  %v3845_v11 = vor.u32 %v5110_v9, %v3844_v7  ;;  %v5142_v12 = vld [vmem:[%s5768_s28 + $0x3ec] sm:$0xf0] }
  0x5a   : > { %v3572_v13 = vld [vmem:[%s5768_s28 + $0xc0] sm:$0xf]  ;;  %v5042_v14 = vld [vmem:[%s5768_s28 + $0xcc] sm:$0xf0]  ;;  %1181 = vmatpush.bf16.msra.mxu1 %v3717_v8  ;;  %v3973_v15 = vor.u32 %v5142_v12, %v3972_v10 }
  0x5b   : > { %v3573_v16 = vor.u32 %v5042_v14, %v3572_v13  ;;  %v3700_v17 = vld [vmem:[%s5768_s28 + $0x1c0] sm:$0xf]  ;;  %v5074_v18 = vld [vmem:[%s5768_s28 + $0x1cc] sm:$0xf0]  ;;  %1194 = vmatpush.bf16.msra.mxu2 %v3845_v11 }
  0x5c   : > { %v3828_v19 = vld [vmem:[%s5768_s28 + $0x2c0] sm:$0xf]  ;;  %v3701_v20 = vor.u32 %v5074_v18, %v3700_v17  ;;  %v5106_v21 = vld [vmem:[%s5768_s28 + $0x2cc] sm:$0xf0]  ;;  %1207 = vmatpush.bf16.msra.mxu3 %v3973_v15 }
  0x5d   : > { %v3956_v22 = vld [vmem:[%s5768_s28 + $0x3c0] sm:$0xf]  ;;  %v5138_v23 = vld [vmem:[%s5768_s28 + $0x3cc] sm:$0xf0]  ;;  %v3829_v24 = vor.u32 %v5106_v21, %v3828_v19  ;;  %1169 = vmatpush.bf16.msra.mxu0 %v3573_v16 }
  0x5e   : > { %v3957_v25 = vor.u32 %v5138_v23, %v3956_v22  ;;  %v3556_v26 = vld [vmem:[%s5768_s28 + $0xa0] sm:$0xf]  ;;  %v5038_v27 = vld [vmem:[%s5768_s28 + $0xac] sm:$0xf0]  ;;  %1182 = vmatpush.bf16.msra.mxu1 %v3701_v20 }
  0x5f   : > { %v3684_v28 = vld [vmem:[%s5768_s28 + $0x1a0] sm:$0xf]  ;;  %v3557_v29 = vor.u32 %v5038_v27, %v3556_v26  ;;  %v5070_v30 = vld [vmem:[%s5768_s28 + $0x1ac] sm:$0xf0]  ;;  %1195 = vmatpush.bf16.msra.mxu2 %v3829_v24 }
  0x60   : > { %v3812_v31 = vld [vmem:[%s5768_s28 + $0x2a0] sm:$0xf]  ;;  %v5102_v32 = vld [vmem:[%s5768_s28 + $0x2ac] sm:$0xf0]  ;;  %v3685_v33 = vor.u32 %v5070_v30, %v3684_v28  ;;  %1208 = vmatpush.bf16.msra.mxu3 %v3957_v25 }
  0x61   : > { %v3940_v34 = vld [vmem:[%s5768_s28 + $0x3a0] sm:$0xf]  ;;  %v5134_v35 = vld [vmem:[%s5768_s28 + $0x3ac] sm:$0xf0]  ;;  %v3813_v39 = vor.u32 %v5102_v32, %v3812_v31  ;;  %1170 = vmatpush.bf16.msra.mxu0 %v3557_v29 }
  0x62   : > { %v3540_v36 = vld [vmem:[%s5768_s28 + $0x80] sm:$0xf]  ;;  %v326_v37 = vld.sshfl [vmem:[#allocation1] sm:$0xff pattern:$0x73625140]  ;;  %v3941_v42 = vor.u32 %v5134_v35, %v3940_v34  ;;  %1183 = vmatpush.bf16.msra.mxu1 %v3685_v33  ;;  %v5607_v33 = vmov 512.0  }
  0x63   : > { %v327_v38 = vld.sshfl [vmem:[#allocation1 + $0x8] sm:$0xff pattern:$0x73625140]  ;;  %v328_v40 = vld.sshfl [vmem:[#allocation1 + $0x10] sm:$0xff pattern:$0x73625140]  ;;  %1196 = vmatpush.bf16.msra.mxu2 %v3813_v39  ;;  %5454 = vrcp.f32 %v5607_v33 }
  0x64   : > { %v329_v41 = vld.sshfl [vmem:[#allocation1 + $0x18] sm:$0xff pattern:$0x73625140]  ;;  %v335_v43 = vsel %vm334_vm0, %v326_v37, 0.0  ;;  %v336_v44 = vsel %vm334_vm0, %v327_v38, 0.0  ;;  %v338_v45 = vsel %vm334_vm0, %v328_v40, 0.0  ;;  %1209 = vmatpush.bf16.msra.mxu3 %v3941_v42 }
  0x65   : > { %v340_v46 = vsel %vm334_vm0, %v329_v41, 0.0  ;;  %v5034_v47 = vld [vmem:[%s5768_s28 + $0x8c] sm:$0xf0]  ;;  %v337_v48 = vadd.f32 %v336_v44, %v335_v43  ;;  %v3668_v50 = vld [vmem:[%s5768_s28 + $0x180] sm:$0xf] }
  0x66   : > { %v3541_v49 = vor.u32 %v5034_v47, %v3540_v36  ;;  %v5066_v51 = vld [vmem:[%s5768_s28 + $0x18c] sm:$0xf0]  ;;  %v3796_v52 = vld [vmem:[%s5768_s28 + $0x280] sm:$0xf]  ;;  %v5128_v33 = vld [vmem:[%s5768_s28 + $0x384] sm:$0xf] }
  0x67   : > { %v3669_v53 = vor.u32 %v5066_v51, %v3668_v50  ;;  %v5098_v54 = vld [vmem:[%s5768_s28 + $0x28c] sm:$0xf0]  ;;  %v3924_v55 = vld [vmem:[%s5768_s28 + $0x380] sm:$0xf]  ;;  %v339_v57 = vadd.f32 %v338_v45, %v337_v48  ;;  %v3590_v48 = vld [vmem:[%s5768_s28 + $0xf0] sm:$0xf0] }
  0x68   : > { %v5130_v56 = vld [vmem:[%s5768_s28 + $0x38c] sm:$0xf0]  ;;  %v3797_v58 = vor.u32 %v5098_v54, %v3796_v52  ;;  %v3524_v60 = vld [vmem:[%s5768_s28 + $0x60] sm:$0xf]  ;;  %1171 = vmatpush.bf16.msra.mxu0 %v3541_v49  ;;  %v5076_v49 = vld [vmem:[%s5768_s28 + $0x1e4] sm:$0xf] }
  0x69   : > { %v3925_v59 = vor.u32 %v5130_v56, %v3924_v55  ;;  %v5030_v61 = vld [vmem:[%s5768_s28 + $0x6c] sm:$0xf0]  ;;  %v3652_v62 = vld [vmem:[%s5768_s28 + $0x160] sm:$0xf]  ;;  %v341_v4 = vadd.f32 %v340_v46, %v339_v57  ;;  %1184 = vmatpush.bf16.msra.mxu1 %v3669_v53  ;;  %v5044_v46 = vld [vmem:[%s5768_s28 + $0xe4] sm:$0xf]  ;;  %v5870_v56 = vpop.eup %5454 }
  0x6a   : > { %v3525_v63 = vor.u32 %v5030_v61, %v3524_v60  ;;  %v5062_v1 = vld [vmem:[%s5768_s28 + $0x16c] sm:$0xf0]  ;;  %v3780_v2 = vld [vmem:[%s5768_s28 + $0x260] sm:$0xf]  ;;  %1197 = vmatpush.bf16.msra.mxu2 %v3797_v58  ;;  %v3718_v50 = vld [vmem:[%s5768_s28 + $0x1f0] sm:$0xf0]  ;;  %v3593_v51 = vor.u32 %v5044_v46, %v3590_v48  ;;  %vm349_vm1 = vweird.f32 %v5870_v56 }
  0x6b   : > { %v5094_v3 = vld [vmem:[%s5768_s28 + $0x26c] sm:$0xf0]  ;;  %v3653_v5 = vor.u32 %v5062_v1, %v3652_v62  ;;  %v3908_v6 = vld [vmem:[%s5768_s28 + $0x360] sm:$0xf]  ;;  %342 = vadd.xlane.f32.xlu0 %v341_v4  ;;  %1210 = vmatpush.bf16.msra.mxu3 %v3925_v59  ;;  %v3721_v52 = vor.u32 %v5076_v49, %v3718_v50  ;;  %v5108_v53 = vld [vmem:[%s5768_s28 + $0x2e4] sm:$0xf] }
  0x6c   : > { %v5126_v7 = vld [vmem:[%s5768_s28 + $0x36c] sm:$0xf0]  ;;  %v3781_v8 = vor.u32 %v5094_v3, %v3780_v2  ;;  %1172 = vmatpush.bf16.msra.mxu0 %v3525_v63  ;;  %v3508_v10 = vld [vmem:[%s5768_s28 + $0x40] sm:$0xf]  ;;  %v3846_v54 = vld [vmem:[%s5768_s28 + $0x2f0] sm:$0xf0] }
  0x6d   : > { %v3909_v9 = vor.u32 %v5126_v7, %v3908_v6  ;;  %1185 = vmatpush.bf16.msra.mxu1 %v3653_v5  ;;  %v5026_v11 = vld [vmem:[%s5768_s28 + $0x4c] sm:$0xf0]  ;;  %v3636_v12 = vld [vmem:[%s5768_s28 + $0x140] sm:$0xf]  ;;  %v5140_v55 = vld [vmem:[%s5768_s28 + $0x3e4] sm:$0xf]  ;;  %v3849_v57 = vor.u32 %v5108_v53, %v3846_v54 }
  0x6e   : > { %1198 = vmatpush.bf16.msra.mxu2 %v3781_v8  ;;  %v3509_v13 = vor.u32 %v5026_v11, %v3508_v10  ;;  %v5058_v14 = vld [vmem:[%s5768_s28 + $0x14c] sm:$0xf0]  ;;  %v3764_v15 = vld [vmem:[%s5768_s28 + $0x240] sm:$0xf]  ;;  %v3974_v58 = vld [vmem:[%s5768_s28 + $0x3f0] sm:$0xf0] }
  0x6f   : > { %1211 = vmatpush.bf16.msra.mxu3 %v3909_v9  ;;  %v5090_v16 = vld [vmem:[%s5768_s28 + $0x24c] sm:$0xf0]  ;;  %v3637_v17 = vor.u32 %v5058_v14, %v3636_v12  ;;  %v3892_v19 = vld [vmem:[%s5768_s28 + $0x340] sm:$0xf]  ;;  %v5040_v59 = vld [vmem:[%s5768_s28 + $0xc4] sm:$0xf]  ;;  %v3977_v61 = vor.u32 %v5140_v55, %v3974_v58 }
  0x70   : > { %v3765_v18 = vor.u32 %v5090_v16, %v3764_v15  ;;  %v5122_v20 = vld [vmem:[%s5768_s28 + $0x34c] sm:$0xf0]  ;;  %1173 = vmatpush.bf16.msra.mxu0 %v3509_v13  ;;  %v3492_v22 = vld [vmem:[%s5768_s28 + $0x20] sm:$0xf]  ;;  %v3574_v60 = vld [vmem:[%s5768_s28 + $0xd0] sm:$0xf0] }
  0x71   : > { %v3893_v21 = vor.u32 %v5122_v20, %v3892_v19  ;;  %1186 = vmatpush.bf16.msra.mxu1 %v3637_v17  ;;  %v5022_v23 = vld [vmem:[%s5768_s28 + $0x2c] sm:$0xf0]  ;;  %v3620_v24 = vld [vmem:[%s5768_s28 + $0x120] sm:$0xf]  ;;  %v3577_v62 = vor.u32 %v5040_v59, %v3574_v60  ;;  %v5072_v63 = vld [vmem:[%s5768_s28 + $0x1c4] sm:$0xf] }
  0x72   : > { %1199 = vmatpush.bf16.msra.mxu2 %v3765_v18  ;;  %v3493_v25 = vor.u32 %v5022_v23, %v3492_v22  ;;  %v5054_v26 = vld [vmem:[%s5768_s28 + $0x12c] sm:$0xf0]  ;;  %v3748_v27 = vld [vmem:[%s5768_s28 + $0x220] sm:$0xf]  ;;  %v3702_v1 = vld [vmem:[%s5768_s28 + $0x1d0] sm:$0xf0] }
  0x73   : > { %1212 = vmatpush.bf16.msra.mxu3 %v3893_v21  ;;  %v5086_v28 = vld [vmem:[%s5768_s28 + $0x22c] sm:$0xf0]  ;;  %v3621_v29 = vor.u32 %v5054_v26, %v3620_v24  ;;  %v3876_v31 = vld [vmem:[%s5768_s28 + $0x320] sm:$0xf]  ;;  %v5104_v2 = vld [vmem:[%s5768_s28 + $0x2c4] sm:$0xf]  ;;  %v3705_v3 = vor.u32 %v5072_v63, %v3702_v1 }
  0x74   : > { %v3749_v30 = vor.u32 %v5086_v28, %v3748_v27  ;;  %v5118_v32 = vld [vmem:[%s5768_s28 + $0x32c] sm:$0xf0]  ;;  %1174 = vmatpush.bf16.msra.mxu0 %v3493_v25  ;;  %v3476_v35 = vld [vmem:[%s5768_s28] sm:$0xf]  ;;  %v3830_v4 = vld [vmem:[%s5768_s28 + $0x2d0] sm:$0xf0] }
  0x75   : > { %v3877_v34 = vor.u32 %v5118_v32, %v3876_v31  ;;  %1187 = vmatpush.bf16.msra.mxu1 %v3621_v29  ;;  %v5018_v36 = vld [vmem:[%s5768_s28 + $0xc] sm:$0xf0]  ;;  %v3604_v37 = vld [vmem:[%s5768_s28 + $0x100] sm:$0xf]  ;;  %v5136_v5 = vld [vmem:[%s5768_s28 + $0x3c4] sm:$0xf]  ;;  %v3833_v8 = vor.u32 %v5104_v2, %v3830_v4 }
  0x76   : > { %1200 = vmatpush.bf16.msra.mxu2 %v3749_v30  ;;  %v3477_v38 = vor.u32 %v5018_v36, %v3476_v35  ;;  %v5050_v39 = vld [vmem:[%s5768_s28 + $0x10c] sm:$0xf0]  ;;  %v3732_v40 = vld [vmem:[%s5768_s28 + $0x200] sm:$0xf]  ;;  %v3958_v6 = vld [vmem:[%s5768_s28 + $0x3d0] sm:$0xf0] }
  0x77   : > { %1213 = vmatpush.bf16.msra.mxu3 %v3877_v34  ;;  %v5082_v41 = vld [vmem:[%s5768_s28 + $0x20c] sm:$0xf0]  ;;  %v3605_v42 = vor.u32 %v5050_v39, %v3604_v37  ;;  %v3860_v44 = vld [vmem:[%s5768_s28 + $0x300] sm:$0xf]  ;;  %v345_v7 = vmul.f32 512.0, %v5870_v56  ;;  %v3961_v9 = vor.u32 %v5136_v5, %v3958_v6 }
  0x78   : > { %v3733_v43 = vor.u32 %v5082_v41, %v3732_v40  ;;  %v5114_v45 = vld [vmem:[%s5768_s28 + $0x30c] sm:$0xf0]  ;;  %1175 = vmatpush.bf16.msra.mxu0 %v3477_v38  ;;  %v5036_v10 = vld [vmem:[%s5768_s28 + $0xa4] sm:$0xf]  ;;  %v3558_v11 = vld [vmem:[%s5768_s28 + $0xb0] sm:$0xf0] }
  0x79   : > { %v3861_v47 = vor.u32 %v5114_v45, %v3860_v44  ;;  %1188 = vmatpush.bf16.msra.mxu1 %v3605_v42  ;;  %v5068_v12 = vld [vmem:[%s5768_s28 + $0x1a4] sm:$0xf]  ;;  %v3561_v13 = vor.u32 %v5036_v10, %v3558_v11  ;;  %v3686_v14 = vld [vmem:[%s5768_s28 + $0x1b0] sm:$0xf0]  ;;  %v346_v21 = vsub.f32 1.0, %v345_v7 }
  0x7a   : > { %1201 = vmatpush.bf16.msra.mxu2 %v3733_v43  ;;  %v5100_v15 = vld [vmem:[%s5768_s28 + $0x2a4] sm:$0xf]  ;;  %v3814_v16 = vld [vmem:[%s5768_s28 + $0x2b0] sm:$0xf0]  ;;  %v3689_v17 = vor.u32 %v5068_v12, %v3686_v14 }
  0x7b   : > { %1214 = vmatpush.bf16.msra.mxu3 %v3861_v47  ;;  %v3817_v18 = vor.u32 %v5100_v15, %v3814_v16  ;;  %v5132_v19 = vld [vmem:[%s5768_s28 + $0x3a4] sm:$0xf]  ;;  %v3942_v20 = vld [vmem:[%s5768_s28 + $0x3b0] sm:$0xf0]  ;;  %v347_v30 = vmul.f32 %v5870_v56, %v346_v21 }
  0x7c   : > { %1220 = vmatpush.bf16.msrb.mxu0 %v3593_v51  ;;  %v3945_v22 = vor.u32 %v5132_v19, %v3942_v20  ;;  %v5032_v23 = vld [vmem:[%s5768_s28 + $0x84] sm:$0xf]  ;;  %v3542_v24 = vld [vmem:[%s5768_s28 + $0x90] sm:$0xf0] }
  0x7d   : > { %1233 = vmatpush.bf16.msrb.mxu1 %v3721_v52  ;;  %v5064_v25 = vld [vmem:[%s5768_s28 + $0x184] sm:$0xf]  ;;  %v3545_v26 = vor.u32 %v5032_v23, %v3542_v24  ;;  %v3670_v27 = vld [vmem:[%s5768_s28 + $0x190] sm:$0xf0]  ;;  %v348_v42 = vadd.f32 %v5870_v56, %v347_v30 }
  0x7e   : > { %1246 = vmatpush.bf16.msrb.mxu2 %v3849_v57  ;;  %v5096_v28 = vld [vmem:[%s5768_s28 + $0x284] sm:$0xf]  ;;  %v3798_v29 = vld [vmem:[%s5768_s28 + $0x290] sm:$0xf0]  ;;  %v3673_v31 = vor.u32 %v5064_v25, %v3670_v27 }
  0x7f   : > { %1259 = vmatpush.bf16.msrb.mxu3 %v3977_v61  ;;  %v3801_v32 = vor.u32 %v5096_v28, %v3798_v29  ;;  %v3926_v34 = vld [vmem:[%s5768_s28 + $0x390] sm:$0xf0]  ;;  %v5028_v35 = vld [vmem:[%s5768_s28 + $0x64] sm:$0xf] }
  0x80   : > { %1221 = vmatpush.bf16.msrb.mxu0 %v3577_v62  ;;  %v3929_v36 = vor.u32 %v5128_v33, %v3926_v34  ;;  %v3526_v37 = vld [vmem:[%s5768_s28 + $0x70] sm:$0xf0]  ;;  %v5060_v38 = vld [vmem:[%s5768_s28 + $0x164] sm:$0xf]  ;;  %v350_v62 = vsel %vm349_vm1, %v5870_v56, %v348_v42  ;;  %v5608_v33 = vmov 269488144  }
  0x81   : > { %1234 = vmatpush.bf16.msrb.mxu1 %v3705_v3  ;;  %v3529_v39 = vor.u32 %v5028_v35, %v3526_v37  ;;  %v3654_v40 = vld [vmem:[%s5768_s28 + $0x170] sm:$0xf0]  ;;  %v5092_v41 = vld [vmem:[%s5768_s28 + $0x264] sm:$0xf]  ;;  %v365_v34 = vunpack.c.l.s4 %v5608_v33  ;;  %v5067_v33 = vld [vmem:[%s5768_s28 + $0x194] sm:$0xf0] }
  0x82   : > { %1247 = vmatpush.bf16.msrb.mxu2 %v3833_v8  ;;  %v3657_v43 = vor.u32 %v5060_v38, %v3654_v40  ;;  %v3782_v44 = vld [vmem:[%s5768_s28 + $0x270] sm:$0xf0]  ;;  %v5124_v45 = vld [vmem:[%s5768_s28 + $0x364] sm:$0xf] }
  0x83   : > { %1260 = vmatpush.bf16.msrb.mxu3 %v3961_v9  ;;  %v3910_v46 = vld [vmem:[%s5768_s28 + $0x370] sm:$0xf0]  ;;  %v3785_v47 = vor.u32 %v5092_v41, %v3782_v44  ;;  %v5024_v49 = vld [vmem:[%s5768_s28 + $0x44] sm:$0xf]  ;;  %v366_v41 = vunpack.c.0.s8 %v365_v34  ;;  %v3804_v34 = vld [vmem:[%s5768_s28 + $0x288] sm:$0xf] }
  0x84   : > { %1222 = vmatpush.bf16.msrb.mxu0 %v3561_v13  ;;  %v3913_v48 = vor.u32 %v5124_v45, %v3910_v46  ;;  %v3510_v50 = vld [vmem:[%s5768_s28 + $0x50] sm:$0xf0]  ;;  %v5056_v51 = vld [vmem:[%s5768_s28 + $0x144] sm:$0xf] }
  0x85   : > { %1235 = vmatpush.bf16.msrb.mxu1 %v3689_v17  ;;  %v3513_v52 = vor.u32 %v5024_v49, %v3510_v50  ;;  %v3638_v53 = vld [vmem:[%s5768_s28 + $0x150] sm:$0xf0]  ;;  %v5088_v54 = vld [vmem:[%s5768_s28 + $0x244] sm:$0xf]  ;;  %v3596_v50 = vld [vmem:[%s5768_s28 + $0xe8] sm:$0xf] }
  0x86   : > { %1248 = vmatpush.bf16.msrb.mxu2 %v3817_v18  ;;  %v3766_v55 = vld [vmem:[%s5768_s28 + $0x250] sm:$0xf0]  ;;  %v3641_v57 = vor.u32 %v5056_v51, %v3638_v53  ;;  %v5120_v59 = vld [vmem:[%s5768_s28 + $0x344] sm:$0xf]  ;;  %v5047_v51 = vld [vmem:[%s5768_s28 + $0xf4] sm:$0xf0] }
  0x87   : > { %1261 = vmatpush.bf16.msrb.mxu3 %v3945_v22  ;;  %v3769_v58 = vor.u32 %v5088_v54, %v3766_v55  ;;  %v3894_v60 = vld [vmem:[%s5768_s28 + $0x350] sm:$0xf0]  ;;  %v5020_v61 = vld [vmem:[%s5768_s28 + $0x24] sm:$0xf]  ;;  %v5079_v53 = vld [vmem:[%s5768_s28 + $0x1f4] sm:$0xf0] }
  0x88   : > { %1223 = vmatpush.bf16.msrb.mxu0 %v3545_v26  ;;  %v3897_v63 = vor.u32 %v5120_v59, %v3894_v60  ;;  %v3494_v1 = vld [vmem:[%s5768_s28 + $0x30] sm:$0xf0]  ;;  %v5052_v2 = vld [vmem:[%s5768_s28 + $0x124] sm:$0xf]  ;;  %v370_v26 = vld [vmem:[%s6686_s1] sm:$0xf] }
  0x89   : > { %1236 = vmatpush.bf16.msrb.mxu1 %v3673_v31  ;;  %v3622_v3 = vld [vmem:[%s5768_s28 + $0x130] sm:$0xf0]  ;;  %v5084_v4 = vld [vmem:[%s5768_s28 + $0x224] sm:$0xf]  ;;  %v3497_v8 = vor.u32 %v5020_v61, %v3494_v1  ;;  %v373_v29 = vperm.slane %v370_v26, 1  ;;  %v374_v30 = vperm.slane %v370_v26, 2 }
  0x8a   : > { %1249 = vmatpush.bf16.msrb.mxu2 %v3801_v32  ;;  %v3750_v5 = vld [vmem:[%s5768_s28 + $0x230] sm:$0xf0]  ;;  %v5116_v6 = vld [vmem:[%s5768_s28 + $0x324] sm:$0xf]  ;;  %v3625_v56 = vor.u32 %v5052_v2, %v3622_v3  ;;  %v375_v31 = vperm.slane %v370_v26, 3  ;;  %v3597_v3 = vor.u32 %v5047_v51, %v3596_v50 }
  0x8b   : > { %1262 = vmatpush.bf16.msrb.mxu3 %v3929_v36  ;;  %v3878_v9 = vld [vmem:[%s5768_s28 + $0x330] sm:$0xf0]  ;;  %v5016_v10 = vld [vmem:[%s5768_s28 + $0x4] sm:$0xf]  ;;  %v3753_v12 = vor.u32 %v5084_v4, %v3750_v5  ;;  %v372_v36 = vperm.slane %v370_v26, 0  ;;  %v376_v37 = vrot.slane %v373_v29, 6 }
  0x8c   : > { %1224 = vmatpush.bf16.msrb.mxu0 %v3529_v39  ;;  %v3478_v13 = vld [vmem:[%s5768_s28 + $0x10] sm:$0xf0]  ;;  %v5048_v14 = vld [vmem:[%s5768_s28 + $0x104] sm:$0xf]  ;;  %v3881_v16 = vor.u32 %v5116_v6, %v3878_v9  ;;  %v377_v38 = vrot.slane %v374_v30, 4  ;;  %v378_v39 = vrot.slane %v375_v31, 2 }
  0x8d   : > { %1237 = vmatpush.bf16.msrb.mxu1 %v3657_v43  ;;  %v3606_v15 = vld [vmem:[%s5768_s28 + $0x110] sm:$0xf0]  ;;  %v5080_v17 = vld [vmem:[%s5768_s28 + $0x204] sm:$0xf]  ;;  %v3481_v22 = vor.u32 %v5016_v10, %v3478_v13  ;;  %v379_v43 = vsel %vm334_vm0, %v372_v36, %v376_v37  ;;  %v3852_v54 = vld [vmem:[%s5768_s28 + $0x2e8] sm:$0xf] }
  0x8e   : > { %1250 = vmatpush.bf16.msrb.mxu2 %v3785_v47  ;;  %v3734_v18 = vld [vmem:[%s5768_s28 + $0x210] sm:$0xf0]  ;;  %v5112_v20 = vld [vmem:[%s5768_s28 + $0x304] sm:$0xf]  ;;  %v3609_v23 = vor.u32 %v5048_v14, %v3606_v15  ;;  %v381_v44 = vsel %vm380_vm3, %v377_v38, %v378_v39  ;;  %v5111_v55 = vld [vmem:[%s5768_s28 + $0x2f4] sm:$0xf0] }
  0x8f   : > { %1263 = vmatpush.bf16.msrb.mxu3 %v3913_v48  ;;  %v3862_v21 = vld [vmem:[%s5768_s28 + $0x310] sm:$0xf0]  ;;  %v3737_v24 = vor.u32 %v5080_v17, %v3734_v18  ;;  %v383_v47 = vsel %vm382_vm6, %v379_v43, %v381_v44  ;;  %v3580_v61 = vld [vmem:[%s5768_s28 + $0xc8] sm:$0xf]  ;;  %v5075_v9 = vld [vmem:[%s5768_s28 + $0x1d4] sm:$0xf0] }
  0x90   : > { %1225 = vmatpush.bf16.msrb.mxu0 %v3513_v52  ;;  %v3865_v25 = vor.u32 %v5112_v20, %v3862_v21  ;;  %v3724_v52 = vld [vmem:[%s5768_s28 + $0x1e8] sm:$0xf]  ;;  %v5139_v13 = vld [vmem:[%s5768_s28 + $0x3d4] sm:$0xf0] }
  0x91   : > { %1238 = vmatpush.bf16.msrb.mxu1 %v3641_v57  ;;  %v3980_v57 = vld [vmem:[%s5768_s28 + $0x3e8] sm:$0xf]  ;;  %v3725_v4 = vor.u32 %v5079_v53, %v3724_v52  ;;  %v5039_v17 = vld [vmem:[%s5768_s28 + $0xb4] sm:$0xf0] }
  0x92   : > { %1251 = vmatpush.bf16.msrb.mxu2 %v3769_v58  ;;  %v5143_v58 = vld [vmem:[%s5768_s28 + $0x3f4] sm:$0xf0]  ;;  %v3836_v10 = vld [vmem:[%s5768_s28 + $0x2c8] sm:$0xf] }
  0x93   : > { %1264 = vmatpush.bf16.msrb.mxu3 %v3897_v63  ;;  %v3692_v20 = vld [vmem:[%s5768_s28 + $0x1a8] sm:$0xf]  ;;  %v5071_v21 = vld [vmem:[%s5768_s28 + $0x1b4] sm:$0xf0] }
  0x94   : > { %1226 = vmatpush.bf16.msrb.mxu0 %v3497_v8  ;;  %v3981_v8 = vor.u32 %v5143_v58, %v3980_v57  ;;  %v5035_v29 = vld [vmem:[%s5768_s28 + $0x94] sm:$0xf0]  ;;  %v3932_v36 = vld [vmem:[%s5768_s28 + $0x388] sm:$0xf] }
  0x95   : > { %1239 = vmatpush.bf16.msrb.mxu1 %v3625_v56  ;;  %v3708_v56 = vld [vmem:[%s5768_s28 + $0x1c8] sm:$0xf]  ;;  %v5131_v37 = vld [vmem:[%s5768_s28 + $0x394] sm:$0xf0] }
  0x96   : > { %1252 = vmatpush.bf16.msrb.mxu2 %v3753_v12  ;;  %v3964_v12 = vld [vmem:[%s5768_s28 + $0x3c8] sm:$0xf]  ;;  %v3709_v15 = vor.u32 %v5075_v9, %v3708_v56  ;;  %v3933_v43 = vor.u32 %v5131_v37, %v3932_v36  ;;  %v5027_v53 = vld [vmem:[%s5768_s28 + $0x54] sm:$0xf0] }
  0x97   : > { %1265 = vmatpush.bf16.msrb.mxu3 %v3881_v16  ;;  %v3564_v16 = vld [vmem:[%s5768_s28 + $0xa8] sm:$0xf]  ;;  %v5059_v58 = vld [vmem:[%s5768_s28 + $0x154] sm:$0xf0] }
  0x98   : > { %1227 = vmatpush.bf16.msrb.mxu0 %v3481_v22  ;;  %v3820_v22 = vld [vmem:[%s5768_s28 + $0x2a8] sm:$0xf]  ;;  %v3565_v26 = vor.u32 %v5039_v17, %v3564_v16  ;;  %v5055_v9 = vld [vmem:[%s5768_s28 + $0x134] sm:$0xf0] }
  0x99   : > { %1240 = vmatpush.bf16.msrb.mxu1 %v3609_v23  ;;  %v5103_v23 = vld [vmem:[%s5768_s28 + $0x2b4] sm:$0xf0]  ;;  %v3660_v44 = vld [vmem:[%s5768_s28 + $0x168] sm:$0xf] }
  0x9a   : > { %1253 = vmatpush.bf16.msrb.mxu2 %v3737_v24  ;;  %v3948_v24 = vld [vmem:[%s5768_s28 + $0x3a8] sm:$0xf]  ;;  %v3821_v30 = vor.u32 %v5103_v23, %v3820_v22  ;;  %v5019_v17 = vld [vmem:[%s5768_s28 + $0x14] sm:$0xf0] }
  0x9b   : > { %1266 = vmatpush.bf16.msrb.mxu3 %v3865_v25  ;;  %v5135_v25 = vld [vmem:[%s5768_s28 + $0x3b4] sm:$0xf0]  ;;  %v3516_v52 = vld [vmem:[%s5768_s28 + $0x48] sm:$0xf] }
  0x9c   : > { %v3949_v31 = vor.u32 %v5135_v25, %v3948_v24  ;;  %v3644_v57 = vld [vmem:[%s5768_s28 + $0x148] sm:$0xf]  ;;  %v5083_v23 = vld [vmem:[%s5768_s28 + $0x214] sm:$0xf0] }
  0x9d   : > { %v3628_v56 = vld [vmem:[%s5768_s28 + $0x128] sm:$0xf]  ;;  %v5115_v25 = vld [vmem:[%s5768_s28 + $0x314] sm:$0xf0] }
  0x9e   : > { %v3629_v16 = vor.u32 %v5055_v9, %v3628_v56  ;;  %v3740_v22 = vld [vmem:[%s5768_s28 + $0x208] sm:$0xf]  ;;  %v5065_v56 = vld [vmem:[%s5768_s28 + $0x18c] sm:$0xf]  ;;  %v3678_v9 = vld [vmem:[%s5768_s28 + $0x198] sm:$0xf0] }
  0x9f   : > { %v3868_v24 = vld [vmem:[%s5768_s28 + $0x308] sm:$0xf]  ;;  %v3741_v36 = vor.u32 %v5083_v23, %v3740_v22  ;;  %v5093_v22 = vld [vmem:[%s5768_s28 + $0x26c] sm:$0xf]  ;;  %v3790_v23 = vld [vmem:[%s5768_s28 + $0x278] sm:$0xf0] }
  0xa0   : > { %v3869_v37 = vor.u32 %v5115_v25, %v3868_v24  ;;  %v5125_v24 = vld [vmem:[%s5768_s28 + $0x36c] sm:$0xf]  ;;  %v3918_v25 = vld [vmem:[%s5768_s28 + $0x378] sm:$0xf0] }
  0xde   : > { %v343_v7 = vpop.xlane.xlu0 %342 }
  0xdf   : > { %v351_v11 = vmul.f32 %v350_v62, %v343_v7  ;;  %v5043_v62 = vld [vmem:[%s5768_s28 + $0xd4] sm:$0xf0]  ;;  %v3853_v7 = vor.u32 %v5111_v55, %v3852_v54 }
  0xe0   : > { %v3581_v14 = vor.u32 %v5043_v62, %v3580_v61  ;;  %v3900_v61 = vld [vmem:[%s5768_s28 + $0x348] sm:$0xf]  ;;  %v5123_v62 = vld [vmem:[%s5768_s28 + $0x354] sm:$0xf0] }
  0xe1   : > { %v352_v19 = vadd.f32 1e-05, %v351_v11  ;;  %v5107_v11 = vld [vmem:[%s5768_s28 + $0x2d4] sm:$0xf0] }
  0xe2   : > { %v3837_v18 = vor.u32 %v5107_v11, %v3836_v10  ;;  %v3756_v10 = vld [vmem:[%s5768_s28 + $0x228] sm:$0xf]  ;;  %v5087_v11 = vld [vmem:[%s5768_s28 + $0x234] sm:$0xf0] }
  0xe3   : > { %5456 = vrsqrt.f32 %v352_v19  ;;  %vm359_vm4 = vweird.f32 %v352_v19 }
  0xe9   : > { %v5457_v27 = vpop.eup %5456 }
  0xea   : > { %v354_v28 = vmul.f32 %v5457_v27, %v352_v19  ;;  %vm360_vm2 = vweird.f32 %v5457_v27  ;;  %v3965_v19 = vor.u32 %v5139_v13, %v3964_v12  ;;  %v3884_v12 = vld [vmem:[%s5768_s28 + $0x328] sm:$0xf]  ;;  %v5119_v13 = vld [vmem:[%s5768_s28 + $0x334] sm:$0xf0] }
  0xeb   : > { %vm361_vm5 = vmor %vm359_vm4, %vm360_vm2 }
  0xec   : > { %v355_v32 = vmul.f32 %v5457_v27, %v354_v28  ;;  %v3548_v28 = vld [vmem:[%s5768_s28 + $0x88] sm:$0xf] }
  0xed   : > { %v3549_v38 = vor.u32 %v5035_v29, %v3548_v28  ;;  %v5077_v28 = vld [vmem:[%s5768_s28 + $0x1ec] sm:$0xf]  ;;  %v3726_v29 = vld [vmem:[%s5768_s28 + $0x1f8] sm:$0xf0] }
  0xee   : > { %v356_v35 = vmul.f32 0.5, %v355_v32  ;;  %v3676_v32 = vld [vmem:[%s5768_s28 + $0x188] sm:$0xf] }
  0xef   : > { %v3677_v39 = vor.u32 %v5067_v33, %v3676_v32  ;;  %v3854_v33 = vld [vmem:[%s5768_s28 + $0x2f8] sm:$0xf0] }
  0xf0   : > { %v357_v40 = vsub.f32 1.5, %v356_v35  ;;  %v5099_v35 = vld [vmem:[%s5768_s28 + $0x294] sm:$0xf0] }
  0xf2   : > { %v358_v42 = vmul.f32 %v5457_v27, %v357_v40  ;;  %v3532_v40 = vld [vmem:[%s5768_s28 + $0x68] sm:$0xf] }
  0xf4   : > { %v362_v45 = vsel %vm361_vm5, %v5457_v27, %v358_v42  ;;  %v3693_v27 = vor.u32 %v5071_v21, %v3692_v20  ;;  %v3805_v42 = vor.u32 %v5099_v35, %v3804_v34  ;;  %v3757_v20 = vor.u32 %v5087_v11, %v3756_v10  ;;  %v5141_v34 = vld [vmem:[%s5768_s28 + $0x3ec] sm:$0xf]  ;;  %v3982_v35 = vld [vmem:[%s5768_s28 + $0x3f8] sm:$0xf0] }
  0xf5   : > { %v367_v46 = vperm.slane %v362_v45, %v366_v41  ;;  %v5031_v41 = vld [vmem:[%s5768_s28 + $0x74] sm:$0xf0]  ;;  %v3885_v21 = vor.u32 %v5119_v13, %v3884_v12  ;;  %v5097_v10 = vld [vmem:[%s5768_s28 + $0x28c] sm:$0xf]  ;;  %v3806_v11 = vld [vmem:[%s5768_s28 + $0x298] sm:$0xf0] }
  0xf6   : > { %v5063_v45 = vld [vmem:[%s5768_s28 + $0x174] sm:$0xf0]  ;;  %v3533_v50 = vor.u32 %v5031_v41, %v3532_v40  ;;  %v5041_v40 = vld [vmem:[%s5768_s28 + $0xcc] sm:$0xf]  ;;  %v3582_v41 = vld [vmem:[%s5768_s28 + $0xd8] sm:$0xf0] }
  0xf7   : > { %v369_v48 = vmul.f32 %v367_v46, %v5784_v0  ;;  %v3788_v46 = vld [vmem:[%s5768_s28 + $0x268] sm:$0xf]  ;;  %v3661_v51 = vor.u32 %v5063_v45, %v3660_v44  ;;  %v5073_v44 = vld [vmem:[%s5768_s28 + $0x1cc] sm:$0xf]  ;;  %v3710_v45 = vld [vmem:[%s5768_s28 + $0x1d8] sm:$0xf0] }
  0xf8   : > { %v5129_v12 = vld [vmem:[%s5768_s28 + $0x38c] sm:$0xf]  ;;  %v3934_v13 = vld [vmem:[%s5768_s28 + $0x398] sm:$0xf0] }
  0xf9   : > { %v385_v49 = vmul.f32 %v383_v47, %v369_v48  ;;  %v5095_v47 = vld [vmem:[%s5768_s28 + $0x274] sm:$0xf0]  ;;  %v3916_v48 = vld [vmem:[%s5768_s28 + $0x368] sm:$0xf] }
  0xfa   : > { %v3789_v54 = vor.u32 %v5095_v47, %v3788_v46  ;;  %v5105_v46 = vld [vmem:[%s5768_s28 + $0x2cc] sm:$0xf]  ;;  %v3838_v47 = vld [vmem:[%s5768_s28 + $0x2d8] sm:$0xf0] }
  0xfb   : > { %387 = vst [vmem:[#allocation1] ss:$4 sm:$0xff] %v385_v49  ;;  %v5127_v49 = vld [vmem:[%s5768_s28 + $0x374] sm:$0xf0] }
  0xfc   : > { %v3917_v55 = vor.u32 %v5127_v49, %v3916_v48  ;;  %v5137_v48 = vld [vmem:[%s5768_s28 + $0x3cc] sm:$0xf]  ;;  %v3966_v49 = vld [vmem:[%s5768_s28 + $0x3d8] sm:$0xf0] }
 0x102   : > { %v388_v59 = vld.sshfl [vmem:[#allocation1] sm:$0xff pattern:$0x73625140]  ;;  %v389_v60 = vld.sshfl [vmem:[#allocation1 + $0x8] sm:$0xff pattern:$0x73625140] }
 0x103   : > { %v5953_v63 = vpack.c.bf16 %v388_v59, %v388_v59  ;;  %v5955_v0 = vpack.c.bf16 %v389_v60, %v389_v60  ;;  %v390_v1 = vld.sshfl [vmem:[#allocation1 + $0x10] sm:$0xff pattern:$0x73625140]  ;;  %v391_v2 = vld.sshfl [vmem:[#allocation1 + $0x18] sm:$0xff pattern:$0x73625140] }
 0x104   : > { %v5957_v5 = vpack.c.bf16 %v390_v1, %v390_v1  ;;  %v5959_v6 = vpack.c.bf16 %v391_v2, %v391_v2  ;;  %v3772_v59 = vld [vmem:[%s5768_s28 + $0x248] sm:$0xf]  ;;  %v5091_v60 = vld [vmem:[%s5768_s28 + $0x254] sm:$0xf0]  ;;  %v3517_v1 = vor.u32 %v5027_v53, %v3516_v52  ;;  %v3645_v2 = vor.u32 %v5059_v58, %v3644_v57  ;;  %v5037_v52 = vld [vmem:[%s5768_s28 + $0xac] sm:$0xf] }
 0x105   : > { %1176 = vmatmul.bf16.vlgmr.msra.gmra.mxu0 %v5953_v63  ;;  %1189 = vmatmul.bf16.vlgmr.msra.gmra.mxu1 %v5955_v0  ;;  %v3566_v53 = vld [vmem:[%s5768_s28 + $0xb8] sm:$0xf0]  ;;  %v5069_v57 = vld [vmem:[%s5768_s28 + $0x1ac] sm:$0xf] }
 0x106   : > { %1202 = vmatmul.bf16.vlgmr.msra.gmra.mxu2 %v5957_v5  ;;  %1215 = vmatmul.bf16.vlgmr.msra.gmra.mxu3 %v5959_v6  ;;  %v3694_v58 = vld [vmem:[%s5768_s28 + $0x1b8] sm:$0xf0] }
 0x107   : > { %1272 = vmatpush.bf16.msra.mxu0 %v3597_v3  ;;  %1285 = vmatpush.bf16.msra.mxu1 %v3725_v4  ;;  %v3500_v3 = vld [vmem:[%s5768_s28 + $0x28] sm:$0xf]  ;;  %v5023_v4 = vld [vmem:[%s5768_s28 + $0x34] sm:$0xf0] }
 0x108   : > { %1298 = vmatpush.bf16.msra.mxu2 %v3853_v7  ;;  %1311 = vmatpush.bf16.msra.mxu3 %v3981_v8  ;;  %v3773_v7 = vor.u32 %v5091_v60, %v3772_v59  ;;  %v3901_v8 = vor.u32 %v5123_v62, %v3900_v61  ;;  %v5101_v59 = vld [vmem:[%s5768_s28 + $0x2ac] sm:$0xf]  ;;  %v3822_v60 = vld [vmem:[%s5768_s28 + $0x2b8] sm:$0xf0] }
 0x109   : > { %v5133_v61 = vld [vmem:[%s5768_s28 + $0x3ac] sm:$0xf]  ;;  %v3950_v62 = vld [vmem:[%s5768_s28 + $0x3b8] sm:$0xf0] }
 0x10b   : > { %1273 = vmatpush.bf16.msra.mxu0 %v3581_v14  ;;  %1286 = vmatpush.bf16.msra.mxu1 %v3709_v15  ;;  %v3484_v14 = vld [vmem:[%s5768_s28 + $0x8] sm:$0xf]  ;;  %v3501_v15 = vor.u32 %v5023_v4, %v3500_v3  ;;  %v5033_v3 = vld [vmem:[%s5768_s28 + $0x8c] sm:$0xf]  ;;  %v3550_v4 = vld [vmem:[%s5768_s28 + $0x98] sm:$0xf0] }
 0x10c   : > { %1299 = vmatpush.bf16.msra.mxu2 %v3837_v18  ;;  %1312 = vmatpush.bf16.msra.mxu3 %v3965_v19  ;;  %v3612_v18 = vld [vmem:[%s5768_s28 + $0x108] sm:$0xf]  ;;  %v5051_v19 = vld [vmem:[%s5768_s28 + $0x114] sm:$0xf0] }
 0x10d   : > { %v3613_v32 = vor.u32 %v5051_v19, %v3612_v18  ;;  %v3809_v18 = vor.u32 %v5097_v10, %v3806_v11  ;;  %v3937_v19 = vor.u32 %v5129_v12, %v3934_v13  ;;  %v4484_v10 = vld [vmem:[%s5775_s14 + $0x3e0] sm:$0xf]  ;;  %v5270_v11 = vld [vmem:[%s5775_s14 + $0x3ec] sm:$0xf0] }
 0x10f   : > { %1274 = vmatpush.bf16.msra.mxu0 %v3565_v26  ;;  %1287 = vmatpush.bf16.msra.mxu1 %v3693_v27  ;;  %v5045_v26 = vld [vmem:[%s5768_s28 + $0xec] sm:$0xf]  ;;  %v3598_v27 = vld [vmem:[%s5768_s28 + $0xf8] sm:$0xf0] }
 0x110   : > { %1300 = vmatpush.bf16.msra.mxu2 %v3821_v30  ;;  %1313 = vmatpush.bf16.msra.mxu3 %v3949_v31  ;;  %v5109_v30 = vld [vmem:[%s5768_s28 + $0x2ec] sm:$0xf]  ;;  %v3485_v31 = vor.u32 %v5019_v17, %v3484_v14  ;;  %v3553_v14 = vor.u32 %v5033_v3, %v3550_v4  ;;  %v3534_v17 = vld [vmem:[%s5768_s28 + $0x78] sm:$0xf0]  ;;  %v4228_v3 = vld [vmem:[%s5775_s14 + $0x1e0] sm:$0xf] }
 0x111   : > { %v5206_v4 = vld [vmem:[%s5775_s14 + $0x1ec] sm:$0xf0] }
 0x113   : > { %1275 = vmatpush.bf16.msra.mxu0 %v3549_v38  ;;  %1288 = vmatpush.bf16.msra.mxu1 %v3677_v39  ;;  %v3601_v38 = vor.u32 %v5045_v26, %v3598_v27  ;;  %v3729_v39 = vor.u32 %v5077_v28, %v3726_v29  ;;  %v5025_v28 = vld [vmem:[%s5768_s28 + $0x4c] sm:$0xf]  ;;  %v3518_v29 = vld [vmem:[%s5768_s28 + $0x58] sm:$0xf0] }
 0x114   : > { %1301 = vmatpush.bf16.msra.mxu2 %v3805_v42  ;;  %1314 = vmatpush.bf16.msra.mxu3 %v3933_v43  ;;  %v3857_v42 = vor.u32 %v5109_v30, %v3854_v33  ;;  %v3985_v43 = vor.u32 %v5141_v34, %v3982_v35  ;;  %v3793_v30 = vor.u32 %v5093_v22, %v3790_v23  ;;  %v3646_v33 = vld [vmem:[%s5768_s28 + $0x158] sm:$0xf0]  ;;  %v5089_v34 = vld [vmem:[%s5768_s28 + $0x24c] sm:$0xf]  ;;  %v4340_v22 = vld [vmem:[%s5775_s14 + $0x2c0] sm:$0xf] }
 0x115   : > { %1228 = vmatmul.bf16.vlgmr.msrb.gmra.mxu0 %v5953_v63  ;;  %1241 = vmatmul.bf16.vlgmr.msrb.gmra.mxu1 %v5955_v0  ;;  %v3774_v35 = vld [vmem:[%s5768_s28 + $0x258] sm:$0xf0]  ;;  %v5234_v23 = vld [vmem:[%s5775_s14 + $0x2cc] sm:$0xf0] }
 0x116   : > { %1254 = vmatmul.bf16.vlgmr.msrb.gmra.mxu2 %v5957_v5  ;;  %1267 = vmatmul.bf16.vlgmr.msrb.gmra.mxu3 %v5959_v6 }
 0x117   : > { %1276 = vmatpush.bf16.msra.mxu0 %v3533_v50  ;;  %1289 = vmatpush.bf16.msra.mxu1 %v3661_v51  ;;  %v3585_v50 = vor.u32 %v5041_v40, %v3582_v41  ;;  %v3713_v51 = vor.u32 %v5073_v44, %v3710_v45  ;;  %v5021_v40 = vld [vmem:[%s5768_s28 + $0x2c] sm:$0xf]  ;;  %v3502_v41 = vld [vmem:[%s5768_s28 + $0x38] sm:$0xf0] }
 0x118   : > { %1302 = vmatpush.bf16.msra.mxu2 %v3789_v54  ;;  %1315 = vmatpush.bf16.msra.mxu3 %v3917_v55  ;;  %v3841_v54 = vor.u32 %v5105_v46, %v3838_v47  ;;  %v3969_v55 = vor.u32 %v5137_v48, %v3966_v49  ;;  %v5053_v44 = vld [vmem:[%s5768_s28 + $0x12c] sm:$0xf]  ;;  %v3630_v45 = vld [vmem:[%s5768_s28 + $0x138] sm:$0xf0] }
 0x119   : > { %v5085_v46 = vld [vmem:[%s5768_s28 + $0x22c] sm:$0xf]  ;;  %v3758_v47 = vld [vmem:[%s5768_s28 + $0x238] sm:$0xf0] }
 0x11a   : > { %v5117_v48 = vld [vmem:[%s5768_s28 + $0x32c] sm:$0xf]  ;;  %v3886_v49 = vld [vmem:[%s5768_s28 + $0x338] sm:$0xf0] }
 0x11b   : > { %1277 = vmatpush.bf16.msra.mxu0 %v3517_v1  ;;  %1290 = vmatpush.bf16.msra.mxu1 %v3645_v2  ;;  %v3569_v1 = vor.u32 %v5037_v52, %v3566_v53  ;;  %v3697_v2 = vor.u32 %v5069_v57, %v3694_v58  ;;  %v3633_v52 = vor.u32 %v5053_v44, %v3630_v45  ;;  %v3486_v53 = vld [vmem:[%s5768_s28 + $0x18] sm:$0xf0]  ;;  %v4180_v44 = vld [vmem:[%s5775_s14 + $0x180] sm:$0xf]  ;;  %v5194_v45 = vld [vmem:[%s5775_s14 + $0x18c] sm:$0xf0] }
 0x11c   : > { %1303 = vmatpush.bf16.msra.mxu2 %v3773_v7  ;;  %1316 = vmatpush.bf16.msra.mxu3 %v3901_v8  ;;  %v3825_v7 = vor.u32 %v5101_v59, %v3822_v60  ;;  %v3953_v8 = vor.u32 %v5133_v61, %v3950_v62  ;;  %v3761_v57 = vor.u32 %v5085_v46, %v3758_v47  ;;  %v5081_v59 = vld [vmem:[%s5768_s28 + $0x20c] sm:$0xf]  ;;  %v3742_v60 = vld [vmem:[%s5768_s28 + $0x218] sm:$0xf0]  ;;  %v4308_v46 = vld [vmem:[%s5775_s14 + $0x280] sm:$0xf] }
 0x11d   : > { %v3889_v58 = vor.u32 %v5117_v48, %v3886_v49  ;;  %v5113_v61 = vld [vmem:[%s5768_s28 + $0x30c] sm:$0xf]  ;;  %v3870_v62 = vld [vmem:[%s5768_s28 + $0x318] sm:$0xf0]  ;;  %v3745_v12 = vor.u32 %v5081_v59, %v3742_v60  ;;  %v5226_v47 = vld [vmem:[%s5775_s14 + $0x28c] sm:$0xf0] }
 0x11e   : > { %v3873_v13 = vor.u32 %v5113_v61, %v3870_v62  ;;  %v4436_v48 = vld [vmem:[%s5775_s14 + $0x380] sm:$0xf]  ;;  %v5258_v49 = vld [vmem:[%s5775_s14 + $0x38c] sm:$0xf0] }
 0x11f   : > { %1278 = vmatpush.bf16.msra.mxu0 %v3501_v15  ;;  %1291 = vmatpush.bf16.msra.mxu1 %v3629_v16  ;;  %v3681_v15 = vor.u32 %v5065_v56, %v3678_v9  ;;  %v5029_v16 = vld [vmem:[%s5768_s28 + $0x6c] sm:$0xf]  ;;  %v5238_v9 = vld [vmem:[%s5775_s14 + $0x2ec] sm:$0xf0]  ;;  %v4292_v59 = vld [vmem:[%s5775_s14 + $0x260] sm:$0xf] }
 0x120   : > { %1304 = vmatpush.bf16.msra.mxu2 %v3757_v20  ;;  %1317 = vmatpush.bf16.msra.mxu3 %v3885_v21  ;;  %v5061_v20 = vld [vmem:[%s5768_s28 + $0x16c] sm:$0xf]  ;;  %v3662_v21 = vld [vmem:[%s5768_s28 + $0x178] sm:$0xf0]  ;;  %v3537_v26 = vor.u32 %v5029_v16, %v3534_v17  ;;  %v4084_v16 = vld [vmem:[%s5775_s14 + $0xc0] sm:$0xf] }
 0x121   : > { %v3665_v27 = vor.u32 %v5061_v20, %v3662_v21  ;;  %v5170_v17 = vld [vmem:[%s5775_s14 + $0xcc] sm:$0xf0]  ;;  %v4212_v20 = vld [vmem:[%s5775_s14 + $0x1c0] sm:$0xf] }
 0x122   : > { %v5202_v21 = vld [vmem:[%s5775_s14 + $0x1cc] sm:$0xf0]  ;;  %v4420_v61 = vld [vmem:[%s5775_s14 + $0x360] sm:$0xf] }
 0x123   : > { %1279 = vmatpush.bf16.msra.mxu0 %v3485_v31  ;;  %1292 = vmatpush.bf16.msra.mxu1 %v3613_v32  ;;  %v3921_v31 = vor.u32 %v5125_v24, %v3918_v25  ;;  %v5057_v32 = vld [vmem:[%s5768_s28 + $0x14c] sm:$0xf]  ;;  %v4468_v24 = vld [vmem:[%s5775_s14 + $0x3c0] sm:$0xf]  ;;  %v5266_v25 = vld [vmem:[%s5775_s14 + $0x3cc] sm:$0xf0] }
 0x124   : > { %1305 = vmatpush.bf16.msra.mxu2 %v3741_v36  ;;  %1318 = vmatpush.bf16.msra.mxu3 %v3869_v37  ;;  %v5121_v36 = vld [vmem:[%s5768_s28 + $0x34c] sm:$0xf]  ;;  %v3902_v37 = vld [vmem:[%s5768_s28 + $0x358] sm:$0xf0]  ;;  %v5222_v60 = vld [vmem:[%s5775_s14 + $0x26c] sm:$0xf0] }
 0x125   : > { %v5254_v62 = vld [vmem:[%s5775_s14 + $0x36c] sm:$0xf0] }
 0x126   : > { %1280 = vmatmul.bf16.vlgmr.msra.gmra.mxu0 %v5953_v63  ;;  %1293 = vmatmul.bf16.vlgmr.msra.gmra.mxu1 %v5955_v0 }
 0x127   : > { %1324 = vmatpush.bf16.msrb.mxu0 %v3601_v38  ;;  %1337 = vmatpush.bf16.msrb.mxu1 %v3729_v39  ;;  %v3521_v38 = vor.u32 %v5025_v28, %v3518_v29  ;;  %v3649_v39 = vor.u32 %v5057_v32, %v3646_v33  ;;  %v4068_v28 = vld [vmem:[%s5775_s14 + $0xa0] sm:$0xf]  ;;  %v5166_v29 = vld [vmem:[%s5775_s14 + $0xac] sm:$0xf0] }
 0x128   : > { %1350 = vmatpush.bf16.msrb.mxu2 %v3857_v42  ;;  %1363 = vmatpush.bf16.msrb.mxu3 %v3985_v43  ;;  %v3777_v42 = vor.u32 %v5089_v34, %v3774_v35  ;;  %v3905_v43 = vor.u32 %v5121_v36, %v3902_v37  ;;  %v4196_v32 = vld [vmem:[%s5775_s14 + $0x1a0] sm:$0xf]  ;;  %v5198_v33 = vld [vmem:[%s5775_s14 + $0x1ac] sm:$0xf0] }
 0x129   : > { %1306 = vmatmul.bf16.vlgmr.msra.gmra.mxu2 %v5957_v5  ;;  %1319 = vmatmul.bf16.vlgmr.msra.gmra.mxu3 %v5959_v6  ;;  %v4324_v34 = vld [vmem:[%s5775_s14 + $0x2a0] sm:$0xf]  ;;  %v5230_v35 = vld [vmem:[%s5775_s14 + $0x2ac] sm:$0xf0] }
 0x12a   : > { %v4452_v36 = vld [vmem:[%s5775_s14 + $0x3a0] sm:$0xf]  ;;  %v5262_v37 = vld [vmem:[%s5775_s14 + $0x3ac] sm:$0xf0] }
 0x12b   : > { %1325 = vmatpush.bf16.msrb.mxu0 %v3585_v50  ;;  %1338 = vmatpush.bf16.msrb.mxu1 %v3713_v51  ;;  %v5017_v50 = vld [vmem:[%s5768_s28 + $0xc] sm:$0xf]  ;;  %v3505_v51 = vor.u32 %v5021_v40, %v3502_v41  ;;  %v4052_v40 = vld [vmem:[%s5775_s14 + $0x80] sm:$0xf]  ;;  %v5162_v41 = vld [vmem:[%s5775_s14 + $0x8c] sm:$0xf0] }
 0x12c   : > { %1351 = vmatpush.bf16.msrb.mxu2 %v3841_v54  ;;  %1364 = vmatpush.bf16.msrb.mxu3 %v3969_v55  ;;  %v5049_v54 = vld [vmem:[%s5768_s28 + $0x10c] sm:$0xf]  ;;  %v3614_v55 = vld [vmem:[%s5768_s28 + $0x118] sm:$0xf0] }
 0x12d   : > { %v3617_v56 = vor.u32 %v5049_v54, %v3614_v55  ;;  %v4309_v54 = vor.u32 %v5226_v47, %v4308_v46  ;;  %v4437_v55 = vor.u32 %v5258_v49, %v4436_v48  ;;  %v5268_v46 = vld [vmem:[%s5775_s14 + $0x3e4] sm:$0xf]  ;;  %v4486_v47 = vld [vmem:[%s5775_s14 + $0x3f0] sm:$0xf0] }
 0x12f   : > { %1326 = vmatpush.bf16.msrb.mxu0 %v3569_v1  ;;  %1339 = vmatpush.bf16.msrb.mxu1 %v3697_v2  ;;  %v4100_v1 = vld [vmem:[%s5775_s14 + $0xe0] sm:$0xf]  ;;  %v5174_v2 = vld [vmem:[%s5775_s14 + $0xec] sm:$0xf0] }
 0x130   : > { %1352 = vmatpush.bf16.msrb.mxu2 %v3825_v7  ;;  %1365 = vmatpush.bf16.msrb.mxu3 %v3953_v8  ;;  %v4356_v7 = vld [vmem:[%s5775_s14 + $0x2e0] sm:$0xf]  ;;  %v3489_v8 = vor.u32 %v5017_v50, %v3486_v53  ;;  %v4053_v50 = vor.u32 %v5162_v41, %v4052_v40  ;;  %v5158_v53 = vld [vmem:[%s5775_s14 + $0x6c] sm:$0xf0]  ;;  %v5204_v40 = vld [vmem:[%s5775_s14 + $0x1e4] sm:$0xf] }
 0x131   : > { %v4230_v41 = vld [vmem:[%s5775_s14 + $0x1f0] sm:$0xf0] }
 0x133   : > { %1327 = vmatpush.bf16.msrb.mxu0 %v3553_v14  ;;  %1340 = vmatpush.bf16.msrb.mxu1 %v3681_v15  ;;  %v4101_v14 = vor.u32 %v5174_v2, %v4100_v1  ;;  %v4229_v15 = vor.u32 %v5206_v4, %v4228_v3  ;;  %v4020_v3 = vld [vmem:[%s5775_s14 + $0x40] sm:$0xf]  ;;  %v5154_v4 = vld [vmem:[%s5775_s14 + $0x4c] sm:$0xf0] }
 0x134   : > { %1353 = vmatpush.bf16.msrb.mxu2 %v3809_v18  ;;  %1366 = vmatpush.bf16.msrb.mxu3 %v3937_v19  ;;  %v4357_v18 = vor.u32 %v5238_v9, %v4356_v7  ;;  %v4485_v19 = vor.u32 %v5270_v11, %v4484_v10  ;;  %v4293_v7 = vor.u32 %v5222_v60, %v4292_v59  ;;  %v5186_v9 = vld [vmem:[%s5775_s14 + $0x14c] sm:$0xf0]  ;;  %v4276_v10 = vld [vmem:[%s5775_s14 + $0x240] sm:$0xf]  ;;  %v5232_v59 = vld [vmem:[%s5775_s14 + $0x2c4] sm:$0xf] }
 0x135   : > { %v5218_v11 = vld [vmem:[%s5775_s14 + $0x24c] sm:$0xf0]  ;;  %v4342_v60 = vld [vmem:[%s5775_s14 + $0x2d0] sm:$0xf0] }
 0x137   : > { %1328 = vmatpush.bf16.msrb.mxu0 %v3537_v26  ;;  %1341 = vmatpush.bf16.msrb.mxu1 %v3665_v27  ;;  %v4085_v26 = vor.u32 %v5170_v17, %v4084_v16  ;;  %v4213_v27 = vor.u32 %v5202_v21, %v4212_v20  ;;  %v4004_v16 = vld [vmem:[%s5775_s14 + $0x20] sm:$0xf]  ;;  %v5150_v17 = vld [vmem:[%s5775_s14 + $0x2c] sm:$0xf0] }
 0x138   : > { %1354 = vmatpush.bf16.msrb.mxu2 %v3793_v30  ;;  %1367 = vmatpush.bf16.msrb.mxu3 %v3921_v31  ;;  %v4341_v30 = vor.u32 %v5234_v23, %v4340_v22  ;;  %v4469_v31 = vor.u32 %v5266_v25, %v4468_v24  ;;  %v4132_v20 = vld [vmem:[%s5775_s14 + $0x120] sm:$0xf]  ;;  %v5182_v21 = vld [vmem:[%s5775_s14 + $0x12c] sm:$0xf0] }
 0x139   : > { %v4260_v22 = vld [vmem:[%s5775_s14 + $0x220] sm:$0xf]  ;;  %v5214_v23 = vld [vmem:[%s5775_s14 + $0x22c] sm:$0xf0] }
 0x13a   : > { %v4388_v24 = vld [vmem:[%s5775_s14 + $0x320] sm:$0xf]  ;;  %v5246_v25 = vld [vmem:[%s5775_s14 + $0x32c] sm:$0xf0] }
 0x13b   : > { %1329 = vmatpush.bf16.msrb.mxu0 %v3521_v38  ;;  %1342 = vmatpush.bf16.msrb.mxu1 %v3649_v39  ;;  %v4069_v38 = vor.u32 %v5166_v29, %v4068_v28  ;;  %v4197_v39 = vor.u32 %v5198_v33, %v4196_v32  ;;  %v4133_v28 = vor.u32 %v5182_v21, %v4132_v20  ;;  %v5146_v29 = vld [vmem:[%s5775_s14 + $0xc] sm:$0xf0]  ;;  %v5192_v20 = vld [vmem:[%s5775_s14 + $0x184] sm:$0xf]  ;;  %v4182_v21 = vld [vmem:[%s5775_s14 + $0x190] sm:$0xf0] }
 0x13c   : > { %1355 = vmatpush.bf16.msrb.mxu2 %v3777_v42  ;;  %1368 = vmatpush.bf16.msrb.mxu3 %v3905_v43  ;;  %v4325_v42 = vor.u32 %v5230_v35, %v4324_v34  ;;  %v4453_v43 = vor.u32 %v5262_v37, %v4452_v36  ;;  %v4261_v32 = vor.u32 %v5214_v23, %v4260_v22  ;;  %v4244_v34 = vld [vmem:[%s5775_s14 + $0x200] sm:$0xf]  ;;  %v5210_v35 = vld [vmem:[%s5775_s14 + $0x20c] sm:$0xf0]  ;;  %v5224_v22 = vld [vmem:[%s5775_s14 + $0x284] sm:$0xf] }
 0x13d   : > { %v4389_v33 = vor.u32 %v5246_v25, %v4388_v24  ;;  %v4372_v36 = vld [vmem:[%s5775_s14 + $0x300] sm:$0xf]  ;;  %v5242_v37 = vld [vmem:[%s5775_s14 + $0x30c] sm:$0xf0]  ;;  %v4245_v48 = vor.u32 %v5210_v35, %v4244_v34  ;;  %v4310_v23 = vld [vmem:[%s5775_s14 + $0x290] sm:$0xf0] }
 0x13e   : > { %v4373_v49 = vor.u32 %v5242_v37, %v4372_v36  ;;  %v5256_v24 = vld [vmem:[%s5775_s14 + $0x384] sm:$0xf]  ;;  %v4438_v25 = vld [vmem:[%s5775_s14 + $0x390] sm:$0xf0] }
 0x13f   : > { %1330 = vmatpush.bf16.msrb.mxu0 %v3505_v51  ;;  %1343 = vmatpush.bf16.msrb.mxu1 %v3633_v52  ;;  %v4181_v51 = vor.u32 %v5194_v45, %v4180_v44  ;;  %v4036_v52 = vld [vmem:[%s5775_s14 + $0x60] sm:$0xf]  ;;  %v4358_v45 = vld [vmem:[%s5775_s14 + $0x2f0] sm:$0xf0]  ;;  %v5220_v34 = vld [vmem:[%s5775_s14 + $0x264] sm:$0xf] }
 0x140   : > { %1356 = vmatpush.bf16.msrb.mxu2 %v3761_v57  ;;  %1369 = vmatpush.bf16.msrb.mxu3 %v3889_v58  ;;  %v4164_v57 = vld [vmem:[%s5775_s14 + $0x160] sm:$0xf]  ;;  %v5190_v58 = vld [vmem:[%s5775_s14 + $0x16c] sm:$0xf0]  ;;  %v4037_v1 = vor.u32 %v5158_v53, %v4036_v52  ;;  %v5168_v52 = vld [vmem:[%s5775_s14 + $0xc4] sm:$0xf] }
 0x141   : > { %v4165_v2 = vor.u32 %v5190_v58, %v4164_v57  ;;  %v4086_v53 = vld [vmem:[%s5775_s14 + $0xd0] sm:$0xf0]  ;;  %v5200_v57 = vld [vmem:[%s5775_s14 + $0x1c4] sm:$0xf] }
 0x142   : > { %v4214_v58 = vld [vmem:[%s5775_s14 + $0x1d0] sm:$0xf0]  ;;  %v5252_v36 = vld [vmem:[%s5775_s14 + $0x364] sm:$0xf] }
 0x143   : > { %1331 = vmatpush.bf16.msrb.mxu0 %v3489_v8  ;;  %1344 = vmatpush.bf16.msrb.mxu1 %v3617_v56  ;;  %v4421_v8 = vor.u32 %v5254_v62, %v4420_v61  ;;  %v4148_v56 = vld [vmem:[%s5775_s14 + $0x140] sm:$0xf]  ;;  %v5264_v61 = vld [vmem:[%s5775_s14 + $0x3c4] sm:$0xf]  ;;  %v4470_v62 = vld [vmem:[%s5775_s14 + $0x3d0] sm:$0xf0] }
 0x144   : > { %1357 = vmatpush.bf16.msrb.mxu2 %v3745_v12  ;;  %1370 = vmatpush.bf16.msrb.mxu3 %v3873_v13  ;;  %v4404_v12 = vld [vmem:[%s5775_s14 + $0x340] sm:$0xf]  ;;  %v5250_v13 = vld [vmem:[%s5775_s14 + $0x34c] sm:$0xf0]  ;;  %v4294_v35 = vld [vmem:[%s5775_s14 + $0x270] sm:$0xf0] }
 0x145   : > { %v4422_v37 = vld [vmem:[%s5775_s14 + $0x370] sm:$0xf0] }
 0x146   : > { %1332 = vmatmul.bf16.vlgmr.msrb.gmra.mxu0 %v5953_v63  ;;  %1345 = vmatmul.bf16.vlgmr.msrb.gmra.mxu1 %v5955_v0 }
 0x147   : > { %2144 = vmatpush.bf16.msra.mxu0 %v4101_v14  ;;  %2157 = vmatpush.bf16.msra.mxu1 %v4229_v15  ;;  %v4021_v14 = vor.u32 %v5154_v4, %v4020_v3  ;;  %v4149_v15 = vor.u32 %v5186_v9, %v4148_v56  ;;  %v5164_v3 = vld [vmem:[%s5775_s14 + $0xa4] sm:$0xf]  ;;  %v4070_v4 = vld [vmem:[%s5775_s14 + $0xb0] sm:$0xf0] }
 0x148   : > { %2170 = vmatpush.bf16.msra.mxu2 %v4357_v18  ;;  %2183 = vmatpush.bf16.msra.mxu3 %v4485_v19  ;;  %v4277_v18 = vor.u32 %v5218_v11, %v4276_v10  ;;  %v4405_v19 = vor.u32 %v5250_v13, %v4404_v12  ;;  %v5196_v56 = vld [vmem:[%s5775_s14 + $0x1a4] sm:$0xf]  ;;  %v4198_v9 = vld [vmem:[%s5775_s14 + $0x1b0] sm:$0xf0] }
 0x149   : > { %1358 = vmatmul.bf16.vlgmr.msrb.gmra.mxu2 %v5957_v5  ;;  %1371 = vmatmul.bf16.vlgmr.msrb.gmra.mxu3 %v5959_v6  ;;  %v5228_v10 = vld [vmem:[%s5775_s14 + $0x2a4] sm:$0xf]  ;;  %v4326_v11 = vld [vmem:[%s5775_s14 + $0x2b0] sm:$0xf0] }
 0x14a   : > { %v5260_v12 = vld [vmem:[%s5775_s14 + $0x3a4] sm:$0xf]  ;;  %v4454_v13 = vld [vmem:[%s5775_s14 + $0x3b0] sm:$0xf0] }
 0x14b   : > { %2145 = vmatpush.bf16.msra.mxu0 %v4085_v26  ;;  %2158 = vmatpush.bf16.msra.mxu1 %v4213_v27  ;;  %v3988_v26 = vld [vmem:[%s5775_s14] sm:$0xf]  ;;  %v4005_v27 = vor.u32 %v5150_v17, %v4004_v16  ;;  %v5160_v16 = vld [vmem:[%s5775_s14 + $0x84] sm:$0xf]  ;;  %v4054_v17 = vld [vmem:[%s5775_s14 + $0x90] sm:$0xf0] }
 0x14c   : > { %2171 = vmatpush.bf16.msra.mxu2 %v4341_v30  ;;  %2184 = vmatpush.bf16.msra.mxu3 %v4469_v31  ;;  %v4116_v30 = vld [vmem:[%s5775_s14 + $0x100] sm:$0xf]  ;;  %v5178_v31 = vld [vmem:[%s5775_s14 + $0x10c] sm:$0xf0] }
 0x14d   : > { %v4117_v44 = vor.u32 %v5178_v31, %v4116_v30  ;;  %v4313_v30 = vor.u32 %v5224_v22, %v4310_v23  ;;  %v4441_v31 = vor.u32 %v5256_v24, %v4438_v25  ;;  %v4492_v22 = vld [vmem:[%s5775_s14 + $0x3e8] sm:$0xf]  ;;  %v5271_v23 = vld [vmem:[%s5775_s14 + $0x3f4] sm:$0xf0] }
 0x14f   : > { %2146 = vmatpush.bf16.msra.mxu0 %v4069_v38  ;;  %2159 = vmatpush.bf16.msra.mxu1 %v4197_v39  ;;  %v5172_v38 = vld [vmem:[%s5775_s14 + $0xe4] sm:$0xf]  ;;  %v4102_v39 = vld [vmem:[%s5775_s14 + $0xf0] sm:$0xf0] }
 0x150   : > { %2172 = vmatpush.bf16.msra.mxu2 %v4325_v42  ;;  %2185 = vmatpush.bf16.msra.mxu3 %v4453_v43  ;;  %v5236_v42 = vld [vmem:[%s5775_s14 + $0x2e4] sm:$0xf]  ;;  %v3989_v43 = vor.u32 %v5146_v29, %v3988_v26  ;;  %v4057_v26 = vor.u32 %v5160_v16, %v4054_v17  ;;  %v4038_v29 = vld [vmem:[%s5775_s14 + $0x70] sm:$0xf0]  ;;  %v4236_v16 = vld [vmem:[%s5775_s14 + $0x1e8] sm:$0xf] }
 0x151   : > { %v5207_v17 = vld [vmem:[%s5775_s14 + $0x1f4] sm:$0xf0] }
 0x153   : > { %2147 = vmatpush.bf16.msra.mxu0 %v4053_v50  ;;  %2160 = vmatpush.bf16.msra.mxu1 %v4181_v51  ;;  %v4105_v50 = vor.u32 %v5172_v38, %v4102_v39  ;;  %v4233_v51 = vor.u32 %v5204_v40, %v4230_v41  ;;  %v5152_v40 = vld [vmem:[%s5775_s14 + $0x44] sm:$0xf]  ;;  %v4022_v41 = vld [vmem:[%s5775_s14 + $0x50] sm:$0xf0] }
 0x154   : > { %2173 = vmatpush.bf16.msra.mxu2 %v4309_v54  ;;  %2186 = vmatpush.bf16.msra.mxu3 %v4437_v55  ;;  %v4361_v54 = vor.u32 %v5236_v42, %v4358_v45  ;;  %v4489_v55 = vor.u32 %v5268_v46, %v4486_v47  ;;  %v4297_v42 = vor.u32 %v5220_v34, %v4294_v35  ;;  %v4150_v45 = vld [vmem:[%s5775_s14 + $0x150] sm:$0xf0]  ;;  %v5216_v46 = vld [vmem:[%s5775_s14 + $0x244] sm:$0xf]  ;;  %v4348_v34 = vld [vmem:[%s5775_s14 + $0x2c8] sm:$0xf] }
 0x155   : > { %v4278_v47 = vld [vmem:[%s5775_s14 + $0x250] sm:$0xf0]  ;;  %v5235_v35 = vld [vmem:[%s5775_s14 + $0x2d4] sm:$0xf0] }
 0x157   : > { %2148 = vmatpush.bf16.msra.mxu0 %v4037_v1  ;;  %2161 = vmatpush.bf16.msra.mxu1 %v4165_v2  ;;  %v4089_v1 = vor.u32 %v5168_v52, %v4086_v53  ;;  %v4217_v2 = vor.u32 %v5200_v57, %v4214_v58  ;;  %v5148_v52 = vld [vmem:[%s5775_s14 + $0x24] sm:$0xf]  ;;  %v4006_v53 = vld [vmem:[%s5775_s14 + $0x30] sm:$0xf0] }
 0x158   : > { %2174 = vmatpush.bf16.msra.mxu2 %v4293_v7  ;;  %2187 = vmatpush.bf16.msra.mxu3 %v4421_v8  ;;  %v4345_v7 = vor.u32 %v5232_v59, %v4342_v60  ;;  %v4473_v8 = vor.u32 %v5264_v61, %v4470_v62  ;;  %v5180_v57 = vld [vmem:[%s5775_s14 + $0x124] sm:$0xf]  ;;  %v4134_v58 = vld [vmem:[%s5775_s14 + $0x130] sm:$0xf0] }
 0x159   : > { %v5212_v59 = vld [vmem:[%s5775_s14 + $0x224] sm:$0xf]  ;;  %v4262_v60 = vld [vmem:[%s5775_s14 + $0x230] sm:$0xf0] }
 0x15a   : > { %v5244_v61 = vld [vmem:[%s5775_s14 + $0x324] sm:$0xf]  ;;  %v4390_v62 = vld [vmem:[%s5775_s14 + $0x330] sm:$0xf0] }
 0x15b   : > { %2149 = vmatpush.bf16.msra.mxu0 %v4021_v14  ;;  %2162 = vmatpush.bf16.msra.mxu1 %v4149_v15  ;;  %v4073_v14 = vor.u32 %v5164_v3, %v4070_v4  ;;  %v4201_v15 = vor.u32 %v5196_v56, %v4198_v9  ;;  %v4137_v3 = vor.u32 %v5180_v57, %v4134_v58  ;;  %v3990_v4 = vld [vmem:[%s5775_s14 + $0x10] sm:$0xf0]  ;;  %v5163_v57 = vld [vmem:[%s5775_s14 + $0x94] sm:$0xf0] }
 0x15c   : > { %2175 = vmatpush.bf16.msra.mxu2 %v4277_v18  ;;  %2188 = vmatpush.bf16.msra.mxu3 %v4405_v19  ;;  %v4329_v18 = vor.u32 %v5228_v10, %v4326_v11  ;;  %v4457_v19 = vor.u32 %v5260_v12, %v4454_v13  ;;  %v4265_v56 = vor.u32 %v5212_v59, %v4262_v60  ;;  %v5208_v10 = vld [vmem:[%s5775_s14 + $0x204] sm:$0xf]  ;;  %v4246_v11 = vld [vmem:[%s5775_s14 + $0x210] sm:$0xf0]  ;;  %v4188_v60 = vld [vmem:[%s5775_s14 + $0x188] sm:$0xf] }
 0x15d   : > { %v4393_v9 = vor.u32 %v5244_v61, %v4390_v62  ;;  %v5240_v12 = vld [vmem:[%s5775_s14 + $0x304] sm:$0xf]  ;;  %v4374_v13 = vld [vmem:[%s5775_s14 + $0x310] sm:$0xf0]  ;;  %v4249_v24 = vor.u32 %v5208_v10, %v4246_v11  ;;  %v5195_v61 = vld [vmem:[%s5775_s14 + $0x194] sm:$0xf0] }
 0x15e   : > { %v4377_v25 = vor.u32 %v5240_v12, %v4374_v13  ;;  %v4316_v62 = vld [vmem:[%s5775_s14 + $0x288] sm:$0xf]  ;;  %v5191_v12 = vld [vmem:[%s5775_s14 + $0x174] sm:$0xf0] }
 0x15f   : > { %2150 = vmatpush.bf16.msra.mxu0 %v4005_v27  ;;  %2163 = vmatpush.bf16.msra.mxu1 %v4133_v28  ;;  %v4185_v27 = vor.u32 %v5192_v20, %v4182_v21  ;;  %v5156_v28 = vld [vmem:[%s5775_s14 + $0x64] sm:$0xf]  ;;  %v5239_v21 = vld [vmem:[%s5775_s14 + $0x2f4] sm:$0xf0]  ;;  %v4172_v11 = vld [vmem:[%s5775_s14 + $0x168] sm:$0xf] }
 0x160   : > { %2176 = vmatpush.bf16.msra.mxu2 %v4261_v32  ;;  %2189 = vmatpush.bf16.msra.mxu3 %v4389_v33  ;;  %v5188_v32 = vld [vmem:[%s5775_s14 + $0x164] sm:$0xf]  ;;  %v4166_v33 = vld [vmem:[%s5775_s14 + $0x170] sm:$0xf0]  ;;  %v4041_v38 = vor.u32 %v5156_v28, %v4038_v29  ;;  %v4092_v28 = vld [vmem:[%s5775_s14 + $0xc8] sm:$0xf] }
 0x161   : > { %v4169_v39 = vor.u32 %v5188_v32, %v4166_v33  ;;  %v5171_v29 = vld [vmem:[%s5775_s14 + $0xd4] sm:$0xf0]  ;;  %v4220_v32 = vld [vmem:[%s5775_s14 + $0x1c8] sm:$0xf] }
 0x162   : > { %v5203_v33 = vld [vmem:[%s5775_s14 + $0x1d4] sm:$0xf0]  ;;  %v4300_v13 = vld [vmem:[%s5775_s14 + $0x268] sm:$0xf] }
 0x163   : > { %2151 = vmatpush.bf16.msra.mxu0 %v3989_v43  ;;  %2164 = vmatpush.bf16.msra.mxu1 %v4117_v44  ;;  %v4425_v43 = vor.u32 %v5252_v36, %v4422_v37  ;;  %v5184_v44 = vld [vmem:[%s5775_s14 + $0x144] sm:$0xf]  ;;  %v4476_v36 = vld [vmem:[%s5775_s14 + $0x3c8] sm:$0xf]  ;;  %v5267_v37 = vld [vmem:[%s5775_s14 + $0x3d4] sm:$0xf0] }
 0x164   : > { %2177 = vmatpush.bf16.msra.mxu2 %v4245_v48  ;;  %2190 = vmatpush.bf16.msra.mxu3 %v4373_v49  ;;  %v5248_v48 = vld [vmem:[%s5775_s14 + $0x344] sm:$0xf]  ;;  %v4406_v49 = vld [vmem:[%s5775_s14 + $0x350] sm:$0xf0] }
 0x166   : > { %2152 = vmatmul.bf16.vlgmr.msra.gmra.mxu0 %v5953_v63  ;;  %2165 = vmatmul.bf16.vlgmr.msra.gmra.mxu1 %v5955_v0 }
 0x167   : > { %2196 = vmatpush.bf16.msrb.mxu0 %v4105_v50  ;;  %2209 = vmatpush.bf16.msrb.mxu1 %v4233_v51  ;;  %v4025_v50 = vor.u32 %v5152_v40, %v4022_v41  ;;  %v4153_v51 = vor.u32 %v5184_v44, %v4150_v45  ;;  %v4076_v40 = vld [vmem:[%s5775_s14 + $0xa8] sm:$0xf]  ;;  %v5167_v41 = vld [vmem:[%s5775_s14 + $0xb4] sm:$0xf0] }
 0x168   : > { %2222 = vmatpush.bf16.msrb.mxu2 %v4361_v54  ;;  %2235 = vmatpush.bf16.msrb.mxu3 %v4489_v55  ;;  %v4281_v54 = vor.u32 %v5216_v46, %v4278_v47  ;;  %v4409_v55 = vor.u32 %v5248_v48, %v4406_v49  ;;  %v4204_v44 = vld [vmem:[%s5775_s14 + $0x1a8] sm:$0xf]  ;;  %v5199_v45 = vld [vmem:[%s5775_s14 + $0x1b4] sm:$0xf0] }
 0x169   : > { %2178 = vmatmul.bf16.vlgmr.msra.gmra.mxu2 %v5957_v5  ;;  %2191 = vmatmul.bf16.vlgmr.msra.gmra.mxu3 %v5959_v6  ;;  %v4332_v46 = vld [vmem:[%s5775_s14 + $0x2a8] sm:$0xf]  ;;  %v5231_v47 = vld [vmem:[%s5775_s14 + $0x2b4] sm:$0xf0] }
 0x16a   : > { %v4460_v48 = vld [vmem:[%s5775_s14 + $0x3a8] sm:$0xf]  ;;  %v5263_v49 = vld [vmem:[%s5775_s14 + $0x3b4] sm:$0xf0]  ;;  %v4333_v58 = vor.u32 %v5231_v47, %v4332_v46 }
 0x16b   : > { %2197 = vmatpush.bf16.msrb.mxu0 %v4089_v1  ;;  %2210 = vmatpush.bf16.msrb.mxu1 %v4217_v2  ;;  %v5144_v1 = vld [vmem:[%s5775_s14 + $0x4] sm:$0xf]  ;;  %v4009_v2 = vor.u32 %v5148_v52, %v4006_v53  ;;  %v4077_v52 = vor.u32 %v5167_v41, %v4076_v40  ;;  %v4205_v53 = vor.u32 %v5199_v45, %v4204_v44  ;;  %v4140_v41 = vld [vmem:[%s5775_s14 + $0x128] sm:$0xf]  ;;  %v5215_v46 = vld [vmem:[%s5775_s14 + $0x234] sm:$0xf0] }
 0x16c   : > { %2223 = vmatpush.bf16.msrb.mxu2 %v4345_v7  ;;  %2236 = vmatpush.bf16.msrb.mxu3 %v4473_v8  ;;  %v5176_v7 = vld [vmem:[%s5775_s14 + $0x104] sm:$0xf]  ;;  %v4118_v8 = vld [vmem:[%s5775_s14 + $0x110] sm:$0xf0]  ;;  %v4461_v59 = vor.u32 %v5263_v49, %v4460_v48  ;;  %v4396_v47 = vld [vmem:[%s5775_s14 + $0x328] sm:$0xf] }
 0x16d   : > { %v4121_v20 = vor.u32 %v5176_v7, %v4118_v8  ;;  %v4189_v7 = vor.u32 %v5195_v61, %v4188_v60  ;;  %v4044_v8 = vld [vmem:[%s5775_s14 + $0x68] sm:$0xf]  ;;  %v5247_v48 = vld [vmem:[%s5775_s14 + $0x334] sm:$0xf0] }
 0x16e   : > { %v4397_v60 = vor.u32 %v5247_v48, %v4396_v47  ;;  %v4252_v61 = vld [vmem:[%s5775_s14 + $0x208] sm:$0xf] }
 0x16f   : > { %2198 = vmatpush.bf16.msrb.mxu0 %v4073_v14  ;;  %2211 = vmatpush.bf16.msrb.mxu1 %v4201_v15  ;;  %v4108_v14 = vld [vmem:[%s5775_s14 + $0xe8] sm:$0xf]  ;;  %v5175_v15 = vld [vmem:[%s5775_s14 + $0xf4] sm:$0xf0] }
 0x170   : > { %2224 = vmatpush.bf16.msrb.mxu2 %v4329_v18  ;;  %2237 = vmatpush.bf16.msrb.mxu3 %v4457_v19  ;;  %v4364_v18 = vld [vmem:[%s5775_s14 + $0x2e8] sm:$0xf]  ;;  %v3993_v19 = vor.u32 %v5144_v1, %v3990_v4  ;;  %v5227_v1 = vld [vmem:[%s5775_s14 + $0x294] sm:$0xf0] }
 0x173   : > { %2199 = vmatpush.bf16.msrb.mxu0 %v4057_v26  ;;  %2212 = vmatpush.bf16.msrb.mxu1 %v4185_v27  ;;  %v4109_v26 = vor.u32 %v5175_v15, %v4108_v14  ;;  %v4237_v27 = vor.u32 %v5207_v17, %v4236_v16  ;;  %v5223_v16 = vld [vmem:[%s5775_s14 + $0x274] sm:$0xf0]  ;;  %v4428_v17 = vld [vmem:[%s5775_s14 + $0x368] sm:$0xf] }
 0x174   : > { %2225 = vmatpush.bf16.msrb.mxu2 %v4313_v30  ;;  %2238 = vmatpush.bf16.msrb.mxu3 %v4441_v31  ;;  %v4365_v30 = vor.u32 %v5239_v21, %v4364_v18  ;;  %v4493_v31 = vor.u32 %v5271_v23, %v4492_v22  ;;  %v5255_v18 = vld [vmem:[%s5775_s14 + $0x374] sm:$0xf0]  ;;  %v4173_v23 = vor.u32 %v5191_v12, %v4172_v11  ;;  %v4366_v11 = vld [vmem:[%s5775_s14 + $0x2f8] sm:$0xf0]  ;;  %v5269_v12 = vld [vmem:[%s5775_s14 + $0x3ec] sm:$0xf] }
 0x177   : > { %2200 = vmatpush.bf16.msrb.mxu0 %v4041_v38  ;;  %2213 = vmatpush.bf16.msrb.mxu1 %v4169_v39  ;;  %v4093_v38 = vor.u32 %v5171_v29, %v4092_v28  ;;  %v4221_v39 = vor.u32 %v5203_v33, %v4220_v32  ;;  %v4429_v28 = vor.u32 %v5255_v18, %v4428_v17  ;;  %v4156_v29 = vld [vmem:[%s5775_s14 + $0x148] sm:$0xf]  ;;  %v5219_v32 = vld [vmem:[%s5775_s14 + $0x254] sm:$0xf0] }
 0x178   : > { %2226 = vmatpush.bf16.msrb.mxu2 %v4297_v42  ;;  %2239 = vmatpush.bf16.msrb.mxu3 %v4425_v43  ;;  %v4349_v42 = vor.u32 %v5235_v35, %v4348_v34  ;;  %v4477_v43 = vor.u32 %v5267_v37, %v4476_v36  ;;  %v4412_v33 = vld [vmem:[%s5775_s14 + $0x348] sm:$0xf]  ;;  %v5251_v34 = vld [vmem:[%s5775_s14 + $0x354] sm:$0xf0] }
 0x179   : > { %v4012_v37 = vld [vmem:[%s5775_s14 + $0x28] sm:$0xf]  ;;  %v4413_v40 = vor.u32 %v5251_v34, %v4412_v33  ;;  %v4478_v33 = vld [vmem:[%s5775_s14 + $0x3d8] sm:$0xf0] }
 0x17b   : > { %2201 = vmatpush.bf16.msrb.mxu0 %v4025_v50  ;;  %2214 = vmatpush.bf16.msrb.mxu1 %v4153_v51 }
 0x17c   : > { %2227 = vmatpush.bf16.msrb.mxu2 %v4281_v54  ;;  %2240 = vmatpush.bf16.msrb.mxu3 %v4409_v55  ;;  %v4060_v55 = vld [vmem:[%s5775_s14 + $0x88] sm:$0xf] }
 0x17d   : > { %v4061_v4 = vor.u32 %v5163_v57, %v4060_v55  ;;  %v5147_v55 = vld [vmem:[%s5775_s14 + $0x14] sm:$0xf0]  ;;  %v4124_v57 = vld [vmem:[%s5775_s14 + $0x108] sm:$0xf] }
 0x17f   : > { %2202 = vmatpush.bf16.msrb.mxu0 %v4009_v2  ;;  %2215 = vmatpush.bf16.msrb.mxu1 %v4137_v3  ;;  %v4444_v2 = vld [vmem:[%s5775_s14 + $0x388] sm:$0xf]  ;;  %v5259_v3 = vld [vmem:[%s5775_s14 + $0x394] sm:$0xf0] }
 0x180   : > { %2228 = vmatpush.bf16.msrb.mxu2 %v4265_v56  ;;  %2241 = vmatpush.bf16.msrb.mxu3 %v4393_v9  ;;  %v5159_v56 = vld [vmem:[%s5775_s14 + $0x74] sm:$0xf0]  ;;  %v4317_v9 = vor.u32 %v5227_v1, %v4316_v62  ;;  %v4445_v10 = vor.u32 %v5259_v3, %v4444_v2  ;;  %v4380_v1 = vld [vmem:[%s5775_s14 + $0x308] sm:$0xf]  ;;  %v5173_v3 = vld [vmem:[%s5775_s14 + $0xec] sm:$0xf] }
 0x181   : > { %v4045_v22 = vor.u32 %v5159_v56, %v4044_v8  ;;  %v5211_v62 = vld [vmem:[%s5775_s14 + $0x214] sm:$0xf0]  ;;  %v4238_v8 = vld [vmem:[%s5775_s14 + $0x1f8] sm:$0xf0]  ;;  %v5237_v56 = vld [vmem:[%s5775_s14 + $0x2ec] sm:$0xf] }
 0x182   : > { %v1177_v50 = vpop.f32.mrf.mxu0  ;;  %v1190_v51 = vpop.f32.mrf.mxu1  ;;  %v5243_v2 = vld [vmem:[%s5775_s14 + $0x314] sm:$0xf0] }
 0x183   : > { %2203 = vmatpush.bf16.msrb.mxu0 %v3993_v19  ;;  %2216 = vmatpush.bf16.msrb.mxu1 %v4121_v20  ;;  %v1191_v54 = vadd.f32 %v1190_v51, %v1177_v50  ;;  %v3996_v51 = vld [vmem:[%s5775_s14 + $0x8] sm:$0xf] }
 0x184   : > { %2229 = vmatpush.bf16.msrb.mxu2 %v4249_v24  ;;  %2242 = vmatpush.bf16.msrb.mxu3 %v4377_v25  ;;  %v4028_v24 = vld [vmem:[%s5775_s14 + $0x48] sm:$0xf]  ;;  %v5155_v25 = vld [vmem:[%s5775_s14 + $0x54] sm:$0xf0] }
 0x185   : > { %v4029_v35 = vor.u32 %v5155_v25, %v4028_v24 }
 0x186   : > { %2204 = vmatmul.bf16.vlgmr.msrb.gmra.mxu0 %v5953_v63  ;;  %2217 = vmatmul.bf16.vlgmr.msrb.gmra.mxu1 %v5955_v0 }
 0x187   : > { %2248 = vmatpush.bf16.msra.mxu0 %v4109_v26  ;;  %2261 = vmatpush.bf16.msra.mxu1 %v4237_v27  ;;  %v4301_v27 = vor.u32 %v5223_v16, %v4300_v13  ;;  %v4494_v13 = vld [vmem:[%s5775_s14 + $0x3f8] sm:$0xf0] }
 0x188   : > { %2274 = vmatpush.bf16.msra.mxu2 %v4365_v30  ;;  %2287 = vmatpush.bf16.msra.mxu3 %v4493_v31  ;;  %v5187_v30 = vld [vmem:[%s5775_s14 + $0x154] sm:$0xf0]  ;;  %v4284_v31 = vld [vmem:[%s5775_s14 + $0x248] sm:$0xf] }
 0x189   : > { %2230 = vmatmul.bf16.vlgmr.msrb.gmra.mxu2 %v5957_v5  ;;  %2243 = vmatmul.bf16.vlgmr.msrb.gmra.mxu3 %v5959_v6  ;;  %v1203_v14 = vpop.f32.mrf.mxu2  ;;  %v1216_v15 = vpop.f32.mrf.mxu3  ;;  %v4157_v36 = vor.u32 %v5187_v30, %v4156_v29  ;;  %v4222_v29 = vld [vmem:[%s5775_s14 + $0x1d8] sm:$0xf0]  ;;  %v5233_v30 = vld [vmem:[%s5775_s14 + $0x2cc] sm:$0xf] }
 0x18a   : > { %v1204_v19 = vadd.f32 %v1203_v14, %v1191_v54  ;;  %v1179_v20 = vpop.f32.mrf.mxu0  ;;  %v1192_v21 = vpop.f32.mrf.mxu1  ;;  %v4253_v14 = vor.u32 %v5211_v62, %v4252_v61  ;;  %v4446_v61 = vld [vmem:[%s5775_s14 + $0x398] sm:$0xf0] }
 0x18b   : > { %2249 = vmatpush.bf16.msra.mxu0 %v4093_v38  ;;  %2262 = vmatpush.bf16.msra.mxu1 %v4221_v39  ;;  %v5151_v38 = vld [vmem:[%s5775_s14 + $0x34] sm:$0xf0]  ;;  %v4285_v39 = vor.u32 %v5219_v32, %v4284_v31  ;;  %v5169_v20 = vld [vmem:[%s5775_s14 + $0xcc] sm:$0xf]  ;;  %v4094_v21 = vld [vmem:[%s5775_s14 + $0xd8] sm:$0xf0] }
 0x18c   : > { %2275 = vmatpush.bf16.msra.mxu2 %v4349_v42  ;;  %2288 = vmatpush.bf16.msra.mxu3 %v4477_v43  ;;  %v6273_v26 = vadd.f32 %v1216_v15, %v1204_v19  ;;  %v5183_v42 = vld [vmem:[%s5775_s14 + $0x134] sm:$0xf0]  ;;  %v4268_v43 = vld [vmem:[%s5775_s14 + $0x228] sm:$0xf]  ;;  %v4381_v15 = vor.u32 %v5243_v2, %v4380_v1  ;;  %v4350_v31 = vld [vmem:[%s5775_s14 + $0x2d8] sm:$0xf0] }
 0x18d   : > { %v5265_v32 = vld [vmem:[%s5775_s14 + $0x3cc] sm:$0xf] }
 0x18f   : > { %2250 = vmatpush.bf16.msra.mxu0 %v4077_v52  ;;  %2263 = vmatpush.bf16.msra.mxu1 %v4205_v53  ;;  %v4013_v52 = vor.u32 %v5151_v38, %v4012_v37  ;;  %v4141_v53 = vor.u32 %v5183_v42, %v4140_v41  ;;  %v5165_v37 = vld [vmem:[%s5775_s14 + $0xac] sm:$0xf]  ;;  %v4078_v38 = vld [vmem:[%s5775_s14 + $0xb8] sm:$0xf0] }
 0x190   : > { %2276 = vmatpush.bf16.msra.mxu2 %v4333_v58  ;;  %2289 = vmatpush.bf16.msra.mxu3 %v4461_v59  ;;  %v5179_v58 = vld [vmem:[%s5775_s14 + $0x114] sm:$0xf0]  ;;  %v4269_v59 = vor.u32 %v5215_v46, %v4268_v43  ;;  %v5197_v41 = vld [vmem:[%s5775_s14 + $0x1ac] sm:$0xf]  ;;  %v4206_v42 = vld [vmem:[%s5775_s14 + $0x1b8] sm:$0xf0]  ;;  %v4081_v47 = vor.u32 %v5165_v37, %v4078_v38 }
 0x191   : > { %v1205_v44 = vpop.f32.mrf.mxu2  ;;  %v1218_v45 = vpop.f32.mrf.mxu3  ;;  %v5229_v43 = vld [vmem:[%s5775_s14 + $0x2ac] sm:$0xf]  ;;  %v4462_v46 = vld [vmem:[%s5775_s14 + $0x3b8] sm:$0xf0]  ;;  %v4209_v48 = vor.u32 %v5197_v41, %v4206_v42 }
 0x192   : > { %v1229_v49 = vpop.f32.mrf.mxu0  ;;  %v1242_v50 = vpop.f32.mrf.mxu1  ;;  %v4334_v44 = vld [vmem:[%s5775_s14 + $0x2b8] sm:$0xf0]  ;;  %v5261_v45 = vld [vmem:[%s5775_s14 + $0x3ac] sm:$0xf] }
 0x193   : > { %2251 = vmatpush.bf16.msra.mxu0 %v4061_v4  ;;  %2264 = vmatpush.bf16.msra.mxu1 %v4189_v7  ;;  %v1243_v54 = vadd.f32 %v1242_v50, %v1229_v49  ;;  %v4110_v4 = vld [vmem:[%s5775_s14 + $0xf8] sm:$0xf0]  ;;  %v5205_v7 = vld [vmem:[%s5775_s14 + $0x1ec] sm:$0xf] }
 0x194   : > { %2277 = vmatpush.bf16.msra.mxu2 %v4317_v9  ;;  %2290 = vmatpush.bf16.msra.mxu3 %v4445_v10  ;;  %v3997_v9 = vor.u32 %v5147_v55, %v3996_v51  ;;  %v4125_v10 = vor.u32 %v5179_v58, %v4124_v57  ;;  %v4113_v16 = vor.u32 %v5173_v3, %v4110_v4  ;;  %v5161_v51 = vld [vmem:[%s5775_s14 + $0x8c] sm:$0xf]  ;;  %v4190_v57 = vld [vmem:[%s5775_s14 + $0x198] sm:$0xf0] }
 0x195   : > { %v4241_v17 = vor.u32 %v5205_v7, %v4238_v8  ;;  %v5193_v55 = vld [vmem:[%s5775_s14 + $0x18c] sm:$0xf]  ;;  %v4046_v8 = vld [vmem:[%s5775_s14 + $0x78] sm:$0xf0] }
 0x196   : > { %v5225_v58 = vld [vmem:[%s5775_s14 + $0x28c] sm:$0xf]  ;;  %v4193_v4 = vor.u32 %v5193_v55, %v4190_v57  ;;  %v4014_v38 = vld [vmem:[%s5775_s14 + $0x38] sm:$0xf0] }
 0x197   : > { %2252 = vmatpush.bf16.msra.mxu0 %v4045_v22  ;;  %2265 = vmatpush.bf16.msra.mxu1 %v4173_v23  ;;  %v4369_v22 = vor.u32 %v5237_v56, %v4366_v11  ;;  %v4497_v23 = vor.u32 %v5269_v12, %v4494_v13  ;;  %v5157_v7 = vld [vmem:[%s5775_s14 + $0x6c] sm:$0xf]  ;;  %v4174_v11 = vld [vmem:[%s5775_s14 + $0x178] sm:$0xf0] }
 0x198   : > { %2278 = vmatpush.bf16.msra.mxu2 %v4301_v27  ;;  %2291 = vmatpush.bf16.msra.mxu3 %v4429_v28  ;;  %v5201_v28 = vld [vmem:[%s5775_s14 + $0x1cc] sm:$0xf]  ;;  %v4302_v13 = vld [vmem:[%s5775_s14 + $0x278] sm:$0xf0] }
 0x199   : > { %v1255_v18 = vpop.f32.mrf.mxu2  ;;  %v1268_v19 = vpop.f32.mrf.mxu3  ;;  %v5221_v12 = vld [vmem:[%s5775_s14 + $0x26c] sm:$0xf]  ;;  %v4126_v55 = vld [vmem:[%s5775_s14 + $0x118] sm:$0xf0] }
 0x19a   : > { %v1256_v24 = vadd.f32 %v1255_v18, %v1243_v54  ;;  %v1231_v25 = vpop.f32.mrf.mxu0  ;;  %v1244_v27 = vpop.f32.mrf.mxu1  ;;  %v4465_v54 = vor.u32 %v5261_v45, %v4462_v46  ;;  %v5153_v18 = vld [vmem:[%s5775_s14 + $0x4c] sm:$0xf]  ;;  %v4270_v45 = vld [vmem:[%s5775_s14 + $0x238] sm:$0xf0] }
 0x19b   : > { %2253 = vmatpush.bf16.msra.mxu0 %v4029_v35  ;;  %2266 = vmatpush.bf16.msra.mxu1 %v4157_v36  ;;  %v4097_v35 = vor.u32 %v5169_v20, %v4094_v21  ;;  %v4225_v36 = vor.u32 %v5201_v28, %v4222_v29  ;;  %v4305_v20 = vor.u32 %v5221_v12, %v4302_v13  ;;  %v4286_v28 = vld [vmem:[%s5775_s14 + $0x258] sm:$0xf0]  ;;  %v5249_v29 = vld [vmem:[%s5775_s14 + $0x34c] sm:$0xf]  ;;  %v5298_v13 = vld [vmem:[%s5786_s17 + $0xcc] sm:$0xf0] }
 0x19c   : > { %2279 = vmatpush.bf16.msra.mxu2 %v4285_v39  ;;  %2292 = vmatpush.bf16.msra.mxu3 %v4413_v40  ;;  %v6313_v34 = vadd.f32 %v1268_v19, %v1256_v24  ;;  %v4353_v39 = vor.u32 %v5233_v30, %v4350_v31  ;;  %v4481_v40 = vor.u32 %v5265_v32, %v4478_v33  ;;  %v4030_v19 = vld [vmem:[%s5775_s14 + $0x58] sm:$0xf0]  ;;  %v5217_v24 = vld [vmem:[%s5775_s14 + $0x24c] sm:$0xf] }
 0x19d   : > { %v4414_v30 = vld [vmem:[%s5775_s14 + $0x358] sm:$0xf0]  ;;  %v5149_v37 = vld [vmem:[%s5775_s14 + $0x2c] sm:$0xf] }
 0x19e   : > { %v4417_v41 = vor.u32 %v5249_v29, %v4414_v30  ;;  %v5181_v42 = vld [vmem:[%s5775_s14 + $0x12c] sm:$0xf]  ;;  %v4548_v29 = vld [vmem:[%s5786_s17 + $0x60] sm:$0xf] }
 0x19f   : > { %2254 = vmatpush.bf16.msra.mxu0 %v4013_v52  ;;  %2267 = vmatpush.bf16.msra.mxu1 %v4141_v53  ;;  %v4062_v52 = vld [vmem:[%s5775_s14 + $0x98] sm:$0xf0]  ;;  %v4337_v53 = vor.u32 %v5229_v43, %v4334_v44  ;;  %v5213_v44 = vld [vmem:[%s5775_s14 + $0x22c] sm:$0xf] }
 0x1a0   : > { %2280 = vmatpush.bf16.msra.mxu2 %v4269_v59  ;;  %2293 = vmatpush.bf16.msra.mxu3 %v4397_v60  ;;  %v4318_v59 = vld [vmem:[%s5775_s14 + $0x298] sm:$0xf0]  ;;  %v5257_v60 = vld [vmem:[%s5775_s14 + $0x38c] sm:$0xf]  ;;  %v4065_v3 = vor.u32 %v5161_v51, %v4062_v52 }
 0x1a1   : > { %v1257_v49 = vpop.f32.mrf.mxu2  ;;  %v1270_v50 = vpop.f32.mrf.mxu3  ;;  %v4321_v56 = vor.u32 %v5225_v58, %v4318_v59  ;;  %v4142_v43 = vld [vmem:[%s5775_s14 + $0x138] sm:$0xf0]  ;;  %v5245_v46 = vld [vmem:[%s5775_s14 + $0x32c] sm:$0xf] }
 0x1a2   : > { %v4145_v49 = vor.u32 %v5181_v42, %v4142_v43  ;;  %v5145_v50 = vld [vmem:[%s5775_s14 + $0xc] sm:$0xf]  ;;  %v3998_v51 = vld [vmem:[%s5775_s14 + $0x18] sm:$0xf0] }
 0x1a3   : > { %2255 = vmatpush.bf16.msra.mxu0 %v3997_v9  ;;  %2268 = vmatpush.bf16.msra.mxu1 %v4125_v10  ;;  %v1281_v62 = vpop.f32.mrf.mxu0  ;;  %v1294_v1 = vpop.f32.mrf.mxu1  ;;  %v4449_v9 = vor.u32 %v5257_v60, %v4446_v61  ;;  %v5189_v10 = vld [vmem:[%s5775_s14 + $0x16c] sm:$0xf]  ;;  %v4254_v58 = vld [vmem:[%s5775_s14 + $0x218] sm:$0xf0] }
 0x1a4   : > { %2281 = vmatpush.bf16.msra.mxu2 %v4253_v14  ;;  %2294 = vmatpush.bf16.msra.mxu3 %v4381_v15  ;;  %v1295_v2 = vadd.f32 %v1294_v1, %v1281_v62  ;;  %v5253_v14 = vld [vmem:[%s5775_s14 + $0x36c] sm:$0xf]  ;;  %v4430_v15 = vld [vmem:[%s5775_s14 + $0x378] sm:$0xf0]  ;;  %v4612_v1 = vld [vmem:[%s5786_s17 + $0xe0] sm:$0xf] }
 0x1a5   : > { %v4433_v21 = vor.u32 %v5253_v14, %v4430_v15  ;;  %v5177_v52 = vld [vmem:[%s5775_s14 + $0x10c] sm:$0xf]  ;;  %v4382_v62 = vld [vmem:[%s5775_s14 + $0x318] sm:$0xf0]  ;;  %v4724_v14 = vld [vmem:[%s5786_s17 + $0x1c0] sm:$0xf] }
 0x1a6   : > { %2256 = vmatmul.bf16.vlgmr.msra.gmra.mxu0 %v5953_v63  ;;  %2269 = vmatmul.bf16.vlgmr.msra.gmra.mxu1 %v5955_v0  ;;  %v5209_v57 = vld [vmem:[%s5775_s14 + $0x20c] sm:$0xf]  ;;  %v5330_v15 = vld [vmem:[%s5786_s17 + $0x1cc] sm:$0xf0] }
 0x1a7   : > { %2300 = vmatpush.bf16.msrb.mxu0 %v4113_v16  ;;  %2313 = vmatpush.bf16.msrb.mxu1 %v4241_v17  ;;  %v4049_v16 = vor.u32 %v5157_v7, %v4046_v8  ;;  %v4177_v17 = vor.u32 %v5189_v10, %v4174_v11  ;;  %v5241_v61 = vld [vmem:[%s5775_s14 + $0x30c] sm:$0xf]  ;;  %v4001_v7 = vor.u32 %v5145_v50, %v3998_v51  ;;  %v4596_v11 = vld [vmem:[%s5786_s17 + $0xc0] sm:$0xf] }
 0x1a8   : > { %2326 = vmatpush.bf16.msrb.mxu2 %v4369_v22  ;;  %2339 = vmatpush.bf16.msrb.mxu3 %v4497_v23  ;;  %v5185_v22 = vld [vmem:[%s5775_s14 + $0x14c] sm:$0xf]  ;;  %v4158_v23 = vld [vmem:[%s5775_s14 + $0x158] sm:$0xf0]  ;;  %v4129_v8 = vor.u32 %v5177_v52, %v4126_v55  ;;  %v5278_v52 = vld [vmem:[%s5786_s17 + $0x2c] sm:$0xf0] }
 0x1a9   : > { %2282 = vmatmul.bf16.vlgmr.msra.gmra.mxu2 %v5957_v5  ;;  %2295 = vmatmul.bf16.vlgmr.msra.gmra.mxu3 %v5959_v6 }
 0x1ab   : > { %2301 = vmatpush.bf16.msrb.mxu0 %v4097_v35  ;;  %2314 = vmatpush.bf16.msrb.mxu1 %v4225_v36  ;;  %v1283_v32 = vpop.f32.mrf.mxu0  ;;  %v1296_v33 = vpop.f32.mrf.mxu1  ;;  %v4033_v35 = vor.u32 %v5153_v18, %v4030_v19  ;;  %v4161_v36 = vor.u32 %v5185_v22, %v4158_v23  ;;  %v4725_v18 = vor.u32 %v5330_v15, %v4724_v14  ;;  %v5294_v19 = vld [vmem:[%s5786_s17 + $0xac] sm:$0xf0]  ;;  %v4564_v23 = vld [vmem:[%s5786_s17 + $0x80] sm:$0xf] }
 0x1ac   : > { %2327 = vmatpush.bf16.msrb.mxu2 %v4353_v39  ;;  %2340 = vmatpush.bf16.msrb.mxu3 %v4481_v40  ;;  %v1307_v25 = vpop.f32.mrf.mxu2  ;;  %v1320_v27 = vpop.f32.mrf.mxu3  ;;  %v4289_v40 = vor.u32 %v5217_v24, %v4286_v28  ;;  %v4676_v32 = vld [vmem:[%s5786_s17 + $0x160] sm:$0xf]  ;;  %v5318_v33 = vld [vmem:[%s5786_s17 + $0x16c] sm:$0xf0] }
 0x1ad   : > { %v1308_v31 = vadd.f32 %v1307_v25, %v1295_v2  ;;  %v5302_v2 = vld [vmem:[%s5786_s17 + $0xec] sm:$0xf0] }
 0x1ae   : > { %v4613_v10 = vor.u32 %v5302_v2, %v4612_v1  ;;  %v5290_v25 = vld [vmem:[%s5786_s17 + $0x8c] sm:$0xf0]  ;;  %v5300_v1 = vld [vmem:[%s5786_s17 + $0xe4] sm:$0xf]  ;;  %v4628_v2 = vld [vmem:[%s5786_s17 + $0x100] sm:$0xf] }
 0x1af   : > { %2302 = vmatpush.bf16.msrb.mxu0 %v4081_v47  ;;  %2315 = vmatpush.bf16.msrb.mxu1 %v4209_v48  ;;  %v6353_v39 = vadd.f32 %v1320_v27, %v1308_v31  ;;  %v4398_v47 = vld [vmem:[%s5775_s14 + $0x338] sm:$0xf0]  ;;  %v4017_v48 = vor.u32 %v5149_v37, %v4014_v38  ;;  %v5286_v31 = vld [vmem:[%s5786_s17 + $0x6c] sm:$0xf0]  ;;  %v4677_v37 = vor.u32 %v5318_v33, %v4676_v32  ;;  %v5288_v33 = vld [vmem:[%s5786_s17 + $0x84] sm:$0xf] }
 0x1b0   : > { %2328 = vmatpush.bf16.msrb.mxu2 %v4337_v53  ;;  %2341 = vmatpush.bf16.msrb.mxu3 %v4465_v54  ;;  %v4273_v53 = vor.u32 %v5213_v44, %v4270_v45  ;;  %v4401_v54 = vor.u32 %v5245_v46, %v4398_v47  ;;  %v5282_v38 = vld [vmem:[%s5786_s17 + $0x4c] sm:$0xf0]  ;;  %v2352_v44 = vsub.f32 0.0, %v6273_v26 }
 0x1b1   : > { %v5362_v14 = vld [vmem:[%s5786_s17 + $0x2cc] sm:$0xf0] }
 0x1b2   : > { %v2356_v55 = vmul.f32 1.442695, %v2352_v44 }
 0x1b3   : > { %2303 = vmatpush.bf16.msrb.mxu0 %v4065_v3  ;;  %2316 = vmatpush.bf16.msrb.mxu1 %v4193_v4  ;;  %v4740_v3 = vld [vmem:[%s5786_s17 + $0x1e0] sm:$0xf]  ;;  %v5334_v4 = vld [vmem:[%s5786_s17 + $0x1ec] sm:$0xf0] }
 0x1b4   : > { %2329 = vmatpush.bf16.msrb.mxu2 %v4321_v56  ;;  %2342 = vmatpush.bf16.msrb.mxu3 %v4449_v9  ;;  %v1309_v59 = vpop.f32.mrf.mxu2  ;;  %v1322_v60 = vpop.f32.mrf.mxu3  ;;  %v4257_v56 = vor.u32 %v5209_v57, %v4254_v58  ;;  %v4385_v9 = vor.u32 %v5241_v61, %v4382_v62  ;;  %v4741_v12 = vor.u32 %v5334_v4, %v4740_v3  ;;  %v4500_v57 = vld [vmem:[%s5786_s17] sm:$0xf]  ;;  %v5366_v62 = vld [vmem:[%s5786_s17 + $0x2ec] sm:$0xf0]  ;;  %5458 = vpow2.f32 %v2356_v55 }
 0x1b5   : > { %v5274_v59 = vld [vmem:[%s5786_s17 + $0xc] sm:$0xf0]  ;;  %v4868_v61 = vld [vmem:[%s5786_s17 + $0x2e0] sm:$0xf] }
 0x1b6   : > { %v5306_v3 = vld [vmem:[%s5786_s17 + $0x10c] sm:$0xf0]  ;;  %v4869_v4 = vor.u32 %v5366_v62, %v4868_v61  ;;  %v5312_v61 = vld [vmem:[%s5786_s17 + $0x144] sm:$0xf]  ;;  %v4662_v62 = vld [vmem:[%s5786_s17 + $0x150] sm:$0xf0] }
 0x1b7   : > { %2304 = vmatpush.bf16.msrb.mxu0 %v4049_v16  ;;  %2317 = vmatpush.bf16.msrb.mxu1 %v4177_v17  ;;  %v4597_v16 = vor.u32 %v5298_v13, %v4596_v11  ;;  %v4580_v17 = vld [vmem:[%s5786_s17 + $0xa0] sm:$0xf]  ;;  %v4501_v11 = vor.u32 %v5274_v59, %v4500_v57  ;;  %v5280_v57 = vld [vmem:[%s5786_s17 + $0x44] sm:$0xf] }
 0x1b8   : > { %2330 = vmatpush.bf16.msrb.mxu2 %v4305_v20  ;;  %2343 = vmatpush.bf16.msrb.mxu3 %v4433_v21  ;;  %v4708_v20 = vld [vmem:[%s5786_s17 + $0x1a0] sm:$0xf]  ;;  %v5326_v21 = vld [vmem:[%s5786_s17 + $0x1ac] sm:$0xf0]  ;;  %v4581_v22 = vor.u32 %v5294_v19, %v4580_v17  ;;  %v4598_v19 = vld [vmem:[%s5786_s17 + $0xd0] sm:$0xf0] }
 0x1b9   : > { %v4709_v24 = vor.u32 %v5326_v21, %v4708_v20  ;;  %v4852_v13 = vld [vmem:[%s5786_s17 + $0x2c0] sm:$0xf]  ;;  %v5328_v20 = vld [vmem:[%s5786_s17 + $0x1c4] sm:$0xf]  ;;  %v4726_v21 = vld [vmem:[%s5786_s17 + $0x1d0] sm:$0xf0] }
 0x1bb   : > { %2305 = vmatpush.bf16.msrb.mxu0 %v4033_v35  ;;  %2318 = vmatpush.bf16.msrb.mxu1 %v4161_v36  ;;  %v4549_v35 = vor.u32 %v5286_v31, %v4548_v29  ;;  %v4532_v36 = vld [vmem:[%s5786_s17 + $0x40] sm:$0xf] }
 0x1bc   : > { %2331 = vmatpush.bf16.msrb.mxu2 %v4289_v40  ;;  %2344 = vmatpush.bf16.msrb.mxu3 %v4417_v41  ;;  %v4660_v40 = vld [vmem:[%s5786_s17 + $0x140] sm:$0xf]  ;;  %v5314_v41 = vld [vmem:[%s5786_s17 + $0x14c] sm:$0xf0] }
 0x1bd   : > { %v4661_v50 = vor.u32 %v5314_v41, %v4660_v40  ;;  %v4820_v29 = vld [vmem:[%s5786_s17 + $0x280] sm:$0xf]  ;;  %v4694_v40 = vld [vmem:[%s5786_s17 + $0x190] sm:$0xf0] }
 0x1be   : > { %v4804_v41 = vld [vmem:[%s5786_s17 + $0x260] sm:$0xf] }
 0x1bf   : > { %2306 = vmatpush.bf16.msrb.mxu0 %v4017_v48  ;;  %2319 = vmatpush.bf16.msrb.mxu1 %v4145_v49  ;;  %v4533_v48 = vor.u32 %v5282_v38, %v4532_v36  ;;  %v4516_v49 = vld [vmem:[%s5786_s17 + $0x20] sm:$0xf]  ;;  %v5320_v38 = vld [vmem:[%s5786_s17 + $0x184] sm:$0xf] }
 0x1c0   : > { %2332 = vmatpush.bf16.msrb.mxu2 %v4273_v53  ;;  %2345 = vmatpush.bf16.msrb.mxu3 %v4401_v54  ;;  %v4644_v53 = vld [vmem:[%s5786_s17 + $0x120] sm:$0xf]  ;;  %v5310_v54 = vld [vmem:[%s5786_s17 + $0x12c] sm:$0xf0]  ;;  %v4517_v58 = vor.u32 %v5278_v52, %v4516_v49  ;;  %v4550_v49 = vld [vmem:[%s5786_s17 + $0x70] sm:$0xf0] }
 0x1c1   : > { %v4645_v60 = vor.u32 %v5310_v54, %v4644_v53  ;;  %v4678_v52 = vld [vmem:[%s5786_s17 + $0x170] sm:$0xf0]  ;;  %v4788_v53 = vld [vmem:[%s5786_s17 + $0x240] sm:$0xf]  ;;  %v5346_v54 = vld [vmem:[%s5786_s17 + $0x24c] sm:$0xf0] }
 0x1c3   : > { %2307 = vmatpush.bf16.msrb.mxu0 %v4001_v7  ;;  %2320 = vmatpush.bf16.msrb.mxu1 %v4129_v8  ;;  %v1333_v27 = vpop.f32.mrf.mxu0  ;;  %v1346_v28 = vpop.f32.mrf.mxu1 }
 0x1c4   : > { %2333 = vmatpush.bf16.msrb.mxu2 %v4257_v56  ;;  %2346 = vmatpush.bf16.msrb.mxu3 %v4385_v9  ;;  %v4614_v56 = vld [vmem:[%s5786_s17 + $0xf0] sm:$0xf0]  ;;  %v5332_v9 = vld [vmem:[%s5786_s17 + $0x1e4] sm:$0xf] }
 0x1c5   : > { %v4617_v15 = vor.u32 %v5300_v1, %v4614_v56  ;;  %v5342_v56 = vld [vmem:[%s5786_s17 + $0x22c] sm:$0xf0] }
 0x1c6   : > { %2308 = vmatmul.bf16.vlgmr.msrb.gmra.mxu0 %v5953_v63  ;;  %2321 = vmatmul.bf16.vlgmr.msrb.gmra.mxu1 %v5955_v0  ;;  %v4692_v63 = vld [vmem:[%s5786_s17 + $0x180] sm:$0xf]  ;;  %v5322_v0 = vld [vmem:[%s5786_s17 + $0x18c] sm:$0xf0] }
 0x1c7   : > { %3153 = vmatpush.bf16.msra.mxu0 %v4613_v10  ;;  %3166 = vmatpush.bf16.msra.mxu1 %v4741_v12  ;;  %v4693_v30 = vor.u32 %v5322_v0, %v4692_v63  ;;  %v4742_v10 = vld [vmem:[%s5786_s17 + $0x1f0] sm:$0xf0]  ;;  %v4629_v12 = vor.u32 %v5306_v3, %v4628_v2  ;;  %v4729_v63 = vor.u32 %v5328_v20, %v4726_v21 }
 0x1c8   : > { %2334 = vmatmul.bf16.vlgmr.msrb.gmra.mxu2 %v5957_v5  ;;  %2347 = vmatmul.bf16.vlgmr.msrb.gmra.mxu3 %v5959_v6  ;;  %v1347_v5 = vadd.f32 %v1346_v28, %v1333_v27  ;;  %v4565_v6 = vor.u32 %v5290_v25, %v4564_v23  ;;  %v4745_v17 = vor.u32 %v5332_v9, %v4742_v10  ;;  %v5358_v23 = vld [vmem:[%s5786_s17 + $0x2ac] sm:$0xf0]  ;;  %v5292_v25 = vld [vmem:[%s5786_s17 + $0xa4] sm:$0xf]  ;;  %v5459_v27 = vpop.eup %5458  ;;  %v4582_v28 = vld [vmem:[%s5786_s17 + $0xb0] sm:$0xf0] }
 0x1c9   : > { %3179 = vmatpush.bf16.msra.mxu2 %v4869_v4  ;;  %v2364_v31 = vadd.f32 1.0, %v5459_v27  ;;  %v4585_v32 = vor.u32 %v5292_v25, %v4582_v28  ;;  %v5338_v25 = vld [vmem:[%s5786_s17 + $0x20c] sm:$0xf0]  ;;  %v5304_v27 = vld [vmem:[%s5786_s17 + $0x104] sm:$0xf] }
 0x1ca   : > { %v4996_v28 = vld [vmem:[%s5786_s17 + $0x3e0] sm:$0xf] }
 0x1cb   : > { %3154 = vmatpush.bf16.msra.mxu0 %v4597_v16  ;;  %3167 = vmatpush.bf16.msra.mxu1 %v4725_v18  ;;  %v1335_v46 = vpop.f32.mrf.mxu0  ;;  %v1348_v47 = vpop.f32.mrf.mxu1  ;;  %v5296_v16 = vld [vmem:[%s5786_s17 + $0xc4] sm:$0xf]  ;;  %v4853_v18 = vor.u32 %v5362_v14, %v4852_v13  ;;  %5460 = vrcp.f32 %v2364_v31  ;;  %v4518_v13 = vld [vmem:[%s5786_s17 + $0x30] sm:$0xf0]  ;;  %v4665_v14 = vor.u32 %v5312_v61, %v4662_v62  ;;  %v5295_v61 = vld [vmem:[%s5786_s17 + $0xb4] sm:$0xf0] }
 0x1cc   : > { %v1359_v42 = vpop.f32.mrf.mxu2  ;;  %v1372_v43 = vpop.f32.mrf.mxu3  ;;  %v5284_v46 = vld [vmem:[%s5786_s17 + $0x64] sm:$0xf]  ;;  %v4697_v47 = vor.u32 %v5320_v38, %v4694_v40  ;;  %v4870_v31 = vld [vmem:[%s5786_s17 + $0x2f0] sm:$0xf0] }
 0x1cd   : > { %v1360_v45 = vadd.f32 %v1359_v42, %v1347_v5  ;;  %3180 = vmatpush.bf16.msra.mxu2 %v4853_v18  ;;  %v5324_v5 = vld [vmem:[%s5786_s17 + $0x1a4] sm:$0xf]  ;;  %v5350_v42 = vld [vmem:[%s5786_s17 + $0x26c] sm:$0xf0]  ;;  %v4553_v55 = vor.u32 %v5284_v46, %v4550_v49  ;;  %v4604_v49 = vld [vmem:[%s5786_s17 + $0xc8] sm:$0xf] }
 0x1cf   : > { %3155 = vmatpush.bf16.msra.mxu0 %v4581_v22  ;;  %3168 = vmatpush.bf16.msra.mxu1 %v4709_v24  ;;  %v6399_v51 = vadd.f32 %v1372_v43, %v1360_v45  ;;  %v4836_v22 = vld [vmem:[%s5786_s17 + $0x2a0] sm:$0xf]  ;;  %v4601_v24 = vor.u32 %v5296_v16, %v4598_v19  ;;  %v5308_v16 = vld [vmem:[%s5786_s17 + $0x124] sm:$0xf]  ;;  %v2353_v19 = vsub.f32 0.0, %v6313_v34 }
 0x1d0   : > { %v4837_v0 = vor.u32 %v5358_v23, %v4836_v22  ;;  %v5272_v22 = vld [vmem:[%s5786_s17 + $0x4] sm:$0xf]  ;;  %v4502_v23 = vld [vmem:[%s5786_s17 + $0x10] sm:$0xf0] }
 0x1d1   : > { %v5461_v2 = vpop.eup %5460 }
 0x1d2   : > { %3181 = vmatpush.bf16.msra.mxu2 %v4837_v0  ;;  %v2372_v18 = vmul.f32 %v5461_v2, %v6273_v26  ;;  %v4948_v2 = vld [vmem:[%s5786_s17 + $0x380] sm:$0xf] }
 0x1d3   : > { %3156 = vmatpush.bf16.msra.mxu0 %v4565_v6  ;;  %3169 = vmatpush.bf16.msra.mxu1 %v4693_v30  ;;  %v4710_v6 = vld [vmem:[%s5786_s17 + $0x1b0] sm:$0xf0]  ;;  %v5354_v30 = vld [vmem:[%s5786_s17 + $0x28c] sm:$0xf0] }
 0x1d4   : > { %v1361_v7 = vpop.f32.mrf.mxu2  ;;  %v1374_v8 = vpop.f32.mrf.mxu3  ;;  %v4821_v36 = vor.u32 %v5354_v30, %v4820_v29  ;;  %v5364_v30 = vld [vmem:[%s5786_s17 + $0x2e4] sm:$0xf] }
 0x1d5   : > { %v4772_v8 = vld [vmem:[%s5786_s17 + $0x220] sm:$0xf] }
 0x1d6   : > { %3182 = vmatpush.bf16.msra.mxu2 %v4821_v36  ;;  %v5303_v36 = vld [vmem:[%s5786_s17 + $0xf4] sm:$0xf0] }
 0x1d7   : > { %3157 = vmatpush.bf16.msra.mxu0 %v4549_v35  ;;  %3170 = vmatpush.bf16.msra.mxu1 %v4677_v37  ;;  %v4713_v35 = vor.u32 %v5324_v5, %v4710_v6  ;;  %v4566_v37 = vld [vmem:[%s5786_s17 + $0x90] sm:$0xf0]  ;;  %v5398_v5 = vld [vmem:[%s5786_s17 + $0x3ec] sm:$0xf0] }
 0x1d8   : > { %v4569_v45 = vor.u32 %v5288_v33, %v4566_v37  ;;  %v4630_v6 = vld [vmem:[%s5786_s17 + $0x110] sm:$0xf0]  ;;  %v4997_v29 = vor.u32 %v5398_v5, %v4996_v28  ;;  %v4873_v37 = vor.u32 %v5364_v30, %v4870_v31  ;;  %v4540_v28 = vld [vmem:[%s5786_s17 + $0x48] sm:$0xf]  ;;  %v5283_v5 = vld [vmem:[%s5786_s17 + $0x54] sm:$0xf0] }
 0x1d9   : > { %v4900_v30 = vld [vmem:[%s5786_s17 + $0x320] sm:$0xf]  ;;  %v5374_v31 = vld [vmem:[%s5786_s17 + $0x32c] sm:$0xf0] }
 0x1da   : > { %3192 = vmatpush.bf16.msra.mxu3 %v4997_v29 }
 0x1db   : > { %3158 = vmatpush.bf16.msra.mxu0 %v4533_v48  ;;  %3171 = vmatpush.bf16.msra.mxu1 %v4661_v50  ;;  %v4805_v48 = vor.u32 %v5350_v42, %v4804_v41  ;;  %v5316_v50 = vld [vmem:[%s5786_s17 + $0x164] sm:$0xf]  ;;  %v4505_v41 = vor.u32 %v5272_v22, %v4502_v23  ;;  %v4633_v42 = vor.u32 %v5304_v27, %v4630_v6  ;;  %v5287_v22 = vld [vmem:[%s5786_s17 + $0x74] sm:$0xf0]  ;;  %v4790_v27 = vld [vmem:[%s5786_s17 + $0x250] sm:$0xf0] }
 0x1dc   : > { %v4681_v59 = vor.u32 %v5316_v50, %v4678_v52  ;;  %v5299_v50 = vld [vmem:[%s5786_s17 + $0xd4] sm:$0xf0] }
 0x1dd   : > { %3183 = vmatpush.bf16.msra.mxu2 %v4805_v48  ;;  %v4854_v48 = vld [vmem:[%s5786_s17 + $0x2d0] sm:$0xf0] }
 0x1df   : > { %3159 = vmatpush.bf16.msra.mxu0 %v4517_v58  ;;  %3172 = vmatpush.bf16.msra.mxu1 %v4645_v60  ;;  %v4534_v58 = vld [vmem:[%s5786_s17 + $0x50] sm:$0xf0]  ;;  %v4789_v60 = vor.u32 %v5346_v54, %v4788_v53  ;;  %v4964_v53 = vld [vmem:[%s5786_s17 + $0x3a0] sm:$0xf]  ;;  %v5390_v54 = vld [vmem:[%s5786_s17 + $0x3ac] sm:$0xf0] }
 0x1e0   : > { %v4537_v7 = vor.u32 %v5280_v57, %v4534_v58  ;;  %v4605_v57 = vor.u32 %v5299_v50, %v4604_v49  ;;  %v4965_v58 = vor.u32 %v5390_v54, %v4964_v53  ;;  %v4748_v49 = vld [vmem:[%s5786_s17 + $0x1e8] sm:$0xf]  ;;  %v5335_v50 = vld [vmem:[%s5786_s17 + $0x1f4] sm:$0xf0]  ;;  %v4884_v54 = vld [vmem:[%s5786_s17 + $0x300] sm:$0xf] }
 0x1e1   : > { %3184 = vmatpush.bf16.msra.mxu2 %v4789_v60  ;;  %v4588_v60 = vld [vmem:[%s5786_s17 + $0xa8] sm:$0xf] }
 0x1e3   : > { %3160 = vmatpush.bf16.msra.mxu0 %v4501_v11  ;;  %3173 = vmatpush.bf16.msra.mxu1 %v4629_v12  ;;  %v2153_v43 = vpop.f32.mrf.mxu0  ;;  %v2166_v44 = vpop.f32.mrf.mxu1  ;;  %v5276_v12 = vld [vmem:[%s5786_s17 + $0x24] sm:$0xf] }
 0x1e4   : > { %v2167_v1 = vadd.f32 %v2166_v44, %v2153_v43  ;;  %v4521_v21 = vor.u32 %v5276_v12, %v4518_v13  ;;  %v4980_v43 = vld [vmem:[%s5786_s17 + $0x3c0] sm:$0xf]  ;;  %v5394_v44 = vld [vmem:[%s5786_s17 + $0x3cc] sm:$0xf0] }
 0x1e5   : > { %v4932_v13 = vld [vmem:[%s5786_s17 + $0x360] sm:$0xf] }
 0x1e7   : > { %3205 = vmatpush.bf16.msrb.mxu0 %v4617_v15  ;;  %3218 = vmatpush.bf16.msrb.mxu1 %v4745_v17  ;;  %v4773_v15 = vor.u32 %v5342_v56, %v4772_v8  ;;  %v4646_v17 = vld [vmem:[%s5786_s17 + $0x130] sm:$0xf0] }
 0x1e8   : > { %v4649_v0 = vor.u32 %v5308_v16, %v4646_v17  ;;  %v4822_v56 = vld [vmem:[%s5786_s17 + $0x290] sm:$0xf0] }
 0x1e9   : > { %3185 = vmatpush.bf16.msra.mxu2 %v4773_v15  ;;  %v5348_v15 = vld [vmem:[%s5786_s17 + $0x264] sm:$0xf] }
 0x1eb   : > { %3206 = vmatpush.bf16.msrb.mxu0 %v4601_v24  ;;  %3219 = vmatpush.bf16.msrb.mxu1 %v4729_v63  ;;  %v2155_v10 = vpop.f32.mrf.mxu0  ;;  %v2168_v11 = vpop.f32.mrf.mxu1  ;;  %v4756_v24 = vld [vmem:[%s5786_s17 + $0x200] sm:$0xf] }
 0x1ec   : > { %v2179_v3 = vpop.f32.mrf.mxu2  ;;  %v2192_v4 = vpop.f32.mrf.mxu3  ;;  %v4757_v26 = vor.u32 %v5338_v25, %v4756_v24  ;;  %v5291_v10 = vld [vmem:[%s5786_s17 + $0x94] sm:$0xf0]  ;;  %v4916_v24 = vld [vmem:[%s5786_s17 + $0x340] sm:$0xf]  ;;  %v5378_v25 = vld [vmem:[%s5786_s17 + $0x34c] sm:$0xf0] }
 0x1ed   : > { %v2180_v9 = vadd.f32 %v2179_v3, %v2167_v1  ;;  %v5386_v3 = vld [vmem:[%s5786_s17 + $0x38c] sm:$0xf0] }
 0x1ee   : > { %3186 = vmatpush.bf16.msra.mxu2 %v4757_v26  ;;  %v4949_v8 = vor.u32 %v5386_v3, %v4948_v2  ;;  %v4917_v26 = vor.u32 %v5378_v25, %v4916_v24  ;;  %v5396_v3 = vld [vmem:[%s5786_s17 + $0x3e4] sm:$0xf]  ;;  %v5327_v24 = vld [vmem:[%s5786_s17 + $0x1b4] sm:$0xf0] }
 0x1ef   : > { %3207 = vmatpush.bf16.msrb.mxu0 %v4585_v32  ;;  %3220 = vmatpush.bf16.msrb.mxu1 %v4713_v35  ;;  %v2193_v20 = vadd.f32 %v2192_v4, %v2180_v9  ;;  %v2358_v32 = vmul.f32 1.442695, %v2353_v19  ;;  %v4620_v35 = vld [vmem:[%s5786_s17 + $0xe8] sm:$0xf]  ;;  %v5352_v4 = vld [vmem:[%s5786_s17 + $0x284] sm:$0xf] }
 0x1f0   : > { %v4621_v46 = vor.u32 %v5303_v36, %v4620_v35  ;;  %v4572_v9 = vld [vmem:[%s5786_s17 + $0x88] sm:$0xf]  ;;  %v4825_v11 = vor.u32 %v5352_v4, %v4822_v56  ;;  %v4998_v4 = vld [vmem:[%s5786_s17 + $0x3f0] sm:$0xf0]  ;;  %v5388_v25 = vld [vmem:[%s5786_s17 + $0x3a4] sm:$0xf] }
 0x1f1   : > { %v2376_v63 = vmul.f32 %v2372_v18, %v2193_v20  ;;  %5462 = vpow2.f32 %v2358_v32  ;;  %v4573_v16 = vor.u32 %v5291_v10, %v4572_v9  ;;  %v4806_v18 = vld [vmem:[%s5786_s17 + $0x270] sm:$0xf0]  ;;  %v5340_v32 = vld [vmem:[%s5786_s17 + $0x224] sm:$0xf]  ;;  %v5001_v56 = vor.u32 %v5396_v3, %v4998_v4  ;;  %v5311_v3 = vld [vmem:[%s5786_s17 + $0x134] sm:$0xf0] }
 0x1f2   : > { %3231 = vmatpush.bf16.msrb.mxu2 %v4873_v37  ;;  %v4809_v23 = vor.u32 %v5348_v15, %v4806_v18  ;;  %v4982_v18 = vld [vmem:[%s5786_s17 + $0x3d0] sm:$0xf0] }
 0x1f3   : > { %3208 = vmatpush.bf16.msrb.mxu0 %v4569_v45  ;;  %3221 = vmatpush.bf16.msrb.mxu1 %v4697_v47  ;;  %v6462_v33 = vpack.c.bf16 %v2376_v63, %v2376_v63  ;;  %v5360_v45 = vld [vmem:[%s5786_s17 + $0x2c4] sm:$0xf]  ;;  %v4981_v47 = vor.u32 %v5394_v44, %v4980_v43 }
 0x1f4   : > { %v2181_v38 = vpop.f32.mrf.mxu2  ;;  %v2194_v40 = vpop.f32.mrf.mxu3  ;;  %v4857_v52 = vor.u32 %v5360_v45, %v4854_v48  ;;  %v5344_v63 = vld [vmem:[%s5786_s17 + $0x244] sm:$0xf]  ;;  %v4524_v45 = vld [vmem:[%s5786_s17 + $0x28] sm:$0xf]  ;;  %v2354_v48 = vsub.f32 0.0, %v6353_v39 }
 0x1f5   : > { %3161 = vmatmul.bf16.vlgmr.msra.gmra.mxu0 %v6462_v33  ;;  %3193 = vmatpush.bf16.msra.mxu3 %v4981_v47  ;;  %v4793_v6 = vor.u32 %v5344_v63, %v4790_v27  ;;  %v4541_v38 = vor.u32 %v5283_v5, %v4540_v28  ;;  %v4901_v40 = vor.u32 %v5374_v31, %v4900_v30  ;;  %v4966_v63 = vld [vmem:[%s5786_s17 + $0x3b0] sm:$0xf0]  ;;  %v5293_v28 = vld [vmem:[%s5786_s17 + $0xac] sm:$0xf]  ;;  %v4590_v5 = vld [vmem:[%s5786_s17 + $0xb8] sm:$0xf0] }
 0x1f6   : > { %3232 = vmatpush.bf16.msrb.mxu2 %v4857_v52  ;;  %v2360_v9 = vmul.f32 1.442695, %v2354_v48  ;;  %v5384_v30 = vld [vmem:[%s5786_s17 + $0x384] sm:$0xf]  ;;  %v4950_v31 = vld [vmem:[%s5786_s17 + $0x390] sm:$0xf0] }
 0x1f7   : > { %3209 = vmatpush.bf16.msrb.mxu0 %v4553_v55  ;;  %3222 = vmatpush.bf16.msrb.mxu1 %v4681_v59  ;;  %v5356_v55 = vld [vmem:[%s5786_s17 + $0x2a4] sm:$0xf]  ;;  %v4838_v59 = vld [vmem:[%s5786_s17 + $0x2b0] sm:$0xf0]  ;;  %v5463_v1 = vpop.eup %5462  ;;  %v5285_v48 = vld [vmem:[%s5786_s17 + $0x6c] sm:$0xf] }
 0x1f8   : > { %v4841_v62 = vor.u32 %v5356_v55, %v4838_v59  ;;  %v2365_v12 = vadd.f32 1.0, %v5463_v1  ;;  %v5370_v55 = vld [vmem:[%s5786_s17 + $0x30c] sm:$0xf0]  ;;  %v4508_v59 = vld [vmem:[%s5786_s17 + $0x8] sm:$0xf] }
 0x1f9   : > { %3194 = vmatpush.bf16.msra.mxu3 %v4965_v58  ;;  %v5275_v1 = vld [vmem:[%s5786_s17 + $0x14] sm:$0xf0] }
 0x1fa   : > { %3233 = vmatpush.bf16.msrb.mxu2 %v4841_v62  ;;  %5464 = vrcp.f32 %v2365_v12  ;;  %v5331_v12 = vld [vmem:[%s5786_s17 + $0x1d4] sm:$0xf0]  ;;  %v4509_v15 = vor.u32 %v5275_v1, %v4508_v59  ;;  %v4918_v59 = vld [vmem:[%s5786_s17 + $0x350] sm:$0xf0] }
 0x1fb   : > { %3210 = vmatpush.bf16.msrb.mxu0 %v4537_v7  ;;  %3223 = vmatpush.bf16.msrb.mxu1 %v4665_v14  ;;  %v4589_v7 = vor.u32 %v5295_v61, %v4588_v60  ;;  %v5382_v14 = vld [vmem:[%s5786_s17 + $0x36c] sm:$0xf0]  ;;  %v4885_v60 = vor.u32 %v5370_v55, %v4884_v54  ;;  %v4758_v61 = vld [vmem:[%s5786_s17 + $0x210] sm:$0xf0]  ;;  %5466 = vpow2.f32 %v2360_v9  ;;  %v4668_v54 = vld [vmem:[%s5786_s17 + $0x148] sm:$0xf] }
 0x1fc   : > { %v4933_v17 = vor.u32 %v5382_v14, %v4932_v13  ;;  %v5315_v55 = vld [vmem:[%s5786_s17 + $0x154] sm:$0xf0] }
 0x1fd   : > { %3195 = vmatpush.bf16.msra.mxu3 %v4949_v8  ;;  %v4622_v8 = vld [vmem:[%s5786_s17 + $0xf8] sm:$0xf0] }
 0x1fe   : > { %3234 = vmatpush.bf16.msrb.mxu2 %v4825_v11  ;;  %v4732_v11 = vld [vmem:[%s5786_s17 + $0x1c8] sm:$0xf] }
 0x1ff   : > { %3211 = vmatpush.bf16.msrb.mxu0 %v4521_v21  ;;  %3224 = vmatpush.bf16.msrb.mxu1 %v4649_v0  ;;  %v4556_v21 = vld [vmem:[%s5786_s17 + $0x68] sm:$0xf] }
 0x200   : > { %v4557_v0 = vor.u32 %v5287_v22, %v4556_v21  ;;  %v5465_v35 = vpop.eup %5464  ;;  %v4606_v21 = vld [vmem:[%s5786_s17 + $0xd8] sm:$0xf0] }
 0x201   : > { %3196 = vmatpush.bf16.msra.mxu3 %v4933_v17  ;;  %v2373_v52 = vmul.f32 %v5465_v35, %v6313_v34  ;;  %v4749_v34 = vor.u32 %v5335_v50, %v4748_v49  ;;  %v5392_v17 = vld [vmem:[%s5786_s17 + $0x3c4] sm:$0xf]  ;;  %v4593_v35 = vor.u32 %v5293_v28, %v4590_v5  ;;  %v4558_v49 = vld [vmem:[%s5786_s17 + $0x78] sm:$0xf0]  ;;  %v4886_v28 = vld [vmem:[%s5786_s17 + $0x310] sm:$0xf0] }
 0x202   : > { %3235 = vmatpush.bf16.msrb.mxu2 %v4809_v23  ;;  %v4985_v22 = vor.u32 %v5392_v17, %v4982_v18  ;;  %v4716_v23 = vld [vmem:[%s5786_s17 + $0x1a8] sm:$0xf] }
 0x203   : > { %3212 = vmatpush.bf16.msrb.mxu0 %v4505_v41  ;;  %3225 = vmatpush.bf16.msrb.mxu1 %v4633_v42  ;;  %v2205_v19 = vpop.f32.mrf.mxu0  ;;  %v2218_v20 = vpop.f32.mrf.mxu1  ;;  %v4774_v41 = vld [vmem:[%s5786_s17 + $0x230] sm:$0xf0]  ;;  %v4717_v27 = vor.u32 %v5327_v24, %v4716_v23  ;;  %v5333_v23 = vld [vmem:[%s5786_s17 + $0x1ec] sm:$0xf]  ;;  %v4750_v24 = vld [vmem:[%s5786_s17 + $0x1f8] sm:$0xf0] }
 0x204   : > { %v2219_v29 = vadd.f32 %v2218_v20, %v2205_v19  ;;  %v4777_v47 = vor.u32 %v5340_v32, %v4774_v41  ;;  %v4733_v19 = vor.u32 %v5331_v12, %v4732_v11  ;;  %v5297_v20 = vld [vmem:[%s5786_s17 + $0xcc] sm:$0xf]  ;;  %v5467_v32 = vpop.eup %5466  ;;  %v4684_v41 = vld [vmem:[%s5786_s17 + $0x168] sm:$0xf] }
 0x205   : > { %3197 = vmatpush.bf16.msra.mxu3 %v4917_v26  ;;  %v4969_v26 = vor.u32 %v5388_v25, %v4966_v63 }
 0x206   : > { %3213 = vmatmul.bf16.vlgmr.msrb.gmra.mxu0 %v6462_v33  ;;  %3236 = vmatpush.bf16.msrb.mxu2 %v4793_v6  ;;  %v4700_v6 = vld [vmem:[%s5786_s17 + $0x188] sm:$0xf] }
 0x207   : > { %3257 = vmatpush.bf16.msra.mxu0 %v4621_v46  ;;  %v5279_v46 = vld [vmem:[%s5786_s17 + $0x34] sm:$0xf0] }
 0x208   : > { %v4525_v58 = vor.u32 %v5279_v46, %v4524_v45  ;;  %v5380_v45 = vld [vmem:[%s5786_s17 + $0x364] sm:$0xf]  ;;  %v4934_v46 = vld [vmem:[%s5786_s17 + $0x370] sm:$0xf0] }
 0x209   : > { %3198 = vmatpush.bf16.msra.mxu3 %v4901_v40  ;;  %v4574_v40 = vld [vmem:[%s5786_s17 + $0x98] sm:$0xf0]  ;;  %v4937_v50 = vor.u32 %v5380_v45, %v4934_v46 }
 0x20a   : > { %3237 = vmatpush.bf16.msrb.mxu2 %v4777_v47 }
 0x20b   : > { %3258 = vmatpush.bf16.msra.mxu0 %v4605_v57  ;;  %v2207_v43 = vpop.f32.mrf.mxu0  ;;  %v2220_v44 = vpop.f32.mrf.mxu1  ;;  %v5336_v57 = vld [vmem:[%s5786_s17 + $0x204] sm:$0xf] }
 0x20c   : > { %v2231_v36 = vpop.f32.mrf.mxu2  ;;  %v2244_v37 = vpop.f32.mrf.mxu3  ;;  %v4761_v2 = vor.u32 %v5336_v57, %v4758_v61  ;;  %v2366_v43 = vadd.f32 1.0, %v5467_v32  ;;  %v4561_v57 = vor.u32 %v5285_v48, %v4558_v49  ;;  %v5281_v61 = vld [vmem:[%s5786_s17 + $0x4c] sm:$0xf]  ;;  %v4753_v32 = vor.u32 %v5333_v23, %v4750_v24  ;;  %v4718_v48 = vld [vmem:[%s5786_s17 + $0x1b8] sm:$0xf0] }
 0x20d   : > { %v2232_v42 = vadd.f32 %v2231_v36, %v2219_v29  ;;  %3199 = vmatpush.bf16.msra.mxu3 %v4885_v60  ;;  %v5323_v29 = vld [vmem:[%s5786_s17 + $0x194] sm:$0xf0]  ;;  %v4953_v36 = vor.u32 %v5384_v30, %v4950_v31  ;;  %v4669_v60 = vor.u32 %v5315_v55, %v4668_v54  ;;  %v4844_v49 = vld [vmem:[%s5786_s17 + $0x2a8] sm:$0xf]  ;;  %v5321_v54 = vld [vmem:[%s5786_s17 + $0x18c] sm:$0xf] }
 0x20e   : > { %3238 = vmatpush.bf16.msrb.mxu2 %v4761_v2  ;;  %5468 = vrcp.f32 %v2366_v43  ;;  %v4652_v2 = vld [vmem:[%s5786_s17 + $0x128] sm:$0xf]  ;;  %v4702_v55 = vld [vmem:[%s5786_s17 + $0x198] sm:$0xf0] }
 0x20f   : > { %3259 = vmatpush.bf16.msra.mxu0 %v4589_v7  ;;  %v2245_v53 = vadd.f32 %v2244_v37, %v2232_v42  ;;  %v5301_v7 = vld [vmem:[%s5786_s17 + $0xec] sm:$0xf]  ;;  %v4701_v37 = vor.u32 %v5323_v29, %v4700_v6  ;;  %v5319_v42 = vld [vmem:[%s5786_s17 + $0x174] sm:$0xf0]  ;;  %v4653_v12 = vor.u32 %v5311_v3, %v4652_v2  ;;  %v4510_v29 = vld [vmem:[%s5786_s17 + $0x18] sm:$0xf0] }
 0x210   : > { %v4685_v47 = vor.u32 %v5319_v42, %v4684_v41  ;;  %v5273_v6 = vld [vmem:[%s5786_s17 + $0xc] sm:$0xf]  ;;  %v4860_v41 = vld [vmem:[%s5786_s17 + $0x2c8] sm:$0xf]  ;;  %v5363_v42 = vld [vmem:[%s5786_s17 + $0x2d4] sm:$0xf0] }
 0x211   : > { %v2377_v62 = vmul.f32 %v2373_v52, %v2245_v53  ;;  %3244 = vmatpush.bf16.msrb.mxu3 %v5001_v56  ;;  %v4861_v46 = vor.u32 %v5363_v42, %v4860_v41  ;;  %v4812_v3 = vld [vmem:[%s5786_s17 + $0x268] sm:$0xf] }
 0x212   : > { %v4988_v42 = vld [vmem:[%s5786_s17 + $0x3c8] sm:$0xf] }
 0x213   : > { %3260 = vmatpush.bf16.msra.mxu0 %v4573_v16  ;;  %v6518_v10 = vpack.c.bf16 %v2377_v62, %v2377_v62  ;;  %v4625_v16 = vor.u32 %v5301_v7, %v4622_v8  ;;  %v4542_v62 = vld [vmem:[%s5786_s17 + $0x58] sm:$0xf0]  ;;  %v5372_v7 = vld [vmem:[%s5786_s17 + $0x324] sm:$0xf]  ;;  %v4902_v8 = vld [vmem:[%s5786_s17 + $0x330] sm:$0xf0] }
 0x214   : > { %v2233_v13 = vpop.f32.mrf.mxu2  ;;  %v2246_v14 = vpop.f32.mrf.mxu3 }
 0x215   : > { %3174 = vmatmul.bf16.vlgmr.msra.gmra.mxu1 %v6518_v10  ;;  %3245 = vmatpush.bf16.msrb.mxu3 %v4985_v22  ;;  %v5469_v56 = vpop.eup %5468  ;;  %v5277_v13 = vld [vmem:[%s5786_s17 + $0x2c] sm:$0xf]  ;;  %v4526_v14 = vld [vmem:[%s5786_s17 + $0x38] sm:$0xf0]  ;;  %v4876_v22 = vld [vmem:[%s5786_s17 + $0x2e8] sm:$0xf] }
 0x216   : > { %3270 = vmatpush.bf16.msra.mxu1 %v4749_v34  ;;  %v4545_v34 = vor.u32 %v5281_v61, %v4542_v62  ;;  %v2374_v25 = vmul.f32 %v5469_v56, %v6353_v39  ;;  %v5317_v62 = vld [vmem:[%s5786_s17 + $0x16c] sm:$0xf] }
 0x217   : > { %3261 = vmatpush.bf16.msra.mxu0 %v4557_v0  ;;  %v4609_v0 = vor.u32 %v5297_v20, %v4606_v21  ;;  %v4636_v20 = vld [vmem:[%s5786_s17 + $0x108] sm:$0xf]  ;;  %v5307_v21 = vld [vmem:[%s5786_s17 + $0x114] sm:$0xf0]  ;;  %v5313_v56 = vld [vmem:[%s5786_s17 + $0x14c] sm:$0xf] }
 0x218   : > { %v4637_v5 = vor.u32 %v5307_v21, %v4636_v20 }
 0x219   : > { %3246 = vmatpush.bf16.msrb.mxu3 %v4969_v26  ;;  %v5367_v26 = vld [vmem:[%s5786_s17 + $0x2f4] sm:$0xf0] }
 0x21a   : > { %3271 = vmatpush.bf16.msra.mxu1 %v4733_v19  ;;  %v4877_v39 = vor.u32 %v5367_v26, %v4876_v22  ;;  %v5305_v26 = vld [vmem:[%s5786_s17 + $0x10c] sm:$0xf] }
 0x21b   : > { %3262 = vmatpush.bf16.msra.mxu0 %v4541_v38  ;;  %v5289_v38 = vld [vmem:[%s5786_s17 + $0x8c] sm:$0xf] }
 0x21c   : > { %v4577_v44 = vor.u32 %v5289_v38, %v4574_v40  ;;  %v4513_v40 = vor.u32 %v5273_v6, %v4510_v29  ;;  %v5004_v6 = vld [vmem:[%s5786_s17 + $0x3e8] sm:$0xf] }
 0x21d   : > { %3247 = vmatpush.bf16.msrb.mxu3 %v4953_v36  ;;  %v5329_v36 = vld [vmem:[%s5786_s17 + $0x1cc] sm:$0xf] }
 0x21e   : > { %3272 = vmatpush.bf16.msra.mxu1 %v4717_v27  ;;  %v5368_v27 = vld [vmem:[%s5786_s17 + $0x304] sm:$0xf] }
 0x21f   : > { %3263 = vmatpush.bf16.msra.mxu0 %v4525_v58  ;;  %v5376_v58 = vld [vmem:[%s5786_s17 + $0x344] sm:$0xf]  ;;  %v4889_v30 = vor.u32 %v5368_v27, %v4886_v28  ;;  %v4638_v27 = vld [vmem:[%s5786_s17 + $0x118] sm:$0xf0]  ;;  %v4764_v28 = vld [vmem:[%s5786_s17 + $0x208] sm:$0xf] }
 0x220   : > { %v4921_v1 = vor.u32 %v5376_v58, %v4918_v59  ;;  %v5355_v58 = vld [vmem:[%s5786_s17 + $0x294] sm:$0xf0] }
 0x221   : > { %3248 = vmatpush.bf16.msrb.mxu3 %v4937_v50  ;;  %v5359_v50 = vld [vmem:[%s5786_s17 + $0x2b4] sm:$0xf0] }
 0x222   : > { %3273 = vmatpush.bf16.msra.mxu1 %v4701_v37  ;;  %v4734_v37 = vld [vmem:[%s5786_s17 + $0x1d8] sm:$0xf0] }
 0x223   : > { %3264 = vmatpush.bf16.msra.mxu0 %v4509_v15  ;;  %v2257_v52 = vpop.f32.mrf.mxu0  ;;  %v2270_v53 = vpop.f32.mrf.mxu1  ;;  %v4905_v15 = vor.u32 %v5372_v7, %v4902_v8  ;;  %v4737_v45 = vor.u32 %v5329_v36, %v4734_v37 }
 0x224   : > { %v2271_v4 = vadd.f32 %v2270_v53, %v2257_v52  ;;  %v4845_v53 = vor.u32 %v5359_v50, %v4844_v49  ;;  %v4972_v50 = vld [vmem:[%s5786_s17 + $0x3a8] sm:$0xf] }
 0x225   : > { %3226 = vmatmul.bf16.vlgmr.msrb.gmra.mxu1 %v6518_v10  ;;  %3249 = vmatpush.bf16.msrb.mxu3 %v4921_v1  ;;  %v4686_v1 = vld [vmem:[%s5786_s17 + $0x178] sm:$0xf0] }
 0x226   : > { %3265 = vmatmul.bf16.vlgmr.msra.gmra.mxu0 %v6462_v33  ;;  %3274 = vmatpush.bf16.msra.mxu1 %v4685_v47  ;;  %v5325_v47 = vld [vmem:[%s5786_s17 + $0x1ac] sm:$0xf] }
 0x227   : > { %3309 = vmatpush.bf16.msrb.mxu0 %v4625_v16  ;;  %v2355_v16 = vsub.f32 0.0, %v6399_v51  ;;  %v4721_v52 = vor.u32 %v5325_v47, %v4718_v48 }
 0x229   : > { %3250 = vmatpush.bf16.msrb.mxu3 %v4905_v15  ;;  %v5309_v15 = vld [vmem:[%s5786_s17 + $0x12c] sm:$0xf] }
 0x22a   : > { %3275 = vmatpush.bf16.msra.mxu1 %v4669_v60  ;;  %v4705_v60 = vor.u32 %v5321_v54, %v4702_v55  ;;  %v4846_v54 = vld [vmem:[%s5786_s17 + $0x2b8] sm:$0xf0] }
 0x22b   : > { %3310 = vmatpush.bf16.msrb.mxu0 %v4609_v0  ;;  %v2259_v18 = vpop.f32.mrf.mxu0  ;;  %v2272_v19 = vpop.f32.mrf.mxu1  ;;  %v4529_v0 = vor.u32 %v5277_v13, %v4526_v14 }
 0x22c   : > { %v2283_v9 = vpop.f32.mrf.mxu2  ;;  %v2296_v11 = vpop.f32.mrf.mxu3  ;;  %v5343_v18 = vld [vmem:[%s5786_s17 + $0x234] sm:$0xf0] }
 0x22d   : > { %v2284_v17 = vadd.f32 %v2283_v9, %v2271_v4  ;;  %3251 = vmatpush.bf16.msrb.mxu3 %v4889_v30  ;;  %v5351_v4 = vld [vmem:[%s5786_s17 + $0x274] sm:$0xf0]  ;;  %v4670_v9 = vld [vmem:[%s5786_s17 + $0x158] sm:$0xf0] }
 0x22e   : > { %3276 = vmatpush.bf16.msra.mxu1 %v4653_v12  ;;  %v4813_v8 = vor.u32 %v5351_v4, %v4812_v3  ;;  %v5347_v12 = vld [vmem:[%s5786_s17 + $0x254] sm:$0xf0]  ;;  %v4673_v13 = vor.u32 %v5313_v56, %v4670_v9  ;;  %v5349_v3 = vld [vmem:[%s5786_s17 + $0x26c] sm:$0xf]  ;;  %v4814_v4 = vld [vmem:[%s5786_s17 + $0x278] sm:$0xf0] }
 0x22f   : > { %3311 = vmatpush.bf16.msrb.mxu0 %v4593_v35  ;;  %v2297_v63 = vadd.f32 %v2296_v11, %v2284_v17  ;;  %v2362_v35 = vmul.f32 1.442695, %v2355_v16  ;;  %v4796_v11 = vld [vmem:[%s5786_s17 + $0x248] sm:$0xf]  ;;  %v4654_v16 = vld [vmem:[%s5786_s17 + $0x138] sm:$0xf0] }
 0x230   : > { %v4797_v14 = vor.u32 %v5347_v12, %v4796_v11  ;;  %v4780_v17 = vld [vmem:[%s5786_s17 + $0x228] sm:$0xf]  ;;  %v4657_v23 = vor.u32 %v5309_v15, %v4654_v16  ;;  %v5345_v56 = vld [vmem:[%s5786_s17 + $0x24c] sm:$0xf]  ;;  %v4798_v9 = vld [vmem:[%s5786_s17 + $0x258] sm:$0xf0] }
 0x231   : > { %v2378_v31 = vmul.f32 %v2374_v25, %v2297_v63  ;;  %5470 = vpow2.f32 %v2362_v35  ;;  %v4878_v35 = vld [vmem:[%s5786_s17 + $0x2f8] sm:$0xf0]  ;;  %v4801_v12 = vor.u32 %v5345_v56, %v4798_v9  ;;  %v5341_v15 = vld [vmem:[%s5786_s17 + $0x22c] sm:$0xf] }
 0x232   : > { %3277 = vmatpush.bf16.msra.mxu1 %v4637_v5  ;;  %v5339_v5 = vld [vmem:[%s5786_s17 + $0x214] sm:$0xf0]  ;;  %v4782_v16 = vld [vmem:[%s5786_s17 + $0x238] sm:$0xf0] }
 0x233   : > { %3312 = vmatpush.bf16.msrb.mxu0 %v4577_v44  ;;  %v6573_v38 = vpack.c.bf16 %v2378_v31, %v2378_v31  ;;  %v5399_v31 = vld [vmem:[%s5786_s17 + $0x3f4] sm:$0xf0]  ;;  %v4765_v37 = vor.u32 %v5339_v5, %v4764_v28  ;;  %v5389_v5 = vld [vmem:[%s5786_s17 + $0x3ac] sm:$0xf] }
 0x234   : > { %v2285_v43 = vpop.f32.mrf.mxu2  ;;  %v2298_v44 = vpop.f32.mrf.mxu3 }
 0x235   : > { %3187 = vmatmul.bf16.vlgmr.msra.gmra.mxu2 %v6573_v38  ;;  %3278 = vmatmul.bf16.vlgmr.msra.gmra.mxu1 %v6518_v10  ;;  %v5395_v44 = vld [vmem:[%s5786_s17 + $0x3d4] sm:$0xf0] }
 0x236   : > { %3322 = vmatpush.bf16.msrb.mxu1 %v4753_v32  ;;  %3283 = vmatpush.bf16.msra.mxu2 %v4877_v39  ;;  %v5365_v32 = vld [vmem:[%s5786_s17 + $0x2ec] sm:$0xf]  ;;  %v4641_v39 = vor.u32 %v5305_v26, %v4638_v27  ;;  %v4989_v48 = vor.u32 %v5395_v44, %v4988_v42  ;;  %v4990_v27 = vld [vmem:[%s5786_s17 + $0x3d8] sm:$0xf0] }
 0x237   : > { %3313 = vmatpush.bf16.msrb.mxu0 %v4561_v57  ;;  %v4828_v57 = vld [vmem:[%s5786_s17 + $0x288] sm:$0xf]  ;;  %v5471_v59 = vpop.eup %5470  ;;  %v4881_v41 = vor.u32 %v5365_v32, %v4878_v35  ;;  %v5393_v26 = vld [vmem:[%s5786_s17 + $0x3cc] sm:$0xf] }
 0x238   : > { %v4829_v61 = vor.u32 %v5355_v58, %v4828_v57  ;;  %v2367_v2 = vadd.f32 1.0, %v5471_v59  ;;  %v4956_v58 = vld [vmem:[%s5786_s17 + $0x388] sm:$0xf]  ;;  %v5387_v59 = vld [vmem:[%s5786_s17 + $0x394] sm:$0xf0]  ;;  %v4993_v28 = vor.u32 %v5393_v26, %v4990_v27 }
 0x239   : > { %v5373_v44 = vld [vmem:[%s5786_s17 + $0x32c] sm:$0xf] }
 0x23a   : > { %3323 = vmatpush.bf16.msrb.mxu1 %v4737_v45  ;;  %3284 = vmatpush.bf16.msra.mxu2 %v4861_v46  ;;  %5472 = vrcp.f32 %v2367_v2  ;;  %v4862_v45 = vld [vmem:[%s5786_s17 + $0x2d8] sm:$0xf0]  ;;  %v5383_v2 = vld [vmem:[%s5786_s17 + $0x374] sm:$0xf0] }
 0x23b   : > { %3314 = vmatpush.bf16.msrb.mxu0 %v4545_v34 }
 0x23e   : > { %3324 = vmatpush.bf16.msrb.mxu1 %v4721_v52  ;;  %3285 = vmatpush.bf16.msra.mxu2 %v4845_v53  ;;  %v5391_v52 = vld [vmem:[%s5786_s17 + $0x3b4] sm:$0xf0]  ;;  %v5357_v53 = vld [vmem:[%s5786_s17 + $0x2ac] sm:$0xf] }
 0x23f   : > { %3315 = vmatpush.bf16.msrb.mxu0 %v4529_v0  ;;  %v4781_v0 = vor.u32 %v5343_v18, %v4780_v17  ;;  %v4973_v55 = vor.u32 %v5391_v52, %v4972_v50  ;;  %v4849_v57 = vor.u32 %v5357_v53, %v4846_v54  ;;  %v4785_v18 = vor.u32 %v5341_v15, %v4782_v16 }
 0x240   : > { %v5473_v20 = vpop.eup %5472 }
 0x241   : > { %v2375_v29 = vmul.f32 %v5473_v20, %v6399_v51  ;;  %v5361_v51 = vld [vmem:[%s5786_s17 + $0x2cc] sm:$0xf]  ;;  %v5371_v20 = vld [vmem:[%s5786_s17 + $0x314] sm:$0xf0] }
 0x242   : > { %3325 = vmatpush.bf16.msrb.mxu1 %v4705_v60  ;;  %3286 = vmatpush.bf16.msra.mxu2 %v4829_v61  ;;  %v4865_v49 = vor.u32 %v5361_v51, %v4862_v45  ;;  %v5353_v60 = vld [vmem:[%s5786_s17 + $0x28c] sm:$0xf]  ;;  %v4957_v61 = vor.u32 %v5387_v59, %v4956_v58  ;;  %v4910_v51 = vld [vmem:[%s5786_s17 + $0x338] sm:$0xf0] }
 0x243   : > { %3316 = vmatpush.bf16.msrb.mxu0 %v4513_v40  ;;  %v2309_v34 = vpop.f32.mrf.mxu0  ;;  %v2322_v7 = vpop.f32.mrf.mxu1  ;;  %v5005_v40 = vor.u32 %v5399_v31, %v5004_v6  ;;  %v4974_v6 = vld [vmem:[%s5786_s17 + $0x3b8] sm:$0xf0]  ;;  %v4913_v45 = vor.u32 %v5373_v44, %v4910_v51 }
 0x244   : > { %v2323_v19 = vadd.f32 %v2322_v7, %v2309_v34  ;;  %v4817_v34 = vor.u32 %v5349_v3, %v4814_v4  ;;  %v4924_v7 = vld [vmem:[%s5786_s17 + $0x348] sm:$0xf]  ;;  %v4958_v31 = vld [vmem:[%s5786_s17 + $0x398] sm:$0xf0] }
 0x245   : > { %3239 = vmatmul.bf16.vlgmr.msrb.gmra.mxu2 %v6573_v38 }
 0x246   : > { %3317 = vmatmul.bf16.vlgmr.msrb.gmra.mxu0 %v6462_v33  ;;  %v4689_v33 = vor.u32 %v5317_v62, %v4686_v1  ;;  %3287 = vmatpush.bf16.msra.mxu2 %v4813_v8  ;;  %v4940_v1 = vld [vmem:[%s5786_s17 + $0x368] sm:$0xf]  ;;  %v5379_v8 = vld [vmem:[%s5786_s17 + $0x354] sm:$0xf0] }
 0x247   : > { %v4925_v11 = vor.u32 %v5379_v8, %v4924_v7 }
 0x248   : > { %3326 = vmatpush.bf16.msrb.mxu1 %v4689_v33  ;;  %v4941_v33 = vor.u32 %v5383_v2, %v4940_v1 }
 0x24a   : > { %3288 = vmatpush.bf16.msra.mxu2 %v4797_v14  ;;  %v5375_v14 = vld [vmem:[%s5786_s17 + $0x334] sm:$0xf0] }
 0x24b   : > { %v2335_v21 = vpop.f32.mrf.mxu2  ;;  %v2348_v22 = vpop.f32.mrf.mxu3 }
 0x24c   : > { %3327 = vmatpush.bf16.msrb.mxu1 %v4673_v13  ;;  %v2336_v24 = vadd.f32 %v2335_v21, %v2323_v19  ;;  %v2311_v25 = vpop.f32.mrf.mxu0  ;;  %v2324_v63 = vpop.f32.mrf.mxu1  ;;  %v4908_v13 = vld [vmem:[%s5786_s17 + $0x328] sm:$0xf]  ;;  %v5337_v21 = vld [vmem:[%s5786_s17 + $0x20c] sm:$0xf] }
 0x24d   : > { %v4909_v17 = vor.u32 %v5375_v14, %v4908_v13  ;;  %v4892_v19 = vld [vmem:[%s5786_s17 + $0x308] sm:$0xf] }
 0x24e   : > { %v2349_v30 = vadd.f32 %v2348_v22, %v2336_v24  ;;  %3289 = vmatpush.bf16.msra.mxu2 %v4781_v0  ;;  %v4766_v22 = vld [vmem:[%s5786_s17 + $0x218] sm:$0xf0]  ;;  %v4893_v25 = vor.u32 %v5371_v20, %v4892_v19 }
 0x24f   : > { %v5006_v24 = vld [vmem:[%s5786_s17 + $0x3f8] sm:$0xf0]  ;;  %v4769_v63 = vor.u32 %v5337_v21, %v4766_v22 }
 0x250   : > { %3328 = vmatpush.bf16.msrb.mxu1 %v4657_v23  ;;  %v2379_v36 = vmul.f32 %v2375_v29, %v2349_v30  ;;  %v5397_v23 = vld [vmem:[%s5786_s17 + $0x3ec] sm:$0xf]  ;;  %v4977_v29 = vor.u32 %v5389_v5, %v4974_v6  ;;  %v2384_v6 = vld [vmem:[%s6690_s5] sm:$0xff] }
 0x251   : > { %v5009_v0 = vor.u32 %v5397_v23, %v5006_v24  ;;  %v5385_v30 = vld [vmem:[%s5786_s17 + $0x38c] sm:$0xf] }
 0x252   : > { %v6611_v43 = vpack.c.bf16 %v2379_v36, %v2379_v36  ;;  %3290 = vmatpush.bf16.msra.mxu2 %v4765_v37  ;;  %v4961_v35 = vor.u32 %v5385_v30, %v4958_v31  ;;  %v4942_v36 = vld [vmem:[%s5786_s17 + $0x378] sm:$0xf0] }
 0x253   : > { %v2337_v46 = vpop.f32.mrf.mxu2  ;;  %v2350_v47 = vpop.f32.mrf.mxu3 }
 0x254   : > { %3329 = vmatpush.bf16.msrb.mxu1 %v4641_v39  ;;  %3200 = vmatmul.bf16.vlgmr.msra.gmra.mxu3 %v6611_v43  ;;  %v5381_v39 = vld [vmem:[%s5786_s17 + $0x36c] sm:$0xf]  ;;  %v4894_v47 = vld [vmem:[%s5786_s17 + $0x318] sm:$0xf0] }
 0x255   : > { %3296 = vmatpush.bf16.msra.mxu3 %v5005_v40  ;;  %3291 = vmatmul.bf16.vlgmr.msra.gmra.mxu2 %v6573_v38  ;;  %v4945_v37 = vor.u32 %v5381_v39, %v4942_v36  ;;  %v5377_v40 = vld [vmem:[%s5786_s17 + $0x34c] sm:$0xf] }
 0x256   : > { %3335 = vmatpush.bf16.msrb.mxu2 %v4881_v41  ;;  %v4926_v41 = vld [vmem:[%s5786_s17 + $0x358] sm:$0xf0]  ;;  %v5369_v46 = vld [vmem:[%s5786_s17 + $0x30c] sm:$0xf] }
 0x257   : > { %3330 = vmatmul.bf16.vlgmr.msrb.gmra.mxu1 %v6518_v10  ;;  %v4830_v10 = vld [vmem:[%s5786_s17 + $0x298] sm:$0xf0]  ;;  %v4929_v42 = vor.u32 %v5377_v40, %v4926_v41 }
 0x258   : > { %v4833_v62 = vor.u32 %v5353_v60, %v4830_v10 }
 0x259   : > { %3297 = vmatpush.bf16.msra.mxu3 %v4989_v48 }
 0x25a   : > { %3336 = vmatpush.bf16.msrb.mxu2 %v4865_v49  ;;  %v4897_v49 = vor.u32 %v5369_v46, %v4894_v47 }
 0x25d   : > { %3298 = vmatpush.bf16.msra.mxu3 %v4973_v55 }
 0x25e   : > { %3337 = vmatpush.bf16.msrb.mxu2 %v4849_v57 }
 0x261   : > { %3299 = vmatpush.bf16.msra.mxu3 %v4957_v61 }
 0x262   : > { %3338 = vmatpush.bf16.msrb.mxu2 %v4833_v62 }
 0x264   : > { %3252 = vmatmul.bf16.vlgmr.msrb.gmra.mxu3 %v6611_v43 }
 0x265   : > { %3300 = vmatpush.bf16.msra.mxu3 %v4941_v33 }
 0x266   : > { %3339 = vmatpush.bf16.msrb.mxu2 %v4817_v34 }
 0x269   : > { %3301 = vmatpush.bf16.msra.mxu3 %v4925_v11 }
 0x26a   : > { %3340 = vmatpush.bf16.msrb.mxu2 %v4801_v12 }
 0x26d   : > { %3302 = vmatpush.bf16.msra.mxu3 %v4909_v17 }
 0x26e   : > { %3341 = vmatpush.bf16.msrb.mxu2 %v4785_v18 }
 0x271   : > { %3303 = vmatpush.bf16.msra.mxu3 %v4893_v25 }
 0x272   : > { %3342 = vmatpush.bf16.msrb.mxu2 %v4769_v63  ;;  %v3162_v32 = vpop.f32.mrf.mxu0 }
 0x274   : > { %3304 = vmatmul.bf16.vlgmr.msra.gmra.mxu3 %v6611_v43 }
 0x275   : > { %3348 = vmatpush.bf16.msrb.mxu3 %v5009_v0  ;;  %3343 = vmatmul.bf16.vlgmr.msrb.gmra.mxu2 %v6573_v38 }
 0x279   : > { %3349 = vmatpush.bf16.msrb.mxu3 %v4993_v28 }
 0x27a   : > { %v3164_v38 = vpop.f32.mrf.mxu0 }
 0x27d   : > { %3350 = vmatpush.bf16.msrb.mxu3 %v4977_v29 }
 0x281   : > { %3351 = vmatpush.bf16.msrb.mxu3 %v4961_v35 }
 0x283   : > { %v3214_v48 = vpop.f32.mrf.mxu0 }
 0x285   : > { %3352 = vmatpush.bf16.msrb.mxu3 %v4945_v37 }
 0x289   : > { %3353 = vmatpush.bf16.msrb.mxu3 %v4929_v42 }
 0x28b   : > { %v3216_v50 = vpop.f32.mrf.mxu0 }
 0x28d   : > { %3354 = vmatpush.bf16.msrb.mxu3 %v4913_v45 }
 0x291   : > { %3355 = vmatpush.bf16.msrb.mxu3 %v4897_v49 }
 0x292   : > { %v3175_v52 = vpop.f32.mrf.mxu1 }
 0x293   : > { %v3176_v53 = vadd.f32 %v3175_v52, %v3162_v32 }
 0x294   : > { %3356 = vmatmul.bf16.vlgmr.msrb.gmra.mxu3 %v6611_v43 }
 0x29a   : > { %v3177_v55 = vpop.f32.mrf.mxu1 }
 0x2a2   : > { %v3227_v58 = vpop.f32.mrf.mxu1 }
 0x2a3   : > { %v3266_v54 = vpop.f32.mrf.mxu0  ;;  %v3228_v59 = vadd.f32 %v3227_v58, %v3214_v48 }
 0x2aa   : > { %v3229_v60 = vpop.f32.mrf.mxu1 }
 0x2ab   : > { %v3268_v57 = vpop.f32.mrf.mxu0 }
 0x2b2   : > { %v3279_v10 = vpop.f32.mrf.mxu1 }
 0x2b3   : > { %v3280_v61 = vadd.f32 %v3279_v10, %v3266_v54 }
 0x2b8   : > { %v3188_v1 = vpop.f32.mrf.mxu2 }
 0x2b9   : > { %v3189_v2 = vadd.f32 %v3188_v1, %v3176_v53 }
 0x2ba   : > { %v3281_v3 = vpop.f32.mrf.mxu1 }
 0x2c0   : > { %v3190_v33 = vpop.f32.mrf.mxu2 }
 0x2c3   : > { %v3318_v62 = vpop.f32.mrf.mxu0 }
 0x2c8   : > { %v3240_v34 = vpop.f32.mrf.mxu2 }
 0x2c9   : > { %v3241_v7 = vadd.f32 %v3240_v34, %v3228_v59 }
 0x2cb   : > { %v3320_v4 = vpop.f32.mrf.mxu0 }
 0x2d0   : > { %v3242_v43 = vpop.f32.mrf.mxu2 }
 0x2d4   : > { %v3331_v8 = vpop.f32.mrf.mxu1 }
 0x2d5   : > { %v3332_v24 = vadd.f32 %v3331_v8, %v3318_v62 }
 0x2d7   : > { %v3201_v56 = vpop.f32.mrf.mxu3 }
 0x2d8   : > { %v3292_v9 = vpop.f32.mrf.mxu2  ;;  %v3202_v16 = vadd.f32 %v3201_v56, %v3189_v2 }
 0x2d9   : > { %v3293_v25 = vadd.f32 %v3292_v9, %v3280_v61 }
 0x2dc   : > { %v3333_v11 = vpop.f32.mrf.mxu1 }
 0x2df   : > { %v3203_v12 = vpop.f32.mrf.mxu3 }
 0x2e0   : > { %v3294_v13 = vpop.f32.mrf.mxu2 }
 0x2e7   : > { %v3253_v14 = vpop.f32.mrf.mxu3 }
 0x2e8   : > { %v3254_v15 = vadd.f32 %v3253_v14, %v3241_v7 }
 0x2ea   : > { %v3365_v17 = vrot.slane %v3254_v15, 6 }
 0x2ec   : > { %v3368_v18 = vsel %vm334_vm0, %v3202_v16, %v3365_v17 }
 0x2ef   : > { %v3255_v19 = vpop.f32.mrf.mxu3 }
 0x2f7   : > { %v3305_v21 = vpop.f32.mrf.mxu3 }
 0x2f8   : > { %v3344_v20 = vpop.f32.mrf.mxu2  ;;  %v3306_v0 = vadd.f32 %v3305_v21, %v3293_v25 }
 0x2f9   : > { %v3345_v63 = vadd.f32 %v3344_v20, %v3332_v24 }
 0x2fa   : > { %v3366_v28 = vrot.slane %v3306_v0, 4 }
 0x2ff   : > { %v3307_v23 = vpop.f32.mrf.mxu3 }
 0x300   : > { %v3346_v22 = vpop.f32.mrf.mxu2 }
 0x317   : > { %v3357_v26 = vpop.f32.mrf.mxu3 }
 0x318   : > { %v3358_v27 = vadd.f32 %v3357_v26, %v3345_v63 }
 0x31a   : > { %v3367_v5 = vrot.slane %v3358_v27, 2 }
 0x31c   : > { %v3369_v29 = vsel %vm380_vm3, %v3366_v28, %v3367_v5 }
 0x31d   : > { %v3370_v30 = vsel %vm382_vm6, %v3368_v18, %v3369_v29 }
 0x31e   : > { %v3372_v31 = vadd.f32 %v3370_v30, %v2384_v6 }
 0x31f   : > { %v3359_v32 = vpop.f32.mrf.mxu3 }
 0x320   : > { %3373 = vst [vmem:[%s6690_s5] sm:$0xff] %v3372_v31 }
 0x321 PF: > { %s6697_s16 = sld [smem:[#allocation9_spill]]  ;;  %p18_p7 = scmp.ge.s32.totalorder %s5661_s23, 4  }
 0x322   : > { %s6698_s18 = smov %s5594_s19  ;;  %s6699_s19 = smov %s5598_s20 }
 0x323   : > { %s6701_s21 = smov %s5661_s23  ;;  %20 = sbr.rel (!%p18_p7) target bundleno = 7 (0x7), region = 104 }
 0x327   : > { %s6700_s20 = smov %s6697_s16 }
 0x328   :  { %3385 = vsyncpa [#allocation3], 1 }
 0x329   :  { %3387 = vsyncpa [#allocation3 + $0x1], 1 }
 0x32a   :  { %3388 = vsyncpa [#allocation5], 1 }
 0x32b   :  { %3390 = vsyncpa [#allocation5 + $0x1], 1 }

</bundles_post_ra>
